<compile_context>
chip_gen: v7x
topology: tpu7x:2x2x1
jax: 0.10.0
libtpu: 0.0.40
codegen_flags: <defaults>
</compile_context>

<pallas_src>
import functools

import numpy as np
import jax
import jax.numpy as jnp
from jax.experimental import pallas as pl
from jax.experimental.pallas import tpu as pltpu

EPS = 1e-5
VMEM_LIMIT = 32 * 1024 * 1024


# ----------------------------------------------------------------------------
# Pallas kernels
# ----------------------------------------------------------------------------
def _mm_stats_kernel(a_ref, b_ref, o_ref, s_ref, q_ref):
    """o = a @ b (bf16 operands, f32 accumulate) + per-column sum / sum-of-sq."""
    o = jnp.dot(a_ref[...], b_ref[...], preferred_element_type=jnp.float32)
    o_ref[...] = o

    @pl.when(pl.program_id(0) == 0)
    def _():
        s_ref[...] = jnp.zeros_like(s_ref)
        q_ref[...] = jnp.zeros_like(q_ref)

    s_ref[...] += jnp.sum(o, axis=0, keepdims=True)
    q_ref[...] += jnp.sum(o * o, axis=0, keepdims=True)


def _affine_relu_kernel(x_ref, s_ref, b_ref, o_ref):
    # BN affine + ReLU on a lane-dense (rows, W*C) view.
    o_ref[...] = jnp.maximum(x_ref[...] * s_ref[...] + b_ref[...], 0.0)


def _res_tail_kernel(z_ref, d_ref, sz_ref, bz_ref, sd_ref, bd_ref, o_ref):
    # relu( BN(conv2_out) + BN(identity) )  -- both affines fused.
    y = (z_ref[...] * sz_ref[...] + bz_ref[...]
         + d_ref[...] * sd_ref[...] + bd_ref[...])
    o_ref[...] = jnp.maximum(y, 0.0)


def _max9_kernel(*refs):
    xs, o_ref = refs[:-1], refs[-1]
    m = xs[0][...]
    for r in xs[1:]:
        m = jnp.maximum(m, r[...])
    o_ref[...] = m


def _upsample_add_kernel(a_ref, x_ref, r_ref, o_ref):
    o_ref[...] = (jnp.dot(a_ref[...], x_ref[...],
                          preferred_element_type=jnp.float32) + r_ref[...])


def _upsample_add_stats_kernel(a_ref, x_ref, r_ref, o_ref, s_ref, q_ref):
    o = (jnp.dot(a_ref[...], x_ref[...],
                 preferred_element_type=jnp.float32) + r_ref[...])
    o_ref[...] = o
    s_ref[...] = jnp.sum(o, axis=0, keepdims=True)
    q_ref[...] = jnp.sum(o * o, axis=0, keepdims=True)


def _bn_relu_mm_stats_kernel(x_ref, s_ref, b_ref, w_ref, o_ref, os_ref, oq_ref):
    # BN affine + ReLU + 1x1 conv (matmul) + stats of the conv output.
    t = jnp.maximum(x_ref[...] * s_ref[...] + b_ref[...], 0.0)
    o = jnp.dot(t.astype(jnp.bfloat16), w_ref[...],
                preferred_element_type=jnp.float32)
    o_ref[...] = o

    @pl.when(pl.program_id(0) == 0)
    def _():
        os_ref[...] = jnp.zeros_like(os_ref)
        oq_ref[...] = jnp.zeros_like(oq_ref)

    os_ref[...] += jnp.sum(o, axis=0, keepdims=True)
    oq_ref[...] += jnp.sum(o * o, axis=0, keepdims=True)


def _mask_tail_kernel(x_ref, s_ref, b_ref, w_ref, t_ref, o_ref):
    # BN affine + ReLU + 1x1 conv + sigmoid + (1 + mask) * trunk, fully fused.
    h = jnp.maximum(x_ref[...] * s_ref[...] + b_ref[...], 0.0)
    z = jnp.dot(h.astype(jnp.bfloat16), w_ref[...],
                preferred_element_type=jnp.float32)
    o_ref[...] = (1.0 + jax.nn.sigmoid(z)) * t_ref[...]


# ----------------------------------------------------------------------------
# pallas_call wrappers
# ----------------------------------------------------------------------------
def _pick_tile(m, cap=1024):
    if m <= cap:
        return m
    for t in (1024, 512, 256, 128, 64, 32, 16):
        if m % t == 0:
            return t
    return m


def _compiler(sem):
    return pltpu.CompilerParams(dimension_semantics=sem,
                                vmem_limit_bytes=VMEM_LIMIT)


def matmul_stats(a, b):
    """(M,K)@(K,N) with bf16 operands / f32 accumulation; also column stats."""
    M, K = a.shape
    _, N = b.shape
    a = a.astype(jnp.bfloat16)
    b = b.astype(jnp.bfloat16)
    TM = _pick_tile(M)
    out, csum, csq = pl.pallas_call(
        _mm_stats_kernel,
        out_shape=(jax.ShapeDtypeStruct((M, N), jnp.float32),
                   jax.ShapeDtypeStruct((1, N), jnp.float32),
                   jax.ShapeDtypeStruct((1, N), jnp.float32)),
        grid=(M // TM,),
        in_specs=[pl.BlockSpec((TM, K), lambda i: (i, 0)),
                  pl.BlockSpec((K, N), lambda i: (0, 0))],
        out_specs=(pl.BlockSpec((TM, N), lambda i: (i, 0)),
                   pl.BlockSpec((1, N), lambda i: (0, 0)),
                   pl.BlockSpec((1, N), lambda i: (0, 0))),
        compiler_params=_compiler(("arbitrary",)),
    )(a, b)
    return out, csum[0], csq[0]


def _ew_call(kernel, rows, cols, *args):
    """Element-wise kernel on a lane-dense (rows, cols) view, tiled over rows."""
    TR = _pick_tile(rows)
    in_specs = []
    for a in args:
        if a.shape[0] == rows:
            in_specs.append(pl.BlockSpec((TR, a.shape[1]), lambda i: (i, 0)))
        else:  # row-broadcast operand, e.g. (1, cols) scale / bias
            in_specs.append(pl.BlockSpec(a.shape, lambda i: (0, 0)))
    return pl.pallas_call(
        kernel,
        out_shape=jax.ShapeDtypeStruct((rows, cols), jnp.float32),
        grid=(rows // TR,),
        in_specs=in_specs,
        out_specs=pl.BlockSpec((TR, cols), lambda i: (i, 0)),
        compiler_params=_compiler(("parallel",)),
    )(*args)


# ----------------------------------------------------------------------------
# Neural-net building blocks (glue = layout / slicing; compute = Pallas)
# ----------------------------------------------------------------------------
def conv2d_stats(x, w_oihw, padding):
    """Stride-1 conv (bias=False) on NHWC; also returns per-channel sum/sumsq
    of the pre-BN output so BN stats need no extra pass over HBM."""
    N, H, W, Cin = x.shape
    Cout, Cin2, kh, kw = w_oihw.shape
    assert Cin == Cin2
    Ho = H + 2 * padding - kh + 1
    Wo = W + 2 * padding - kw + 1
    if kh == 1 and kw == 1 and padding == 0:
        a = x.reshape(N * H * W, Cin)
    else:
        xp = jnp.pad(x, ((0, 0), (padding, padding), (padding, padding), (0, 0)))
        # TODO(synk): for large H/W/C replace glue-side im2col with an in-kernel
        # 9-tap accumulation over a haloed input tile (reads x from HBM once).
        patches = [xp[:, dy:dy + Ho, dx:dx + Wo, :]
                   for dy in range(kh) for dx in range(kw)]
        a = jnp.concatenate(patches, axis=-1).reshape(N * Ho * Wo, kh * kw * Cin)
    b = jnp.transpose(w_oihw, (2, 3, 1, 0)).reshape(kh * kw * Cin, Cout)
    out, csum, csq = matmul_stats(a, b)
    return out.reshape(N, Ho, Wo, Cout), csum, csq


def _bn_scale_bias(csum, csq, count, gamma, beta):
    mean = csum / count
    var = jnp.maximum(csq / count - mean * mean, 0.0)   # biased variance
    scale = gamma * jax.lax.rsqrt(var + EPS)
    bias = beta - mean * scale
    return scale, bias


def _tile_row(v, w):
    return jnp.tile(v, w).reshape(1, w * v.shape[0])


def bn_relu(z, csum, csq, gamma, beta):
    """Training-mode BN + ReLU, lane-dense fused Pallas kernel."""
    N, H, W, C = z.shape
    scale, bias = _bn_scale_bias(csum, csq, N * H * W, gamma, beta)
    out = _ew_call(_affine_relu_kernel, N * H, W * C,
                   z.reshape(N * H, W * C),
                   _tile_row(scale, W), _tile_row(bias, W))
    return out.reshape(N, H, W, C)


def basic_res_block(x, p):
    z1, s1, q1 = conv2d_stats(x, p['conv1_w'], padding=1)
    y1 = bn_relu(z1, s1, q1, *p['bn1'])
    z2, s2, q2 = conv2d_stats(y1, p['conv2_w'], padding=1)
    N, H, W, C = z2.shape
    cnt = N * H * W
    sc2, bi2 = _bn_scale_bias(s2, q2, cnt, *p['bn2'])
    if 'ds_w' in p:
        d, sd_, qd_ = conv2d_stats(x, p['ds_w'], padding=0)
        scd, bid = _bn_scale_bias(sd_, qd_, cnt, *p['ds_bn'])
    else:
        d = x
        scd = jnp.ones((C,), jnp.float32)
        bid = jnp.zeros((C,), jnp.float32)
    out = _ew_call(_res_tail_kernel, N * H, W * C,
                   z2.reshape(N * H, W * C), d.reshape(N * H, W * C),
                   _tile_row(sc2, W), _tile_row(bi2, W),
                   _tile_row(scd, W), _tile_row(bid, W))
    return out.reshape(N, H, W, C)


def maxpool_3x3_s2_p1(x):
    """nn.MaxPool2d(kernel_size=3, stride=2, padding=1) on NHWC."""
    N, H, W, C = x.shape
    Ho = (H - 1) // 2 + 1
    Wo = (W - 1) // 2 + 1
    xp = jnp.pad(x, ((0, 0), (1, 1), (1, 1), (0, 0)),
                 constant_values=-jnp.inf)
    views = [xp[:, dy:dy + 2 * Ho - 1:2, dx:dx + 2 * Wo - 1:2, :]
             .reshape(N * Ho, Wo * C)
             for dy in range(3) for dx in range(3)]
    out = _ew_call(_max9_kernel, N * Ho, Wo * C, *views)
    return out.reshape(N, Ho, Wo, C)


def _interp_matrix_np(n_in, n_out):
    """Bilinear interpolation matrix (n_out, n_in), align_corners=True."""
    out_idx = np.arange(n_out, dtype=np.float64)
    denom = max(n_out - 1, 1)
    src = out_idx * (n_in - 1) / denom
    i0 = np.clip(np.floor(src).astype(np.int64), 0, n_in - 1)
    i1 = np.minimum(i0 + 1, n_in - 1)
    frac = src - i0
    A = np.zeros((n_out, n_in), dtype=np.float64)
    A[np.arange(n_out), i0] += 1.0 - frac
    A[np.arange(n_out), i1] += frac
    return A


def _to_hw_nc(x):
    N, H, W, C = x.shape
    return jnp.transpose(x, (1, 2, 0, 3)).reshape(H * W, N * C)


def _from_hw_nc(y, N, H, W, C):
    return jnp.transpose(y.reshape(H, W, N, C), (2, 0, 1, 3))


def upsample_add(A_np, x_hwnc, skip_hwnc, with_stats=False):
    """y = kron-interp(A) @ x + skip, all in one Pallas matmul kernel.
    Optionally also returns per-(n,c)-column sum / sum-of-squares."""
    A = jnp.asarray(A_np, jnp.float32)
    M, K = A.shape
    _, NC = x_hwnc.shape
    in_specs = [pl.BlockSpec((M, K), lambda i: (0, 0)),
                pl.BlockSpec((K, NC), lambda i: (0, 0)),
                pl.BlockSpec((M, NC), lambda i: (0, 0))]
    if not with_stats:
        return pl.pallas_call(
            _upsample_add_kernel,
            out_shape=jax.ShapeDtypeStruct((M, NC), jnp.float32),
            grid=(1,),
            in_specs=in_specs,
            out_specs=pl.BlockSpec((M, NC), lambda i: (0, 0)),
            compiler_params=_compiler(("arbitrary",)),
        )(A, x_hwnc, skip_hwnc)
    out, s, q = pl.pallas_call(
        _upsample_add_stats_kernel,
        out_shape=(jax.ShapeDtypeStruct((M, NC), jnp.float32),
                   jax.ShapeDtypeStruct((1, NC), jnp.float32),
                   jax.ShapeDtypeStruct((1, NC), jnp.float32)),
        grid=(1,),
        in_specs=in_specs,
        out_specs=(pl.BlockSpec((M, NC), lambda i: (0, 0)),
                   pl.BlockSpec((1, NC), lambda i: (0, 0)),
                   pl.BlockSpec((1, NC), lambda i: (0, 0))),
        compiler_params=_compiler(("arbitrary",)),
    )(A, x_hwnc, skip_hwnc)
    return out, s[0], q[0]


def out_mask_apply(out_nhwc, csum, csq, p, trunk_nhwc):
    """out_mask = BN-ReLU-Conv1x1-BN-ReLU-Conv1x1-Sigmoid; result=(1+mask)*trunk."""
    N, H, W, C = out_nhwc.shape
    rows = N * H * W
    x = out_nhwc.reshape(rows, C)
    trunk = trunk_nhwc.reshape(rows, C)
    TM = _pick_tile(rows)

    g1, b1 = p['mask_bn1']
    sc1, bi1 = _bn_scale_bias(csum, csq, rows, g1, b1)
    w1 = jnp.transpose(p['mask_conv1_w'][:, :, 0, 0]).astype(jnp.bfloat16)
    y, ys, yq = pl.pallas_call(
        _bn_relu_mm_stats_kernel,
        out_shape=(jax.ShapeDtypeStruct((rows, C), jnp.float32),
                   jax.ShapeDtypeStruct((1, C), jnp.float32),
                   jax.ShapeDtypeStruct((1, C), jnp.float32)),
        grid=(rows // TM,),
        in_specs=[pl.BlockSpec((TM, C), lambda i: (i, 0)),
                  pl.BlockSpec((1, C), lambda i: (0, 0)),
                  pl.BlockSpec((1, C), lambda i: (0, 0)),
                  pl.BlockSpec((C, C), lambda i: (0, 0))],
        out_specs=(pl.BlockSpec((TM, C), lambda i: (i, 0)),
                   pl.BlockSpec((1, C), lambda i: (0, 0)),
                   pl.BlockSpec((1, C), lambda i: (0, 0))),
        compiler_params=_compiler(("arbitrary",)),
    )(x, sc1.reshape(1, C), bi1.reshape(1, C), w1)

    g2, b2 = p['mask_bn2']
    sc2, bi2 = _bn_scale_bias(ys[0], yq[0], rows, g2, b2)
    w2 = jnp.transpose(p['mask_conv2_w'][:, :, 0, 0]).astype(jnp.bfloat16)
    result = pl.pallas_call(
        _mask_tail_kernel,
        out_shape=jax.ShapeDtypeStruct((rows, C), jnp.float32),
        grid=(rows // TM,),
        in_specs=[pl.BlockSpec((TM, C), lambda i: (i, 0)),
                  pl.BlockSpec((1, C), lambda i: (0, 0)),
                  pl.BlockSpec((1, C), lambda i: (0, 0)),
                  pl.BlockSpec((C, C), lambda i: (0, 0)),
                  pl.BlockSpec((TM, C), lambda i: (i, 0))],
        out_specs=pl.BlockSpec((TM, C), lambda i: (i, 0)),
        compiler_params=_compiler(("parallel",)),
    )(y, sc2.reshape(1, C), bi2.reshape(1, C), w2, trunk)
    return result.reshape(N, H, W, C)


# ----------------------------------------------------------------------------
# Full forward pass of AttentionConvBlockL3
# ----------------------------------------------------------------------------
def attention_conv_block_l3(x_nchw, params, size):
    assert size % 8 == 0
    x = jnp.transpose(x_nchw, (0, 2, 3, 1)).astype(jnp.float32)   # NCHW -> NHWC
    N = x.shape[0]

    # trunk branch: two residual units
    out_trunk = basic_res_block(x, params['trunk1'])
    out_trunk = basic_res_block(out_trunk, params['trunk2'])

    # soft-mask branch
    out = basic_res_block(x, params['down1'])                     # size
    skip_c1 = basic_res_block(out, params['skip1'])               # size
    out = maxpool_3x3_s2_p1(out)                                  # size/2
    out = basic_res_block(out, params['down2'])
    out = maxpool_3x3_s2_p1(out)                                  # size/4
    out = basic_res_block(out, params['down3'])
    skip_c3 = basic_res_block(out, params['skip3'])               # size/4
    out = maxpool_3x3_s2_p1(out)                                  # size/8
    C = out.shape[-1]

    s8, s4, s2 = size // 8, size // 4, size // 2
    # upsample3 (size/8 -> size/4) + skip_c3 as one Kronecker matmul
    A3 = np.kron(_interp_matrix_np(s8, s4), _interp_matrix_np(s8, s4))
    u3 = upsample_add(A3, _to_hw_nc(out), _to_hw_nc(skip_c3))     # (s4*s4, N*C)

    # upsample2 o upsample1 (size/4 -> size) composed into a single matmul,
    # with the skip_c1 add and the mask-head BN statistics fused in.
    Ac = _interp_matrix_np(s2, size) @ _interp_matrix_np(s4, s2)  # (size, s4)
    A21 = np.kron(Ac, Ac)                                         # (size^2, s4^2)
    o_hwnc, snc, qnc = upsample_add(A21, u3, _to_hw_nc(skip_c1), with_stats=True)
    out_full = _from_hw_nc(o_hwnc, N, size, size, C)              # NHWC
    csum = snc.reshape(N, C).sum(axis=0)
    csq = qnc.reshape(N, C).sum(axis=0)

    result = out_mask_apply(out_full, csum, csq, params, out_trunk)
    return jnp.transpose(result, (0, 3, 1, 2))                    # NHWC -> NCHW


# ----------------------------------------------------------------------------
# Deterministic parameter init (matches the PyTorch module's parameter shapes)
# ----------------------------------------------------------------------------
def _conv_init(key, cout, cin, kh, kw):
    fan_in = cin * kh * kw
    return (jax.random.normal(key, (cout, cin, kh, kw), jnp.float32)
            / np.sqrt(fan_in))


def _bn_init(key, c):
    k1, k2 = jax.random.split(key)
    gamma = 1.0 + 0.1 * jax.random.normal(k1, (c,), jnp.float32)
    beta = 0.1 * jax.random.normal(k2, (c,), jnp.float32)
    return gamma, beta


def _init_res_block(key, cin, cout):
    keys = jax.random.split(key, 6)
    p = {
        'conv1_w': _conv_init(keys[0], cout, cin, 3, 3),
        'bn1': _bn_init(keys[1], cout),
        'conv2_w': _conv_init(keys[2], cout, cout, 3, 3),
        'bn2': _bn_init(keys[3], cout),
    }
    if cin != cout:   # every block here has stride 1, downsample iff channel change
        p['ds_w'] = _conv_init(keys[4], cout, cin, 1, 1)
        p['ds_bn'] = _bn_init(keys[5], cout)
    return p


def init_params(key, in_plane, num_plane):
    keys = jax.random.split(key, 11)
    return {
        'trunk1': _init_res_block(keys[0], in_plane, num_plane),
        'trunk2': _init_res_block(keys[1], num_plane, num_plane),
        'down1': _init_res_block(keys[2], in_plane, num_plane),
        'skip1': _init_res_block(keys[3], num_plane, num_plane),
        'down2': _init_res_block(keys[4], num_plane, num_plane),
        'down3': _init_res_block(keys[5], num_plane, num_plane),
        'skip3': _init_res_block(keys[6], num_plane, num_plane),
        'mask_bn1': _bn_init(keys[7], num_plane),
        'mask_conv1_w': _conv_init(keys[8], num_plane, num_plane, 1, 1),
        'mask_bn2': _bn_init(keys[9], num_plane),
        'mask_conv2_w': _conv_init(keys[10], num_plane, num_plane, 1, 1),
    }


# ----------------------------------------------------------------------------
if __name__ == "__main__":
    size = 16          # spatial size (H = W = size), must be divisible by 8
    in_plane = 4
    num_plane = 8
    batch = 2

    key = jax.random.PRNGKey(0)
    k_params, k_x = jax.random.split(key)
    params = init_params(k_params, in_plane, num_plane)
    x = jax.random.normal(k_x, (batch, in_plane, size, size), jnp.float32)

    fwd = jax.jit(functools.partial(attention_conv_block_l3, size=size))
    out = fwd(x, params)
    out = jax.block_until_ready(out)
    assert out.shape == (batch, num_plane, size, size), out.shape
    assert bool(jnp.all(jnp.isfinite(out)))
    print("KERNEL_OK")
</pallas_src>

<mosaic_0001>
module attributes {stable_mosaic.version = 11 : i64} {
  func.func @_mm_stats_kernel(%arg0: i32, %arg1: memref<512x36xbf16, #tpu.memory_space<vmem>>, %arg2: memref<36x8xbf16, #tpu.memory_space<vmem>>, %arg3: memref<512x8xf32, #tpu.memory_space<vmem>>, %arg4: memref<1x8xf32, #tpu.memory_space<vmem>>, %arg5: memref<1x8xf32, #tpu.memory_space<vmem>>) attributes {dimension_semantics = [#tpu.dimension_semantics<arbitrary>], iteration_bounds = array<i64: 1>, scalar_prefetch = 0 : i64, scratch_operands = 0 : i64, tpu.core_type = #tpu.core_type<tc>, window_params = [{transform_indices = @transform_0, window_bounds = array<i64: 512, 36>}, {pipeline_mode = #tpu.pipeline_mode<synchronous>, transform_indices = @transform_1, window_bounds = array<i64: 36, 8>}, {transform_indices = @transform_2, window_bounds = array<i64: 512, 8>}, {pipeline_mode = #tpu.pipeline_mode<synchronous>, transform_indices = @transform_3, window_bounds = array<i64: 1, 8>}, {pipeline_mode = #tpu.pipeline_mode<synchronous>, transform_indices = @transform_4, window_bounds = array<i64: 1, 8>}]} {
    %c0 = arith.constant 0 : index
    %c0_0 = arith.constant 0 : index
    %0 = vector.load %arg1[%c0, %c0_0] : memref<512x36xbf16, #tpu.memory_space<vmem>>, vector<512x36xbf16>
    %c0_1 = arith.constant 0 : index
    %c0_2 = arith.constant 0 : index
    %1 = vector.load %arg2[%c0_1, %c0_2] : memref<36x8xbf16, #tpu.memory_space<vmem>>, vector<36x8xbf16>
    %cst = arith.constant dense<0.000000e+00> : vector<512x8xf32>
    %2 = tpu.matmul %0, %1, %cst {dimension_numbers = #tpu.dot_dimension_numbers<[1], [0], [0], [1], [0, 0, 1, 1], [], []>} : vector<512x36xbf16>, vector<36x8xbf16>, vector<512x8xf32> -> vector<512x8xf32>
    %c0_3 = arith.constant 0 : index
    %c0_4 = arith.constant 0 : index
    %3 = vector.load %arg3[%c0_3, %c0_4] : memref<512x8xf32, #tpu.memory_space<vmem>>, vector<512x8xf32>
    tpu.vector_store %arg3[%c0_3, %c0_4], %2 {strides = array<i32>} : memref<512x8xf32, #tpu.memory_space<vmem>>, vector<512x8xf32>,
    %c0_i32 = arith.constant 0 : i32
    %4 = arith.cmpi eq, %arg0, %c0_i32 : i32
    %5 = arith.extui %4 : i1 to i32
    %c0_i32_5 = arith.constant 0 : i32
    %6 = arith.cmpi ne, %5, %c0_i32_5 : i32
    scf.if %6 {
      %cst_16 = arith.constant 0.000000e+00 : f32
      %18 = vector.broadcast %cst_16 : f32 to vector<1x8xf32>
      %c0_17 = arith.constant 0 : index
      %c0_18 = arith.constant 0 : index
      %19 = vector.load %arg4[%c0_17, %c0_18] : memref<1x8xf32, #tpu.memory_space<vmem>>, vector<1x8xf32>
      tpu.vector_store %arg4[%c0_17, %c0_18], %18 {strides = array<i32>} : memref<1x8xf32, #tpu.memory_space<vmem>>, vector<1x8xf32>,
      %cst_19 = arith.constant 0.000000e+00 : f32
      %20 = vector.broadcast %cst_19 : f32 to vector<1x8xf32>
      %c0_20 = arith.constant 0 : index
      %c0_21 = arith.constant 0 : index
      %21 = vector.load %arg5[%c0_20, %c0_21] : memref<1x8xf32, #tpu.memory_space<vmem>>, vector<1x8xf32>
      tpu.vector_store %arg5[%c0_20, %c0_21], %20 {strides = array<i32>} : memref<1x8xf32, #tpu.memory_space<vmem>>, vector<1x8xf32>,
    } else {
    }
    %c0_6 = arith.constant 0 : index
    %c0_7 = arith.constant 0 : index
    %7 = vector.load %arg4[%c0_6, %c0_7] : memref<1x8xf32, #tpu.memory_space<vmem>>, vector<1x8xf32>
    %cst_8 = arith.constant dense<0.000000e+00> : vector<8xf32>
    %8 = vector.multi_reduction <add>, %2, %cst_8 [0] : vector<512x8xf32> to vector<8xf32>
    %9 = vector.shape_cast %8 : vector<8xf32> to vector<1x8xf32>
    %10 = arith.addf %7, %9 : vector<1x8xf32>
    %c0_9 = arith.constant 0 : index
    %c0_10 = arith.constant 0 : index
    %11 = vector.load %arg4[%c0_9, %c0_10] : memref<1x8xf32, #tpu.memory_space<vmem>>, vector<1x8xf32>
    tpu.vector_store %arg4[%c0_9, %c0_10], %10 {strides = array<i32>} : memref<1x8xf32, #tpu.memory_space<vmem>>, vector<1x8xf32>,
    %c0_11 = arith.constant 0 : index
    %c0_12 = arith.constant 0 : index
    %12 = vector.load %arg5[%c0_11, %c0_12] : memref<1x8xf32, #tpu.memory_space<vmem>>, vector<1x8xf32>
    %13 = arith.mulf %2, %2 : vector<512x8xf32>
    %cst_13 = arith.constant dense<0.000000e+00> : vector<8xf32>
    %14 = vector.multi_reduction <add>, %13, %cst_13 [0] : vector<512x8xf32> to vector<8xf32>
    %15 = vector.shape_cast %14 : vector<8xf32> to vector<1x8xf32>
    %16 = arith.addf %12, %15 : vector<1x8xf32>
    %c0_14 = arith.constant 0 : index
    %c0_15 = arith.constant 0 : index
    %17 = vector.load %arg5[%c0_14, %c0_15] : memref<1x8xf32, #tpu.memory_space<vmem>>, vector<1x8xf32>
    tpu.vector_store %arg5[%c0_14, %c0_15], %16 {strides = array<i32>} : memref<1x8xf32, #tpu.memory_space<vmem>>, vector<1x8xf32>,
    return
  }
  func.func @transform_0(%arg0: i32) -> (i32, i32) {
    %c0_i32 = arith.constant 0 : i32
    %c0_i32_0 = arith.constant 0 : i32
    return %arg0, %c0_i32 : i32, i32
  }
  func.func @transform_1(%arg0: i32) -> (i32, i32) {
    %c0_i32 = arith.constant 0 : i32
    %c0_i32_0 = arith.constant 0 : i32
    %c0_i32_1 = arith.constant 0 : i32
    return %c0_i32, %c0_i32_0 : i32, i32
  }
  func.func @transform_2(%arg0: i32) -> (i32, i32) {
    %c0_i32 = arith.constant 0 : i32
    %c0_i32_0 = arith.constant 0 : i32
    return %arg0, %c0_i32 : i32, i32
  }
  func.func @transform_3(%arg0: i32) -> (i32, i32) {
    %c0_i32 = arith.constant 0 : i32
    %c0_i32_0 = arith.constant 0 : i32
    %c0_i32_1 = arith.constant 0 : i32
    return %c0_i32, %c0_i32_0 : i32, i32
  }
  func.func @transform_4(%arg0: i32) -> (i32, i32) {
    %c0_i32 = arith.constant 0 : i32
    %c0_i32_0 = arith.constant 0 : i32
    %c0_i32_1 = arith.constant 0 : i32
    return %c0_i32, %c0_i32_0 : i32, i32
  }
}

module attributes {stable_mosaic.version = 11 : i64} {
  func.func @_affine_relu_kernel(%arg0: i32, %arg1: memref<32x128xf32, #tpu.memory_space<vmem>>, %arg2: memref<1x128xf32, #tpu.memory_space<vmem>>, %arg3: memref<1x128xf32, #tpu.memory_space<vmem>>, %arg4: memref<32x128xf32, #tpu.memory_space<vmem>>) attributes {dimension_semantics = [#tpu.dimension_semantics<parallel>], iteration_bounds = array<i64: 1>, scalar_prefetch = 0 : i64, scratch_operands = 0 : i64, tpu.core_type = #tpu.core_type<tc>, window_params = [{transform_indices = @transform_0, window_bounds = array<i64: 32, 128>}, {pipeline_mode = #tpu.pipeline_mode<synchronous>, transform_indices = @transform_1, window_bounds = array<i64: 1, 128>}, {pipeline_mode = #tpu.pipeline_mode<synchronous>, transform_indices = @transform_2, window_bounds = array<i64: 1, 128>}, {transform_indices = @transform_3, window_bounds = array<i64: 32, 128>}]} {
    %c0 = arith.constant 0 : index
    %c0_0 = arith.constant 0 : index
    %0 = vector.load %arg1[%c0, %c0_0] : memref<32x128xf32, #tpu.memory_space<vmem>>, vector<32x128xf32>
    %c0_1 = arith.constant 0 : index
    %c0_2 = arith.constant 0 : index
    %1 = vector.load %arg2[%c0_1, %c0_2] : memref<1x128xf32, #tpu.memory_space<vmem>>, vector<1x128xf32>
    %2 = vector.broadcast %1 : vector<1x128xf32> to vector<32x128xf32>
    %3 = arith.mulf %0, %2 : vector<32x128xf32>
    %c0_3 = arith.constant 0 : index
    %c0_4 = arith.constant 0 : index
    %4 = vector.load %arg3[%c0_3, %c0_4] : memref<1x128xf32, #tpu.memory_space<vmem>>, vector<1x128xf32>
    %5 = vector.broadcast %4 : vector<1x128xf32> to vector<32x128xf32>
    %6 = arith.addf %3, %5 : vector<32x128xf32>
    %cst = arith.constant 0.000000e+00 : f32
    %7 = vector.broadcast %cst : f32 to vector<32x128xf32>
    %8 = arith.maximumf %6, %7 : vector<32x128xf32>
    %c0_5 = arith.constant 0 : index
    %c0_6 = arith.constant 0 : index
    %9 = vector.load %arg4[%c0_5, %c0_6] : memref<32x128xf32, #tpu.memory_space<vmem>>, vector<32x128xf32>
    tpu.vector_store %arg4[%c0_5, %c0_6], %8 {strides = array<i32>} : memref<32x128xf32, #tpu.memory_space<vmem>>, vector<32x128xf32>,
    return
  }
  func.func @transform_0(%arg0: i32) -> (i32, i32) {
    %c0_i32 = arith.constant 0 : i32
    %c0_i32_0 = arith.constant 0 : i32
    return %arg0, %c0_i32 : i32, i32
  }
  func.func @transform_1(%arg0: i32) -> (i32, i32) {
    %c0_i32 = arith.constant 0 : i32
    %c0_i32_0 = arith.constant 0 : i32
    %c0_i32_1 = arith.constant 0 : i32
    return %c0_i32, %c0_i32_0 : i32, i32
  }
  func.func @transform_2(%arg0: i32) -> (i32, i32) {
    %c0_i32 = arith.constant 0 : i32
    %c0_i32_0 = arith.constant 0 : i32
    %c0_i32_1 = arith.constant 0 : i32
    return %c0_i32, %c0_i32_0 : i32, i32
  }
  func.func @transform_3(%arg0: i32) -> (i32, i32) {
    %c0_i32 = arith.constant 0 : i32
    %c0_i32_0 = arith.constant 0 : i32
    return %arg0, %c0_i32 : i32, i32
  }
}

module attributes {stable_mosaic.version = 11 : i64} {
  func.func @_mm_stats_kernel(%arg0: i32, %arg1: memref<512x72xbf16, #tpu.memory_space<vmem>>, %arg2: memref<72x8xbf16, #tpu.memory_space<vmem>>, %arg3: memref<512x8xf32, #tpu.memory_space<vmem>>, %arg4: memref<1x8xf32, #tpu.memory_space<vmem>>, %arg5: memref<1x8xf32, #tpu.memory_space<vmem>>) attributes {dimension_semantics = [#tpu.dimension_semantics<arbitrary>], iteration_bounds = array<i64: 1>, scalar_prefetch = 0 : i64, scratch_operands = 0 : i64, tpu.core_type = #tpu.core_type<tc>, window_params = [{transform_indices = @transform_0, window_bounds = array<i64: 512, 72>}, {pipeline_mode = #tpu.pipeline_mode<synchronous>, transform_indices = @transform_1, window_bounds = array<i64: 72, 8>}, {transform_indices = @transform_2, window_bounds = array<i64: 512, 8>}, {pipeline_mode = #tpu.pipeline_mode<synchronous>, transform_indices = @transform_3, window_bounds = array<i64: 1, 8>}, {pipeline_mode = #tpu.pipeline_mode<synchronous>, transform_indices = @transform_4, window_bounds = array<i64: 1, 8>}]} {
    %c0 = arith.constant 0 : index
    %c0_0 = arith.constant 0 : index
    %0 = vector.load %arg1[%c0, %c0_0] : memref<512x72xbf16, #tpu.memory_space<vmem>>, vector<512x72xbf16>
    %c0_1 = arith.constant 0 : index
    %c0_2 = arith.constant 0 : index
    %1 = vector.load %arg2[%c0_1, %c0_2] : memref<72x8xbf16, #tpu.memory_space<vmem>>, vector<72x8xbf16>
    %cst = arith.constant dense<0.000000e+00> : vector<512x8xf32>
    %2 = tpu.matmul %0, %1, %cst {dimension_numbers = #tpu.dot_dimension_numbers<[1], [0], [0], [1], [0, 0, 1, 1], [], []>} : vector<512x72xbf16>, vector<72x8xbf16>, vector<512x8xf32> -> vector<512x8xf32>
    %c0_3 = arith.constant 0 : index
    %c0_4 = arith.constant 0 : index
    %3 = vector.load %arg3[%c0_3, %c0_4] : memref<512x8xf32, #tpu.memory_space<vmem>>, vector<512x8xf32>
    tpu.vector_store %arg3[%c0_3, %c0_4], %2 {strides = array<i32>} : memref<512x8xf32, #tpu.memory_space<vmem>>, vector<512x8xf32>,
    %c0_i32 = arith.constant 0 : i32
    %4 = arith.cmpi eq, %arg0, %c0_i32 : i32
    %5 = arith.extui %4 : i1 to i32
    %c0_i32_5 = arith.constant 0 : i32
    %6 = arith.cmpi ne, %5, %c0_i32_5 : i32
    scf.if %6 {
      %cst_16 = arith.constant 0.000000e+00 : f32
      %18 = vector.broadcast %cst_16 : f32 to vector<1x8xf32>
      %c0_17 = arith.constant 0 : index
      %c0_18 = arith.constant 0 : index
      %19 = vector.load %arg4[%c0_17, %c0_18] : memref<1x8xf32, #tpu.memory_space<vmem>>, vector<1x8xf32>
      tpu.vector_store %arg4[%c0_17, %c0_18], %18 {strides = array<i32>} : memref<1x8xf32, #tpu.memory_space<vmem>>, vector<1x8xf32>,
      %cst_19 = arith.constant 0.000000e+00 : f32
      %20 = vector.broadcast %cst_19 : f32 to vector<1x8xf32>
      %c0_20 = arith.constant 0 : index
      %c0_21 = arith.constant 0 : index
      %21 = vector.load %arg5[%c0_20, %c0_21] : memref<1x8xf32, #tpu.memory_space<vmem>>, vector<1x8xf32>
      tpu.vector_store %arg5[%c0_20, %c0_21], %20 {strides = array<i32>} : memref<1x8xf32, #tpu.memory_space<vmem>>, vector<1x8xf32>,
    } else {
    }
    %c0_6 = arith.constant 0 : index
    %c0_7 = arith.constant 0 : index
    %7 = vector.load %arg4[%c0_6, %c0_7] : memref<1x8xf32, #tpu.memory_space<vmem>>, vector<1x8xf32>
    %cst_8 = arith.constant dense<0.000000e+00> : vector<8xf32>
    %8 = vector.multi_reduction <add>, %2, %cst_8 [0] : vector<512x8xf32> to vector<8xf32>
    %9 = vector.shape_cast %8 : vector<8xf32> to vector<1x8xf32>
    %10 = arith.addf %7, %9 : vector<1x8xf32>
    %c0_9 = arith.constant 0 : index
    %c0_10 = arith.constant 0 : index
    %11 = vector.load %arg4[%c0_9, %c0_10] : memref<1x8xf32, #tpu.memory_space<vmem>>, vector<1x8xf32>
    tpu.vector_store %arg4[%c0_9, %c0_10], %10 {strides = array<i32>} : memref<1x8xf32, #tpu.memory_space<vmem>>, vector<1x8xf32>,
    %c0_11 = arith.constant 0 : index
    %c0_12 = arith.constant 0 : index
    %12 = vector.load %arg5[%c0_11, %c0_12] : memref<1x8xf32, #tpu.memory_space<vmem>>, vector<1x8xf32>
    %13 = arith.mulf %2, %2 : vector<512x8xf32>
    %cst_13 = arith.constant dense<0.000000e+00> : vector<8xf32>
    %14 = vector.multi_reduction <add>, %13, %cst_13 [0] : vector<512x8xf32> to vector<8xf32>
    %15 = vector.shape_cast %14 : vector<8xf32> to vector<1x8xf32>
    %16 = arith.addf %12, %15 : vector<1x8xf32>
    %c0_14 = arith.constant 0 : index
    %c0_15 = arith.constant 0 : index
    %17 = vector.load %arg5[%c0_14, %c0_15] : memref<1x8xf32, #tpu.memory_space<vmem>>, vector<1x8xf32>
    tpu.vector_store %arg5[%c0_14, %c0_15], %16 {strides = array<i32>} : memref<1x8xf32, #tpu.memory_space<vmem>>, vector<1x8xf32>,
    return
  }
  func.func @transform_0(%arg0: i32) -> (i32, i32) {
    %c0_i32 = arith.constant 0 : i32
    %c0_i32_0 = arith.constant 0 : i32
    return %arg0, %c0_i32 : i32, i32
  }
  func.func @transform_1(%arg0: i32) -> (i32, i32) {
    %c0_i32 = arith.constant 0 : i32
    %c0_i32_0 = arith.constant 0 : i32
    %c0_i32_1 = arith.constant 0 : i32
    return %c0_i32, %c0_i32_0 : i32, i32
  }
  func.func @transform_2(%arg0: i32) -> (i32, i32) {
    %c0_i32 = arith.constant 0 : i32
    %c0_i32_0 = arith.constant 0 : i32
    return %arg0, %c0_i32 : i32, i32
  }
  func.func @transform_3(%arg0: i32) -> (i32, i32) {
    %c0_i32 = arith.constant 0 : i32
    %c0_i32_0 = arith.constant 0 : i32
    %c0_i32_1 = arith.constant 0 : i32
    return %c0_i32, %c0_i32_0 : i32, i32
  }
  func.func @transform_4(%arg0: i32) -> (i32, i32) {
    %c0_i32 = arith.constant 0 : i32
    %c0_i32_0 = arith.constant 0 : i32
    %c0_i32_1 = arith.constant 0 : i32
    return %c0_i32, %c0_i32_0 : i32, i32
  }
}

module attributes {stable_mosaic.version = 11 : i64} {
  func.func @_mm_stats_kernel(%arg0: i32, %arg1: memref<512x4xbf16, #tpu.memory_space<vmem>>, %arg2: memref<4x8xbf16, #tpu.memory_space<vmem>>, %arg3: memref<512x8xf32, #tpu.memory_space<vmem>>, %arg4: memref<1x8xf32, #tpu.memory_space<vmem>>, %arg5: memref<1x8xf32, #tpu.memory_space<vmem>>) attributes {dimension_semantics = [#tpu.dimension_semantics<arbitrary>], iteration_bounds = array<i64: 1>, scalar_prefetch = 0 : i64, scratch_operands = 0 : i64, tpu.core_type = #tpu.core_type<tc>, window_params = [{transform_indices = @transform_0, window_bounds = array<i64: 512, 4>}, {pipeline_mode = #tpu.pipeline_mode<synchronous>, transform_indices = @transform_1, window_bounds = array<i64: 4, 8>}, {transform_indices = @transform_2, window_bounds = array<i64: 512, 8>}, {pipeline_mode = #tpu.pipeline_mode<synchronous>, transform_indices = @transform_3, window_bounds = array<i64: 1, 8>}, {pipeline_mode = #tpu.pipeline_mode<synchronous>, transform_indices = @transform_4, window_bounds = array<i64: 1, 8>}]} {
    %c0 = arith.constant 0 : index
    %c0_0 = arith.constant 0 : index
    %0 = vector.load %arg1[%c0, %c0_0] : memref<512x4xbf16, #tpu.memory_space<vmem>>, vector<512x4xbf16>
    %c0_1 = arith.constant 0 : index
    %c0_2 = arith.constant 0 : index
    %1 = vector.load %arg2[%c0_1, %c0_2] : memref<4x8xbf16, #tpu.memory_space<vmem>>, vector<4x8xbf16>
    %cst = arith.constant dense<0.000000e+00> : vector<512x8xf32>
    %2 = tpu.matmul %0, %1, %cst {dimension_numbers = #tpu.dot_dimension_numbers<[1], [0], [0], [1], [0, 0, 1, 1], [], []>} : vector<512x4xbf16>, vector<4x8xbf16>, vector<512x8xf32> -> vector<512x8xf32>
    %c0_3 = arith.constant 0 : index
    %c0_4 = arith.constant 0 : index
    %3 = vector.load %arg3[%c0_3, %c0_4] : memref<512x8xf32, #tpu.memory_space<vmem>>, vector<512x8xf32>
    tpu.vector_store %arg3[%c0_3, %c0_4], %2 {strides = array<i32>} : memref<512x8xf32, #tpu.memory_space<vmem>>, vector<512x8xf32>,
    %c0_i32 = arith.constant 0 : i32
    %4 = arith.cmpi eq, %arg0, %c0_i32 : i32
    %5 = arith.extui %4 : i1 to i32
    %c0_i32_5 = arith.constant 0 : i32
    %6 = arith.cmpi ne, %5, %c0_i32_5 : i32
    scf.if %6 {
      %cst_16 = arith.constant 0.000000e+00 : f32
      %18 = vector.broadcast %cst_16 : f32 to vector<1x8xf32>
      %c0_17 = arith.constant 0 : index
      %c0_18 = arith.constant 0 : index
      %19 = vector.load %arg4[%c0_17, %c0_18] : memref<1x8xf32, #tpu.memory_space<vmem>>, vector<1x8xf32>
      tpu.vector_store %arg4[%c0_17, %c0_18], %18 {strides = array<i32>} : memref<1x8xf32, #tpu.memory_space<vmem>>, vector<1x8xf32>,
      %cst_19 = arith.constant 0.000000e+00 : f32
      %20 = vector.broadcast %cst_19 : f32 to vector<1x8xf32>
      %c0_20 = arith.constant 0 : index
      %c0_21 = arith.constant 0 : index
      %21 = vector.load %arg5[%c0_20, %c0_21] : memref<1x8xf32, #tpu.memory_space<vmem>>, vector<1x8xf32>
      tpu.vector_store %arg5[%c0_20, %c0_21], %20 {strides = array<i32>} : memref<1x8xf32, #tpu.memory_space<vmem>>, vector<1x8xf32>,
    } else {
    }
    %c0_6 = arith.constant 0 : index
    %c0_7 = arith.constant 0 : index
    %7 = vector.load %arg4[%c0_6, %c0_7] : memref<1x8xf32, #tpu.memory_space<vmem>>, vector<1x8xf32>
    %cst_8 = arith.constant dense<0.000000e+00> : vector<8xf32>
    %8 = vector.multi_reduction <add>, %2, %cst_8 [0] : vector<512x8xf32> to vector<8xf32>
    %9 = vector.shape_cast %8 : vector<8xf32> to vector<1x8xf32>
    %10 = arith.addf %7, %9 : vector<1x8xf32>
    %c0_9 = arith.constant 0 : index
    %c0_10 = arith.constant 0 : index
    %11 = vector.load %arg4[%c0_9, %c0_10] : memref<1x8xf32, #tpu.memory_space<vmem>>, vector<1x8xf32>
    tpu.vector_store %arg4[%c0_9, %c0_10], %10 {strides = array<i32>} : memref<1x8xf32, #tpu.memory_space<vmem>>, vector<1x8xf32>,
    %c0_11 = arith.constant 0 : index
    %c0_12 = arith.constant 0 : index
    %12 = vector.load %arg5[%c0_11, %c0_12] : memref<1x8xf32, #tpu.memory_space<vmem>>, vector<1x8xf32>
    %13 = arith.mulf %2, %2 : vector<512x8xf32>
    %cst_13 = arith.constant dense<0.000000e+00> : vector<8xf32>
    %14 = vector.multi_reduction <add>, %13, %cst_13 [0] : vector<512x8xf32> to vector<8xf32>
    %15 = vector.shape_cast %14 : vector<8xf32> to vector<1x8xf32>
    %16 = arith.addf %12, %15 : vector<1x8xf32>
    %c0_14 = arith.constant 0 : index
    %c0_15 = arith.constant 0 : index
    %17 = vector.load %arg5[%c0_14, %c0_15] : memref<1x8xf32, #tpu.memory_space<vmem>>, vector<1x8xf32>
    tpu.vector_store %arg5[%c0_14, %c0_15], %16 {strides = array<i32>} : memref<1x8xf32, #tpu.memory_space<vmem>>, vector<1x8xf32>,
    return
  }
  func.func @transform_0(%arg0: i32) -> (i32, i32) {
    %c0_i32 = arith.constant 0 : i32
    %c0_i32_0 = arith.constant 0 : i32
    return %arg0, %c0_i32 : i32, i32
  }
  func.func @transform_1(%arg0: i32) -> (i32, i32) {
    %c0_i32 = arith.constant 0 : i32
    %c0_i32_0 = arith.constant 0 : i32
    %c0_i32_1 = arith.constant 0 : i32
    return %c0_i32, %c0_i32_0 : i32, i32
  }
  func.func @transform_2(%arg0: i32) -> (i32, i32) {
    %c0_i32 = arith.constant 0 : i32
    %c0_i32_0 = arith.constant 0 : i32
    return %arg0, %c0_i32 : i32, i32
  }
  func.func @transform_3(%arg0: i32) -> (i32, i32) {
    %c0_i32 = arith.constant 0 : i32
    %c0_i32_0 = arith.constant 0 : i32
    %c0_i32_1 = arith.constant 0 : i32
    return %c0_i32, %c0_i32_0 : i32, i32
  }
  func.func @transform_4(%arg0: i32) -> (i32, i32) {
    %c0_i32 = arith.constant 0 : i32
    %c0_i32_0 = arith.constant 0 : i32
    %c0_i32_1 = arith.constant 0 : i32
    return %c0_i32, %c0_i32_0 : i32, i32
  }
}

module attributes {stable_mosaic.version = 11 : i64} {
  func.func @_res_tail_kernel(%arg0: i32, %arg1: memref<32x128xf32, #tpu.memory_space<vmem>>, %arg2: memref<32x128xf32, #tpu.memory_space<vmem>>, %arg3: memref<1x128xf32, #tpu.memory_space<vmem>>, %arg4: memref<1x128xf32, #tpu.memory_space<vmem>>, %arg5: memref<1x128xf32, #tpu.memory_space<vmem>>, %arg6: memref<1x128xf32, #tpu.memory_space<vmem>>, %arg7: memref<32x128xf32, #tpu.memory_space<vmem>>) attributes {dimension_semantics = [#tpu.dimension_semantics<parallel>], iteration_bounds = array<i64: 1>, scalar_prefetch = 0 : i64, scratch_operands = 0 : i64, tpu.core_type = #tpu.core_type<tc>, window_params = [{transform_indices = @transform_0, window_bounds = array<i64: 32, 128>}, {transform_indices = @transform_1, window_bounds = array<i64: 32, 128>}, {pipeline_mode = #tpu.pipeline_mode<synchronous>, transform_indices = @transform_2, window_bounds = array<i64: 1, 128>}, {pipeline_mode = #tpu.pipeline_mode<synchronous>, transform_indices = @transform_3, window_bounds = array<i64: 1, 128>}, {pipeline_mode = #tpu.pipeline_mode<synchronous>, transform_indices = @transform_4, window_bounds = array<i64: 1, 128>}, {pipeline_mode = #tpu.pipeline_mode<synchronous>, transform_indices = @transform_5, window_bounds = array<i64: 1, 128>}, {transform_indices = @transform_6, window_bounds = array<i64: 32, 128>}]} {
    %c0 = arith.constant 0 : index
    %c0_0 = arith.constant 0 : index
    %0 = vector.load %arg1[%c0, %c0_0] : memref<32x128xf32, #tpu.memory_space<vmem>>, vector<32x128xf32>
    %c0_1 = arith.constant 0 : index
    %c0_2 = arith.constant 0 : index
    %1 = vector.load %arg3[%c0_1, %c0_2] : memref<1x128xf32, #tpu.memory_space<vmem>>, vector<1x128xf32>
    %2 = vector.broadcast %1 : vector<1x128xf32> to vector<32x128xf32>
    %3 = arith.mulf %0, %2 : vector<32x128xf32>
    %c0_3 = arith.constant 0 : index
    %c0_4 = arith.constant 0 : index
    %4 = vector.load %arg4[%c0_3, %c0_4] : memref<1x128xf32, #tpu.memory_space<vmem>>, vector<1x128xf32>
    %5 = vector.broadcast %4 : vector<1x128xf32> to vector<32x128xf32>
    %6 = arith.addf %3, %5 : vector<32x128xf32>
    %c0_5 = arith.constant 0 : index
    %c0_6 = arith.constant 0 : index
    %7 = vector.load %arg2[%c0_5, %c0_6] : memref<32x128xf32, #tpu.memory_space<vmem>>, vector<32x128xf32>
    %c0_7 = arith.constant 0 : index
    %c0_8 = arith.constant 0 : index
    %8 = vector.load %arg5[%c0_7, %c0_8] : memref<1x128xf32, #tpu.memory_space<vmem>>, vector<1x128xf32>
    %9 = vector.broadcast %8 : vector<1x128xf32> to vector<32x128xf32>
    %10 = arith.mulf %7, %9 : vector<32x128xf32>
    %11 = arith.addf %6, %10 : vector<32x128xf32>
    %c0_9 = arith.constant 0 : index
    %c0_10 = arith.constant 0 : index
    %12 = vector.load %arg6[%c0_9, %c0_10] : memref<1x128xf32, #tpu.memory_space<vmem>>, vector<1x128xf32>
    %13 = vector.broadcast %12 : vector<1x128xf32> to vector<32x128xf32>
    %14 = arith.addf %11, %13 : vector<32x128xf32>
    %cst = arith.constant 0.000000e+00 : f32
    %15 = vector.broadcast %cst : f32 to vector<32x128xf32>
    %16 = arith.maximumf %14, %15 : vector<32x128xf32>
    %c0_11 = arith.constant 0 : index
    %c0_12 = arith.constant 0 : index
    %17 = vector.load %arg7[%c0_11, %c0_12] : memref<32x128xf32, #tpu.memory_space<vmem>>, vector<32x128xf32>
    tpu.vector_store %arg7[%c0_11, %c0_12], %16 {strides = array<i32>} : memref<32x128xf32, #tpu.memory_space<vmem>>, vector<32x128xf32>,
    return
  }
  func.func @transform_0(%arg0: i32) -> (i32, i32) {
    %c0_i32 = arith.constant 0 : i32
    %c0_i32_0 = arith.constant 0 : i32
    return %arg0, %c0_i32 : i32, i32
  }
  func.func @transform_1(%arg0: i32) -> (i32, i32) {
    %c0_i32 = arith.constant 0 : i32
    %c0_i32_0 = arith.constant 0 : i32
    return %arg0, %c0_i32 : i32, i32
  }
  func.func @transform_2(%arg0: i32) -> (i32, i32) {
    %c0_i32 = arith.constant 0 : i32
    %c0_i32_0 = arith.constant 0 : i32
    %c0_i32_1 = arith.constant 0 : i32
    return %c0_i32, %c0_i32_0 : i32, i32
  }
  func.func @transform_3(%arg0: i32) -> (i32, i32) {
    %c0_i32 = arith.constant 0 : i32
    %c0_i32_0 = arith.constant 0 : i32
    %c0_i32_1 = arith.constant 0 : i32
    return %c0_i32, %c0_i32_0 : i32, i32
  }
  func.func @transform_4(%arg0: i32) -> (i32, i32) {
    %c0_i32 = arith.constant 0 : i32
    %c0_i32_0 = arith.constant 0 : i32
    %c0_i32_1 = arith.constant 0 : i32
    return %c0_i32, %c0_i32_0 : i32, i32
  }
  func.func @transform_5(%arg0: i32) -> (i32, i32) {
    %c0_i32 = arith.constant 0 : i32
    %c0_i32_0 = arith.constant 0 : i32
    %c0_i32_1 = arith.constant 0 : i32
    return %c0_i32, %c0_i32_0 : i32, i32
  }
  func.func @transform_6(%arg0: i32) -> (i32, i32) {
    %c0_i32 = arith.constant 0 : i32
    %c0_i32_0 = arith.constant 0 : i32
    return %arg0, %c0_i32 : i32, i32
  }
}

module attributes {stable_mosaic.version = 11 : i64} {
  func.func @_max9_kernel(%arg0: i32, %arg1: memref<16x64xf32, #tpu.memory_space<vmem>>, %arg2: memref<16x64xf32, #tpu.memory_space<vmem>>, %arg3: memref<16x64xf32, #tpu.memory_space<vmem>>, %arg4: memref<16x64xf32, #tpu.memory_space<vmem>>, %arg5: memref<16x64xf32, #tpu.memory_space<vmem>>, %arg6: memref<16x64xf32, #tpu.memory_space<vmem>>, %arg7: memref<16x64xf32, #tpu.memory_space<vmem>>, %arg8: memref<16x64xf32, #tpu.memory_space<vmem>>, %arg9: memref<16x64xf32, #tpu.memory_space<vmem>>, %arg10: memref<16x64xf32, #tpu.memory_space<vmem>>) attributes {dimension_semantics = [#tpu.dimension_semantics<parallel>], iteration_bounds = array<i64: 1>, scalar_prefetch = 0 : i64, scratch_operands = 0 : i64, tpu.core_type = #tpu.core_type<tc>, window_params = [{transform_indices = @transform_0, window_bounds = array<i64: 16, 64>}, {transform_indices = @transform_1, window_bounds = array<i64: 16, 64>}, {transform_indices = @transform_2, window_bounds = array<i64: 16, 64>}, {transform_indices = @transform_3, window_bounds = array<i64: 16, 64>}, {transform_indices = @transform_4, window_bounds = array<i64: 16, 64>}, {transform_indices = @transform_5, window_bounds = array<i64: 16, 64>}, {transform_indices = @transform_6, window_bounds = array<i64: 16, 64>}, {transform_indices = @transform_7, window_bounds = array<i64: 16, 64>}, {transform_indices = @transform_8, window_bounds = array<i64: 16, 64>}, {transform_indices = @transform_9, window_bounds = array<i64: 16, 64>}]} {
    %c0 = arith.constant 0 : index
    %c0_0 = arith.constant 0 : index
    %0 = vector.load %arg1[%c0, %c0_0] : memref<16x64xf32, #tpu.memory_space<vmem>>, vector<16x64xf32>
    %c0_1 = arith.constant 0 : index
    %c0_2 = arith.constant 0 : index
    %1 = vector.load %arg2[%c0_1, %c0_2] : memref<16x64xf32, #tpu.memory_space<vmem>>, vector<16x64xf32>
    %2 = arith.maximumf %0, %1 : vector<16x64xf32>
    %c0_3 = arith.constant 0 : index
    %c0_4 = arith.constant 0 : index
    %3 = vector.load %arg3[%c0_3, %c0_4] : memref<16x64xf32, #tpu.memory_space<vmem>>, vector<16x64xf32>
    %4 = arith.maximumf %2, %3 : vector<16x64xf32>
    %c0_5 = arith.constant 0 : index
    %c0_6 = arith.constant 0 : index
    %5 = vector.load %arg4[%c0_5, %c0_6] : memref<16x64xf32, #tpu.memory_space<vmem>>, vector<16x64xf32>
    %6 = arith.maximumf %4, %5 : vector<16x64xf32>
    %c0_7 = arith.constant 0 : index
    %c0_8 = arith.constant 0 : index
    %7 = vector.load %arg5[%c0_7, %c0_8] : memref<16x64xf32, #tpu.memory_space<vmem>>, vector<16x64xf32>
    %8 = arith.maximumf %6, %7 : vector<16x64xf32>
    %c0_9 = arith.constant 0 : index
    %c0_10 = arith.constant 0 : index
    %9 = vector.load %arg6[%c0_9, %c0_10] : memref<16x64xf32, #tpu.memory_space<vmem>>, vector<16x64xf32>
    %10 = arith.maximumf %8, %9 : vector<16x64xf32>
    %c0_11 = arith.constant 0 : index
    %c0_12 = arith.constant 0 : index
    %11 = vector.load %arg7[%c0_11, %c0_12] : memref<16x64xf32, #tpu.memory_space<vmem>>, vector<16x64xf32>
    %12 = arith.maximumf %10, %11 : vector<16x64xf32>
    %c0_13 = arith.constant 0 : index
    %c0_14 = arith.constant 0 : index
    %13 = vector.load %arg8[%c0_13, %c0_14] : memref<16x64xf32, #tpu.memory_space<vmem>>, vector<16x64xf32>
    %14 = arith.maximumf %12, %13 : vector<16x64xf32>
    %c0_15 = arith.constant 0 : index
    %c0_16 = arith.constant 0 : index
    %15 = vector.load %arg9[%c0_15, %c0_16] : memref<16x64xf32, #tpu.memory_space<vmem>>, vector<16x64xf32>
    %16 = arith.maximumf %14, %15 : vector<16x64xf32>
    %c0_17 = arith.constant 0 : index
    %c0_18 = arith.constant 0 : index
    %17 = vector.load %arg10[%c0_17, %c0_18] : memref<16x64xf32, #tpu.memory_space<vmem>>, vector<16x64xf32>
    tpu.vector_store %arg10[%c0_17, %c0_18], %16 {strides = array<i32>} : memref<16x64xf32, #tpu.memory_space<vmem>>, vector<16x64xf32>,
    return
  }
  func.func @transform_0(%arg0: i32) -> (i32, i32) {
    %c0_i32 = arith.constant 0 : i32
    %c0_i32_0 = arith.constant 0 : i32
    return %arg0, %c0_i32 : i32, i32
  }
  func.func @transform_1(%arg0: i32) -> (i32, i32) {
    %c0_i32 = arith.constant 0 : i32
    %c0_i32_0 = arith.constant 0 : i32
    return %arg0, %c0_i32 : i32, i32
  }
  func.func @transform_2(%arg0: i32) -> (i32, i32) {
    %c0_i32 = arith.constant 0 : i32
    %c0_i32_0 = arith.constant 0 : i32
    return %arg0, %c0_i32 : i32, i32
  }
  func.func @transform_3(%arg0: i32) -> (i32, i32) {
    %c0_i32 = arith.constant 0 : i32
    %c0_i32_0 = arith.constant 0 : i32
    return %arg0, %c0_i32 : i32, i32
  }
  func.func @transform_4(%arg0: i32) -> (i32, i32) {
    %c0_i32 = arith.constant 0 : i32
    %c0_i32_0 = arith.constant 0 : i32
    return %arg0, %c0_i32 : i32, i32
  }
  func.func @transform_5(%arg0: i32) -> (i32, i32) {
    %c0_i32 = arith.constant 0 : i32
    %c0_i32_0 = arith.constant 0 : i32
    return %arg0, %c0_i32 : i32, i32
  }
  func.func @transform_6(%arg0: i32) -> (i32, i32) {
    %c0_i32 = arith.constant 0 : i32
    %c0_i32_0 = arith.constant 0 : i32
    return %arg0, %c0_i32 : i32, i32
  }
  func.func @transform_7(%arg0: i32) -> (i32, i32) {
    %c0_i32 = arith.constant 0 : i32
    %c0_i32_0 = arith.constant 0 : i32
    return %arg0, %c0_i32 : i32, i32
  }
  func.func @transform_8(%arg0: i32) -> (i32, i32) {
    %c0_i32 = arith.constant 0 : i32
    %c0_i32_0 = arith.constant 0 : i32
    return %arg0, %c0_i32 : i32, i32
  }
  func.func @transform_9(%arg0: i32) -> (i32, i32) {
    %c0_i32 = arith.constant 0 : i32
    %c0_i32_0 = arith.constant 0 : i32
    return %arg0, %c0_i32 : i32, i32
  }
}

module attributes {stable_mosaic.version = 11 : i64} {
  func.func @_mm_stats_kernel(%arg0: i32, %arg1: memref<128x72xbf16, #tpu.memory_space<vmem>>, %arg2: memref<72x8xbf16, #tpu.memory_space<vmem>>, %arg3: memref<128x8xf32, #tpu.memory_space<vmem>>, %arg4: memref<1x8xf32, #tpu.memory_space<vmem>>, %arg5: memref<1x8xf32, #tpu.memory_space<vmem>>) attributes {dimension_semantics = [#tpu.dimension_semantics<arbitrary>], iteration_bounds = array<i64: 1>, scalar_prefetch = 0 : i64, scratch_operands = 0 : i64, tpu.core_type = #tpu.core_type<tc>, window_params = [{transform_indices = @transform_0, window_bounds = array<i64: 128, 72>}, {pipeline_mode = #tpu.pipeline_mode<synchronous>, transform_indices = @transform_1, window_bounds = array<i64: 72, 8>}, {transform_indices = @transform_2, window_bounds = array<i64: 128, 8>}, {pipeline_mode = #tpu.pipeline_mode<synchronous>, transform_indices = @transform_3, window_bounds = array<i64: 1, 8>}, {pipeline_mode = #tpu.pipeline_mode<synchronous>, transform_indices = @transform_4, window_bounds = array<i64: 1, 8>}]} {
    %c0 = arith.constant 0 : index
    %c0_0 = arith.constant 0 : index
    %0 = vector.load %arg1[%c0, %c0_0] : memref<128x72xbf16, #tpu.memory_space<vmem>>, vector<128x72xbf16>
    %c0_1 = arith.constant 0 : index
    %c0_2 = arith.constant 0 : index
    %1 = vector.load %arg2[%c0_1, %c0_2] : memref<72x8xbf16, #tpu.memory_space<vmem>>, vector<72x8xbf16>
    %cst = arith.constant dense<0.000000e+00> : vector<128x8xf32>
    %2 = tpu.matmul %0, %1, %cst {dimension_numbers = #tpu.dot_dimension_numbers<[1], [0], [0], [1], [0, 0, 1, 1], [], []>} : vector<128x72xbf16>, vector<72x8xbf16>, vector<128x8xf32> -> vector<128x8xf32>
    %c0_3 = arith.constant 0 : index
    %c0_4 = arith.constant 0 : index
    %3 = vector.load %arg3[%c0_3, %c0_4] : memref<128x8xf32, #tpu.memory_space<vmem>>, vector<128x8xf32>
    tpu.vector_store %arg3[%c0_3, %c0_4], %2 {strides = array<i32>} : memref<128x8xf32, #tpu.memory_space<vmem>>, vector<128x8xf32>,
    %c0_i32 = arith.constant 0 : i32
    %4 = arith.cmpi eq, %arg0, %c0_i32 : i32
    %5 = arith.extui %4 : i1 to i32
    %c0_i32_5 = arith.constant 0 : i32
    %6 = arith.cmpi ne, %5, %c0_i32_5 : i32
    scf.if %6 {
      %cst_16 = arith.constant 0.000000e+00 : f32
      %18 = vector.broadcast %cst_16 : f32 to vector<1x8xf32>
      %c0_17 = arith.constant 0 : index
      %c0_18 = arith.constant 0 : index
      %19 = vector.load %arg4[%c0_17, %c0_18] : memref<1x8xf32, #tpu.memory_space<vmem>>, vector<1x8xf32>
      tpu.vector_store %arg4[%c0_17, %c0_18], %18 {strides = array<i32>} : memref<1x8xf32, #tpu.memory_space<vmem>>, vector<1x8xf32>,
      %cst_19 = arith.constant 0.000000e+00 : f32
      %20 = vector.broadcast %cst_19 : f32 to vector<1x8xf32>
      %c0_20 = arith.constant 0 : index
      %c0_21 = arith.constant 0 : index
      %21 = vector.load %arg5[%c0_20, %c0_21] : memref<1x8xf32, #tpu.memory_space<vmem>>, vector<1x8xf32>
      tpu.vector_store %arg5[%c0_20, %c0_21], %20 {strides = array<i32>} : memref<1x8xf32, #tpu.memory_space<vmem>>, vector<1x8xf32>,
    } else {
    }
    %c0_6 = arith.constant 0 : index
    %c0_7 = arith.constant 0 : index
    %7 = vector.load %arg4[%c0_6, %c0_7] : memref<1x8xf32, #tpu.memory_space<vmem>>, vector<1x8xf32>
    %cst_8 = arith.constant dense<0.000000e+00> : vector<8xf32>
    %8 = vector.multi_reduction <add>, %2, %cst_8 [0] : vector<128x8xf32> to vector<8xf32>
    %9 = vector.shape_cast %8 : vector<8xf32> to vector<1x8xf32>
    %10 = arith.addf %7, %9 : vector<1x8xf32>
    %c0_9 = arith.constant 0 : index
    %c0_10 = arith.constant 0 : index
    %11 = vector.load %arg4[%c0_9, %c0_10] : memref<1x8xf32, #tpu.memory_space<vmem>>, vector<1x8xf32>
    tpu.vector_store %arg4[%c0_9, %c0_10], %10 {strides = array<i32>} : memref<1x8xf32, #tpu.memory_space<vmem>>, vector<1x8xf32>,
    %c0_11 = arith.constant 0 : index
    %c0_12 = arith.constant 0 : index
    %12 = vector.load %arg5[%c0_11, %c0_12] : memref<1x8xf32, #tpu.memory_space<vmem>>, vector<1x8xf32>
    %13 = arith.mulf %2, %2 : vector<128x8xf32>
    %cst_13 = arith.constant dense<0.000000e+00> : vector<8xf32>
    %14 = vector.multi_reduction <add>, %13, %cst_13 [0] : vector<128x8xf32> to vector<8xf32>
    %15 = vector.shape_cast %14 : vector<8xf32> to vector<1x8xf32>
    %16 = arith.addf %12, %15 : vector<1x8xf32>
    %c0_14 = arith.constant 0 : index
    %c0_15 = arith.constant 0 : index
    %17 = vector.load %arg5[%c0_14, %c0_15] : memref<1x8xf32, #tpu.memory_space<vmem>>, vector<1x8xf32>
    tpu.vector_store %arg5[%c0_14, %c0_15], %16 {strides = array<i32>} : memref<1x8xf32, #tpu.memory_space<vmem>>, vector<1x8xf32>,
    return
  }
  func.func @transform_0(%arg0: i32) -> (i32, i32) {
    %c0_i32 = arith.constant 0 : i32
    %c0_i32_0 = arith.constant 0 : i32
    return %arg0, %c0_i32 : i32, i32
  }
  func.func @transform_1(%arg0: i32) -> (i32, i32) {
    %c0_i32 = arith.constant 0 : i32
    %c0_i32_0 = arith.constant 0 : i32
    %c0_i32_1 = arith.constant 0 : i32
    return %c0_i32, %c0_i32_0 : i32, i32
  }
  func.func @transform_2(%arg0: i32) -> (i32, i32) {
    %c0_i32 = arith.constant 0 : i32
    %c0_i32_0 = arith.constant 0 : i32
    return %arg0, %c0_i32 : i32, i32
  }
  func.func @transform_3(%arg0: i32) -> (i32, i32) {
    %c0_i32 = arith.constant 0 : i32
    %c0_i32_0 = arith.constant 0 : i32
    %c0_i32_1 = arith.constant 0 : i32
    return %c0_i32, %c0_i32_0 : i32, i32
  }
  func.func @transform_4(%arg0: i32) -> (i32, i32) {
    %c0_i32 = arith.constant 0 : i32
    %c0_i32_0 = arith.constant 0 : i32
    %c0_i32_1 = arith.constant 0 : i32
    return %c0_i32, %c0_i32_0 : i32, i32
  }
}

module attributes {stable_mosaic.version = 11 : i64} {
  func.func @_affine_relu_kernel(%arg0: i32, %arg1: memref<16x64xf32, #tpu.memory_space<vmem>>, %arg2: memref<1x64xf32, #tpu.memory_space<vmem>>, %arg3: memref<1x64xf32, #tpu.memory_space<vmem>>, %arg4: memref<16x64xf32, #tpu.memory_space<vmem>>) attributes {dimension_semantics = [#tpu.dimension_semantics<parallel>], iteration_bounds = array<i64: 1>, scalar_prefetch = 0 : i64, scratch_operands = 0 : i64, tpu.core_type = #tpu.core_type<tc>, window_params = [{transform_indices = @transform_0, window_bounds = array<i64: 16, 64>}, {pipeline_mode = #tpu.pipeline_mode<synchronous>, transform_indices = @transform_1, window_bounds = array<i64: 1, 64>}, {pipeline_mode = #tpu.pipeline_mode<synchronous>, transform_indices = @transform_2, window_bounds = array<i64: 1, 64>}, {transform_indices = @transform_3, window_bounds = array<i64: 16, 64>}]} {
    %c0 = arith.constant 0 : index
    %c0_0 = arith.constant 0 : index
    %0 = vector.load %arg1[%c0, %c0_0] : memref<16x64xf32, #tpu.memory_space<vmem>>, vector<16x64xf32>
    %c0_1 = arith.constant 0 : index
    %c0_2 = arith.constant 0 : index
    %1 = vector.load %arg2[%c0_1, %c0_2] : memref<1x64xf32, #tpu.memory_space<vmem>>, vector<1x64xf32>
    %2 = vector.broadcast %1 : vector<1x64xf32> to vector<16x64xf32>
    %3 = arith.mulf %0, %2 : vector<16x64xf32>
    %c0_3 = arith.constant 0 : index
    %c0_4 = arith.constant 0 : index
    %4 = vector.load %arg3[%c0_3, %c0_4] : memref<1x64xf32, #tpu.memory_space<vmem>>, vector<1x64xf32>
    %5 = vector.broadcast %4 : vector<1x64xf32> to vector<16x64xf32>
    %6 = arith.addf %3, %5 : vector<16x64xf32>
    %cst = arith.constant 0.000000e+00 : f32
    %7 = vector.broadcast %cst : f32 to vector<16x64xf32>
    %8 = arith.maximumf %6, %7 : vector<16x64xf32>
    %c0_5 = arith.constant 0 : index
    %c0_6 = arith.constant 0 : index
    %9 = vector.load %arg4[%c0_5, %c0_6] : memref<16x64xf32, #tpu.memory_space<vmem>>, vector<16x64xf32>
    tpu.vector_store %arg4[%c0_5, %c0_6], %8 {strides = array<i32>} : memref<16x64xf32, #tpu.memory_space<vmem>>, vector<16x64xf32>,
    return
  }
  func.func @transform_0(%arg0: i32) -> (i32, i32) {
    %c0_i32 = arith.constant 0 : i32
    %c0_i32_0 = arith.constant 0 : i32
    return %arg0, %c0_i32 : i32, i32
  }
  func.func @transform_1(%arg0: i32) -> (i32, i32) {
    %c0_i32 = arith.constant 0 : i32
    %c0_i32_0 = arith.constant 0 : i32
    %c0_i32_1 = arith.constant 0 : i32
    return %c0_i32, %c0_i32_0 : i32, i32
  }
  func.func @transform_2(%arg0: i32) -> (i32, i32) {
    %c0_i32 = arith.constant 0 : i32
    %c0_i32_0 = arith.constant 0 : i32
    %c0_i32_1 = arith.constant 0 : i32
    return %c0_i32, %c0_i32_0 : i32, i32
  }
  func.func @transform_3(%arg0: i32) -> (i32, i32) {
    %c0_i32 = arith.constant 0 : i32
    %c0_i32_0 = arith.constant 0 : i32
    return %arg0, %c0_i32 : i32, i32
  }
}

module attributes {stable_mosaic.version = 11 : i64} {
  func.func @_res_tail_kernel(%arg0: i32, %arg1: memref<16x64xf32, #tpu.memory_space<vmem>>, %arg2: memref<16x64xf32, #tpu.memory_space<vmem>>, %arg3: memref<1x64xf32, #tpu.memory_space<vmem>>, %arg4: memref<1x64xf32, #tpu.memory_space<vmem>>, %arg5: memref<1x64xf32, #tpu.memory_space<vmem>>, %arg6: memref<1x64xf32, #tpu.memory_space<vmem>>, %arg7: memref<16x64xf32, #tpu.memory_space<vmem>>) attributes {dimension_semantics = [#tpu.dimension_semantics<parallel>], iteration_bounds = array<i64: 1>, scalar_prefetch = 0 : i64, scratch_operands = 0 : i64, tpu.core_type = #tpu.core_type<tc>, window_params = [{transform_indices = @transform_0, window_bounds = array<i64: 16, 64>}, {transform_indices = @transform_1, window_bounds = array<i64: 16, 64>}, {pipeline_mode = #tpu.pipeline_mode<synchronous>, transform_indices = @transform_2, window_bounds = array<i64: 1, 64>}, {pipeline_mode = #tpu.pipeline_mode<synchronous>, transform_indices = @transform_3, window_bounds = array<i64: 1, 64>}, {pipeline_mode = #tpu.pipeline_mode<synchronous>, transform_indices = @transform_4, window_bounds = array<i64: 1, 64>}, {pipeline_mode = #tpu.pipeline_mode<synchronous>, transform_indices = @transform_5, window_bounds = array<i64: 1, 64>}, {transform_indices = @transform_6, window_bounds = array<i64: 16, 64>}]} {
    %c0 = arith.constant 0 : index
    %c0_0 = arith.constant 0 : index
    %0 = vector.load %arg1[%c0, %c0_0] : memref<16x64xf32, #tpu.memory_space<vmem>>, vector<16x64xf32>
    %c0_1 = arith.constant 0 : index
    %c0_2 = arith.constant 0 : index
    %1 = vector.load %arg3[%c0_1, %c0_2] : memref<1x64xf32, #tpu.memory_space<vmem>>, vector<1x64xf32>
    %2 = vector.broadcast %1 : vector<1x64xf32> to vector<16x64xf32>
    %3 = arith.mulf %0, %2 : vector<16x64xf32>
    %c0_3 = arith.constant 0 : index
    %c0_4 = arith.constant 0 : index
    %4 = vector.load %arg4[%c0_3, %c0_4] : memref<1x64xf32, #tpu.memory_space<vmem>>, vector<1x64xf32>
    %5 = vector.broadcast %4 : vector<1x64xf32> to vector<16x64xf32>
    %6 = arith.addf %3, %5 : vector<16x64xf32>
    %c0_5 = arith.constant 0 : index
    %c0_6 = arith.constant 0 : index
    %7 = vector.load %arg2[%c0_5, %c0_6] : memref<16x64xf32, #tpu.memory_space<vmem>>, vector<16x64xf32>
    %c0_7 = arith.constant 0 : index
    %c0_8 = arith.constant 0 : index
    %8 = vector.load %arg5[%c0_7, %c0_8] : memref<1x64xf32, #tpu.memory_space<vmem>>, vector<1x64xf32>
    %9 = vector.broadcast %8 : vector<1x64xf32> to vector<16x64xf32>
    %10 = arith.mulf %7, %9 : vector<16x64xf32>
    %11 = arith.addf %6, %10 : vector<16x64xf32>
    %c0_9 = arith.constant 0 : index
    %c0_10 = arith.constant 0 : index
    %12 = vector.load %arg6[%c0_9, %c0_10] : memref<1x64xf32, #tpu.memory_space<vmem>>, vector<1x64xf32>
    %13 = vector.broadcast %12 : vector<1x64xf32> to vector<16x64xf32>
    %14 = arith.addf %11, %13 : vector<16x64xf32>
    %cst = arith.constant 0.000000e+00 : f32
    %15 = vector.broadcast %cst : f32 to vector<16x64xf32>
    %16 = arith.maximumf %14, %15 : vector<16x64xf32>
    %c0_11 = arith.constant 0 : index
    %c0_12 = arith.constant 0 : index
    %17 = vector.load %arg7[%c0_11, %c0_12] : memref<16x64xf32, #tpu.memory_space<vmem>>, vector<16x64xf32>
    tpu.vector_store %arg7[%c0_11, %c0_12], %16 {strides = array<i32>} : memref<16x64xf32, #tpu.memory_space<vmem>>, vector<16x64xf32>,
    return
  }
  func.func @transform_0(%arg0: i32) -> (i32, i32) {
    %c0_i32 = arith.constant 0 : i32
    %c0_i32_0 = arith.constant 0 : i32
    return %arg0, %c0_i32 : i32, i32
  }
  func.func @transform_1(%arg0: i32) -> (i32, i32) {
    %c0_i32 = arith.constant 0 : i32
    %c0_i32_0 = arith.constant 0 : i32
    return %arg0, %c0_i32 : i32, i32
  }
  func.func @transform_2(%arg0: i32) -> (i32, i32) {
    %c0_i32 = arith.constant 0 : i32
    %c0_i32_0 = arith.constant 0 : i32
    %c0_i32_1 = arith.constant 0 : i32
    return %c0_i32, %c0_i32_0 : i32, i32
  }
  func.func @transform_3(%arg0: i32) -> (i32, i32) {
    %c0_i32 = arith.constant 0 : i32
    %c0_i32_0 = arith.constant 0 : i32
    %c0_i32_1 = arith.constant 0 : i32
    return %c0_i32, %c0_i32_0 : i32, i32
  }
  func.func @transform_4(%arg0: i32) -> (i32, i32) {
    %c0_i32 = arith.constant 0 : i32
    %c0_i32_0 = arith.constant 0 : i32
    %c0_i32_1 = arith.constant 0 : i32
    return %c0_i32, %c0_i32_0 : i32, i32
  }
  func.func @transform_5(%arg0: i32) -> (i32, i32) {
    %c0_i32 = arith.constant 0 : i32
    %c0_i32_0 = arith.constant 0 : i32
    %c0_i32_1 = arith.constant 0 : i32
    return %c0_i32, %c0_i32_0 : i32, i32
  }
  func.func @transform_6(%arg0: i32) -> (i32, i32) {
    %c0_i32 = arith.constant 0 : i32
    %c0_i32_0 = arith.constant 0 : i32
    return %arg0, %c0_i32 : i32, i32
  }
}

module attributes {stable_mosaic.version = 11 : i64} {
  func.func @_max9_kernel(%arg0: i32, %arg1: memref<8x32xf32, #tpu.memory_space<vmem>>, %arg2: memref<8x32xf32, #tpu.memory_space<vmem>>, %arg3: memref<8x32xf32, #tpu.memory_space<vmem>>, %arg4: memref<8x32xf32, #tpu.memory_space<vmem>>, %arg5: memref<8x32xf32, #tpu.memory_space<vmem>>, %arg6: memref<8x32xf32, #tpu.memory_space<vmem>>, %arg7: memref<8x32xf32, #tpu.memory_space<vmem>>, %arg8: memref<8x32xf32, #tpu.memory_space<vmem>>, %arg9: memref<8x32xf32, #tpu.memory_space<vmem>>, %arg10: memref<8x32xf32, #tpu.memory_space<vmem>>) attributes {dimension_semantics = [#tpu.dimension_semantics<parallel>], iteration_bounds = array<i64: 1>, scalar_prefetch = 0 : i64, scratch_operands = 0 : i64, tpu.core_type = #tpu.core_type<tc>, window_params = [{transform_indices = @transform_0, window_bounds = array<i64: 8, 32>}, {transform_indices = @transform_1, window_bounds = array<i64: 8, 32>}, {transform_indices = @transform_2, window_bounds = array<i64: 8, 32>}, {transform_indices = @transform_3, window_bounds = array<i64: 8, 32>}, {transform_indices = @transform_4, window_bounds = array<i64: 8, 32>}, {transform_indices = @transform_5, window_bounds = array<i64: 8, 32>}, {transform_indices = @transform_6, window_bounds = array<i64: 8, 32>}, {transform_indices = @transform_7, window_bounds = array<i64: 8, 32>}, {transform_indices = @transform_8, window_bounds = array<i64: 8, 32>}, {transform_indices = @transform_9, window_bounds = array<i64: 8, 32>}]} {
    %c0 = arith.constant 0 : index
    %c0_0 = arith.constant 0 : index
    %0 = vector.load %arg1[%c0, %c0_0] : memref<8x32xf32, #tpu.memory_space<vmem>>, vector<8x32xf32>
    %c0_1 = arith.constant 0 : index
    %c0_2 = arith.constant 0 : index
    %1 = vector.load %arg2[%c0_1, %c0_2] : memref<8x32xf32, #tpu.memory_space<vmem>>, vector<8x32xf32>
    %2 = arith.maximumf %0, %1 : vector<8x32xf32>
    %c0_3 = arith.constant 0 : index
    %c0_4 = arith.constant 0 : index
    %3 = vector.load %arg3[%c0_3, %c0_4] : memref<8x32xf32, #tpu.memory_space<vmem>>, vector<8x32xf32>
    %4 = arith.maximumf %2, %3 : vector<8x32xf32>
    %c0_5 = arith.constant 0 : index
    %c0_6 = arith.constant 0 : index
    %5 = vector.load %arg4[%c0_5, %c0_6] : memref<8x32xf32, #tpu.memory_space<vmem>>, vector<8x32xf32>
    %6 = arith.maximumf %4, %5 : vector<8x32xf32>
    %c0_7 = arith.constant 0 : index
    %c0_8 = arith.constant 0 : index
    %7 = vector.load %arg5[%c0_7, %c0_8] : memref<8x32xf32, #tpu.memory_space<vmem>>, vector<8x32xf32>
    %8 = arith.maximumf %6, %7 : vector<8x32xf32>
    %c0_9 = arith.constant 0 : index
    %c0_10 = arith.constant 0 : index
    %9 = vector.load %arg6[%c0_9, %c0_10] : memref<8x32xf32, #tpu.memory_space<vmem>>, vector<8x32xf32>
    %10 = arith.maximumf %8, %9 : vector<8x32xf32>
    %c0_11 = arith.constant 0 : index
    %c0_12 = arith.constant 0 : index
    %11 = vector.load %arg7[%c0_11, %c0_12] : memref<8x32xf32, #tpu.memory_space<vmem>>, vector<8x32xf32>
    %12 = arith.maximumf %10, %11 : vector<8x32xf32>
    %c0_13 = arith.constant 0 : index
    %c0_14 = arith.constant 0 : index
    %13 = vector.load %arg8[%c0_13, %c0_14] : memref<8x32xf32, #tpu.memory_space<vmem>>, vector<8x32xf32>
    %14 = arith.maximumf %12, %13 : vector<8x32xf32>
    %c0_15 = arith.constant 0 : index
    %c0_16 = arith.constant 0 : index
    %15 = vector.load %arg9[%c0_15, %c0_16] : memref<8x32xf32, #tpu.memory_space<vmem>>, vector<8x32xf32>
    %16 = arith.maximumf %14, %15 : vector<8x32xf32>
    %c0_17 = arith.constant 0 : index
    %c0_18 = arith.constant 0 : index
    %17 = vector.load %arg10[%c0_17, %c0_18] : memref<8x32xf32, #tpu.memory_space<vmem>>, vector<8x32xf32>
    tpu.vector_store %arg10[%c0_17, %c0_18], %16 {strides = array<i32>} : memref<8x32xf32, #tpu.memory_space<vmem>>, vector<8x32xf32>,
    return
  }
  func.func @transform_0(%arg0: i32) -> (i32, i32) {
    %c0_i32 = arith.constant 0 : i32
    %c0_i32_0 = arith.constant 0 : i32
    return %arg0, %c0_i32 : i32, i32
  }
  func.func @transform_1(%arg0: i32) -> (i32, i32) {
    %c0_i32 = arith.constant 0 : i32
    %c0_i32_0 = arith.constant 0 : i32
    return %arg0, %c0_i32 : i32, i32
  }
  func.func @transform_2(%arg0: i32) -> (i32, i32) {
    %c0_i32 = arith.constant 0 : i32
    %c0_i32_0 = arith.constant 0 : i32
    return %arg0, %c0_i32 : i32, i32
  }
  func.func @transform_3(%arg0: i32) -> (i32, i32) {
    %c0_i32 = arith.constant 0 : i32
    %c0_i32_0 = arith.constant 0 : i32
    return %arg0, %c0_i32 : i32, i32
  }
  func.func @transform_4(%arg0: i32) -> (i32, i32) {
    %c0_i32 = arith.constant 0 : i32
    %c0_i32_0 = arith.constant 0 : i32
    return %arg0, %c0_i32 : i32, i32
  }
  func.func @transform_5(%arg0: i32) -> (i32, i32) {
    %c0_i32 = arith.constant 0 : i32
    %c0_i32_0 = arith.constant 0 : i32
    return %arg0, %c0_i32 : i32, i32
  }
  func.func @transform_6(%arg0: i32) -> (i32, i32) {
    %c0_i32 = arith.constant 0 : i32
    %c0_i32_0 = arith.constant 0 : i32
    return %arg0, %c0_i32 : i32, i32
  }
  func.func @transform_7(%arg0: i32) -> (i32, i32) {
    %c0_i32 = arith.constant 0 : i32
    %c0_i32_0 = arith.constant 0 : i32
    return %arg0, %c0_i32 : i32, i32
  }
  func.func @transform_8(%arg0: i32) -> (i32, i32) {
    %c0_i32 = arith.constant 0 : i32
    %c0_i32_0 = arith.constant 0 : i32
    return %arg0, %c0_i32 : i32, i32
  }
  func.func @transform_9(%arg0: i32) -> (i32, i32) {
    %c0_i32 = arith.constant 0 : i32
    %c0_i32_0 = arith.constant 0 : i32
    return %arg0, %c0_i32 : i32, i32
  }
}

module attributes {stable_mosaic.version = 11 : i64} {
  func.func @_mm_stats_kernel(%arg0: i32, %arg1: memref<32x72xbf16, #tpu.memory_space<vmem>>, %arg2: memref<72x8xbf16, #tpu.memory_space<vmem>>, %arg3: memref<32x8xf32, #tpu.memory_space<vmem>>, %arg4: memref<1x8xf32, #tpu.memory_space<vmem>>, %arg5: memref<1x8xf32, #tpu.memory_space<vmem>>) attributes {dimension_semantics = [#tpu.dimension_semantics<arbitrary>], iteration_bounds = array<i64: 1>, scalar_prefetch = 0 : i64, scratch_operands = 0 : i64, tpu.core_type = #tpu.core_type<tc>, window_params = [{transform_indices = @transform_0, window_bounds = array<i64: 32, 72>}, {pipeline_mode = #tpu.pipeline_mode<synchronous>, transform_indices = @transform_1, window_bounds = array<i64: 72, 8>}, {transform_indices = @transform_2, window_bounds = array<i64: 32, 8>}, {pipeline_mode = #tpu.pipeline_mode<synchronous>, transform_indices = @transform_3, window_bounds = array<i64: 1, 8>}, {pipeline_mode = #tpu.pipeline_mode<synchronous>, transform_indices = @transform_4, window_bounds = array<i64: 1, 8>}]} {
    %c0 = arith.constant 0 : index
    %c0_0 = arith.constant 0 : index
    %0 = vector.load %arg1[%c0, %c0_0] : memref<32x72xbf16, #tpu.memory_space<vmem>>, vector<32x72xbf16>
    %c0_1 = arith.constant 0 : index
    %c0_2 = arith.constant 0 : index
    %1 = vector.load %arg2[%c0_1, %c0_2] : memref<72x8xbf16, #tpu.memory_space<vmem>>, vector<72x8xbf16>
    %cst = arith.constant dense<0.000000e+00> : vector<32x8xf32>
    %2 = tpu.matmul %0, %1, %cst {dimension_numbers = #tpu.dot_dimension_numbers<[1], [0], [0], [1], [0, 0, 1, 1], [], []>} : vector<32x72xbf16>, vector<72x8xbf16>, vector<32x8xf32> -> vector<32x8xf32>
    %c0_3 = arith.constant 0 : index
    %c0_4 = arith.constant 0 : index
    %3 = vector.load %arg3[%c0_3, %c0_4] : memref<32x8xf32, #tpu.memory_space<vmem>>, vector<32x8xf32>
    tpu.vector_store %arg3[%c0_3, %c0_4], %2 {strides = array<i32>} : memref<32x8xf32, #tpu.memory_space<vmem>>, vector<32x8xf32>,
    %c0_i32 = arith.constant 0 : i32
    %4 = arith.cmpi eq, %arg0, %c0_i32 : i32
    %5 = arith.extui %4 : i1 to i32
    %c0_i32_5 = arith.constant 0 : i32
    %6 = arith.cmpi ne, %5, %c0_i32_5 : i32
    scf.if %6 {
      %cst_16 = arith.constant 0.000000e+00 : f32
      %18 = vector.broadcast %cst_16 : f32 to vector<1x8xf32>
      %c0_17 = arith.constant 0 : index
      %c0_18 = arith.constant 0 : index
      %19 = vector.load %arg4[%c0_17, %c0_18] : memref<1x8xf32, #tpu.memory_space<vmem>>, vector<1x8xf32>
      tpu.vector_store %arg4[%c0_17, %c0_18], %18 {strides = array<i32>} : memref<1x8xf32, #tpu.memory_space<vmem>>, vector<1x8xf32>,
      %cst_19 = arith.constant 0.000000e+00 : f32
      %20 = vector.broadcast %cst_19 : f32 to vector<1x8xf32>
      %c0_20 = arith.constant 0 : index
      %c0_21 = arith.constant 0 : index
      %21 = vector.load %arg5[%c0_20, %c0_21] : memref<1x8xf32, #tpu.memory_space<vmem>>, vector<1x8xf32>
      tpu.vector_store %arg5[%c0_20, %c0_21], %20 {strides = array<i32>} : memref<1x8xf32, #tpu.memory_space<vmem>>, vector<1x8xf32>,
    } else {
    }
    %c0_6 = arith.constant 0 : index
    %c0_7 = arith.constant 0 : index
    %7 = vector.load %arg4[%c0_6, %c0_7] : memref<1x8xf32, #tpu.memory_space<vmem>>, vector<1x8xf32>
    %cst_8 = arith.constant dense<0.000000e+00> : vector<8xf32>
    %8 = vector.multi_reduction <add>, %2, %cst_8 [0] : vector<32x8xf32> to vector<8xf32>
    %9 = vector.shape_cast %8 : vector<8xf32> to vector<1x8xf32>
    %10 = arith.addf %7, %9 : vector<1x8xf32>
    %c0_9 = arith.constant 0 : index
    %c0_10 = arith.constant 0 : index
    %11 = vector.load %arg4[%c0_9, %c0_10] : memref<1x8xf32, #tpu.memory_space<vmem>>, vector<1x8xf32>
    tpu.vector_store %arg4[%c0_9, %c0_10], %10 {strides = array<i32>} : memref<1x8xf32, #tpu.memory_space<vmem>>, vector<1x8xf32>,
    %c0_11 = arith.constant 0 : index
    %c0_12 = arith.constant 0 : index
    %12 = vector.load %arg5[%c0_11, %c0_12] : memref<1x8xf32, #tpu.memory_space<vmem>>, vector<1x8xf32>
    %13 = arith.mulf %2, %2 : vector<32x8xf32>
    %cst_13 = arith.constant dense<0.000000e+00> : vector<8xf32>
    %14 = vector.multi_reduction <add>, %13, %cst_13 [0] : vector<32x8xf32> to vector<8xf32>
    %15 = vector.shape_cast %14 : vector<8xf32> to vector<1x8xf32>
    %16 = arith.addf %12, %15 : vector<1x8xf32>
    %c0_14 = arith.constant 0 : index
    %c0_15 = arith.constant 0 : index
    %17 = vector.load %arg5[%c0_14, %c0_15] : memref<1x8xf32, #tpu.memory_space<vmem>>, vector<1x8xf32>
    tpu.vector_store %arg5[%c0_14, %c0_15], %16 {strides = array<i32>} : memref<1x8xf32, #tpu.memory_space<vmem>>, vector<1x8xf32>,
    return
  }
  func.func @transform_0(%arg0: i32) -> (i32, i32) {
    %c0_i32 = arith.constant 0 : i32
    %c0_i32_0 = arith.constant 0 : i32
    return %arg0, %c0_i32 : i32, i32
  }
  func.func @transform_1(%arg0: i32) -> (i32, i32) {
    %c0_i32 = arith.constant 0 : i32
    %c0_i32_0 = arith.constant 0 : i32
    %c0_i32_1 = arith.constant 0 : i32
    return %c0_i32, %c0_i32_0 : i32, i32
  }
  func.func @transform_2(%arg0: i32) -> (i32, i32) {
    %c0_i32 = arith.constant 0 : i32
    %c0_i32_0 = arith.constant 0 : i32
    return %arg0, %c0_i32 : i32, i32
  }
  func.func @transform_3(%arg0: i32) -> (i32, i32) {
    %c0_i32 = arith.constant 0 : i32
    %c0_i32_0 = arith.constant 0 : i32
    %c0_i32_1 = arith.constant 0 : i32
    return %c0_i32, %c0_i32_0 : i32, i32
  }
  func.func @transform_4(%arg0: i32) -> (i32, i32) {
    %c0_i32 = arith.constant 0 : i32
    %c0_i32_0 = arith.constant 0 : i32
    %c0_i32_1 = arith.constant 0 : i32
    return %c0_i32, %c0_i32_0 : i32, i32
  }
}

module attributes {stable_mosaic.version = 11 : i64} {
  func.func @_affine_relu_kernel(%arg0: i32, %arg1: memref<8x32xf32, #tpu.memory_space<vmem>>, %arg2: memref<1x32xf32, #tpu.memory_space<vmem>>, %arg3: memref<1x32xf32, #tpu.memory_space<vmem>>, %arg4: memref<8x32xf32, #tpu.memory_space<vmem>>) attributes {dimension_semantics = [#tpu.dimension_semantics<parallel>], iteration_bounds = array<i64: 1>, scalar_prefetch = 0 : i64, scratch_operands = 0 : i64, tpu.core_type = #tpu.core_type<tc>, window_params = [{transform_indices = @transform_0, window_bounds = array<i64: 8, 32>}, {pipeline_mode = #tpu.pipeline_mode<synchronous>, transform_indices = @transform_1, window_bounds = array<i64: 1, 32>}, {pipeline_mode = #tpu.pipeline_mode<synchronous>, transform_indices = @transform_2, window_bounds = array<i64: 1, 32>}, {transform_indices = @transform_3, window_bounds = array<i64: 8, 32>}]} {
    %c0 = arith.constant 0 : index
    %c0_0 = arith.constant 0 : index
    %0 = vector.load %arg1[%c0, %c0_0] : memref<8x32xf32, #tpu.memory_space<vmem>>, vector<8x32xf32>
    %c0_1 = arith.constant 0 : index
    %c0_2 = arith.constant 0 : index
    %1 = vector.load %arg2[%c0_1, %c0_2] : memref<1x32xf32, #tpu.memory_space<vmem>>, vector<1x32xf32>
    %2 = vector.broadcast %1 : vector<1x32xf32> to vector<8x32xf32>
    %3 = arith.mulf %0, %2 : vector<8x32xf32>
    %c0_3 = arith.constant 0 : index
    %c0_4 = arith.constant 0 : index
    %4 = vector.load %arg3[%c0_3, %c0_4] : memref<1x32xf32, #tpu.memory_space<vmem>>, vector<1x32xf32>
    %5 = vector.broadcast %4 : vector<1x32xf32> to vector<8x32xf32>
    %6 = arith.addf %3, %5 : vector<8x32xf32>
    %cst = arith.constant 0.000000e+00 : f32
    %7 = vector.broadcast %cst : f32 to vector<8x32xf32>
    %8 = arith.maximumf %6, %7 : vector<8x32xf32>
    %c0_5 = arith.constant 0 : index
    %c0_6 = arith.constant 0 : index
    %9 = vector.load %arg4[%c0_5, %c0_6] : memref<8x32xf32, #tpu.memory_space<vmem>>, vector<8x32xf32>
    tpu.vector_store %arg4[%c0_5, %c0_6], %8 {strides = array<i32>} : memref<8x32xf32, #tpu.memory_space<vmem>>, vector<8x32xf32>,
    return
  }
  func.func @transform_0(%arg0: i32) -> (i32, i32) {
    %c0_i32 = arith.constant 0 : i32
    %c0_i32_0 = arith.constant 0 : i32
    return %arg0, %c0_i32 : i32, i32
  }
  func.func @transform_1(%arg0: i32) -> (i32, i32) {
    %c0_i32 = arith.constant 0 : i32
    %c0_i32_0 = arith.constant 0 : i32
    %c0_i32_1 = arith.constant 0 : i32
    return %c0_i32, %c0_i32_0 : i32, i32
  }
  func.func @transform_2(%arg0: i32) -> (i32, i32) {
    %c0_i32 = arith.constant 0 : i32
    %c0_i32_0 = arith.constant 0 : i32
    %c0_i32_1 = arith.constant 0 : i32
    return %c0_i32, %c0_i32_0 : i32, i32
  }
  func.func @transform_3(%arg0: i32) -> (i32, i32) {
    %c0_i32 = arith.constant 0 : i32
    %c0_i32_0 = arith.constant 0 : i32
    return %arg0, %c0_i32 : i32, i32
  }
}

module attributes {stable_mosaic.version = 11 : i64} {
  func.func @_res_tail_kernel(%arg0: i32, %arg1: memref<8x32xf32, #tpu.memory_space<vmem>>, %arg2: memref<8x32xf32, #tpu.memory_space<vmem>>, %arg3: memref<1x32xf32, #tpu.memory_space<vmem>>, %arg4: memref<1x32xf32, #tpu.memory_space<vmem>>, %arg5: memref<1x32xf32, #tpu.memory_space<vmem>>, %arg6: memref<1x32xf32, #tpu.memory_space<vmem>>, %arg7: memref<8x32xf32, #tpu.memory_space<vmem>>) attributes {dimension_semantics = [#tpu.dimension_semantics<parallel>], iteration_bounds = array<i64: 1>, scalar_prefetch = 0 : i64, scratch_operands = 0 : i64, tpu.core_type = #tpu.core_type<tc>, window_params = [{transform_indices = @transform_0, window_bounds = array<i64: 8, 32>}, {transform_indices = @transform_1, window_bounds = array<i64: 8, 32>}, {pipeline_mode = #tpu.pipeline_mode<synchronous>, transform_indices = @transform_2, window_bounds = array<i64: 1, 32>}, {pipeline_mode = #tpu.pipeline_mode<synchronous>, transform_indices = @transform_3, window_bounds = array<i64: 1, 32>}, {pipeline_mode = #tpu.pipeline_mode<synchronous>, transform_indices = @transform_4, window_bounds = array<i64: 1, 32>}, {pipeline_mode = #tpu.pipeline_mode<synchronous>, transform_indices = @transform_5, window_bounds = array<i64: 1, 32>}, {transform_indices = @transform_6, window_bounds = array<i64: 8, 32>}]} {
    %c0 = arith.constant 0 : index
    %c0_0 = arith.constant 0 : index
    %0 = vector.load %arg1[%c0, %c0_0] : memref<8x32xf32, #tpu.memory_space<vmem>>, vector<8x32xf32>
    %c0_1 = arith.constant 0 : index
    %c0_2 = arith.constant 0 : index
    %1 = vector.load %arg3[%c0_1, %c0_2] : memref<1x32xf32, #tpu.memory_space<vmem>>, vector<1x32xf32>
    %2 = vector.broadcast %1 : vector<1x32xf32> to vector<8x32xf32>
    %3 = arith.mulf %0, %2 : vector<8x32xf32>
    %c0_3 = arith.constant 0 : index
    %c0_4 = arith.constant 0 : index
    %4 = vector.load %arg4[%c0_3, %c0_4] : memref<1x32xf32, #tpu.memory_space<vmem>>, vector<1x32xf32>
    %5 = vector.broadcast %4 : vector<1x32xf32> to vector<8x32xf32>
    %6 = arith.addf %3, %5 : vector<8x32xf32>
    %c0_5 = arith.constant 0 : index
    %c0_6 = arith.constant 0 : index
    %7 = vector.load %arg2[%c0_5, %c0_6] : memref<8x32xf32, #tpu.memory_space<vmem>>, vector<8x32xf32>
    %c0_7 = arith.constant 0 : index
    %c0_8 = arith.constant 0 : index
    %8 = vector.load %arg5[%c0_7, %c0_8] : memref<1x32xf32, #tpu.memory_space<vmem>>, vector<1x32xf32>
    %9 = vector.broadcast %8 : vector<1x32xf32> to vector<8x32xf32>
    %10 = arith.mulf %7, %9 : vector<8x32xf32>
    %11 = arith.addf %6, %10 : vector<8x32xf32>
    %c0_9 = arith.constant 0 : index
    %c0_10 = arith.constant 0 : index
    %12 = vector.load %arg6[%c0_9, %c0_10] : memref<1x32xf32, #tpu.memory_space<vmem>>, vector<1x32xf32>
    %13 = vector.broadcast %12 : vector<1x32xf32> to vector<8x32xf32>
    %14 = arith.addf %11, %13 : vector<8x32xf32>
    %cst = arith.constant 0.000000e+00 : f32
    %15 = vector.broadcast %cst : f32 to vector<8x32xf32>
    %16 = arith.maximumf %14, %15 : vector<8x32xf32>
    %c0_11 = arith.constant 0 : index
    %c0_12 = arith.constant 0 : index
    %17 = vector.load %arg7[%c0_11, %c0_12] : memref<8x32xf32, #tpu.memory_space<vmem>>, vector<8x32xf32>
    tpu.vector_store %arg7[%c0_11, %c0_12], %16 {strides = array<i32>} : memref<8x32xf32, #tpu.memory_space<vmem>>, vector<8x32xf32>,
    return
  }
  func.func @transform_0(%arg0: i32) -> (i32, i32) {
    %c0_i32 = arith.constant 0 : i32
    %c0_i32_0 = arith.constant 0 : i32
    return %arg0, %c0_i32 : i32, i32
  }
  func.func @transform_1(%arg0: i32) -> (i32, i32) {
    %c0_i32 = arith.constant 0 : i32
    %c0_i32_0 = arith.constant 0 : i32
    return %arg0, %c0_i32 : i32, i32
  }
  func.func @transform_2(%arg0: i32) -> (i32, i32) {
    %c0_i32 = arith.constant 0 : i32
    %c0_i32_0 = arith.constant 0 : i32
    %c0_i32_1 = arith.constant 0 : i32
    return %c0_i32, %c0_i32_0 : i32, i32
  }
  func.func @transform_3(%arg0: i32) -> (i32, i32) {
    %c0_i32 = arith.constant 0 : i32
    %c0_i32_0 = arith.constant 0 : i32
    %c0_i32_1 = arith.constant 0 : i32
    return %c0_i32, %c0_i32_0 : i32, i32
  }
  func.func @transform_4(%arg0: i32) -> (i32, i32) {
    %c0_i32 = arith.constant 0 : i32
    %c0_i32_0 = arith.constant 0 : i32
    %c0_i32_1 = arith.constant 0 : i32
    return %c0_i32, %c0_i32_0 : i32, i32
  }
  func.func @transform_5(%arg0: i32) -> (i32, i32) {
    %c0_i32 = arith.constant 0 : i32
    %c0_i32_0 = arith.constant 0 : i32
    %c0_i32_1 = arith.constant 0 : i32
    return %c0_i32, %c0_i32_0 : i32, i32
  }
  func.func @transform_6(%arg0: i32) -> (i32, i32) {
    %c0_i32 = arith.constant 0 : i32
    %c0_i32_0 = arith.constant 0 : i32
    return %arg0, %c0_i32 : i32, i32
  }
}

module attributes {stable_mosaic.version = 11 : i64} {
  func.func @_max9_kernel(%arg0: i32, %arg1: memref<4x16xf32, #tpu.memory_space<vmem>>, %arg2: memref<4x16xf32, #tpu.memory_space<vmem>>, %arg3: memref<4x16xf32, #tpu.memory_space<vmem>>, %arg4: memref<4x16xf32, #tpu.memory_space<vmem>>, %arg5: memref<4x16xf32, #tpu.memory_space<vmem>>, %arg6: memref<4x16xf32, #tpu.memory_space<vmem>>, %arg7: memref<4x16xf32, #tpu.memory_space<vmem>>, %arg8: memref<4x16xf32, #tpu.memory_space<vmem>>, %arg9: memref<4x16xf32, #tpu.memory_space<vmem>>, %arg10: memref<4x16xf32, #tpu.memory_space<vmem>>) attributes {dimension_semantics = [#tpu.dimension_semantics<parallel>], iteration_bounds = array<i64: 1>, scalar_prefetch = 0 : i64, scratch_operands = 0 : i64, tpu.core_type = #tpu.core_type<tc>, window_params = [{transform_indices = @transform_0, window_bounds = array<i64: 4, 16>}, {transform_indices = @transform_1, window_bounds = array<i64: 4, 16>}, {transform_indices = @transform_2, window_bounds = array<i64: 4, 16>}, {transform_indices = @transform_3, window_bounds = array<i64: 4, 16>}, {transform_indices = @transform_4, window_bounds = array<i64: 4, 16>}, {transform_indices = @transform_5, window_bounds = array<i64: 4, 16>}, {transform_indices = @transform_6, window_bounds = array<i64: 4, 16>}, {transform_indices = @transform_7, window_bounds = array<i64: 4, 16>}, {transform_indices = @transform_8, window_bounds = array<i64: 4, 16>}, {transform_indices = @transform_9, window_bounds = array<i64: 4, 16>}]} {
    %c0 = arith.constant 0 : index
    %c0_0 = arith.constant 0 : index
    %0 = vector.load %arg1[%c0, %c0_0] : memref<4x16xf32, #tpu.memory_space<vmem>>, vector<4x16xf32>
    %c0_1 = arith.constant 0 : index
    %c0_2 = arith.constant 0 : index
    %1 = vector.load %arg2[%c0_1, %c0_2] : memref<4x16xf32, #tpu.memory_space<vmem>>, vector<4x16xf32>
    %2 = arith.maximumf %0, %1 : vector<4x16xf32>
    %c0_3 = arith.constant 0 : index
    %c0_4 = arith.constant 0 : index
    %3 = vector.load %arg3[%c0_3, %c0_4] : memref<4x16xf32, #tpu.memory_space<vmem>>, vector<4x16xf32>
    %4 = arith.maximumf %2, %3 : vector<4x16xf32>
    %c0_5 = arith.constant 0 : index
    %c0_6 = arith.constant 0 : index
    %5 = vector.load %arg4[%c0_5, %c0_6] : memref<4x16xf32, #tpu.memory_space<vmem>>, vector<4x16xf32>
    %6 = arith.maximumf %4, %5 : vector<4x16xf32>
    %c0_7 = arith.constant 0 : index
    %c0_8 = arith.constant 0 : index
    %7 = vector.load %arg5[%c0_7, %c0_8] : memref<4x16xf32, #tpu.memory_space<vmem>>, vector<4x16xf32>
    %8 = arith.maximumf %6, %7 : vector<4x16xf32>
    %c0_9 = arith.constant 0 : index
    %c0_10 = arith.constant 0 : index
    %9 = vector.load %arg6[%c0_9, %c0_10] : memref<4x16xf32, #tpu.memory_space<vmem>>, vector<4x16xf32>
    %10 = arith.maximumf %8, %9 : vector<4x16xf32>
    %c0_11 = arith.constant 0 : index
    %c0_12 = arith.constant 0 : index
    %11 = vector.load %arg7[%c0_11, %c0_12] : memref<4x16xf32, #tpu.memory_space<vmem>>, vector<4x16xf32>
    %12 = arith.maximumf %10, %11 : vector<4x16xf32>
    %c0_13 = arith.constant 0 : index
    %c0_14 = arith.constant 0 : index
    %13 = vector.load %arg8[%c0_13, %c0_14] : memref<4x16xf32, #tpu.memory_space<vmem>>, vector<4x16xf32>
    %14 = arith.maximumf %12, %13 : vector<4x16xf32>
    %c0_15 = arith.constant 0 : index
    %c0_16 = arith.constant 0 : index
    %15 = vector.load %arg9[%c0_15, %c0_16] : memref<4x16xf32, #tpu.memory_space<vmem>>, vector<4x16xf32>
    %16 = arith.maximumf %14, %15 : vector<4x16xf32>
    %c0_17 = arith.constant 0 : index
    %c0_18 = arith.constant 0 : index
    %17 = vector.load %arg10[%c0_17, %c0_18] : memref<4x16xf32, #tpu.memory_space<vmem>>, vector<4x16xf32>
    tpu.vector_store %arg10[%c0_17, %c0_18], %16 {strides = array<i32>} : memref<4x16xf32, #tpu.memory_space<vmem>>, vector<4x16xf32>,
    return
  }
  func.func @transform_0(%arg0: i32) -> (i32, i32) {
    %c0_i32 = arith.constant 0 : i32
    %c0_i32_0 = arith.constant 0 : i32
    return %arg0, %c0_i32 : i32, i32
  }
  func.func @transform_1(%arg0: i32) -> (i32, i32) {
    %c0_i32 = arith.constant 0 : i32
    %c0_i32_0 = arith.constant 0 : i32
    return %arg0, %c0_i32 : i32, i32
  }
  func.func @transform_2(%arg0: i32) -> (i32, i32) {
    %c0_i32 = arith.constant 0 : i32
    %c0_i32_0 = arith.constant 0 : i32
    return %arg0, %c0_i32 : i32, i32
  }
  func.func @transform_3(%arg0: i32) -> (i32, i32) {
    %c0_i32 = arith.constant 0 : i32
    %c0_i32_0 = arith.constant 0 : i32
    return %arg0, %c0_i32 : i32, i32
  }
  func.func @transform_4(%arg0: i32) -> (i32, i32) {
    %c0_i32 = arith.constant 0 : i32
    %c0_i32_0 = arith.constant 0 : i32
    return %arg0, %c0_i32 : i32, i32
  }
  func.func @transform_5(%arg0: i32) -> (i32, i32) {
    %c0_i32 = arith.constant 0 : i32
    %c0_i32_0 = arith.constant 0 : i32
    return %arg0, %c0_i32 : i32, i32
  }
  func.func @transform_6(%arg0: i32) -> (i32, i32) {
    %c0_i32 = arith.constant 0 : i32
    %c0_i32_0 = arith.constant 0 : i32
    return %arg0, %c0_i32 : i32, i32
  }
  func.func @transform_7(%arg0: i32) -> (i32, i32) {
    %c0_i32 = arith.constant 0 : i32
    %c0_i32_0 = arith.constant 0 : i32
    return %arg0, %c0_i32 : i32, i32
  }
  func.func @transform_8(%arg0: i32) -> (i32, i32) {
    %c0_i32 = arith.constant 0 : i32
    %c0_i32_0 = arith.constant 0 : i32
    return %arg0, %c0_i32 : i32, i32
  }
  func.func @transform_9(%arg0: i32) -> (i32, i32) {
    %c0_i32 = arith.constant 0 : i32
    %c0_i32_0 = arith.constant 0 : i32
    return %arg0, %c0_i32 : i32, i32
  }
}

module attributes {stable_mosaic.version = 11 : i64} {
  func.func @_upsample_add_kernel(%arg0: i32, %arg1: memref<16x4xf32, #tpu.memory_space<vmem>>, %arg2: memref<4x16xf32, #tpu.memory_space<vmem>>, %arg3: memref<16x16xf32, #tpu.memory_space<vmem>>, %arg4: memref<16x16xf32, #tpu.memory_space<vmem>>) attributes {dimension_semantics = [#tpu.dimension_semantics<arbitrary>], iteration_bounds = array<i64: 1>, scalar_prefetch = 0 : i64, scratch_operands = 0 : i64, tpu.core_type = #tpu.core_type<tc>, window_params = [{pipeline_mode = #tpu.pipeline_mode<synchronous>, transform_indices = @transform_0, window_bounds = array<i64: 16, 4>}, {pipeline_mode = #tpu.pipeline_mode<synchronous>, transform_indices = @transform_1, window_bounds = array<i64: 4, 16>}, {pipeline_mode = #tpu.pipeline_mode<synchronous>, transform_indices = @transform_2, window_bounds = array<i64: 16, 16>}, {pipeline_mode = #tpu.pipeline_mode<synchronous>, transform_indices = @transform_3, window_bounds = array<i64: 16, 16>}]} {
    %c0 = arith.constant 0 : index
    %c0_0 = arith.constant 0 : index
    %0 = vector.load %arg1[%c0, %c0_0] : memref<16x4xf32, #tpu.memory_space<vmem>>, vector<16x4xf32>
    %c0_1 = arith.constant 0 : index
    %c0_2 = arith.constant 0 : index
    %1 = vector.load %arg2[%c0_1, %c0_2] : memref<4x16xf32, #tpu.memory_space<vmem>>, vector<4x16xf32>
    %cst = arith.constant dense<0.000000e+00> : vector<16x16xf32>
    %2 = tpu.matmul %0, %1, %cst {dimension_numbers = #tpu.dot_dimension_numbers<[1], [0], [0], [1], [0, 0, 1, 1], [], []>} : vector<16x4xf32>, vector<4x16xf32>, vector<16x16xf32> -> vector<16x16xf32>
    %c0_3 = arith.constant 0 : index
    %c0_4 = arith.constant 0 : index
    %3 = vector.load %arg3[%c0_3, %c0_4] : memref<16x16xf32, #tpu.memory_space<vmem>>, vector<16x16xf32>
    %4 = arith.addf %2, %3 : vector<16x16xf32>
    %c0_5 = arith.constant 0 : index
    %c0_6 = arith.constant 0 : index
    %5 = vector.load %arg4[%c0_5, %c0_6] : memref<16x16xf32, #tpu.memory_space<vmem>>, vector<16x16xf32>
    tpu.vector_store %arg4[%c0_5, %c0_6], %4 {strides = array<i32>} : memref<16x16xf32, #tpu.memory_space<vmem>>, vector<16x16xf32>,
    return
  }
  func.func @transform_0(%arg0: i32) -> (i32, i32) {
    %c0_i32 = arith.constant 0 : i32
    %c0_i32_0 = arith.constant 0 : i32
    %c0_i32_1 = arith.constant 0 : i32
    return %c0_i32, %c0_i32_0 : i32, i32
  }
  func.func @transform_1(%arg0: i32) -> (i32, i32) {
    %c0_i32 = arith.constant 0 : i32
    %c0_i32_0 = arith.constant 0 : i32
    %c0_i32_1 = arith.constant 0 : i32
    return %c0_i32, %c0_i32_0 : i32, i32
  }
  func.func @transform_2(%arg0: i32) -> (i32, i32) {
    %c0_i32 = arith.constant 0 : i32
    %c0_i32_0 = arith.constant 0 : i32
    %c0_i32_1 = arith.constant 0 : i32
    return %c0_i32, %c0_i32_0 : i32, i32
  }
  func.func @transform_3(%arg0: i32) -> (i32, i32) {
    %c0_i32 = arith.constant 0 : i32
    %c0_i32_0 = arith.constant 0 : i32
    %c0_i32_1 = arith.constant 0 : i32
    return %c0_i32, %c0_i32_0 : i32, i32
  }
}

module attributes {stable_mosaic.version = 11 : i64} {
  func.func @_upsample_add_stats_kernel(%arg0: i32, %arg1: memref<256x16xf32, #tpu.memory_space<vmem>>, %arg2: memref<16x16xf32, #tpu.memory_space<vmem>>, %arg3: memref<256x16xf32, #tpu.memory_space<vmem>>, %arg4: memref<256x16xf32, #tpu.memory_space<vmem>>, %arg5: memref<1x16xf32, #tpu.memory_space<vmem>>, %arg6: memref<1x16xf32, #tpu.memory_space<vmem>>) attributes {dimension_semantics = [#tpu.dimension_semantics<arbitrary>], iteration_bounds = array<i64: 1>, scalar_prefetch = 0 : i64, scratch_operands = 0 : i64, tpu.core_type = #tpu.core_type<tc>, window_params = [{pipeline_mode = #tpu.pipeline_mode<synchronous>, transform_indices = @transform_0, window_bounds = array<i64: 256, 16>}, {pipeline_mode = #tpu.pipeline_mode<synchronous>, transform_indices = @transform_1, window_bounds = array<i64: 16, 16>}, {pipeline_mode = #tpu.pipeline_mode<synchronous>, transform_indices = @transform_2, window_bounds = array<i64: 256, 16>}, {pipeline_mode = #tpu.pipeline_mode<synchronous>, transform_indices = @transform_3, window_bounds = array<i64: 256, 16>}, {pipeline_mode = #tpu.pipeline_mode<synchronous>, transform_indices = @transform_4, window_bounds = array<i64: 1, 16>}, {pipeline_mode = #tpu.pipeline_mode<synchronous>, transform_indices = @transform_5, window_bounds = array<i64: 1, 16>}]} {
    %c0 = arith.constant 0 : index
    %c0_0 = arith.constant 0 : index
    %0 = vector.load %arg1[%c0, %c0_0] : memref<256x16xf32, #tpu.memory_space<vmem>>, vector<256x16xf32>
    %c0_1 = arith.constant 0 : index
    %c0_2 = arith.constant 0 : index
    %1 = vector.load %arg2[%c0_1, %c0_2] : memref<16x16xf32, #tpu.memory_space<vmem>>, vector<16x16xf32>
    %cst = arith.constant dense<0.000000e+00> : vector<256x16xf32>
    %2 = tpu.matmul %0, %1, %cst {dimension_numbers = #tpu.dot_dimension_numbers<[1], [0], [0], [1], [0, 0, 1, 1], [], []>} : vector<256x16xf32>, vector<16x16xf32>, vector<256x16xf32> -> vector<256x16xf32>
    %c0_3 = arith.constant 0 : index
    %c0_4 = arith.constant 0 : index
    %3 = vector.load %arg3[%c0_3, %c0_4] : memref<256x16xf32, #tpu.memory_space<vmem>>, vector<256x16xf32>
    %4 = arith.addf %2, %3 : vector<256x16xf32>
    %c0_5 = arith.constant 0 : index
    %c0_6 = arith.constant 0 : index
    %5 = vector.load %arg4[%c0_5, %c0_6] : memref<256x16xf32, #tpu.memory_space<vmem>>, vector<256x16xf32>
    tpu.vector_store %arg4[%c0_5, %c0_6], %4 {strides = array<i32>} : memref<256x16xf32, #tpu.memory_space<vmem>>, vector<256x16xf32>,
    %cst_7 = arith.constant dense<0.000000e+00> : vector<16xf32>
    %6 = vector.multi_reduction <add>, %4, %cst_7 [0] : vector<256x16xf32> to vector<16xf32>
    %7 = vector.shape_cast %6 : vector<16xf32> to vector<1x16xf32>
    %c0_8 = arith.constant 0 : index
    %c0_9 = arith.constant 0 : index
    %8 = vector.load %arg5[%c0_8, %c0_9] : memref<1x16xf32, #tpu.memory_space<vmem>>, vector<1x16xf32>
    tpu.vector_store %arg5[%c0_8, %c0_9], %7 {strides = array<i32>} : memref<1x16xf32, #tpu.memory_space<vmem>>, vector<1x16xf32>,
    %9 = arith.mulf %4, %4 : vector<256x16xf32>
    %cst_10 = arith.constant dense<0.000000e+00> : vector<16xf32>
    %10 = vector.multi_reduction <add>, %9, %cst_10 [0] : vector<256x16xf32> to vector<16xf32>
    %11 = vector.shape_cast %10 : vector<16xf32> to vector<1x16xf32>
    %c0_11 = arith.constant 0 : index
    %c0_12 = arith.constant 0 : index
    %12 = vector.load %arg6[%c0_11, %c0_12] : memref<1x16xf32, #tpu.memory_space<vmem>>, vector<1x16xf32>
    tpu.vector_store %arg6[%c0_11, %c0_12], %11 {strides = array<i32>} : memref<1x16xf32, #tpu.memory_space<vmem>>, vector<1x16xf32>,
    return
  }
  func.func @transform_0(%arg0: i32) -> (i32, i32) {
    %c0_i32 = arith.constant 0 : i32
    %c0_i32_0 = arith.constant 0 : i32
    %c0_i32_1 = arith.constant 0 : i32
    return %c0_i32, %c0_i32_0 : i32, i32
  }
  func.func @transform_1(%arg0: i32) -> (i32, i32) {
    %c0_i32 = arith.constant 0 : i32
    %c0_i32_0 = arith.constant 0 : i32
    %c0_i32_1 = arith.constant 0 : i32
    return %c0_i32, %c0_i32_0 : i32, i32
  }
  func.func @transform_2(%arg0: i32) -> (i32, i32) {
    %c0_i32 = arith.constant 0 : i32
    %c0_i32_0 = arith.constant 0 : i32
    %c0_i32_1 = arith.constant 0 : i32
    return %c0_i32, %c0_i32_0 : i32, i32
  }
  func.func @transform_3(%arg0: i32) -> (i32, i32) {
    %c0_i32 = arith.constant 0 : i32
    %c0_i32_0 = arith.constant 0 : i32
    %c0_i32_1 = arith.constant 0 : i32
    return %c0_i32, %c0_i32_0 : i32, i32
  }
  func.func @transform_4(%arg0: i32) -> (i32, i32) {
    %c0_i32 = arith.constant 0 : i32
    %c0_i32_0 = arith.constant 0 : i32
    %c0_i32_1 = arith.constant 0 : i32
    return %c0_i32, %c0_i32_0 : i32, i32
  }
  func.func @transform_5(%arg0: i32) -> (i32, i32) {
    %c0_i32 = arith.constant 0 : i32
    %c0_i32_0 = arith.constant 0 : i32
    %c0_i32_1 = arith.constant 0 : i32
    return %c0_i32, %c0_i32_0 : i32, i32
  }
}

module attributes {stable_mosaic.version = 11 : i64} {
  func.func @_bn_relu_mm_stats_kernel(%arg0: i32, %arg1: memref<512x8xf32, #tpu.memory_space<vmem>>, %arg2: memref<1x8xf32, #tpu.memory_space<vmem>>, %arg3: memref<1x8xf32, #tpu.memory_space<vmem>>, %arg4: memref<8x8xbf16, #tpu.memory_space<vmem>>, %arg5: memref<512x8xf32, #tpu.memory_space<vmem>>, %arg6: memref<1x8xf32, #tpu.memory_space<vmem>>, %arg7: memref<1x8xf32, #tpu.memory_space<vmem>>) attributes {dimension_semantics = [#tpu.dimension_semantics<arbitrary>], iteration_bounds = array<i64: 1>, scalar_prefetch = 0 : i64, scratch_operands = 0 : i64, tpu.core_type = #tpu.core_type<tc>, window_params = [{transform_indices = @transform_0, window_bounds = array<i64: 512, 8>}, {pipeline_mode = #tpu.pipeline_mode<synchronous>, transform_indices = @transform_1, window_bounds = array<i64: 1, 8>}, {pipeline_mode = #tpu.pipeline_mode<synchronous>, transform_indices = @transform_2, window_bounds = array<i64: 1, 8>}, {pipeline_mode = #tpu.pipeline_mode<synchronous>, transform_indices = @transform_3, window_bounds = array<i64: 8, 8>}, {transform_indices = @transform_4, window_bounds = array<i64: 512, 8>}, {pipeline_mode = #tpu.pipeline_mode<synchronous>, transform_indices = @transform_5, window_bounds = array<i64: 1, 8>}, {pipeline_mode = #tpu.pipeline_mode<synchronous>, transform_indices = @transform_6, window_bounds = array<i64: 1, 8>}]} {
    %c0 = arith.constant 0 : index
    %c0_0 = arith.constant 0 : index
    %0 = vector.load %arg1[%c0, %c0_0] : memref<512x8xf32, #tpu.memory_space<vmem>>, vector<512x8xf32>
    %c0_1 = arith.constant 0 : index
    %c0_2 = arith.constant 0 : index
    %1 = vector.load %arg2[%c0_1, %c0_2] : memref<1x8xf32, #tpu.memory_space<vmem>>, vector<1x8xf32>
    %2 = vector.broadcast %1 : vector<1x8xf32> to vector<512x8xf32>
    %3 = arith.mulf %0, %2 : vector<512x8xf32>
    %c0_3 = arith.constant 0 : index
    %c0_4 = arith.constant 0 : index
    %4 = vector.load %arg3[%c0_3, %c0_4] : memref<1x8xf32, #tpu.memory_space<vmem>>, vector<1x8xf32>
    %5 = vector.broadcast %4 : vector<1x8xf32> to vector<512x8xf32>
    %6 = arith.addf %3, %5 : vector<512x8xf32>
    %cst = arith.constant 0.000000e+00 : f32
    %7 = vector.broadcast %cst : f32 to vector<512x8xf32>
    %8 = arith.maximumf %6, %7 : vector<512x8xf32>
    %9 = arith.truncf %8 : vector<512x8xf32> to vector<512x8xbf16>
    %c0_5 = arith.constant 0 : index
    %c0_6 = arith.constant 0 : index
    %10 = vector.load %arg4[%c0_5, %c0_6] : memref<8x8xbf16, #tpu.memory_space<vmem>>, vector<8x8xbf16>
    %cst_7 = arith.constant dense<0.000000e+00> : vector<512x8xf32>
    %11 = tpu.matmul %9, %10, %cst_7 {dimension_numbers = #tpu.dot_dimension_numbers<[1], [0], [0], [1], [0, 0, 1, 1], [], []>} : vector<512x8xbf16>, vector<8x8xbf16>, vector<512x8xf32> -> vector<512x8xf32>
    %c0_8 = arith.constant 0 : index
    %c0_9 = arith.constant 0 : index
    %12 = vector.load %arg5[%c0_8, %c0_9] : memref<512x8xf32, #tpu.memory_space<vmem>>, vector<512x8xf32>
    tpu.vector_store %arg5[%c0_8, %c0_9], %11 {strides = array<i32>} : memref<512x8xf32, #tpu.memory_space<vmem>>, vector<512x8xf32>,
    %c0_i32 = arith.constant 0 : i32
    %13 = arith.cmpi eq, %arg0, %c0_i32 : i32
    %14 = arith.extui %13 : i1 to i32
    %c0_i32_10 = arith.constant 0 : i32
    %15 = arith.cmpi ne, %14, %c0_i32_10 : i32
    scf.if %15 {
      %cst_21 = arith.constant 0.000000e+00 : f32
      %27 = vector.broadcast %cst_21 : f32 to vector<1x8xf32>
      %c0_22 = arith.constant 0 : index
      %c0_23 = arith.constant 0 : index
      %28 = vector.load %arg6[%c0_22, %c0_23] : memref<1x8xf32, #tpu.memory_space<vmem>>, vector<1x8xf32>
      tpu.vector_store %arg6[%c0_22, %c0_23], %27 {strides = array<i32>} : memref<1x8xf32, #tpu.memory_space<vmem>>, vector<1x8xf32>,
      %cst_24 = arith.constant 0.000000e+00 : f32
      %29 = vector.broadcast %cst_24 : f32 to vector<1x8xf32>
      %c0_25 = arith.constant 0 : index
      %c0_26 = arith.constant 0 : index
      %30 = vector.load %arg7[%c0_25, %c0_26] : memref<1x8xf32, #tpu.memory_space<vmem>>, vector<1x8xf32>
      tpu.vector_store %arg7[%c0_25, %c0_26], %29 {strides = array<i32>} : memref<1x8xf32, #tpu.memory_space<vmem>>, vector<1x8xf32>,
    } else {
    }
    %c0_11 = arith.constant 0 : index
    %c0_12 = arith.constant 0 : index
    %16 = vector.load %arg6[%c0_11, %c0_12] : memref<1x8xf32, #tpu.memory_space<vmem>>, vector<1x8xf32>
    %cst_13 = arith.constant dense<0.000000e+00> : vector<8xf32>
    %17 = vector.multi_reduction <add>, %11, %cst_13 [0] : vector<512x8xf32> to vector<8xf32>
    %18 = vector.shape_cast %17 : vector<8xf32> to vector<1x8xf32>
    %19 = arith.addf %16, %18 : vector<1x8xf32>
    %c0_14 = arith.constant 0 : index
    %c0_15 = arith.constant 0 : index
    %20 = vector.load %arg6[%c0_14, %c0_15] : memref<1x8xf32, #tpu.memory_space<vmem>>, vector<1x8xf32>
    tpu.vector_store %arg6[%c0_14, %c0_15], %19 {strides = array<i32>} : memref<1x8xf32, #tpu.memory_space<vmem>>, vector<1x8xf32>,
    %c0_16 = arith.constant 0 : index
    %c0_17 = arith.constant 0 : index
    %21 = vector.load %arg7[%c0_16, %c0_17] : memref<1x8xf32, #tpu.memory_space<vmem>>, vector<1x8xf32>
    %22 = arith.mulf %11, %11 : vector<512x8xf32>
    %cst_18 = arith.constant dense<0.000000e+00> : vector<8xf32>
    %23 = vector.multi_reduction <add>, %22, %cst_18 [0] : vector<512x8xf32> to vector<8xf32>
    %24 = vector.shape_cast %23 : vector<8xf32> to vector<1x8xf32>
    %25 = arith.addf %21, %24 : vector<1x8xf32>
    %c0_19 = arith.constant 0 : index
    %c0_20 = arith.constant 0 : index
    %26 = vector.load %arg7[%c0_19, %c0_20] : memref<1x8xf32, #tpu.memory_space<vmem>>, vector<1x8xf32>
    tpu.vector_store %arg7[%c0_19, %c0_20], %25 {strides = array<i32>} : memref<1x8xf32, #tpu.memory_space<vmem>>, vector<1x8xf32>,
    return
  }
  func.func @transform_0(%arg0: i32) -> (i32, i32) {
    %c0_i32 = arith.constant 0 : i32
    %c0_i32_0 = arith.constant 0 : i32
    return %arg0, %c0_i32 : i32, i32
  }
  func.func @transform_1(%arg0: i32) -> (i32, i32) {
    %c0_i32 = arith.constant 0 : i32
    %c0_i32_0 = arith.constant 0 : i32
    %c0_i32_1 = arith.constant 0 : i32
    return %c0_i32, %c0_i32_0 : i32, i32
  }
  func.func @transform_2(%arg0: i32) -> (i32, i32) {
    %c0_i32 = arith.constant 0 : i32
    %c0_i32_0 = arith.constant 0 : i32
    %c0_i32_1 = arith.constant 0 : i32
    return %c0_i32, %c0_i32_0 : i32, i32
  }
  func.func @transform_3(%arg0: i32) -> (i32, i32) {
    %c0_i32 = arith.constant 0 : i32
    %c0_i32_0 = arith.constant 0 : i32
    %c0_i32_1 = arith.constant 0 : i32
    return %c0_i32, %c0_i32_0 : i32, i32
  }
  func.func @transform_4(%arg0: i32) -> (i32, i32) {
    %c0_i32 = arith.constant 0 : i32
    %c0_i32_0 = arith.constant 0 : i32
    return %arg0, %c0_i32 : i32, i32
  }
  func.func @transform_5(%arg0: i32) -> (i32, i32) {
    %c0_i32 = arith.constant 0 : i32
    %c0_i32_0 = arith.constant 0 : i32
    %c0_i32_1 = arith.constant 0 : i32
    return %c0_i32, %c0_i32_0 : i32, i32
  }
  func.func @transform_6(%arg0: i32) -> (i32, i32) {
    %c0_i32 = arith.constant 0 : i32
    %c0_i32_0 = arith.constant 0 : i32
    %c0_i32_1 = arith.constant 0 : i32
    return %c0_i32, %c0_i32_0 : i32, i32
  }
}

module attributes {stable_mosaic.version = 11 : i64} {
  func.func @_mask_tail_kernel(%arg0: i32, %arg1: memref<512x8xf32, #tpu.memory_space<vmem>>, %arg2: memref<1x8xf32, #tpu.memory_space<vmem>>, %arg3: memref<1x8xf32, #tpu.memory_space<vmem>>, %arg4: memref<8x8xbf16, #tpu.memory_space<vmem>>, %arg5: memref<512x8xf32, #tpu.memory_space<vmem>>, %arg6: memref<512x8xf32, #tpu.memory_space<vmem>>) attributes {dimension_semantics = [#tpu.dimension_semantics<parallel>], iteration_bounds = array<i64: 1>, scalar_prefetch = 0 : i64, scratch_operands = 0 : i64, tpu.core_type = #tpu.core_type<tc>, window_params = [{transform_indices = @transform_0, window_bounds = array<i64: 512, 8>}, {pipeline_mode = #tpu.pipeline_mode<synchronous>, transform_indices = @transform_1, window_bounds = array<i64: 1, 8>}, {pipeline_mode = #tpu.pipeline_mode<synchronous>, transform_indices = @transform_2, window_bounds = array<i64: 1, 8>}, {pipeline_mode = #tpu.pipeline_mode<synchronous>, transform_indices = @transform_3, window_bounds = array<i64: 8, 8>}, {transform_indices = @transform_4, window_bounds = array<i64: 512, 8>}, {transform_indices = @transform_5, window_bounds = array<i64: 512, 8>}]} {
    %c0 = arith.constant 0 : index
    %c0_0 = arith.constant 0 : index
    %0 = vector.load %arg1[%c0, %c0_0] : memref<512x8xf32, #tpu.memory_space<vmem>>, vector<512x8xf32>
    %c0_1 = arith.constant 0 : index
    %c0_2 = arith.constant 0 : index
    %1 = vector.load %arg2[%c0_1, %c0_2] : memref<1x8xf32, #tpu.memory_space<vmem>>, vector<1x8xf32>
    %2 = vector.broadcast %1 : vector<1x8xf32> to vector<512x8xf32>
    %3 = arith.mulf %0, %2 : vector<512x8xf32>
    %c0_3 = arith.constant 0 : index
    %c0_4 = arith.constant 0 : index
    %4 = vector.load %arg3[%c0_3, %c0_4] : memref<1x8xf32, #tpu.memory_space<vmem>>, vector<1x8xf32>
    %5 = vector.broadcast %4 : vector<1x8xf32> to vector<512x8xf32>
    %6 = arith.addf %3, %5 : vector<512x8xf32>
    %cst = arith.constant 0.000000e+00 : f32
    %7 = vector.broadcast %cst : f32 to vector<512x8xf32>
    %8 = arith.maximumf %6, %7 : vector<512x8xf32>
    %9 = arith.truncf %8 : vector<512x8xf32> to vector<512x8xbf16>
    %c0_5 = arith.constant 0 : index
    %c0_6 = arith.constant 0 : index
    %10 = vector.load %arg4[%c0_5, %c0_6] : memref<8x8xbf16, #tpu.memory_space<vmem>>, vector<8x8xbf16>
    %cst_7 = arith.constant dense<0.000000e+00> : vector<512x8xf32>
    %11 = tpu.matmul %9, %10, %cst_7 {dimension_numbers = #tpu.dot_dimension_numbers<[1], [0], [0], [1], [0, 0, 1, 1], [], []>} : vector<512x8xbf16>, vector<8x8xbf16>, vector<512x8xf32> -> vector<512x8xf32>
    %12 = arith.negf %11 : vector<512x8xf32>
    %13 = math.exp %12 : vector<512x8xf32>
    %cst_8 = arith.constant 1.000000e+00 : f32
    %14 = vector.broadcast %cst_8 : f32 to vector<512x8xf32>
    %15 = arith.addf %14, %13 : vector<512x8xf32>
    %16 = arith.divf %14, %15 : vector<512x8xf32>
    %cst_9 = arith.constant 1.000000e+00 : f32
    %17 = vector.broadcast %cst_9 : f32 to vector<512x8xf32>
    %18 = arith.addf %17, %16 : vector<512x8xf32>
    %c0_10 = arith.constant 0 : index
    %c0_11 = arith.constant 0 : index
    %19 = vector.load %arg5[%c0_10, %c0_11] : memref<512x8xf32, #tpu.memory_space<vmem>>, vector<512x8xf32>
    %20 = arith.mulf %18, %19 : vector<512x8xf32>
    %c0_12 = arith.constant 0 : index
    %c0_13 = arith.constant 0 : index
    %21 = vector.load %arg6[%c0_12, %c0_13] : memref<512x8xf32, #tpu.memory_space<vmem>>, vector<512x8xf32>
    tpu.vector_store %arg6[%c0_12, %c0_13], %20 {strides = array<i32>} : memref<512x8xf32, #tpu.memory_space<vmem>>, vector<512x8xf32>,
    return
  }
  func.func @transform_0(%arg0: i32) -> (i32, i32) {
    %c0_i32 = arith.constant 0 : i32
    %c0_i32_0 = arith.constant 0 : i32
    return %arg0, %c0_i32 : i32, i32
  }
  func.func @transform_1(%arg0: i32) -> (i32, i32) {
    %c0_i32 = arith.constant 0 : i32
    %c0_i32_0 = arith.constant 0 : i32
    %c0_i32_1 = arith.constant 0 : i32
    return %c0_i32, %c0_i32_0 : i32, i32
  }
  func.func @transform_2(%arg0: i32) -> (i32, i32) {
    %c0_i32 = arith.constant 0 : i32
    %c0_i32_0 = arith.constant 0 : i32
    %c0_i32_1 = arith.constant 0 : i32
    return %c0_i32, %c0_i32_0 : i32, i32
  }
  func.func @transform_3(%arg0: i32) -> (i32, i32) {
    %c0_i32 = arith.constant 0 : i32
    %c0_i32_0 = arith.constant 0 : i32
    %c0_i32_1 = arith.constant 0 : i32
    return %c0_i32, %c0_i32_0 : i32, i32
  }
  func.func @transform_4(%arg0: i32) -> (i32, i32) {
    %c0_i32 = arith.constant 0 : i32
    %c0_i32_0 = arith.constant 0 : i32
    return %arg0, %c0_i32 : i32, i32
  }
  func.func @transform_5(%arg0: i32) -> (i32, i32) {
    %c0_i32 = arith.constant 0 : i32
    %c0_i32_0 = arith.constant 0 : i32
    return %arg0, %c0_i32 : i32, i32
  }
}

</mosaic_0001>

<bundles_post_ra>
// kernel: tile.217
= control target key start
LH: loop header
LB: loop body
LE: loop exit
PB: predicated region body
PF: predicated region fallthrough
CT: control target
= control target key end

     0   :  { %s28_s0 = inlined_call_operand.vmem [shape: f32[8], index: 0, kind: input, shape index: {}]   ;;  %s29_s1 = inlined_call_operand.vmem [shape: f32[16,8], index: 1, kind: output, shape index: {}]  }
   0x1   :  { %v4_v0 = vld [vmem:[%s28_s0] ss:$0 sm:$0xff] }
   0x2   :  { %5 = vst [vmem:[%s29_s1] sm:$0xff] %v4_v0  ;;  %8 = vst [vmem:[%s29_s1 + $0x8] sm:$0xff] %v4_v0 }

// kernel: tile.218
= control target key start
LH: loop header
LB: loop body
LE: loop exit
PB: predicated region body
PF: predicated region fallthrough
CT: control target
= control target key end

     0   :  { %s131_s10 = smov 120   ;;  %s132_s11 = smov 104   ;;  %vm3_vm0 = vcmask 64512   ;;  %vm9_vm1 = vcmask 1048512   ;;  %vm15_vm2 = vcmask 982912   ;;  %vm21_vm3 = vcmask 917312   ;;  %s207_s0 = inlined_call_operand.vmem [shape: f32[16,8], index: 0, kind: input, shape index: {}]   ;;  %s208_s1 = inlined_call_operand.vmem [shape: f32[1,128], index: 1, kind: output, shape index: {}]  }
   0x1   :  { %v101_v0 = vld [vmem:[%s207_s0 + $0xf] sm:$0x1]   ;;  %v103_v1 = vld [vmem:[%s207_s0 + $0xd] sm:$0x1]   ;;  %v102_v2 = vld [vmem:[%s207_s0 + $0xe] sm:$0x1]  }
   0x2   :  { %7 = vrot.lane.b32.xlu0 %v101_v0, %s131_s10  ;;  %19 = vrot.lane.b32.xlu1 %v103_v1, %s132_s11  ;;  %v104_v3 = vld [vmem:[%s207_s0 + $0xc] sm:$0x1]   ;;  %s133_s16 = smov 112   ;;  %s134_s17 = smov 96   ;;  %v105_v4 = vld [vmem:[%s207_s0 + $0xb] sm:$0x1]  }
   0x3   :  { %v106_v5 = vld [vmem:[%s207_s0 + $0xa] sm:$0x1]   ;;  %v2_v6 = vld [vmem:[%s207_s0] sm:$0x1]   ;;  %s135_s24 = smov 88   ;;  %s136_s25 = smov 80  }
   0x4   :  { %4 = vst.msk [vmem:[#allocation0] sm:$0x1] %vm3_vm0, %v2_v6   ;;  %v107_v7 = vld [vmem:[%s207_s0 + $0x9] sm:$0x1]   ;;  %v108_v8 = vld [vmem:[%s207_s0 + $0x8] sm:$0x1]  }
   0x5   :  { %s137_s30 = smov 72   ;;  %s138_s2 = smov 64   ;;  %v109_v9 = vld [vmem:[%s207_s0 + $0x7] sm:$0x1]   ;;  %v110_v10 = vld [vmem:[%s207_s0 + $0x6] sm:$0x1]  }
   0x6   :  { %13 = vrot.lane.b32.xlu0 %v102_v2, %s133_s16  ;;  %25 = vrot.lane.b32.xlu1 %v104_v3, %s134_s17  ;;  %s139_s7 = smov 56   ;;  %s140_s8 = smov 48   ;;  %v111_v11 = vld [vmem:[%s207_s0 + $0x5] sm:$0x1]   ;;  %v112_v12 = vld [vmem:[%s207_s0 + $0x4] sm:$0x1]  }
   0x7   :  { %s141_s13 = smov 40   ;;  %s142_s14 = smov 32   ;;  %v113_v13 = vld [vmem:[%s207_s0 + $0x3] sm:$0x1]   ;;  %v114_v14 = vld [vmem:[%s207_s0 + $0x2] sm:$0x1]  }
   0x8   :  { %s143_s19 = smov 24   ;;  %s144_s20 = smov 16   ;;  %v115_v15 = vld [vmem:[%s207_s0 + $0x1] sm:$0x1]   ;;  %vm27_vm4 = vcmask 851712   ;;  %vm33_vm5 = vcmask 786112  }
   0x9   :  { %s145_s0 = smov 8   ;;  %vm39_vm6 = vcmask 720512   ;;  %vm45_vm7 = vcmask 654912   ;;  %vm51_vm8 = vcmask 589312   ;;  %vm57_vm9 = vcmask 523712  }
   0xa   :  { %31 = vrot.lane.b32.xlu0 %v105_v4, %s135_s24  ;;  %37 = vrot.lane.b32.xlu1 %v106_v5, %s136_s25  ;;  %vm63_vm10 = vcmask 458112   ;;  %vm69_vm11 = vcmask 392512   ;;  %vm75_vm12 = vcmask 326912   ;;  %vm81_vm13 = vcmask 261312  }
   0xb   :  { %vm87_vm14 = vcmask 195712   ;;  %vm93_vm15 = vcmask 130112  }
   0xe   :  { %43 = vrot.lane.b32.xlu0 %v107_v7, %s137_s30  ;;  %49 = vrot.lane.b32.xlu1 %v108_v8, %s138_s2 }
  0x12   :  { %55 = vrot.lane.b32.xlu0 %v109_v9, %s139_s7  ;;  %61 = vrot.lane.b32.xlu1 %v110_v10, %s140_s8 }
  0x16   :  { %67 = vrot.lane.b32.xlu0 %v111_v11, %s141_s13  ;;  %73 = vrot.lane.b32.xlu1 %v112_v12, %s142_s14 }
  0x1a   :  { %79 = vrot.lane.b32.xlu0 %v113_v13, %s143_s19  ;;  %85 = vrot.lane.b32.xlu1 %v114_v14, %s144_s20 }
  0x1e   :  { %91 = vrot.lane.b32.xlu0 %v115_v15, %s145_s0 }
  0x74   :  { %v8_v16 = vpop.permute.xlu0 %7   ;;  %v20_v17 = vpop.permute.xlu1 %19  }
  0x75   :  { %10 = vst.msk [vmem:[#allocation0] sm:$0x1] %vm9_vm1, %v8_v16  }
  0x78   :  { %v14_v18 = vpop.permute.xlu0 %13   ;;  %v26_v19 = vpop.permute.xlu1 %25  }
  0x79   :  { %16 = vst.msk [vmem:[#allocation0] sm:$0x1] %vm15_vm2, %v14_v18  }
  0x7a   :  { %22 = vst.msk [vmem:[#allocation0] sm:$0x1] %vm21_vm3, %v20_v17  }
  0x7b   :  { %28 = vst.msk [vmem:[#allocation0] sm:$0x1] %vm27_vm4, %v26_v19  }
  0x7c   :  { %v32_v20 = vpop.permute.xlu0 %31   ;;  %v38_v21 = vpop.permute.xlu1 %37  }
  0x7d   :  { %34 = vst.msk [vmem:[#allocation0] sm:$0x1] %vm33_vm5, %v32_v20  }
  0x7e   :  { %40 = vst.msk [vmem:[#allocation0] sm:$0x1] %vm39_vm6, %v38_v21  }
  0x80   :  { %v44_v22 = vpop.permute.xlu0 %43   ;;  %v50_v23 = vpop.permute.xlu1 %49  }
  0x81   :  { %46 = vst.msk [vmem:[#allocation0] sm:$0x1] %vm45_vm7, %v44_v22  }
  0x82   :  { %52 = vst.msk [vmem:[#allocation0] sm:$0x1] %vm51_vm8, %v50_v23  }
  0x84   :  { %v56_v24 = vpop.permute.xlu0 %55   ;;  %v62_v25 = vpop.permute.xlu1 %61  }
  0x85   :  { %58 = vst.msk [vmem:[#allocation0] sm:$0x1] %vm57_vm9, %v56_v24  }
  0x86   :  { %64 = vst.msk [vmem:[#allocation0] sm:$0x1] %vm63_vm10, %v62_v25  }
  0x88   :  { %v68_v26 = vpop.permute.xlu0 %67   ;;  %v74_v27 = vpop.permute.xlu1 %73  }
  0x89   :  { %70 = vst.msk [vmem:[#allocation0] sm:$0x1] %vm69_vm11, %v68_v26  }
  0x8a   :  { %76 = vst.msk [vmem:[#allocation0] sm:$0x1] %vm75_vm12, %v74_v27  }
  0x8c   :  { %v80_v28 = vpop.permute.xlu0 %79   ;;  %v86_v29 = vpop.permute.xlu1 %85  }
  0x8d   :  { %82 = vst.msk [vmem:[#allocation0] sm:$0x1] %vm81_vm13, %v80_v28  }
  0x8e   :  { %88 = vst.msk [vmem:[#allocation0] sm:$0x1] %vm87_vm14, %v86_v29  }
  0x90   :  { %v92_v30 = vpop.permute.xlu0 %91  }
  0x91   :  { %94 = vst.msk [vmem:[#allocation0] sm:$0x1] %vm93_vm15, %v92_v30  }
  0x98   :  { %v98_v31 = vld [vmem:[#allocation0] sm:$0x1] }
  0x99   :  { %100 = vst [vmem:[%s208_s1] sm:$0x1] %v98_v31 }

// kernel: attention_conv_block_l3.47
= control target key start
LH: loop header
LB: loop body
LE: loop exit
PB: predicated region body
PF: predicated region fallthrough
CT: control target
= control target key end

     0   :  { %s104_s0 = inlined_call_operand.vmem [shape: f32[32,128], index: 0, kind: input, shape index: {}]   ;;  %s105_s1 = inlined_call_operand.vmem [shape: f32[1,128], index: 1, kind: input, shape index: {}]   ;;  %s106_s2 = inlined_call_operand.vmem [shape: f32[1,128], index: 2, kind: input, shape index: {}]   ;;  %s107_s3 = inlined_call_operand.vmem [shape: f32[32,128], index: 3, kind: output, shape index: {}]  }
   0x1   :  { %v14_v0 = vld [vmem:[%s104_s0] sm:$0xff]  ;;  %v15_v4 = vld [vmem:[%s104_s0 + $0x8] sm:$0xff]  ;;  %v16_v5 = vld [vmem:[%s104_s0 + $0x10] sm:$0xff] }
   0x2   :  { %v52_v1 = vld [vmem:[%s105_s1] ss:$0 sm:$0xff]  ;;  %v17_v6 = vld [vmem:[%s104_s0 + $0x18] sm:$0xff] }
   0x3   :  { %v53_v2 = vld [vmem:[%s106_s2] ss:$0 sm:$0xff]  ;;  %v25_v3 = vmul.f32 %v52_v1, %v14_v0  ;;  %v26_v7 = vmul.f32 %v52_v1, %v15_v4  ;;  %v27_v8 = vmul.f32 %v52_v1, %v16_v5  ;;  %v28_v9 = vmul.f32 %v52_v1, %v17_v6 }
   0x5   :  { %v36_v10 = vadd.f32 %v53_v2, %v25_v3  ;;  %v37_v11 = vadd.f32 %v53_v2, %v26_v7  ;;  %v38_v12 = vadd.f32 %v53_v2, %v27_v8  ;;  %v39_v13 = vadd.f32 %v53_v2, %v28_v9 }
   0x7   :  { %v40_v14 = vmax.f32 %v36_v10, 0.0  ;;  %v41_v15 = vmax.f32 %v37_v11, 0.0  ;;  %v42_v16 = vmax.f32 %v38_v12, 0.0  ;;  %v43_v17 = vmax.f32 %v39_v13, 0.0 }
   0x9   :  { %44 = vst [vmem:[%s107_s3] sm:$0xff] %v40_v14  ;;  %45 = vst [vmem:[%s107_s3 + $0x8] sm:$0xff] %v41_v15 }
   0xa   :  { %46 = vst [vmem:[%s107_s3 + $0x10] sm:$0xff] %v42_v16  ;;  %47 = vst [vmem:[%s107_s3 + $0x18] sm:$0xff] %v43_v17 }

// kernel: attention_conv_block_l3.46
= control target key start
LH: loop header
LB: loop body
LE: loop exit
PB: predicated region body
PF: predicated region fallthrough
CT: control target
= control target key end

     0   :  { %vm259_vm0 = vcmask 293888   ;;  %vm356_vm1 = vcmask 1041408   ;;  %vm718_vm2 = vcmask 57344   ;;  %vm649_vm3 = vcmask 64512   ;;  %s2047_s1 = inlined_call_operand.vmem [shape: bf16[36,8], index: 1, kind: input, shape index: {}]   ;;  %s2048_s0 = inlined_call_operand.vmem [shape: bf16[512,36], index: 0, kind: input, shape index: {}]   ;;  %s2049_s3 = inlined_call_operand.vmem [shape: f32[1,8], index: 3, kind: output, shape index: {1}]   ;;  %s2050_s4 = inlined_call_operand.vmem [shape: f32[1,8], index: 4, kind: output, shape index: {2}]   ;;  %s2051_s2 = inlined_call_operand.vmem [shape: f32[512,8], index: 2, kind: output, shape index: {0}]  }
   0x1   :  { %v1251_v0 = vld [vmem:[%s2047_s1] sm:$0xff]   ;;  %v1252_v1 = vld [vmem:[%s2047_s1 + $0x8] sm:$0xff]   ;;  %v1253_v2 = vld [vmem:[%s2047_s1 + $0x10] ss:$0 sps:$4 sm:$0x33]   ;;  %v1286_v36 = vmov 0.0  }
   0x2   :  { %1172 = vmatprep.subr.bf16.mxu0 %v1251_v0  ;;  %v1254_v3 = vld [vmem:[%s2048_s0] sm:$0xff]   ;;  %1242 = vmatprep.subr.bf16.mxu1 %v1251_v0  ;;  %v358_v4 = vsel %vm356_vm1, %v1253_v2, 0  ;;  %v1255_v5 = vld [vmem:[%s2048_s0 + $0x8] sm:$0xff]   ;;  %v1256_v6 = vld [vmem:[%s2048_s0 + $0x10] sm:$0xff]   ;;  %719 = vst.msk [vmem:[%s2049_s3] sm:$0x1] %vm718_vm2, %v1286_v36 }
   0x3   :  { %1173 = vmatpush3.bf16.msra.mxu0 %v1251_v0  ;;  %1245 = vmatpush3.bf16.msra.mxu1 %v1251_v0  ;;  %v1257_v7 = vld [vmem:[%s2048_s0 + $0x18] sm:$0xff]   ;;  %v1258_v8 = vld [vmem:[%s2048_s0 + $0x20] sm:$0xff]   ;;  %v1271_v10 = vld [vmem:[%s2048_s0 + $0x88] sm:$0xff]   ;;  %720 = vst.msk [vmem:[%s2050_s4] sm:$0x1] %vm718_vm2, %v1286_v36 }
   0x4   :  { %1174 = vmatprep.subr.bf16.mxu0 %v1252_v1  ;;  %1178 = vmatprep.mubr.msk.bf16.mxu0 %vm259_vm0, %v1254_v3  ;;  %v1270_v9 = vld [vmem:[%s2048_s0 + $0x80] sm:$0xff]   ;;  %v1272_v11 = vld [vmem:[%s2048_s0 + $0x90] sm:$0xff]   ;;  %v1259_v12 = vld [vmem:[%s2048_s0 + $0x28] sm:$0xff]  }
   0x5   :  { %1243 = vmatprep.subr.bf16.mxu1 %v1252_v1  ;;  %1210 = vmatprep.mubr.msk.bf16.mxu1 %vm259_vm0, %v1270_v9  ;;  %v1260_v13 = vld [vmem:[%s2048_s0 + $0x30] sm:$0xff]   ;;  %v1273_v14 = vld [vmem:[%s2048_s0 + $0x98] sm:$0xff]   ;;  %v1274_v15 = vld [vmem:[%s2048_s0 + $0xa0] sm:$0xff]  }
   0x6   :  { %v1261_v16 = vld [vmem:[%s2048_s0 + $0x38] sm:$0xff]   ;;  %v1275_v17 = vld [vmem:[%s2048_s0 + $0xa8] sm:$0xff]   ;;  %v1262_v18 = vld [vmem:[%s2048_s0 + $0x40] sm:$0xff]  }
   0x7   :  { %1175 = vmatpush3.bf16.msra.mxu0 %v1252_v1  ;;  %1246 = vmatpush3.bf16.msra.mxu1 %v1252_v1  ;;  %v1276_v19 = vld [vmem:[%s2048_s0 + $0xb0] sm:$0xff]   ;;  %v1263_v20 = vld [vmem:[%s2048_s0 + $0x48] sm:$0xff]   ;;  %v1277_v21 = vld [vmem:[%s2048_s0 + $0xb8] sm:$0xff]  }
   0x8   :  { %1248 = vmatprep.subr.msk.bf16.mxu0 %vm356_vm1, %v1253_v2  ;;  %1249 = vmatprep.subr.msk.bf16.mxu1 %vm356_vm1, %v1253_v2  ;;  %v1264_v22 = vld [vmem:[%s2048_s0 + $0x50] sm:$0xff]   ;;  %v1278_v23 = vld [vmem:[%s2048_s0 + $0xc0] sm:$0xff]   ;;  %v1265_v24 = vld [vmem:[%s2048_s0 + $0x58] sm:$0xff]  }
   0x9   :  { %v1279_v25 = vld [vmem:[%s2048_s0 + $0xc8] sm:$0xff]   ;;  %v1266_v26 = vld [vmem:[%s2048_s0 + $0x60] sm:$0xff]   ;;  %v1280_v27 = vld [vmem:[%s2048_s0 + $0xd0] sm:$0xff]  }
   0xa   :  { %v1267_v28 = vld [vmem:[%s2048_s0 + $0x68] sm:$0xff]   ;;  %v1281_v29 = vld [vmem:[%s2048_s0 + $0xd8] sm:$0xff]   ;;  %v1268_v30 = vld [vmem:[%s2048_s0 + $0x70] sm:$0xff]  }
   0xb   :  { %1177 = vmatpush3.bf16.msra.mxu0 %v358_v4  ;;  %1247 = vmatpush3.bf16.msra.mxu1 %v358_v4  ;;  %v1282_v31 = vld [vmem:[%s2048_s0 + $0xe0] sm:$0xff]   ;;  %v1269_v32 = vld [vmem:[%s2048_s0 + $0x78] sm:$0xff]   ;;  %v1283_v33 = vld [vmem:[%s2048_s0 + $0xe8] sm:$0xff]  }
   0xc   :  { %v1284_v34 = vld [vmem:[%s2048_s0 + $0xf0] sm:$0xff]   ;;  %v1285_v35 = vld [vmem:[%s2048_s0 + $0xf8] sm:$0xff]  }
   0xe   :  { %1179 = vmatmul.mubr.msk.bf16.vlgmr.msra.gmra.mrb[0].mxu0 %vm259_vm0, %v1255_v5  ;;  %1211 = vmatmul.mubr.msk.bf16.vlgmr.msra.gmra.mrb[0].mxu1 %vm259_vm0, %v1271_v10 }
   0xf   :  { %1182 = vmatprep.mubr.msk.bf16.mxu0 %vm259_vm0, %v1256_v6  ;;  %1214 = vmatprep.mubr.msk.bf16.mxu1 %vm259_vm0, %v1272_v11 }
  0x16   :  { %1183 = vmatmul.mubr.msk.bf16.gmra.mrb[4].mxu0 %vm259_vm0, %v1257_v7  ;;  %1215 = vmatmul.mubr.msk.bf16.gmra.mrb[4].mxu1 %vm259_vm0, %v1273_v14 }
  0x17   :  { %1186 = vmatprep.mubr.msk.bf16.mxu0 %vm259_vm0, %v1258_v8  ;;  %1218 = vmatprep.mubr.msk.bf16.mxu1 %vm259_vm0, %v1274_v15 }
  0x1e   :  { %1187 = vmatmul.mubr.msk.bf16.gmra.mrb[8].mxu0 %vm259_vm0, %v1259_v12  ;;  %1219 = vmatmul.mubr.msk.bf16.gmra.mrb[8].mxu1 %vm259_vm0, %v1275_v17 }
  0x1f   :  { %1190 = vmatprep.mubr.msk.bf16.mxu0 %vm259_vm0, %v1260_v13  ;;  %1222 = vmatprep.mubr.msk.bf16.mxu1 %vm259_vm0, %v1276_v19 }
  0x26   :  { %1191 = vmatmul.mubr.msk.bf16.gmra.mrb[12].mxu0 %vm259_vm0, %v1261_v16  ;;  %1223 = vmatmul.mubr.msk.bf16.gmra.mrb[12].mxu1 %vm259_vm0, %v1277_v21 }
  0x27   :  { %1194 = vmatprep.mubr.msk.bf16.mxu0 %vm259_vm0, %v1262_v18  ;;  %1226 = vmatprep.mubr.msk.bf16.mxu1 %vm259_vm0, %v1278_v23 }
  0x2e   :  { %1195 = vmatmul.mubr.msk.bf16.gmra.mrb[16].mxu0 %vm259_vm0, %v1263_v20  ;;  %1227 = vmatmul.mubr.msk.bf16.gmra.mrb[16].mxu1 %vm259_vm0, %v1279_v25 }
  0x2f   :  { %1198 = vmatprep.mubr.msk.bf16.mxu0 %vm259_vm0, %v1264_v22  ;;  %1230 = vmatprep.mubr.msk.bf16.mxu1 %vm259_vm0, %v1280_v27 }
  0x36   :  { %1199 = vmatmul.mubr.msk.bf16.gmra.mrb[20].mxu0 %vm259_vm0, %v1265_v24  ;;  %1231 = vmatmul.mubr.msk.bf16.gmra.mrb[20].mxu1 %vm259_vm0, %v1281_v29 }
  0x37   :  { %1202 = vmatprep.mubr.msk.bf16.mxu0 %vm259_vm0, %v1266_v26  ;;  %1234 = vmatprep.mubr.msk.bf16.mxu1 %vm259_vm0, %v1282_v31 }
  0x3e   :  { %1203 = vmatmul.mubr.msk.bf16.gmra.mrb[24].mxu0 %vm259_vm0, %v1267_v28  ;;  %1235 = vmatmul.mubr.msk.bf16.gmra.mrb[24].mxu1 %vm259_vm0, %v1283_v33 }
  0x3f   :  { %1206 = vmatprep.mubr.msk.bf16.mxu0 %vm259_vm0, %v1268_v30  ;;  %1238 = vmatprep.mubr.msk.bf16.mxu1 %vm259_vm0, %v1284_v34 }
  0x46   :  { %1207 = vmatmul.mubr.msk.bf16.gmra.mrb[28].mxu0 %vm259_vm0, %v1269_v32  ;;  %1239 = vmatmul.mubr.msk.bf16.gmra.mrb[28].mxu1 %vm259_vm0, %v1285_v35 }
  0xe1   :  { %v1180_v37 = vpop.f32.mrb[0].mxu0  ;;  %v1480_v56 = vpop.f32.mrb[0].mxu1 }
  0xe2   :  { %652 = vst.msk [vmem:[%s2051_s2 + $0x10] sm:$0xff] %vm649_vm3, %v1180_v37  ;;  %v394_v38 = vpop.f32.mrb[1].mxu0  ;;  %v861_v42 = vmul.f32 %v1180_v37, %v1180_v37  ;;  %v725_v47 = vsel %vm649_vm3, %v1180_v37, 0.0  ;;  %684 = vst.msk [vmem:[%s2051_s2 + $0x110] sm:$0xff] %vm649_vm3, %v1480_v56  ;;  %v1491_v60 = vpop.f32.mrb[1].mxu1 }
  0xe3   :  { %650 = vst.msk [vmem:[%s2051_s2] sm:$0xff] %vm649_vm3, %v394_v38  ;;  %v859_v39 = vmul.f32 %v394_v38, %v394_v38  ;;  %v1181_v40 = vpop.f32.mrb[2].mxu0  ;;  %v722_v43 = vsel %vm649_vm3, %v394_v38, 0.0  ;;  %682 = vst.msk [vmem:[%s2051_s2 + $0x100] sm:$0xff] %vm649_vm3, %v1491_v60  ;;  %v1504_v1 = vpop.f32.mrb[2].mxu1 }
  0xe4   :  { %653 = vst.msk [vmem:[%s2051_s2 + $0x18] sm:$0xff] %vm649_vm3, %v1181_v40  ;;  %v397_v41 = vpop.f32.mrb[3].mxu0  ;;  %v862_v49 = vmul.f32 %v1181_v40, %v1181_v40  ;;  %v926_v53 = vsel %vm649_vm3, %v861_v42, 0.0  ;;  %v727_v54 = vsel %vm649_vm3, %v1181_v40, 0.0  ;;  %685 = vst.msk [vmem:[%s2051_s2 + $0x118] sm:$0xff] %vm649_vm3, %v1504_v1  ;;  %v1515_v5 = vpop.f32.mrb[3].mxu1 }
  0xe5   :  { %651 = vst.msk [vmem:[%s2051_s2 + $0x8] sm:$0xff] %vm649_vm3, %v397_v41  ;;  %v723_v44 = vsel %vm649_vm3, %v397_v41, 0.0  ;;  %v860_v45 = vmul.f32 %v397_v41, %v397_v41  ;;  %v923_v48 = vsel %vm649_vm3, %v859_v39, 0.0  ;;  %683 = vst.msk [vmem:[%s2051_s2 + $0x108] sm:$0xff] %vm649_vm3, %v1515_v5 }
  0xe6   :  { %v724_v46 = vadd.f32 %v723_v44, %v722_v43  ;;  %v928_v61 = vsel %vm649_vm3, %v862_v49, 0.0 }
  0xe7   :  { %v924_v50 = vsel %vm649_vm3, %v860_v45, 0.0 }
  0xe8   :  { %v726_v51 = vadd.f32 %v725_v47, %v724_v46  ;;  %v925_v52 = vadd.f32 %v924_v50, %v923_v48 }
  0xe9   :  { %v1184_v55 = vpop.f32.mrb[4].mxu0  ;;  %v1532_v20 = vpop.f32.mrb[4].mxu1 }
  0xea   :  { %v927_v57 = vadd.f32 %v926_v53, %v925_v52  ;;  %656 = vst.msk [vmem:[%s2051_s2 + $0x30] sm:$0xff] %vm649_vm3, %v1184_v55  ;;  %v410_v58 = vpop.f32.mrb[5].mxu0  ;;  %v728_v59 = vadd.f32 %v727_v54, %v726_v51  ;;  %v865_v6 = vmul.f32 %v1184_v55, %v1184_v55  ;;  %v733_v12 = vsel %vm649_vm3, %v1184_v55, 0.0  ;;  %688 = vst.msk [vmem:[%s2051_s2 + $0x130] sm:$0xff] %vm649_vm3, %v1532_v20  ;;  %v1543_v24 = vpop.f32.mrb[5].mxu1 }
  0xeb   :  { %654 = vst.msk [vmem:[%s2051_s2 + $0x20] sm:$0xff] %vm649_vm3, %v410_v58  ;;  %v729_v62 = vsel %vm649_vm3, %v410_v58, 0.0  ;;  %v863_v63 = vmul.f32 %v410_v58, %v410_v58  ;;  %v1185_v0 = vpop.f32.mrb[6].mxu0  ;;  %686 = vst.msk [vmem:[%s2051_s2 + $0x120] sm:$0xff] %vm649_vm3, %v1543_v24  ;;  %v1556_v29 = vpop.f32.mrb[6].mxu1 }
  0xec   :  { %v730_v2 = vadd.f32 %v729_v62, %v728_v59  ;;  %v929_v3 = vadd.f32 %v928_v61, %v927_v57  ;;  %657 = vst.msk [vmem:[%s2051_s2 + $0x38] sm:$0xff] %vm649_vm3, %v1185_v0  ;;  %v413_v4 = vpop.f32.mrb[7].mxu0  ;;  %v866_v13 = vmul.f32 %v1185_v0, %v1185_v0  ;;  %v934_v17 = vsel %vm649_vm3, %v865_v6, 0.0  ;;  %689 = vst.msk [vmem:[%s2051_s2 + $0x138] sm:$0xff] %vm649_vm3, %v1556_v29  ;;  %v1567_v33 = vpop.f32.mrb[7].mxu1 }
  0xed   :  { %v930_v7 = vsel %vm649_vm3, %v863_v63, 0.0  ;;  %655 = vst.msk [vmem:[%s2051_s2 + $0x28] sm:$0xff] %vm649_vm3, %v413_v4  ;;  %v731_v8 = vsel %vm649_vm3, %v413_v4, 0.0  ;;  %v864_v9 = vmul.f32 %v413_v4, %v413_v4  ;;  %v735_v18 = vsel %vm649_vm3, %v1185_v0, 0.0  ;;  %687 = vst.msk [vmem:[%s2051_s2 + $0x128] sm:$0xff] %vm649_vm3, %v1567_v33 }
  0xee   :  { %v931_v10 = vadd.f32 %v930_v7, %v929_v3  ;;  %v732_v11 = vadd.f32 %v731_v8, %v730_v2  ;;  %v936_v25 = vsel %vm649_vm3, %v866_v13, 0.0 }
  0xef   :  { %v932_v14 = vsel %vm649_vm3, %v864_v9, 0.0 }
  0xf0   :  { %v734_v15 = vadd.f32 %v733_v12, %v732_v11  ;;  %v933_v16 = vadd.f32 %v932_v14, %v931_v10 }
  0xf1   :  { %v1188_v19 = vpop.f32.mrb[8].mxu0  ;;  %v1584_v48 = vpop.f32.mrb[8].mxu1 }
  0xf2   :  { %v935_v21 = vadd.f32 %v934_v17, %v933_v16  ;;  %660 = vst.msk [vmem:[%s2051_s2 + $0x50] sm:$0xff] %vm649_vm3, %v1188_v19  ;;  %v426_v22 = vpop.f32.mrb[9].mxu0  ;;  %v736_v23 = vadd.f32 %v735_v18, %v734_v15  ;;  %v869_v34 = vmul.f32 %v1188_v19, %v1188_v19  ;;  %v741_v40 = vsel %vm649_vm3, %v1188_v19, 0.0  ;;  %692 = vst.msk [vmem:[%s2051_s2 + $0x150] sm:$0xff] %vm649_vm3, %v1584_v48  ;;  %v1595_v52 = vpop.f32.mrb[9].mxu1 }
  0xf3   :  { %658 = vst.msk [vmem:[%s2051_s2 + $0x40] sm:$0xff] %vm649_vm3, %v426_v22  ;;  %v737_v26 = vsel %vm649_vm3, %v426_v22, 0.0  ;;  %v867_v27 = vmul.f32 %v426_v22, %v426_v22  ;;  %v1189_v28 = vpop.f32.mrb[10].mxu0  ;;  %690 = vst.msk [vmem:[%s2051_s2 + $0x140] sm:$0xff] %vm649_vm3, %v1595_v52  ;;  %v1608_v58 = vpop.f32.mrb[10].mxu1 }
  0xf4   :  { %v738_v30 = vadd.f32 %v737_v26, %v736_v23  ;;  %v937_v31 = vadd.f32 %v936_v25, %v935_v21  ;;  %661 = vst.msk [vmem:[%s2051_s2 + $0x58] sm:$0xff] %vm649_vm3, %v1189_v28  ;;  %v429_v32 = vpop.f32.mrb[11].mxu0  ;;  %v870_v41 = vmul.f32 %v1189_v28, %v1189_v28  ;;  %v942_v45 = vsel %vm649_vm3, %v869_v34, 0.0  ;;  %693 = vst.msk [vmem:[%s2051_s2 + $0x158] sm:$0xff] %vm649_vm3, %v1608_v58  ;;  %v1619_v63 = vpop.f32.mrb[11].mxu1 }
  0xf5   :  { %v938_v35 = vsel %vm649_vm3, %v867_v27, 0.0  ;;  %659 = vst.msk [vmem:[%s2051_s2 + $0x48] sm:$0xff] %vm649_vm3, %v429_v32  ;;  %v739_v36 = vsel %vm649_vm3, %v429_v32, 0.0  ;;  %v868_v37 = vmul.f32 %v429_v32, %v429_v32  ;;  %v743_v46 = vsel %vm649_vm3, %v1189_v28, 0.0  ;;  %691 = vst.msk [vmem:[%s2051_s2 + $0x148] sm:$0xff] %vm649_vm3, %v1619_v63 }
  0xf6   :  { %v939_v38 = vadd.f32 %v938_v35, %v937_v31  ;;  %v740_v39 = vadd.f32 %v739_v36, %v738_v30  ;;  %v944_v53 = vsel %vm649_vm3, %v870_v41, 0.0 }
  0xf7   :  { %v940_v42 = vsel %vm649_vm3, %v868_v37, 0.0 }
  0xf8   :  { %v742_v43 = vadd.f32 %v741_v40, %v740_v39  ;;  %v941_v44 = vadd.f32 %v940_v42, %v939_v38 }
  0xf9   :  { %v1192_v47 = vpop.f32.mrb[12].mxu0  ;;  %v1636_v16 = vpop.f32.mrb[12].mxu1 }
  0xfa   :  { %v943_v49 = vadd.f32 %v942_v45, %v941_v44  ;;  %664 = vst.msk [vmem:[%s2051_s2 + $0x70] sm:$0xff] %vm649_vm3, %v1192_v47  ;;  %v442_v50 = vpop.f32.mrb[13].mxu0  ;;  %v744_v51 = vadd.f32 %v743_v46, %v742_v43  ;;  %v873_v0 = vmul.f32 %v1192_v47, %v1192_v47  ;;  %v749_v8 = vsel %vm649_vm3, %v1192_v47, 0.0  ;;  %696 = vst.msk [vmem:[%s2051_s2 + $0x170] sm:$0xff] %vm649_vm3, %v1636_v16  ;;  %v1647_v21 = vpop.f32.mrb[13].mxu1 }
  0xfb   :  { %662 = vst.msk [vmem:[%s2051_s2 + $0x60] sm:$0xff] %vm649_vm3, %v442_v50  ;;  %v745_v54 = vsel %vm649_vm3, %v442_v50, 0.0  ;;  %v871_v55 = vmul.f32 %v442_v50, %v442_v50  ;;  %v1193_v57 = vpop.f32.mrb[14].mxu0  ;;  %694 = vst.msk [vmem:[%s2051_s2 + $0x160] sm:$0xff] %vm649_vm3, %v1647_v21  ;;  %v1660_v27 = vpop.f32.mrb[14].mxu1 }
  0xfc   :  { %v746_v59 = vadd.f32 %v745_v54, %v744_v51  ;;  %v945_v61 = vadd.f32 %v944_v53, %v943_v49  ;;  %665 = vst.msk [vmem:[%s2051_s2 + $0x78] sm:$0xff] %vm649_vm3, %v1193_v57  ;;  %v445_v62 = vpop.f32.mrb[15].mxu0  ;;  %v874_v9 = vmul.f32 %v1193_v57, %v1193_v57  ;;  %v950_v13 = vsel %vm649_vm3, %v873_v0, 0.0  ;;  %697 = vst.msk [vmem:[%s2051_s2 + $0x178] sm:$0xff] %vm649_vm3, %v1660_v27  ;;  %v1671_v32 = vpop.f32.mrb[15].mxu1 }
  0xfd   :  { %v946_v2 = vsel %vm649_vm3, %v871_v55, 0.0  ;;  %663 = vst.msk [vmem:[%s2051_s2 + $0x68] sm:$0xff] %vm649_vm3, %v445_v62  ;;  %v747_v3 = vsel %vm649_vm3, %v445_v62, 0.0  ;;  %v872_v4 = vmul.f32 %v445_v62, %v445_v62  ;;  %v751_v14 = vsel %vm649_vm3, %v1193_v57, 0.0  ;;  %695 = vst.msk [vmem:[%s2051_s2 + $0x168] sm:$0xff] %vm649_vm3, %v1671_v32 }
  0xfe   :  { %v947_v6 = vadd.f32 %v946_v2, %v945_v61  ;;  %v748_v7 = vadd.f32 %v747_v3, %v746_v59  ;;  %v952_v22 = vsel %vm649_vm3, %v874_v9, 0.0 }
  0xff   :  { %v948_v10 = vsel %vm649_vm3, %v872_v4, 0.0 }
 0x100   :  { %v750_v11 = vadd.f32 %v749_v8, %v748_v7  ;;  %v949_v12 = vadd.f32 %v948_v10, %v947_v6 }
 0x101   :  { %v1196_v15 = vpop.f32.mrb[16].mxu0  ;;  %v1688_v49 = vpop.f32.mrb[16].mxu1 }
 0x102   :  { %v951_v17 = vadd.f32 %v950_v13, %v949_v12  ;;  %668 = vst.msk [vmem:[%s2051_s2 + $0x90] sm:$0xff] %vm649_vm3, %v1196_v15  ;;  %v458_v18 = vpop.f32.mrb[17].mxu0  ;;  %v752_v19 = vadd.f32 %v751_v14, %v750_v11  ;;  %v877_v34 = vmul.f32 %v1196_v15, %v1196_v15  ;;  %v757_v40 = vsel %vm649_vm3, %v1196_v15, 0.0  ;;  %700 = vst.msk [vmem:[%s2051_s2 + $0x190] sm:$0xff] %vm649_vm3, %v1688_v49  ;;  %v1699_v54 = vpop.f32.mrb[17].mxu1 }
 0x103   :  { %666 = vst.msk [vmem:[%s2051_s2 + $0x80] sm:$0xff] %vm649_vm3, %v458_v18  ;;  %v753_v23 = vsel %vm649_vm3, %v458_v18, 0.0  ;;  %v875_v25 = vmul.f32 %v458_v18, %v458_v18  ;;  %v1197_v26 = vpop.f32.mrb[18].mxu0  ;;  %698 = vst.msk [vmem:[%s2051_s2 + $0x180] sm:$0xff] %vm649_vm3, %v1699_v54  ;;  %v1712_v62 = vpop.f32.mrb[18].mxu1 }
 0x104   :  { %v754_v28 = vadd.f32 %v753_v23, %v752_v19  ;;  %v953_v30 = vadd.f32 %v952_v22, %v951_v17  ;;  %669 = vst.msk [vmem:[%s2051_s2 + $0x98] sm:$0xff] %vm649_vm3, %v1197_v26  ;;  %v461_v31 = vpop.f32.mrb[19].mxu0  ;;  %v878_v41 = vmul.f32 %v1197_v26, %v1197_v26  ;;  %v958_v45 = vsel %vm649_vm3, %v877_v34, 0.0  ;;  %701 = vst.msk [vmem:[%s2051_s2 + $0x198] sm:$0xff] %vm649_vm3, %v1712_v62  ;;  %v1723_v4 = vpop.f32.mrb[19].mxu1 }
 0x105   :  { %v954_v35 = vsel %vm649_vm3, %v875_v25, 0.0  ;;  %667 = vst.msk [vmem:[%s2051_s2 + $0x88] sm:$0xff] %vm649_vm3, %v461_v31  ;;  %v755_v36 = vsel %vm649_vm3, %v461_v31, 0.0  ;;  %v876_v37 = vmul.f32 %v461_v31, %v461_v31  ;;  %v759_v46 = vsel %vm649_vm3, %v1197_v26, 0.0  ;;  %699 = vst.msk [vmem:[%s2051_s2 + $0x188] sm:$0xff] %vm649_vm3, %v1723_v4 }
 0x106   :  { %v955_v38 = vadd.f32 %v954_v35, %v953_v30  ;;  %v756_v39 = vadd.f32 %v755_v36, %v754_v28  ;;  %v960_v55 = vsel %vm649_vm3, %v878_v41, 0.0 }
 0x107   :  { %v956_v42 = vsel %vm649_vm3, %v876_v37, 0.0 }
 0x108   :  { %v758_v43 = vadd.f32 %v757_v40, %v756_v39  ;;  %v957_v44 = vadd.f32 %v956_v42, %v955_v38 }
 0x109   :  { %v1200_v47 = vpop.f32.mrb[20].mxu0  ;;  %v1740_v23 = vpop.f32.mrb[20].mxu1 }
 0x10a   :  { %v959_v50 = vadd.f32 %v958_v45, %v957_v44  ;;  %672 = vst.msk [vmem:[%s2051_s2 + $0xb0] sm:$0xff] %vm649_vm3, %v1200_v47  ;;  %v474_v51 = vpop.f32.mrb[21].mxu0  ;;  %v760_v53 = vadd.f32 %v759_v46, %v758_v43  ;;  %v881_v6 = vmul.f32 %v1200_v47, %v1200_v47  ;;  %v765_v12 = vsel %vm649_vm3, %v1200_v47, 0.0  ;;  %704 = vst.msk [vmem:[%s2051_s2 + $0x1b0] sm:$0xff] %vm649_vm3, %v1740_v23  ;;  %v1751_v30 = vpop.f32.mrb[21].mxu1 }
 0x10b   :  { %670 = vst.msk [vmem:[%s2051_s2 + $0xa0] sm:$0xff] %vm649_vm3, %v474_v51  ;;  %v761_v57 = vsel %vm649_vm3, %v474_v51, 0.0  ;;  %v879_v59 = vmul.f32 %v474_v51, %v474_v51  ;;  %v1201_v61 = vpop.f32.mrb[22].mxu0  ;;  %702 = vst.msk [vmem:[%s2051_s2 + $0x1a0] sm:$0xff] %vm649_vm3, %v1751_v30  ;;  %v1764_v37 = vpop.f32.mrb[22].mxu1 }
 0x10c   :  { %v762_v0 = vadd.f32 %v761_v57, %v760_v53  ;;  %v961_v2 = vadd.f32 %v960_v55, %v959_v50  ;;  %673 = vst.msk [vmem:[%s2051_s2 + $0xb8] sm:$0xff] %vm649_vm3, %v1201_v61  ;;  %v477_v3 = vpop.f32.mrb[23].mxu0  ;;  %v882_v13 = vmul.f32 %v1201_v61, %v1201_v61  ;;  %v966_v18 = vsel %vm649_vm3, %v881_v6, 0.0  ;;  %705 = vst.msk [vmem:[%s2051_s2 + $0x1b8] sm:$0xff] %vm649_vm3, %v1764_v37  ;;  %v1775_v41 = vpop.f32.mrb[23].mxu1 }
 0x10d   :  { %v962_v7 = vsel %vm649_vm3, %v879_v59, 0.0  ;;  %671 = vst.msk [vmem:[%s2051_s2 + $0xa8] sm:$0xff] %vm649_vm3, %v477_v3  ;;  %v763_v8 = vsel %vm649_vm3, %v477_v3, 0.0  ;;  %v880_v9 = vmul.f32 %v477_v3, %v477_v3  ;;  %v767_v19 = vsel %vm649_vm3, %v1201_v61, 0.0  ;;  %703 = vst.msk [vmem:[%s2051_s2 + $0x1a8] sm:$0xff] %vm649_vm3, %v1775_v41 }
 0x10e   :  { %v963_v10 = vadd.f32 %v962_v7, %v961_v2  ;;  %v764_v11 = vadd.f32 %v763_v8, %v762_v0  ;;  %v968_v31 = vsel %vm649_vm3, %v882_v13, 0.0 }
 0x10f   :  { %v964_v14 = vsel %vm649_vm3, %v880_v9, 0.0 }
 0x110   :  { %v766_v15 = vadd.f32 %v765_v12, %v764_v11  ;;  %v965_v17 = vadd.f32 %v964_v14, %v963_v10 }
 0x111   :  { %v1204_v22 = vpop.f32.mrb[24].mxu0  ;;  %v1792_v2 = vpop.f32.mrb[24].mxu1 }
 0x112   :  { %v967_v25 = vadd.f32 %v966_v18, %v965_v17  ;;  %676 = vst.msk [vmem:[%s2051_s2 + $0xd0] sm:$0xff] %vm649_vm3, %v1204_v22  ;;  %v490_v26 = vpop.f32.mrb[25].mxu0  ;;  %v768_v28 = vadd.f32 %v767_v19, %v766_v15  ;;  %v885_v42 = vmul.f32 %v1204_v22, %v1204_v22  ;;  %v773_v50 = vsel %vm649_vm3, %v1204_v22, 0.0  ;;  %708 = vst.msk [vmem:[%s2051_s2 + $0x1d0] sm:$0xff] %vm649_vm3, %v1792_v2  ;;  %v1803_v8 = vpop.f32.mrb[25].mxu1 }
 0x113   :  { %674 = vst.msk [vmem:[%s2051_s2 + $0xc0] sm:$0xff] %vm649_vm3, %v490_v26  ;;  %v769_v34 = vsel %vm649_vm3, %v490_v26, 0.0  ;;  %v883_v35 = vmul.f32 %v490_v26, %v490_v26  ;;  %v1205_v36 = vpop.f32.mrb[26].mxu0  ;;  %706 = vst.msk [vmem:[%s2051_s2 + $0x1c0] sm:$0xff] %vm649_vm3, %v1803_v8  ;;  %v1816_v13 = vpop.f32.mrb[26].mxu1 }
 0x114   :  { %v770_v38 = vadd.f32 %v769_v34, %v768_v28  ;;  %v969_v39 = vadd.f32 %v968_v31, %v967_v25  ;;  %677 = vst.msk [vmem:[%s2051_s2 + $0xd8] sm:$0xff] %vm649_vm3, %v1205_v36  ;;  %v493_v40 = vpop.f32.mrb[27].mxu0  ;;  %v886_v51 = vmul.f32 %v1205_v36, %v1205_v36  ;;  %v974_v59 = vsel %vm649_vm3, %v885_v42, 0.0  ;;  %709 = vst.msk [vmem:[%s2051_s2 + $0x1d8] sm:$0xff] %vm649_vm3, %v1816_v13  ;;  %v1827_v18 = vpop.f32.mrb[27].mxu1 }
 0x115   :  { %v970_v43 = vsel %vm649_vm3, %v883_v35, 0.0  ;;  %675 = vst.msk [vmem:[%s2051_s2 + $0xc8] sm:$0xff] %vm649_vm3, %v493_v40  ;;  %v771_v44 = vsel %vm649_vm3, %v493_v40, 0.0  ;;  %v884_v45 = vmul.f32 %v493_v40, %v493_v40  ;;  %v775_v61 = vsel %vm649_vm3, %v1205_v36, 0.0  ;;  %707 = vst.msk [vmem:[%s2051_s2 + $0x1c8] sm:$0xff] %vm649_vm3, %v1827_v18 }
 0x116   :  { %v971_v46 = vadd.f32 %v970_v43, %v969_v39  ;;  %v772_v47 = vadd.f32 %v771_v44, %v770_v38  ;;  %v976_v9 = vsel %vm649_vm3, %v886_v51, 0.0  ;;  %v891_v38 = vmul.f32 %v1491_v60, %v1491_v60 }
 0x117   :  { %v972_v53 = vsel %vm649_vm3, %v884_v45, 0.0  ;;  %v785_v44 = vsel %vm649_vm3, %v1491_v60, 0.0 }
 0x118   :  { %v774_v55 = vadd.f32 %v773_v50, %v772_v47  ;;  %v973_v57 = vadd.f32 %v972_v53, %v971_v46  ;;  %v986_v53 = vsel %vm649_vm3, %v891_v38, 0.0 }
 0x119   :  { %v1208_v0 = vpop.f32.mrb[28].mxu0  ;;  %v1848_v45 = vpop.f32.mrb[28].mxu1 }
 0x11a   :  { %v975_v3 = vadd.f32 %v974_v59, %v973_v57  ;;  %680 = vst.msk [vmem:[%s2051_s2 + $0xf0] sm:$0xff] %vm649_vm3, %v1208_v0  ;;  %v506_v6 = vpop.f32.mrb[29].mxu0  ;;  %v776_v7 = vadd.f32 %v775_v61, %v774_v55  ;;  %v889_v19 = vmul.f32 %v1208_v0, %v1208_v0  ;;  %v781_v34 = vsel %vm649_vm3, %v1208_v0, 0.0  ;;  %712 = vst.msk [vmem:[%s2051_s2 + $0x1f0] sm:$0xff] %vm649_vm3, %v1848_v45  ;;  %v1855_v50 = vpop.f32.mrb[29].mxu1 }
 0x11b   :  { %678 = vst.msk [vmem:[%s2051_s2 + $0xe0] sm:$0xff] %vm649_vm3, %v506_v6  ;;  %v777_v10 = vsel %vm649_vm3, %v506_v6, 0.0  ;;  %v887_v11 = vmul.f32 %v506_v6, %v506_v6  ;;  %v1209_v12 = vpop.f32.mrb[30].mxu0  ;;  %v892_v55 = vmul.f32 %v1515_v5, %v1515_v5  ;;  %710 = vst.msk [vmem:[%s2051_s2 + $0x1e0] sm:$0xff] %vm649_vm3, %v1855_v50  ;;  %v1866_v60 = vpop.f32.mrb[30].mxu1  ;;  %v893_v0 = vmul.f32 %v1480_v56, %v1480_v56 }
 0x11c   :  { %v778_v14 = vadd.f32 %v777_v10, %v776_v7  ;;  %v977_v15 = vadd.f32 %v976_v9, %v975_v3  ;;  %681 = vst.msk [vmem:[%s2051_s2 + $0xf8] sm:$0xff] %vm649_vm3, %v1209_v12  ;;  %v509_v17 = vpop.f32.mrb[31].mxu0  ;;  %v890_v35 = vmul.f32 %v1209_v12, %v1209_v12  ;;  %v982_v42 = vsel %vm649_vm3, %v889_v19, 0.0  ;;  %713 = vst.msk [vmem:[%s2051_s2 + $0x1f8] sm:$0xff] %vm649_vm3, %v1866_v60  ;;  %v1873_v61 = vpop.f32.mrb[31].mxu1 }
 0x11d   :  { %v978_v22 = vsel %vm649_vm3, %v887_v11, 0.0  ;;  %679 = vst.msk [vmem:[%s2051_s2 + $0xe8] sm:$0xff] %vm649_vm3, %v509_v17  ;;  %v779_v25 = vsel %vm649_vm3, %v509_v17, 0.0  ;;  %v888_v26 = vmul.f32 %v509_v17, %v509_v17  ;;  %v783_v43 = vsel %vm649_vm3, %v1209_v12, 0.0  ;;  %711 = vst.msk [vmem:[%s2051_s2 + $0x1e8] sm:$0xff] %vm649_vm3, %v1873_v61 }
 0x11e   :  { %v979_v28 = vadd.f32 %v978_v22, %v977_v15  ;;  %v780_v31 = vadd.f32 %v779_v25, %v778_v14  ;;  %v984_v51 = vsel %vm649_vm3, %v890_v35, 0.0  ;;  %v787_v3 = vsel %vm649_vm3, %v1515_v5, 0.0 }
 0x11f   :  { %v980_v36 = vsel %vm649_vm3, %v888_v26, 0.0  ;;  %v789_v9 = vsel %vm649_vm3, %v1480_v56, 0.0  ;;  %v894_v10 = vmul.f32 %v1504_v1, %v1504_v1  ;;  %v988_v11 = vsel %vm649_vm3, %v892_v55, 0.0 }
 0x120   :  { %v782_v39 = vadd.f32 %v781_v34, %v780_v31  ;;  %v981_v40 = vadd.f32 %v980_v36, %v979_v28  ;;  %v895_v12 = vmul.f32 %v1543_v24, %v1543_v24  ;;  %v990_v15 = vsel %vm649_vm3, %v893_v0, 0.0 }
 0x121   :  { %v791_v17 = vsel %vm649_vm3, %v1504_v1, 0.0  ;;  %v793_v19 = vsel %vm649_vm3, %v1543_v24, 0.0  ;;  %v992_v25 = vsel %vm649_vm3, %v894_v10, 0.0  ;;  %v896_v28 = vmul.f32 %v1567_v33, %v1567_v33 }
 0x122   :  { %v983_v46 = vadd.f32 %v982_v42, %v981_v40  ;;  %v784_v47 = vadd.f32 %v783_v43, %v782_v39  ;;  %v994_v26 = vsel %vm649_vm3, %v895_v12, 0.0  ;;  %v897_v35 = vmul.f32 %v1532_v20, %v1532_v20 }
 0x123   :  { %v795_v1 = vsel %vm649_vm3, %v1567_v33, 0.0  ;;  %v797_v24 = vsel %vm649_vm3, %v1532_v20, 0.0  ;;  %v898_v39 = vmul.f32 %v1556_v29, %v1556_v29  ;;  %v996_v40 = vsel %vm649_vm3, %v896_v28, 0.0 }
 0x124   :  { %v786_v57 = vadd.f32 %v785_v44, %v784_v47  ;;  %v985_v59 = vadd.f32 %v984_v51, %v983_v46  ;;  %v899_v42 = vmul.f32 %v1595_v52, %v1595_v52  ;;  %v998_v46 = vsel %vm649_vm3, %v897_v35, 0.0 }
 0x125   :  { %v799_v33 = vsel %vm649_vm3, %v1556_v29, 0.0  ;;  %v801_v47 = vsel %vm649_vm3, %v1595_v52, 0.0  ;;  %v803_v29 = vsel %vm649_vm3, %v1619_v63, 0.0  ;;  %v805_v52 = vsel %vm649_vm3, %v1584_v48, 0.0 }
 0x126   :  { %v987_v6 = vadd.f32 %v986_v53, %v985_v59  ;;  %v788_v7 = vadd.f32 %v787_v3, %v786_v57  ;;  %v1000_v53 = vsel %vm649_vm3, %v898_v39, 0.0  ;;  %v1002_v55 = vsel %vm649_vm3, %v899_v42, 0.0 }
 0x127   :  { %v900_v57 = vmul.f32 %v1619_v63, %v1619_v63  ;;  %v901_v3 = vmul.f32 %v1584_v48, %v1584_v48  ;;  %v807_v63 = vsel %vm649_vm3, %v1608_v58, 0.0  ;;  %v905_v28 = vmul.f32 %v1636_v16, %v1636_v16 }
 0x128   :  { %v790_v5 = vadd.f32 %v789_v9, %v788_v7  ;;  %v989_v14 = vadd.f32 %v988_v11, %v987_v6  ;;  %v902_v9 = vmul.f32 %v1608_v58, %v1608_v58  ;;  %v903_v11 = vmul.f32 %v1647_v21, %v1647_v21 }
 0x129   :  { %v1004_v10 = vsel %vm649_vm3, %v900_v57, 0.0  ;;  %v811_v58 = vsel %vm649_vm3, %v1671_v32, 0.0  ;;  %v906_v35 = vmul.f32 %v1660_v27, %v1660_v27  ;;  %v1014_v39 = vsel %vm649_vm3, %v905_v28, 0.0 }
 0x12a   :  { %v991_v22 = vadd.f32 %v990_v15, %v989_v14  ;;  %v792_v56 = vadd.f32 %v791_v17, %v790_v5  ;;  %v1006_v14 = vsel %vm649_vm3, %v901_v3, 0.0  ;;  %v809_v15 = vsel %vm649_vm3, %v1647_v21, 0.0 }
 0x12b   :  { %v813_v21 = vsel %vm649_vm3, %v1636_v16, 0.0 }
 0x12c   :  { %v794_v31 = vadd.f32 %v793_v19, %v792_v56  ;;  %v993_v34 = vadd.f32 %v992_v25, %v991_v22  ;;  %v1008_v19 = vsel %vm649_vm3, %v902_v9, 0.0  ;;  %v1010_v22 = vsel %vm649_vm3, %v903_v11, 0.0 }
 0x12d   :  { %v904_v56 = vmul.f32 %v1671_v32, %v1671_v32  ;;  %v815_v32 = vsel %vm649_vm3, %v1660_v27, 0.0  ;;  %v819_v27 = vsel %vm649_vm3, %v1723_v4, 0.0 }
 0x12e   :  { %v995_v36 = vadd.f32 %v994_v26, %v993_v34  ;;  %v796_v38 = vadd.f32 %v795_v1, %v794_v31 }
 0x12f   :  { %v1012_v1 = vsel %vm649_vm3, %v904_v56, 0.0 }
 0x130   :  { %v798_v43 = vadd.f32 %v797_v24, %v796_v38  ;;  %v997_v44 = vadd.f32 %v996_v40, %v995_v36  ;;  %v907_v36 = vmul.f32 %v1699_v54, %v1699_v54  ;;  %v817_v40 = vsel %vm649_vm3, %v1699_v54, 0.0 }
 0x131   :  { %v821_v54 = vsel %vm649_vm3, %v1688_v49, 0.0 }
 0x132   :  { %v999_v51 = vadd.f32 %v998_v46, %v997_v44  ;;  %v800_v20 = vadd.f32 %v799_v33, %v798_v43  ;;  %v1016_v43 = vsel %vm649_vm3, %v906_v35, 0.0  ;;  %v1018_v44 = vsel %vm649_vm3, %v907_v36, 0.0 }
 0x133   :  { %v908_v46 = vmul.f32 %v1723_v4, %v1723_v4  ;;  %v823_v4 = vsel %vm649_vm3, %v1712_v62, 0.0  ;;  %v917_v35 = vmul.f32 %v1792_v2, %v1792_v2 }
 0x134   :  { %v802_v59 = vadd.f32 %v801_v47, %v800_v20  ;;  %v1001_v0 = vadd.f32 %v1000_v53, %v999_v51  ;;  %v909_v51 = vmul.f32 %v1688_v49, %v1688_v49 }
 0x135   :  { %v1020_v57 = vsel %vm649_vm3, %v908_v46, 0.0 }
 0x136   :  { %v1003_v6 = vadd.f32 %v1002_v55, %v1001_v0  ;;  %v804_v7 = vadd.f32 %v803_v29, %v802_v59  ;;  %v910_v55 = vmul.f32 %v1712_v62, %v1712_v62  ;;  %v911_v59 = vmul.f32 %v1751_v30, %v1751_v30 }
 0x137   :  { %v1022_v29 = vsel %vm649_vm3, %v909_v51, 0.0  ;;  %v827_v62 = vsel %vm649_vm3, %v1775_v41, 0.0 }
 0x138   :  { %v806_v12 = vadd.f32 %v805_v52, %v804_v7  ;;  %v1005_v5 = vadd.f32 %v1004_v10, %v1003_v6  ;;  %v825_v6 = vsel %vm649_vm3, %v1751_v30, 0.0  ;;  %v1024_v52 = vsel %vm649_vm3, %v910_v55, 0.0 }
 0x139   :  { %v1026_v9 = vsel %vm649_vm3, %v911_v59, 0.0  ;;  %v912_v10 = vmul.f32 %v1775_v41, %v1775_v41  ;;  %v829_v30 = vsel %vm649_vm3, %v1740_v23, 0.0  ;;  %v831_v41 = vsel %vm649_vm3, %v1764_v37, 0.0 }
 0x13a   :  { %v1007_v17 = vadd.f32 %v1006_v14, %v1005_v5  ;;  %v808_v48 = vadd.f32 %v807_v63, %v806_v12  ;;  %v913_v5 = vmul.f32 %v1740_v23, %v1740_v23 }
 0x13c   :  { %v810_v25 = vadd.f32 %v809_v15, %v808_v48  ;;  %v1009_v26 = vadd.f32 %v1008_v19, %v1007_v17  ;;  %v914_v15 = vmul.f32 %v1764_v37, %v1764_v37  ;;  %v1028_v17 = vsel %vm649_vm3, %v912_v10, 0.0 }
 0x13d   :  { %v915_v48 = vmul.f32 %v1803_v8, %v1803_v8  ;;  %v1030_v56 = vsel %vm649_vm3, %v913_v5, 0.0  ;;  %v835_v37 = vsel %vm649_vm3, %v1827_v18, 0.0 }
 0x13e   :  { %v1011_v31 = vadd.f32 %v1010_v22, %v1009_v26  ;;  %v812_v34 = vadd.f32 %v811_v58, %v810_v25  ;;  %v833_v25 = vsel %vm649_vm3, %v1803_v8, 0.0  ;;  %v1032_v28 = vsel %vm649_vm3, %v914_v15, 0.0 }
 0x13f   :  { %v1034_v58 = vsel %vm649_vm3, %v915_v48, 0.0  ;;  %v837_v8 = vsel %vm649_vm3, %v1792_v2, 0.0 }
 0x140   :  { %v814_v38 = vadd.f32 %v813_v21, %v812_v34  ;;  %v1013_v24 = vadd.f32 %v1012_v1, %v1011_v31  ;;  %v916_v31 = vmul.f32 %v1827_v18, %v1827_v18  ;;  %v839_v18 = vsel %vm649_vm3, %v1816_v13, 0.0 }
 0x142   :  { %v1015_v42 = vadd.f32 %v1014_v39, %v1013_v24  ;;  %v816_v16 = vadd.f32 %v815_v32, %v814_v38  ;;  %v918_v38 = vmul.f32 %v1816_v13, %v1816_v13  ;;  %v1036_v24 = vsel %vm649_vm3, %v916_v31, 0.0 }
 0x143   :  { %v919_v39 = vmul.f32 %v1855_v50, %v1855_v50  ;;  %v843_v13 = vsel %vm649_vm3, %v1873_v61, 0.0 }
 0x144   :  { %v818_v33 = vadd.f32 %v817_v40, %v816_v16  ;;  %v1017_v47 = vadd.f32 %v1016_v43, %v1015_v42  ;;  %v1038_v42 = vsel %vm649_vm3, %v917_v35, 0.0  ;;  %v841_v16 = vsel %vm649_vm3, %v1855_v50, 0.0 }
 0x145   :  { %v1042_v46 = vsel %vm649_vm3, %v919_v39, 0.0  ;;  %v845_v50 = vsel %vm649_vm3, %v1848_v45, 0.0 }
 0x146   :  { %v1019_v20 = vadd.f32 %v1018_v44, %v1017_v47  ;;  %v820_v53 = vadd.f32 %v819_v27, %v818_v33  ;;  %v1040_v44 = vsel %vm649_vm3, %v918_v38, 0.0  ;;  %v920_v33 = vmul.f32 %v1873_v61, %v1873_v61 }
 0x147   :  { %v921_v27 = vmul.f32 %v1848_v45, %v1848_v45 }
 0x148   :  { %v822_v0 = vadd.f32 %v821_v54, %v820_v53  ;;  %v1021_v3 = vadd.f32 %v1020_v57, %v1019_v20  ;;  %v922_v54 = vmul.f32 %v1866_v60, %v1866_v60  ;;  %v1044_v55 = vsel %vm649_vm3, %v920_v33, 0.0 }
 0x14a   :  { %v1023_v7 = vadd.f32 %v1022_v29, %v1021_v3  ;;  %v824_v49 = vadd.f32 %v823_v4, %v822_v0  ;;  %v1046_v0 = vsel %vm649_vm3, %v921_v27, 0.0  ;;  %v847_v3 = vsel %vm649_vm3, %v1866_v60, 0.0 }
 0x14b   :  { %v1048_v61 = vsel %vm649_vm3, %v922_v54, 0.0 }
 0x14c   :  { %v826_v11 = vadd.f32 %v825_v6, %v824_v49  ;;  %v1025_v12 = vadd.f32 %v1024_v52, %v1023_v7 }
 0x14e   :  { %v1027_v14 = vadd.f32 %v1026_v9, %v1025_v12  ;;  %v828_v63 = vadd.f32 %v827_v62, %v826_v11  ;;  %v721_v62 = vld [vmem:[%s2049_s3] sm:$0x1] }
 0x150   :  { %v830_v19 = vadd.f32 %v829_v30, %v828_v63  ;;  %v1029_v22 = vadd.f32 %v1028_v17, %v1027_v14  ;;  %v858_v63 = vld [vmem:[%s2050_s4] sm:$0x1] }
 0x152   :  { %v1031_v26 = vadd.f32 %v1030_v56, %v1029_v22  ;;  %v832_v23 = vadd.f32 %v831_v41, %v830_v19 }
 0x154   :  { %v834_v34 = vadd.f32 %v833_v25, %v832_v23  ;;  %v1033_v21 = vadd.f32 %v1032_v28, %v1031_v26 }
 0x156   :  { %v1035_v1 = vadd.f32 %v1034_v58, %v1033_v21  ;;  %v836_v36 = vadd.f32 %v835_v37, %v834_v34 }
 0x158   :  { %v838_v32 = vadd.f32 %v837_v8, %v836_v36  ;;  %v1037_v40 = vadd.f32 %v1036_v24, %v1035_v1 }
 0x15a   :  { %v1039_v43 = vadd.f32 %v1038_v42, %v1037_v40  ;;  %v840_v2 = vadd.f32 %v839_v18, %v838_v32 }
 0x15c   :  { %v842_v47 = vadd.f32 %v841_v16, %v840_v2  ;;  %v1041_v51 = vadd.f32 %v1040_v44, %v1039_v43 }
 0x15e   :  { %v1043_v20 = vadd.f32 %v1042_v46, %v1041_v51  ;;  %v844_v53 = vadd.f32 %v843_v13, %v842_v47 }
 0x160   :  { %v846_v57 = vadd.f32 %v845_v50, %v844_v53  ;;  %v1045_v59 = vadd.f32 %v1044_v55, %v1043_v20 }
 0x162   :  { %v848_v29 = vadd.f32 %v847_v3, %v846_v57  ;;  %v1047_v4 = vadd.f32 %v1046_v0, %v1045_v59 }
 0x164   :  { %v849_v6 = vrot.slane %v848_v29, 4  ;;  %v1049_v7 = vadd.f32 %v1048_v61, %v1047_v4 }
 0x166   :  { %v850_v49 = vadd.f32 %v849_v6, %v848_v29  ;;  %v1050_v45 = vrot.slane %v1049_v7, 4 }
 0x168   :  { %v851_v52 = vrot.slane %v850_v49, 2  ;;  %v1051_v9 = vadd.f32 %v1050_v45, %v1049_v7 }
 0x16a   :  { %v852_v10 = vadd.f32 %v851_v52, %v850_v49  ;;  %v1052_v11 = vrot.slane %v1051_v9, 2 }
 0x16c   :  { %v853_v12 = vrot.slane %v852_v10, 1  ;;  %v1053_v5 = vadd.f32 %v1052_v11, %v1051_v9 }
 0x16e   :  { %v854_v14 = vadd.f32 %v853_v12, %v852_v10  ;;  %v1054_v60 = vrot.slane %v1053_v5, 1 }
 0x170   :  { %v855_v30 = vadd.f32 %v854_v14, %v721_v62  ;;  %v1055_v15 = vadd.f32 %v1054_v60, %v1053_v5 }
 0x172   :  { %857 = vst.msk [vmem:[%s2049_s3] sm:$0x1] %vm718_vm2, %v855_v30  ;;  %v1056_v17 = vadd.f32 %v1055_v15, %v858_v63 }
 0x174   :  { %1057 = vst.msk [vmem:[%s2050_s4] sm:$0x1] %vm718_vm2, %v1056_v17 }

// kernel: attention_conv_block_l3.48
= control target key start
LH: loop header
LB: loop body
LE: loop exit
PB: predicated region body
PF: predicated region fallthrough
CT: control target
= control target key end

     0   :  { %vm275_vm0 = vcmask 588800   ;;  %vm372_vm1 = vcmask 1043456   ;;  %vm734_vm2 = vcmask 57344   ;;  %vm665_vm3 = vcmask 64512   ;;  %s2083_s1 = inlined_call_operand.vmem [shape: bf16[72,8], index: 1, kind: input, shape index: {}]   ;;  %s2084_s0 = inlined_call_operand.vmem [shape: bf16[512,72], index: 0, kind: input, shape index: {}]   ;;  %s2085_s3 = inlined_call_operand.vmem [shape: f32[1,8], index: 3, kind: output, shape index: {1}]   ;;  %s2086_s4 = inlined_call_operand.vmem [shape: f32[1,8], index: 4, kind: output, shape index: {2}]   ;;  %s2087_s2 = inlined_call_operand.vmem [shape: f32[512,8], index: 2, kind: output, shape index: {0}]  }
   0x1   :  { %v1279_v0 = vld [vmem:[%s2083_s1] sm:$0xff]   ;;  %v1280_v1 = vld [vmem:[%s2083_s1 + $0x8] sm:$0xff]   ;;  %v1281_v2 = vld [vmem:[%s2083_s1 + $0x10] sm:$0xff]   ;;  %v1316_v38 = vmov 0.0  }
   0x2   :  { %1192 = vmatprep.subr.bf16.mxu0 %v1279_v0  ;;  %1266 = vmatprep.subr.bf16.mxu1 %v1279_v0  ;;  %v1284_v3 = vld [vmem:[%s2084_s0] sm:$0xff]   ;;  %v1282_v4 = vld [vmem:[%s2083_s1 + $0x18] sm:$0xff]   ;;  %v1285_v7 = vld [vmem:[%s2084_s0 + $0x8] sm:$0xff]   ;;  %735 = vst.msk [vmem:[%s2085_s3] sm:$0x1] %vm734_vm2, %v1316_v38 }
   0x3   :  { %1193 = vmatpush3.bf16.msra.mxu0 %v1279_v0  ;;  %1271 = vmatpush3.bf16.msra.mxu1 %v1279_v0  ;;  %v1283_v5 = vld [vmem:[%s2083_s1 + $0x20] ss:$0 sps:$4 sm:$0xff]   ;;  %v1286_v8 = vld [vmem:[%s2084_s0 + $0x10] sm:$0xff]   ;;  %v1301_v10 = vld [vmem:[%s2084_s0 + $0x88] sm:$0xff]   ;;  %736 = vst.msk [vmem:[%s2086_s4] sm:$0x1] %vm734_vm2, %v1316_v38 }
   0x4   :  { %1194 = vmatprep.subr.bf16.mxu0 %v1280_v1  ;;  %1267 = vmatprep.subr.bf16.mxu1 %v1280_v1  ;;  %v374_v6 = vsel %vm372_vm1, %v1283_v5, 0  ;;  %v1300_v9 = vld [vmem:[%s2084_s0 + $0x80] sm:$0xff]   ;;  %v1302_v11 = vld [vmem:[%s2084_s0 + $0x90] sm:$0xff]   ;;  %v1287_v12 = vld [vmem:[%s2084_s0 + $0x18] sm:$0xff]  }
   0x5   :  { %1202 = vmatprep.mubr.msk.bf16.mxu0 %vm275_vm0, %v1284_v3  ;;  %1234 = vmatprep.mubr.msk.bf16.mxu1 %vm275_vm0, %v1300_v9  ;;  %v1288_v13 = vld [vmem:[%s2084_s0 + $0x20] sm:$0xff]   ;;  %v1303_v14 = vld [vmem:[%s2084_s0 + $0x98] sm:$0xff]   ;;  %v1289_v16 = vld [vmem:[%s2084_s0 + $0x28] sm:$0xff]  }
   0x6   :  { %v1304_v15 = vld [vmem:[%s2084_s0 + $0xa0] sm:$0xff]   ;;  %v1290_v17 = vld [vmem:[%s2084_s0 + $0x30] sm:$0xff]   ;;  %v1305_v18 = vld [vmem:[%s2084_s0 + $0xa8] sm:$0xff]  }
   0x7   :  { %1195 = vmatpush3.bf16.msra.mxu0 %v1280_v1  ;;  %1272 = vmatpush3.bf16.msra.mxu1 %v1280_v1  ;;  %v1306_v19 = vld [vmem:[%s2084_s0 + $0xb0] sm:$0xff]   ;;  %v1291_v20 = vld [vmem:[%s2084_s0 + $0x38] sm:$0xff]   ;;  %v1292_v21 = vld [vmem:[%s2084_s0 + $0x40] sm:$0xff]  }
   0x8   :  { %1196 = vmatprep.subr.bf16.mxu0 %v1281_v2  ;;  %1268 = vmatprep.subr.bf16.mxu1 %v1281_v2  ;;  %v1307_v22 = vld [vmem:[%s2084_s0 + $0xb8] sm:$0xff]   ;;  %v1308_v23 = vld [vmem:[%s2084_s0 + $0xc0] sm:$0xff]   ;;  %v1293_v24 = vld [vmem:[%s2084_s0 + $0x48] sm:$0xff]  }
   0x9   :  { %v1294_v25 = vld [vmem:[%s2084_s0 + $0x50] sm:$0xff]   ;;  %v1309_v26 = vld [vmem:[%s2084_s0 + $0xc8] sm:$0xff]   ;;  %v1295_v28 = vld [vmem:[%s2084_s0 + $0x58] sm:$0xff]  }
   0xa   :  { %v1310_v27 = vld [vmem:[%s2084_s0 + $0xd0] sm:$0xff]   ;;  %v1296_v29 = vld [vmem:[%s2084_s0 + $0x60] sm:$0xff]   ;;  %v1311_v30 = vld [vmem:[%s2084_s0 + $0xd8] sm:$0xff]  }
   0xb   :  { %1197 = vmatpush3.bf16.msra.mxu0 %v1281_v2  ;;  %1273 = vmatpush3.bf16.msra.mxu1 %v1281_v2  ;;  %v1312_v31 = vld [vmem:[%s2084_s0 + $0xe0] sm:$0xff]   ;;  %v1297_v32 = vld [vmem:[%s2084_s0 + $0x68] sm:$0xff]   ;;  %v1298_v33 = vld [vmem:[%s2084_s0 + $0x70] sm:$0xff]  }
   0xc   :  { %1198 = vmatprep.subr.bf16.mxu0 %v1282_v4  ;;  %1269 = vmatprep.subr.bf16.mxu1 %v1282_v4  ;;  %v1313_v34 = vld [vmem:[%s2084_s0 + $0xe8] sm:$0xff]   ;;  %v1314_v35 = vld [vmem:[%s2084_s0 + $0xf0] sm:$0xff]   ;;  %v1299_v36 = vld [vmem:[%s2084_s0 + $0x78] sm:$0xff]  }
   0xd   :  { %v1315_v37 = vld [vmem:[%s2084_s0 + $0xf8] sm:$0xff]  }
   0xf   :  { %1199 = vmatpush3.bf16.msra.mxu0 %v1282_v4  ;;  %1274 = vmatpush3.bf16.msra.mxu1 %v1282_v4 }
  0x10   :  { %1276 = vmatprep.subr.msk.bf16.mxu0 %vm372_vm1, %v1283_v5  ;;  %1277 = vmatprep.subr.msk.bf16.mxu1 %vm372_vm1, %v1283_v5 }
  0x13   :  { %1201 = vmatpush3.bf16.msra.mxu0 %v374_v6  ;;  %1275 = vmatpush3.bf16.msra.mxu1 %v374_v6 }
  0x16   :  { %1203 = vmatmul.mubr.msk.bf16.vlgmr.msra.gmra.mrb[0].mxu0 %vm275_vm0, %v1285_v7  ;;  %1235 = vmatmul.mubr.msk.bf16.vlgmr.msra.gmra.mrb[0].mxu1 %vm275_vm0, %v1301_v10 }
  0x17   :  { %1206 = vmatprep.mubr.msk.bf16.mxu0 %vm275_vm0, %v1286_v8  ;;  %1238 = vmatprep.mubr.msk.bf16.mxu1 %vm275_vm0, %v1302_v11 }
  0x1e   :  { %1207 = vmatmul.mubr.msk.bf16.gmra.mrb[4].mxu0 %vm275_vm0, %v1287_v12  ;;  %1239 = vmatmul.mubr.msk.bf16.gmra.mrb[4].mxu1 %vm275_vm0, %v1303_v14 }
  0x1f   :  { %1210 = vmatprep.mubr.msk.bf16.mxu0 %vm275_vm0, %v1288_v13  ;;  %1242 = vmatprep.mubr.msk.bf16.mxu1 %vm275_vm0, %v1304_v15 }
  0x26   :  { %1211 = vmatmul.mubr.msk.bf16.gmra.mrb[8].mxu0 %vm275_vm0, %v1289_v16  ;;  %1243 = vmatmul.mubr.msk.bf16.gmra.mrb[8].mxu1 %vm275_vm0, %v1305_v18 }
  0x27   :  { %1214 = vmatprep.mubr.msk.bf16.mxu0 %vm275_vm0, %v1290_v17  ;;  %1246 = vmatprep.mubr.msk.bf16.mxu1 %vm275_vm0, %v1306_v19 }
  0x2e   :  { %1215 = vmatmul.mubr.msk.bf16.gmra.mrb[12].mxu0 %vm275_vm0, %v1291_v20  ;;  %1247 = vmatmul.mubr.msk.bf16.gmra.mrb[12].mxu1 %vm275_vm0, %v1307_v22 }
  0x2f   :  { %1218 = vmatprep.mubr.msk.bf16.mxu0 %vm275_vm0, %v1292_v21  ;;  %1250 = vmatprep.mubr.msk.bf16.mxu1 %vm275_vm0, %v1308_v23 }
  0x36   :  { %1219 = vmatmul.mubr.msk.bf16.gmra.mrb[16].mxu0 %vm275_vm0, %v1293_v24  ;;  %1251 = vmatmul.mubr.msk.bf16.gmra.mrb[16].mxu1 %vm275_vm0, %v1309_v26 }
  0x37   :  { %1222 = vmatprep.mubr.msk.bf16.mxu0 %vm275_vm0, %v1294_v25  ;;  %1254 = vmatprep.mubr.msk.bf16.mxu1 %vm275_vm0, %v1310_v27 }
  0x3e   :  { %1223 = vmatmul.mubr.msk.bf16.gmra.mrb[20].mxu0 %vm275_vm0, %v1295_v28  ;;  %1255 = vmatmul.mubr.msk.bf16.gmra.mrb[20].mxu1 %vm275_vm0, %v1311_v30 }
  0x3f   :  { %1226 = vmatprep.mubr.msk.bf16.mxu0 %vm275_vm0, %v1296_v29  ;;  %1258 = vmatprep.mubr.msk.bf16.mxu1 %vm275_vm0, %v1312_v31 }
  0x46   :  { %1227 = vmatmul.mubr.msk.bf16.gmra.mrb[24].mxu0 %vm275_vm0, %v1297_v32  ;;  %1259 = vmatmul.mubr.msk.bf16.gmra.mrb[24].mxu1 %vm275_vm0, %v1313_v34 }
  0x47   :  { %1230 = vmatprep.mubr.msk.bf16.mxu0 %vm275_vm0, %v1298_v33  ;;  %1262 = vmatprep.mubr.msk.bf16.mxu1 %vm275_vm0, %v1314_v35 }
  0x4e   :  { %1231 = vmatmul.mubr.msk.bf16.gmra.mrb[28].mxu0 %vm275_vm0, %v1299_v36  ;;  %1263 = vmatmul.mubr.msk.bf16.gmra.mrb[28].mxu1 %vm275_vm0, %v1315_v37 }
  0xe9   :  { %v1204_v39 = vpop.f32.mrb[0].mxu0  ;;  %v1501_v43 = vpop.f32.mrb[0].mxu1 }
  0xea   :  { %668 = vst.msk [vmem:[%s2087_s2 + $0x10] sm:$0xff] %vm665_vm3, %v1204_v39  ;;  %v410_v40 = vpop.f32.mrb[1].mxu0  ;;  %700 = vst.msk [vmem:[%s2087_s2 + $0x110] sm:$0xff] %vm665_vm3, %v1501_v43  ;;  %v1512_v45 = vpop.f32.mrb[1].mxu1  ;;  %v877_v46 = vmul.f32 %v1204_v39, %v1204_v39  ;;  %v741_v53 = vsel %vm665_vm3, %v1204_v39, 0.0 }
  0xeb   :  { %666 = vst.msk [vmem:[%s2087_s2] sm:$0xff] %vm665_vm3, %v410_v40  ;;  %v875_v41 = vmul.f32 %v410_v40, %v410_v40  ;;  %v1205_v42 = vpop.f32.mrb[2].mxu0  ;;  %v738_v47 = vsel %vm665_vm3, %v410_v40, 0.0  ;;  %698 = vst.msk [vmem:[%s2087_s2 + $0x100] sm:$0xff] %vm665_vm3, %v1512_v45  ;;  %v1525_v50 = vpop.f32.mrb[2].mxu1 }
  0xec   :  { %669 = vst.msk [vmem:[%s2087_s2 + $0x18] sm:$0xff] %vm665_vm3, %v1205_v42  ;;  %v413_v44 = vpop.f32.mrb[3].mxu0  ;;  %701 = vst.msk [vmem:[%s2087_s2 + $0x118] sm:$0xff] %vm665_vm3, %v1525_v50  ;;  %v1532_v52 = vpop.f32.mrb[3].mxu1  ;;  %v878_v55 = vmul.f32 %v1205_v42, %v1205_v42  ;;  %v942_v59 = vsel %vm665_vm3, %v877_v46, 0.0  ;;  %v743_v60 = vsel %vm665_vm3, %v1205_v42, 0.0 }
  0xed   :  { %667 = vst.msk [vmem:[%s2087_s2 + $0x8] sm:$0xff] %vm665_vm3, %v413_v44  ;;  %v739_v48 = vsel %vm665_vm3, %v413_v44, 0.0  ;;  %v876_v49 = vmul.f32 %v413_v44, %v413_v44  ;;  %v939_v54 = vsel %vm665_vm3, %v875_v41, 0.0  ;;  %699 = vst.msk [vmem:[%s2087_s2 + $0x108] sm:$0xff] %vm665_vm3, %v1532_v52 }
  0xee   :  { %v740_v51 = vadd.f32 %v739_v48, %v738_v47  ;;  %v944_v1 = vsel %vm665_vm3, %v878_v55, 0.0 }
  0xef   :  { %v940_v56 = vsel %vm665_vm3, %v876_v49, 0.0 }
  0xf0   :  { %v742_v57 = vadd.f32 %v741_v53, %v740_v51  ;;  %v941_v58 = vadd.f32 %v940_v56, %v939_v54 }
  0xf1   :  { %v1208_v61 = vpop.f32.mrb[4].mxu0  ;;  %v1554_v5 = vpop.f32.mrb[4].mxu1 }
  0xf2   :  { %v943_v62 = vadd.f32 %v942_v59, %v941_v58  ;;  %672 = vst.msk [vmem:[%s2087_s2 + $0x30] sm:$0xff] %vm665_vm3, %v1208_v61  ;;  %v426_v63 = vpop.f32.mrb[5].mxu0  ;;  %v744_v0 = vadd.f32 %v743_v60, %v742_v57  ;;  %704 = vst.msk [vmem:[%s2087_s2 + $0x130] sm:$0xff] %vm665_vm3, %v1554_v5  ;;  %v1565_v9 = vpop.f32.mrb[5].mxu1  ;;  %v881_v10 = vmul.f32 %v1208_v61, %v1208_v61  ;;  %v749_v18 = vsel %vm665_vm3, %v1208_v61, 0.0 }
  0xf3   :  { %670 = vst.msk [vmem:[%s2087_s2 + $0x20] sm:$0xff] %vm665_vm3, %v426_v63  ;;  %v745_v2 = vsel %vm665_vm3, %v426_v63, 0.0  ;;  %v879_v3 = vmul.f32 %v426_v63, %v426_v63  ;;  %v1209_v4 = vpop.f32.mrb[6].mxu0  ;;  %702 = vst.msk [vmem:[%s2087_s2 + $0x120] sm:$0xff] %vm665_vm3, %v1565_v9  ;;  %v1578_v14 = vpop.f32.mrb[6].mxu1 }
  0xf4   :  { %v746_v6 = vadd.f32 %v745_v2, %v744_v0  ;;  %v945_v7 = vadd.f32 %v944_v1, %v943_v62  ;;  %673 = vst.msk [vmem:[%s2087_s2 + $0x38] sm:$0xff] %vm665_vm3, %v1209_v4  ;;  %v429_v8 = vpop.f32.mrb[7].mxu0  ;;  %705 = vst.msk [vmem:[%s2087_s2 + $0x138] sm:$0xff] %vm665_vm3, %v1578_v14  ;;  %v1585_v17 = vpop.f32.mrb[7].mxu1  ;;  %v882_v19 = vmul.f32 %v1209_v4, %v1209_v4  ;;  %v950_v23 = vsel %vm665_vm3, %v881_v10, 0.0 }
  0xf5   :  { %v946_v11 = vsel %vm665_vm3, %v879_v3, 0.0  ;;  %671 = vst.msk [vmem:[%s2087_s2 + $0x28] sm:$0xff] %vm665_vm3, %v429_v8  ;;  %v747_v12 = vsel %vm665_vm3, %v429_v8, 0.0  ;;  %v880_v13 = vmul.f32 %v429_v8, %v429_v8  ;;  %703 = vst.msk [vmem:[%s2087_s2 + $0x128] sm:$0xff] %vm665_vm3, %v1585_v17  ;;  %v751_v24 = vsel %vm665_vm3, %v1209_v4, 0.0 }
  0xf6   :  { %v947_v15 = vadd.f32 %v946_v11, %v945_v7  ;;  %v748_v16 = vadd.f32 %v747_v12, %v746_v6  ;;  %v952_v29 = vsel %vm665_vm3, %v882_v19, 0.0 }
  0xf7   :  { %v948_v20 = vsel %vm665_vm3, %v880_v13, 0.0 }
  0xf8   :  { %v750_v21 = vadd.f32 %v749_v18, %v748_v16  ;;  %v949_v22 = vadd.f32 %v948_v20, %v947_v15 }
  0xf9   :  { %v1212_v25 = vpop.f32.mrb[8].mxu0  ;;  %v1606_v33 = vpop.f32.mrb[8].mxu1 }
  0xfa   :  { %v951_v26 = vadd.f32 %v950_v23, %v949_v22  ;;  %676 = vst.msk [vmem:[%s2087_s2 + $0x50] sm:$0xff] %vm665_vm3, %v1212_v25  ;;  %v442_v27 = vpop.f32.mrb[9].mxu0  ;;  %v752_v28 = vadd.f32 %v751_v24, %v750_v21  ;;  %708 = vst.msk [vmem:[%s2087_s2 + $0x150] sm:$0xff] %vm665_vm3, %v1606_v33  ;;  %v1617_v37 = vpop.f32.mrb[9].mxu1  ;;  %v885_v38 = vmul.f32 %v1212_v25, %v1212_v25  ;;  %v757_v48 = vsel %vm665_vm3, %v1212_v25, 0.0 }
  0xfb   :  { %674 = vst.msk [vmem:[%s2087_s2 + $0x40] sm:$0xff] %vm665_vm3, %v442_v27  ;;  %v753_v30 = vsel %vm665_vm3, %v442_v27, 0.0  ;;  %v883_v31 = vmul.f32 %v442_v27, %v442_v27  ;;  %v1213_v32 = vpop.f32.mrb[10].mxu0  ;;  %706 = vst.msk [vmem:[%s2087_s2 + $0x140] sm:$0xff] %vm665_vm3, %v1617_v37  ;;  %v1630_v42 = vpop.f32.mrb[10].mxu1 }
  0xfc   :  { %v754_v34 = vadd.f32 %v753_v30, %v752_v28  ;;  %v953_v35 = vadd.f32 %v952_v29, %v951_v26  ;;  %677 = vst.msk [vmem:[%s2087_s2 + $0x58] sm:$0xff] %vm665_vm3, %v1213_v32  ;;  %v445_v36 = vpop.f32.mrb[11].mxu0  ;;  %709 = vst.msk [vmem:[%s2087_s2 + $0x158] sm:$0xff] %vm665_vm3, %v1630_v42  ;;  %v1637_v47 = vpop.f32.mrb[11].mxu1  ;;  %v886_v49 = vmul.f32 %v1213_v32, %v1213_v32  ;;  %v958_v55 = vsel %vm665_vm3, %v885_v38, 0.0 }
  0xfd   :  { %v954_v39 = vsel %vm665_vm3, %v883_v31, 0.0  ;;  %675 = vst.msk [vmem:[%s2087_s2 + $0x48] sm:$0xff] %vm665_vm3, %v445_v36  ;;  %v755_v40 = vsel %vm665_vm3, %v445_v36, 0.0  ;;  %v884_v41 = vmul.f32 %v445_v36, %v445_v36  ;;  %707 = vst.msk [vmem:[%s2087_s2 + $0x148] sm:$0xff] %vm665_vm3, %v1637_v47  ;;  %v759_v56 = vsel %vm665_vm3, %v1213_v32, 0.0 }
  0xfe   :  { %v955_v44 = vadd.f32 %v954_v39, %v953_v35  ;;  %v756_v46 = vadd.f32 %v755_v40, %v754_v34  ;;  %v960_v61 = vsel %vm665_vm3, %v886_v49, 0.0 }
  0xff   :  { %v956_v51 = vsel %vm665_vm3, %v884_v41, 0.0 }
 0x100   :  { %v758_v53 = vadd.f32 %v757_v48, %v756_v46  ;;  %v957_v54 = vadd.f32 %v956_v51, %v955_v44 }
 0x101   :  { %v1216_v57 = vpop.f32.mrb[12].mxu0  ;;  %v1658_v1 = vpop.f32.mrb[12].mxu1 }
 0x102   :  { %v959_v58 = vadd.f32 %v958_v55, %v957_v54  ;;  %680 = vst.msk [vmem:[%s2087_s2 + $0x70] sm:$0xff] %vm665_vm3, %v1216_v57  ;;  %v458_v59 = vpop.f32.mrb[13].mxu0  ;;  %v760_v60 = vadd.f32 %v759_v56, %v758_v53  ;;  %712 = vst.msk [vmem:[%s2087_s2 + $0x170] sm:$0xff] %vm665_vm3, %v1658_v1  ;;  %v1669_v6 = vpop.f32.mrb[13].mxu1  ;;  %v889_v7 = vmul.f32 %v1216_v57, %v1216_v57  ;;  %v765_v18 = vsel %vm665_vm3, %v1216_v57, 0.0 }
 0x103   :  { %678 = vst.msk [vmem:[%s2087_s2 + $0x60] sm:$0xff] %vm665_vm3, %v458_v59  ;;  %v761_v62 = vsel %vm665_vm3, %v458_v59, 0.0  ;;  %v887_v63 = vmul.f32 %v458_v59, %v458_v59  ;;  %v1217_v0 = vpop.f32.mrb[14].mxu0  ;;  %710 = vst.msk [vmem:[%s2087_s2 + $0x160] sm:$0xff] %vm665_vm3, %v1669_v6  ;;  %v1682_v12 = vpop.f32.mrb[14].mxu1 }
 0x104   :  { %v762_v2 = vadd.f32 %v761_v62, %v760_v60  ;;  %v961_v3 = vadd.f32 %v960_v61, %v959_v58  ;;  %681 = vst.msk [vmem:[%s2087_s2 + $0x78] sm:$0xff] %vm665_vm3, %v1217_v0  ;;  %v461_v4 = vpop.f32.mrb[15].mxu0  ;;  %713 = vst.msk [vmem:[%s2087_s2 + $0x178] sm:$0xff] %vm665_vm3, %v1682_v12  ;;  %v1689_v16 = vpop.f32.mrb[15].mxu1  ;;  %v890_v19 = vmul.f32 %v1217_v0, %v1217_v0  ;;  %v966_v23 = vsel %vm665_vm3, %v889_v7, 0.0 }
 0x105   :  { %v962_v8 = vsel %vm665_vm3, %v887_v63, 0.0  ;;  %679 = vst.msk [vmem:[%s2087_s2 + $0x68] sm:$0xff] %vm665_vm3, %v461_v4  ;;  %v763_v10 = vsel %vm665_vm3, %v461_v4, 0.0  ;;  %v888_v11 = vmul.f32 %v461_v4, %v461_v4  ;;  %711 = vst.msk [vmem:[%s2087_s2 + $0x168] sm:$0xff] %vm665_vm3, %v1689_v16  ;;  %v767_v24 = vsel %vm665_vm3, %v1217_v0, 0.0 }
 0x106   :  { %v963_v13 = vadd.f32 %v962_v8, %v961_v3  ;;  %v764_v15 = vadd.f32 %v763_v10, %v762_v2  ;;  %v968_v29 = vsel %vm665_vm3, %v890_v19, 0.0 }
 0x107   :  { %v964_v20 = vsel %vm665_vm3, %v888_v11, 0.0 }
 0x108   :  { %v766_v21 = vadd.f32 %v765_v18, %v764_v15  ;;  %v965_v22 = vadd.f32 %v964_v20, %v963_v13 }
 0x109   :  { %v1220_v25 = vpop.f32.mrb[16].mxu0  ;;  %v1710_v34 = vpop.f32.mrb[16].mxu1 }
 0x10a   :  { %v967_v26 = vadd.f32 %v966_v23, %v965_v22  ;;  %684 = vst.msk [vmem:[%s2087_s2 + $0x90] sm:$0xff] %vm665_vm3, %v1220_v25  ;;  %v474_v27 = vpop.f32.mrb[17].mxu0  ;;  %v768_v28 = vadd.f32 %v767_v24, %v766_v21  ;;  %716 = vst.msk [vmem:[%s2087_s2 + $0x190] sm:$0xff] %vm665_vm3, %v1710_v34  ;;  %v1721_v39 = vpop.f32.mrb[17].mxu1  ;;  %v893_v40 = vmul.f32 %v1220_v25, %v1220_v25  ;;  %v773_v54 = vsel %vm665_vm3, %v1220_v25, 0.0 }
 0x10b   :  { %682 = vst.msk [vmem:[%s2087_s2 + $0x80] sm:$0xff] %vm665_vm3, %v474_v27  ;;  %v769_v30 = vsel %vm665_vm3, %v474_v27, 0.0  ;;  %v891_v31 = vmul.f32 %v474_v27, %v474_v27  ;;  %v1221_v32 = vpop.f32.mrb[18].mxu0  ;;  %714 = vst.msk [vmem:[%s2087_s2 + $0x180] sm:$0xff] %vm665_vm3, %v1721_v39  ;;  %v1734_v48 = vpop.f32.mrb[18].mxu1 }
 0x10c   :  { %v770_v35 = vadd.f32 %v769_v30, %v768_v28  ;;  %v969_v36 = vadd.f32 %v968_v29, %v967_v26  ;;  %685 = vst.msk [vmem:[%s2087_s2 + $0x98] sm:$0xff] %vm665_vm3, %v1221_v32  ;;  %v477_v38 = vpop.f32.mrb[19].mxu0  ;;  %717 = vst.msk [vmem:[%s2087_s2 + $0x198] sm:$0xff] %vm665_vm3, %v1734_v48  ;;  %v1741_v53 = vpop.f32.mrb[19].mxu1  ;;  %v894_v55 = vmul.f32 %v1221_v32, %v1221_v32  ;;  %v974_v59 = vsel %vm665_vm3, %v893_v40, 0.0 }
 0x10d   :  { %v970_v41 = vsel %vm665_vm3, %v891_v31, 0.0  ;;  %683 = vst.msk [vmem:[%s2087_s2 + $0x88] sm:$0xff] %vm665_vm3, %v477_v38  ;;  %v771_v44 = vsel %vm665_vm3, %v477_v38, 0.0  ;;  %v892_v46 = vmul.f32 %v477_v38, %v477_v38  ;;  %715 = vst.msk [vmem:[%s2087_s2 + $0x188] sm:$0xff] %vm665_vm3, %v1741_v53  ;;  %v775_v60 = vsel %vm665_vm3, %v1221_v32, 0.0 }
 0x10e   :  { %v971_v49 = vadd.f32 %v970_v41, %v969_v36  ;;  %v772_v51 = vadd.f32 %v771_v44, %v770_v35  ;;  %v976_v2 = vsel %vm665_vm3, %v894_v55, 0.0 }
 0x10f   :  { %v972_v56 = vsel %vm665_vm3, %v892_v46, 0.0 }
 0x110   :  { %v774_v57 = vadd.f32 %v773_v54, %v772_v51  ;;  %v973_v58 = vadd.f32 %v972_v56, %v971_v49 }
 0x111   :  { %v1224_v61 = vpop.f32.mrb[20].mxu0  ;;  %v1762_v8 = vpop.f32.mrb[20].mxu1 }
 0x112   :  { %v975_v62 = vadd.f32 %v974_v59, %v973_v58  ;;  %688 = vst.msk [vmem:[%s2087_s2 + $0xb0] sm:$0xff] %vm665_vm3, %v1224_v61  ;;  %v490_v63 = vpop.f32.mrb[21].mxu0  ;;  %v776_v0 = vadd.f32 %v775_v60, %v774_v57  ;;  %720 = vst.msk [vmem:[%s2087_s2 + $0x1b0] sm:$0xff] %vm665_vm3, %v1762_v8  ;;  %v1773_v15 = vpop.f32.mrb[21].mxu1  ;;  %v897_v18 = vmul.f32 %v1224_v61, %v1224_v61  ;;  %v781_v26 = vsel %vm665_vm3, %v1224_v61, 0.0 }
 0x113   :  { %686 = vst.msk [vmem:[%s2087_s2 + $0xa0] sm:$0xff] %vm665_vm3, %v490_v63  ;;  %v777_v3 = vsel %vm665_vm3, %v490_v63, 0.0  ;;  %v895_v4 = vmul.f32 %v490_v63, %v490_v63  ;;  %v1225_v7 = vpop.f32.mrb[22].mxu0  ;;  %718 = vst.msk [vmem:[%s2087_s2 + $0x1a0] sm:$0xff] %vm665_vm3, %v1773_v15  ;;  %v1786_v22 = vpop.f32.mrb[22].mxu1 }
 0x114   :  { %v778_v10 = vadd.f32 %v777_v3, %v776_v0  ;;  %v977_v11 = vadd.f32 %v976_v2, %v975_v62  ;;  %689 = vst.msk [vmem:[%s2087_s2 + $0xb8] sm:$0xff] %vm665_vm3, %v1225_v7  ;;  %v493_v13 = vpop.f32.mrb[23].mxu0  ;;  %721 = vst.msk [vmem:[%s2087_s2 + $0x1b8] sm:$0xff] %vm665_vm3, %v1786_v22  ;;  %v1793_v25 = vpop.f32.mrb[23].mxu1  ;;  %v898_v27 = vmul.f32 %v1225_v7, %v1225_v7  ;;  %v982_v31 = vsel %vm665_vm3, %v897_v18, 0.0 }
 0x115   :  { %v978_v19 = vsel %vm665_vm3, %v895_v4, 0.0  ;;  %687 = vst.msk [vmem:[%s2087_s2 + $0xa8] sm:$0xff] %vm665_vm3, %v493_v13  ;;  %v779_v20 = vsel %vm665_vm3, %v493_v13, 0.0  ;;  %v896_v21 = vmul.f32 %v493_v13, %v493_v13  ;;  %719 = vst.msk [vmem:[%s2087_s2 + $0x1a8] sm:$0xff] %vm665_vm3, %v1793_v25  ;;  %v783_v32 = vsel %vm665_vm3, %v1225_v7, 0.0 }
 0x116   :  { %v979_v23 = vadd.f32 %v978_v19, %v977_v11  ;;  %v780_v24 = vadd.f32 %v779_v20, %v778_v10  ;;  %v984_v41 = vsel %vm665_vm3, %v898_v27, 0.0 }
 0x117   :  { %v980_v28 = vsel %vm665_vm3, %v896_v21, 0.0 }
 0x118   :  { %v782_v29 = vadd.f32 %v781_v26, %v780_v24  ;;  %v981_v30 = vadd.f32 %v980_v28, %v979_v23 }
 0x119   :  { %v1228_v35 = vpop.f32.mrb[24].mxu0  ;;  %v1814_v51 = vpop.f32.mrb[24].mxu1 }
 0x11a   :  { %v983_v36 = vadd.f32 %v982_v31, %v981_v30  ;;  %692 = vst.msk [vmem:[%s2087_s2 + $0xd0] sm:$0xff] %vm665_vm3, %v1228_v35  ;;  %v506_v38 = vpop.f32.mrb[25].mxu0  ;;  %v784_v40 = vadd.f32 %v783_v32, %v782_v29  ;;  %724 = vst.msk [vmem:[%s2087_s2 + $0x1d0] sm:$0xff] %vm665_vm3, %v1814_v51  ;;  %v1825_v57 = vpop.f32.mrb[25].mxu1  ;;  %v901_v58 = vmul.f32 %v1228_v35, %v1228_v35  ;;  %v789_v3 = vsel %vm665_vm3, %v1228_v35, 0.0 }
 0x11b   :  { %690 = vst.msk [vmem:[%s2087_s2 + $0xc0] sm:$0xff] %vm665_vm3, %v506_v38  ;;  %v785_v44 = vsel %vm665_vm3, %v506_v38, 0.0  ;;  %v899_v46 = vmul.f32 %v506_v38, %v506_v38  ;;  %v1229_v49 = vpop.f32.mrb[26].mxu0  ;;  %722 = vst.msk [vmem:[%s2087_s2 + $0x1c0] sm:$0xff] %vm665_vm3, %v1825_v57  ;;  %v1838_v62 = vpop.f32.mrb[26].mxu1 }
 0x11c   :  { %v786_v54 = vadd.f32 %v785_v44, %v784_v40  ;;  %v985_v55 = vadd.f32 %v984_v41, %v983_v36  ;;  %693 = vst.msk [vmem:[%s2087_s2 + $0xd8] sm:$0xff] %vm665_vm3, %v1229_v49  ;;  %v509_v56 = vpop.f32.mrb[27].mxu0  ;;  %725 = vst.msk [vmem:[%s2087_s2 + $0x1d8] sm:$0xff] %vm665_vm3, %v1838_v62  ;;  %v1845_v2 = vpop.f32.mrb[27].mxu1  ;;  %v902_v4 = vmul.f32 %v1229_v49, %v1229_v49  ;;  %v990_v13 = vsel %vm665_vm3, %v901_v58, 0.0 }
 0x11d   :  { %v986_v59 = vsel %vm665_vm3, %v899_v46, 0.0  ;;  %691 = vst.msk [vmem:[%s2087_s2 + $0xc8] sm:$0xff] %vm665_vm3, %v509_v56  ;;  %v787_v60 = vsel %vm665_vm3, %v509_v56, 0.0  ;;  %v900_v61 = vmul.f32 %v509_v56, %v509_v56  ;;  %723 = vst.msk [vmem:[%s2087_s2 + $0x1c8] sm:$0xff] %vm665_vm3, %v1845_v2  ;;  %v791_v18 = vsel %vm665_vm3, %v1229_v49, 0.0 }
 0x11e   :  { %v987_v63 = vadd.f32 %v986_v59, %v985_v55  ;;  %v788_v0 = vadd.f32 %v787_v60, %v786_v54  ;;  %v992_v24 = vsel %vm665_vm3, %v902_v4, 0.0  ;;  %v907_v59 = vmul.f32 %v1512_v45, %v1512_v45 }
 0x11f   :  { %v988_v7 = vsel %vm665_vm3, %v900_v61, 0.0 }
 0x120   :  { %v790_v10 = vadd.f32 %v789_v3, %v788_v0  ;;  %v989_v11 = vadd.f32 %v988_v7, %v987_v63  ;;  %v801_v3 = vsel %vm665_vm3, %v1512_v45, 0.0  ;;  %v805_v45 = vsel %vm665_vm3, %v1501_v43, 0.0 }
 0x121   :  { %v1232_v19 = vpop.f32.mrb[28].mxu0  ;;  %v1866_v29 = vpop.f32.mrb[28].mxu1 }
 0x122   :  { %v991_v20 = vadd.f32 %v990_v13, %v989_v11  ;;  %696 = vst.msk [vmem:[%s2087_s2 + $0xf0] sm:$0xff] %vm665_vm3, %v1232_v19  ;;  %v522_v21 = vpop.f32.mrb[29].mxu0  ;;  %v792_v23 = vadd.f32 %v791_v18, %v790_v10  ;;  %728 = vst.msk [vmem:[%s2087_s2 + $0x1f0] sm:$0xff] %vm665_vm3, %v1866_v29  ;;  %v1877_v35 = vpop.f32.mrb[29].mxu1  ;;  %v905_v36 = vmul.f32 %v1232_v19, %v1232_v19  ;;  %v797_v55 = vsel %vm665_vm3, %v1232_v19, 0.0 }
 0x123   :  { %694 = vst.msk [vmem:[%s2087_s2 + $0xe0] sm:$0xff] %vm665_vm3, %v522_v21  ;;  %v793_v26 = vsel %vm665_vm3, %v522_v21, 0.0  ;;  %v903_v27 = vmul.f32 %v522_v21, %v522_v21  ;;  %v1233_v28 = vpop.f32.mrb[30].mxu0  ;;  %726 = vst.msk [vmem:[%s2087_s2 + $0x1e0] sm:$0xff] %vm665_vm3, %v1877_v35  ;;  %v1890_v44 = vpop.f32.mrb[30].mxu1  ;;  %v1002_v11 = vsel %vm665_vm3, %v907_v59, 0.0  ;;  %v908_v13 = vmul.f32 %v1532_v52, %v1532_v52 }
 0x124   :  { %v794_v30 = vadd.f32 %v793_v26, %v792_v23  ;;  %v993_v31 = vadd.f32 %v992_v24, %v991_v20  ;;  %697 = vst.msk [vmem:[%s2087_s2 + $0xf8] sm:$0xff] %vm665_vm3, %v1233_v28  ;;  %v525_v32 = vpop.f32.mrb[31].mxu0  ;;  %729 = vst.msk [vmem:[%s2087_s2 + $0x1f8] sm:$0xff] %vm665_vm3, %v1890_v44  ;;  %v1897_v54 = vpop.f32.mrb[31].mxu1  ;;  %v906_v56 = vmul.f32 %v1233_v28, %v1233_v28  ;;  %v998_v63 = vsel %vm665_vm3, %v905_v36, 0.0 }
 0x125   :  { %v994_v38 = vsel %vm665_vm3, %v903_v27, 0.0  ;;  %695 = vst.msk [vmem:[%s2087_s2 + $0xe8] sm:$0xff] %vm665_vm3, %v525_v32  ;;  %v795_v40 = vsel %vm665_vm3, %v525_v32, 0.0  ;;  %v904_v41 = vmul.f32 %v525_v32, %v525_v32  ;;  %727 = vst.msk [vmem:[%s2087_s2 + $0x1e8] sm:$0xff] %vm665_vm3, %v1897_v54  ;;  %v799_v0 = vsel %vm665_vm3, %v1233_v28, 0.0 }
 0x126   :  { %v995_v46 = vadd.f32 %v994_v38, %v993_v31  ;;  %v796_v49 = vadd.f32 %v795_v40, %v794_v30  ;;  %v1000_v10 = vsel %vm665_vm3, %v906_v56, 0.0  ;;  %v909_v20 = vmul.f32 %v1501_v43, %v1501_v43 }
 0x127   :  { %v996_v58 = vsel %vm665_vm3, %v904_v41, 0.0  ;;  %v803_v21 = vsel %vm665_vm3, %v1532_v52, 0.0  ;;  %v910_v26 = vmul.f32 %v1525_v50, %v1525_v50  ;;  %v1004_v27 = vsel %vm665_vm3, %v908_v13, 0.0 }
 0x128   :  { %v798_v60 = vadd.f32 %v797_v55, %v796_v49  ;;  %v997_v61 = vadd.f32 %v996_v58, %v995_v46  ;;  %v911_v28 = vmul.f32 %v1565_v9, %v1565_v9  ;;  %v1006_v32 = vsel %vm665_vm3, %v909_v20, 0.0 }
 0x129   :  { %v807_v52 = vsel %vm665_vm3, %v1525_v50, 0.0  ;;  %v809_v36 = vsel %vm665_vm3, %v1565_v9, 0.0  ;;  %v1008_v40 = vsel %vm665_vm3, %v910_v26, 0.0  ;;  %v912_v46 = vmul.f32 %v1585_v17, %v1585_v17 }
 0x12a   :  { %v999_v4 = vadd.f32 %v998_v63, %v997_v61  ;;  %v800_v7 = vadd.f32 %v799_v0, %v798_v60  ;;  %v1010_v41 = vsel %vm665_vm3, %v911_v28, 0.0  ;;  %v913_v56 = vmul.f32 %v1554_v5, %v1554_v5 }
 0x12b   :  { %v811_v50 = vsel %vm665_vm3, %v1585_v17, 0.0  ;;  %v813_v9 = vsel %vm665_vm3, %v1554_v5, 0.0  ;;  %v914_v60 = vmul.f32 %v1578_v14, %v1578_v14  ;;  %v1012_v61 = vsel %vm665_vm3, %v912_v46, 0.0 }
 0x12c   :  { %v802_v18 = vadd.f32 %v801_v3, %v800_v7  ;;  %v1001_v19 = vadd.f32 %v1000_v10, %v999_v4  ;;  %v915_v63 = vmul.f32 %v1617_v37, %v1617_v37  ;;  %v1014_v4 = vsel %vm665_vm3, %v913_v56, 0.0 }
 0x12d   :  { %v815_v17 = vsel %vm665_vm3, %v1578_v14, 0.0  ;;  %v817_v7 = vsel %vm665_vm3, %v1617_v37, 0.0  ;;  %v819_v14 = vsel %vm665_vm3, %v1637_v47, 0.0  ;;  %v821_v37 = vsel %vm665_vm3, %v1606_v33, 0.0 }
 0x12e   :  { %v1003_v23 = vadd.f32 %v1002_v11, %v1001_v19  ;;  %v804_v24 = vadd.f32 %v803_v21, %v802_v18  ;;  %v1016_v11 = vsel %vm665_vm3, %v914_v60, 0.0  ;;  %v1018_v13 = vsel %vm665_vm3, %v915_v63, 0.0 }
 0x12f   :  { %v916_v18 = vmul.f32 %v1637_v47, %v1637_v47  ;;  %v917_v21 = vmul.f32 %v1606_v33, %v1606_v33  ;;  %v823_v47 = vsel %vm665_vm3, %v1630_v42, 0.0  ;;  %v921_v46 = vmul.f32 %v1658_v1, %v1658_v1 }
 0x130   :  { %v806_v30 = vadd.f32 %v805_v45, %v804_v24  ;;  %v1005_v31 = vadd.f32 %v1004_v27, %v1003_v23  ;;  %v918_v45 = vmul.f32 %v1630_v42, %v1630_v42  ;;  %v919_v27 = vmul.f32 %v1669_v6, %v1669_v6 }
 0x131   :  { %v1020_v26 = vsel %vm665_vm3, %v916_v18, 0.0  ;;  %v827_v42 = vsel %vm665_vm3, %v1689_v16, 0.0  ;;  %v922_v56 = vmul.f32 %v1682_v12, %v1682_v12  ;;  %v1030_v60 = vsel %vm665_vm3, %v921_v46, 0.0 }
 0x132   :  { %v1007_v38 = vadd.f32 %v1006_v32, %v1005_v31  ;;  %v808_v43 = vadd.f32 %v807_v52, %v806_v30  ;;  %v1022_v31 = vsel %vm665_vm3, %v917_v21, 0.0  ;;  %v825_v32 = vsel %vm665_vm3, %v1669_v6, 0.0 }
 0x133   :  { %v829_v6 = vsel %vm665_vm3, %v1658_v1, 0.0 }
 0x134   :  { %v810_v49 = vadd.f32 %v809_v36, %v808_v43  ;;  %v1009_v55 = vadd.f32 %v1008_v40, %v1007_v38  ;;  %v1024_v36 = vsel %vm665_vm3, %v918_v45, 0.0  ;;  %v1026_v38 = vsel %vm665_vm3, %v919_v27, 0.0 }
 0x135   :  { %v920_v43 = vmul.f32 %v1689_v16, %v1689_v16  ;;  %v831_v16 = vsel %vm665_vm3, %v1682_v12, 0.0  ;;  %v835_v12 = vsel %vm665_vm3, %v1741_v53, 0.0 }
 0x136   :  { %v1011_v58 = vadd.f32 %v1010_v41, %v1009_v55  ;;  %v812_v59 = vadd.f32 %v811_v50, %v810_v49 }
 0x137   :  { %v1028_v50 = vsel %vm665_vm3, %v920_v43, 0.0 }
 0x138   :  { %v814_v0 = vadd.f32 %v813_v9, %v812_v59  ;;  %v1013_v3 = vadd.f32 %v1012_v61, %v1011_v58  ;;  %v923_v58 = vmul.f32 %v1721_v39, %v1721_v39  ;;  %v833_v61 = vsel %vm665_vm3, %v1721_v39, 0.0 }
 0x139   :  { %v837_v39 = vsel %vm665_vm3, %v1710_v34, 0.0 }
 0x13a   :  { %v1015_v10 = vadd.f32 %v1014_v4, %v1013_v3  ;;  %v816_v5 = vadd.f32 %v815_v17, %v814_v0  ;;  %v1032_v0 = vsel %vm665_vm3, %v922_v56, 0.0  ;;  %v1034_v3 = vsel %vm665_vm3, %v923_v58, 0.0 }
 0x13b   :  { %v924_v4 = vmul.f32 %v1741_v53, %v1741_v53  ;;  %v839_v53 = vsel %vm665_vm3, %v1734_v48, 0.0  ;;  %v933_v56 = vmul.f32 %v1814_v51, %v1814_v51 }
 0x13c   :  { %v818_v19 = vadd.f32 %v817_v7, %v816_v5  ;;  %v1017_v20 = vadd.f32 %v1016_v11, %v1015_v10  ;;  %v925_v10 = vmul.f32 %v1710_v34, %v1710_v34 }
 0x13d   :  { %v1036_v18 = vsel %vm665_vm3, %v924_v4, 0.0 }
 0x13e   :  { %v1019_v23 = vadd.f32 %v1018_v13, %v1017_v20  ;;  %v820_v24 = vadd.f32 %v819_v14, %v818_v19  ;;  %v926_v13 = vmul.f32 %v1734_v48, %v1734_v48  ;;  %v927_v19 = vmul.f32 %v1773_v15, %v1773_v15 }
 0x13f   :  { %v1038_v14 = vsel %vm665_vm3, %v925_v10, 0.0  ;;  %v843_v48 = vsel %vm665_vm3, %v1793_v25, 0.0 }
 0x140   :  { %v822_v28 = vadd.f32 %v821_v37, %v820_v24  ;;  %v1021_v30 = vadd.f32 %v1020_v26, %v1019_v23  ;;  %v841_v23 = vsel %vm665_vm3, %v1773_v15, 0.0  ;;  %v1040_v37 = vsel %vm665_vm3, %v926_v13, 0.0 }
 0x141   :  { %v1042_v45 = vsel %vm665_vm3, %v927_v19, 0.0  ;;  %v928_v26 = vmul.f32 %v1793_v25, %v1793_v25  ;;  %v845_v15 = vsel %vm665_vm3, %v1762_v8, 0.0  ;;  %v847_v25 = vsel %vm665_vm3, %v1786_v22, 0.0 }
 0x142   :  { %v1023_v52 = vadd.f32 %v1022_v31, %v1021_v30  ;;  %v824_v33 = vadd.f32 %v823_v47, %v822_v28  ;;  %v929_v30 = vmul.f32 %v1762_v8, %v1762_v8 }
 0x144   :  { %v826_v40 = vadd.f32 %v825_v32, %v824_v33  ;;  %v1025_v41 = vadd.f32 %v1024_v36, %v1023_v52  ;;  %v930_v32 = vmul.f32 %v1786_v22, %v1786_v22  ;;  %v1044_v52 = vsel %vm665_vm3, %v928_v26, 0.0 }
 0x145   :  { %v931_v33 = vmul.f32 %v1825_v57, %v1825_v57  ;;  %v1046_v43 = vsel %vm665_vm3, %v929_v30, 0.0  ;;  %v851_v22 = vsel %vm665_vm3, %v1845_v2, 0.0 }
 0x146   :  { %v1027_v49 = vadd.f32 %v1026_v38, %v1025_v41  ;;  %v828_v55 = vadd.f32 %v827_v42, %v826_v40  ;;  %v849_v40 = vsel %vm665_vm3, %v1825_v57, 0.0  ;;  %v1048_v46 = vsel %vm665_vm3, %v930_v32, 0.0 }
 0x147   :  { %v1050_v42 = vsel %vm665_vm3, %v931_v33, 0.0  ;;  %v853_v57 = vsel %vm665_vm3, %v1814_v51, 0.0 }
 0x148   :  { %v830_v59 = vadd.f32 %v829_v6, %v828_v55  ;;  %v1029_v9 = vadd.f32 %v1028_v50, %v1027_v49  ;;  %v932_v49 = vmul.f32 %v1845_v2, %v1845_v2  ;;  %v855_v2 = vsel %vm665_vm3, %v1838_v62, 0.0 }
 0x14a   :  { %v1031_v63 = vadd.f32 %v1030_v60, %v1029_v9  ;;  %v832_v1 = vadd.f32 %v831_v16, %v830_v59  ;;  %v934_v59 = vmul.f32 %v1838_v62, %v1838_v62  ;;  %v1052_v9 = vsel %vm665_vm3, %v932_v49, 0.0 }
 0x14b   :  { %v935_v60 = vmul.f32 %v1877_v35, %v1877_v35  ;;  %v859_v62 = vsel %vm665_vm3, %v1897_v54, 0.0 }
 0x14c   :  { %v834_v17 = vadd.f32 %v833_v61, %v832_v1  ;;  %v1033_v7 = vadd.f32 %v1032_v0, %v1031_v63  ;;  %v1054_v63 = vsel %vm665_vm3, %v933_v56, 0.0  ;;  %v857_v1 = vsel %vm665_vm3, %v1877_v35, 0.0 }
 0x14d   :  { %v1058_v4 = vsel %vm665_vm3, %v935_v60, 0.0  ;;  %v861_v35 = vsel %vm665_vm3, %v1866_v29, 0.0 }
 0x14e   :  { %v1035_v5 = vadd.f32 %v1034_v3, %v1033_v7  ;;  %v836_v11 = vadd.f32 %v835_v12, %v834_v17  ;;  %v1056_v3 = vsel %vm665_vm3, %v934_v59, 0.0  ;;  %v936_v17 = vmul.f32 %v1897_v54, %v1897_v54 }
 0x14f   :  { %v937_v12 = vmul.f32 %v1866_v29, %v1866_v29 }
 0x150   :  { %v838_v20 = vadd.f32 %v837_v39, %v836_v11  ;;  %v1037_v21 = vadd.f32 %v1036_v18, %v1035_v5  ;;  %v938_v39 = vmul.f32 %v1890_v44, %v1890_v44  ;;  %v1060_v13 = vsel %vm665_vm3, %v936_v17, 0.0 }
 0x152   :  { %v1039_v24 = vadd.f32 %v1038_v14, %v1037_v21  ;;  %v840_v34 = vadd.f32 %v839_v53, %v838_v20  ;;  %v1062_v20 = vsel %vm665_vm3, %v937_v12, 0.0  ;;  %v863_v21 = vsel %vm665_vm3, %v1890_v44, 0.0 }
 0x153   :  { %v1064_v54 = vsel %vm665_vm3, %v938_v39, 0.0 }
 0x154   :  { %v842_v27 = vadd.f32 %v841_v23, %v840_v34  ;;  %v1041_v28 = vadd.f32 %v1040_v37, %v1039_v24 }
 0x156   :  { %v1043_v31 = vadd.f32 %v1042_v45, %v1041_v28  ;;  %v844_v47 = vadd.f32 %v843_v48, %v842_v27  ;;  %v737_v48 = vld [vmem:[%s2085_s3] sm:$0x1] }
 0x158   :  { %v846_v36 = vadd.f32 %v845_v15, %v844_v47  ;;  %v1045_v38 = vadd.f32 %v1044_v52, %v1043_v31  ;;  %v874_v47 = vld [vmem:[%s2086_s4] sm:$0x1] }
 0x15a   :  { %v1047_v41 = vadd.f32 %v1046_v43, %v1045_v38  ;;  %v848_v8 = vadd.f32 %v847_v25, %v846_v36 }
 0x15c   :  { %v850_v55 = vadd.f32 %v849_v40, %v848_v8  ;;  %v1049_v6 = vadd.f32 %v1048_v46, %v1047_v41 }
 0x15e   :  { %v1051_v50 = vadd.f32 %v1050_v42, %v1049_v6  ;;  %v852_v58 = vadd.f32 %v851_v22, %v850_v55 }
 0x160   :  { %v854_v16 = vadd.f32 %v853_v57, %v852_v58  ;;  %v1053_v61 = vadd.f32 %v1052_v9, %v1051_v50 }
 0x162   :  { %v1055_v0 = vadd.f32 %v1054_v63, %v1053_v61  ;;  %v856_v51 = vadd.f32 %v855_v2, %v854_v16 }
 0x164   :  { %v858_v7 = vadd.f32 %v857_v1, %v856_v51  ;;  %v1057_v10 = vadd.f32 %v1056_v3, %v1055_v0 }
 0x166   :  { %v1059_v5 = vadd.f32 %v1058_v4, %v1057_v10  ;;  %v860_v11 = vadd.f32 %v859_v62, %v858_v7 }
 0x168   :  { %v862_v18 = vadd.f32 %v861_v35, %v860_v11  ;;  %v1061_v19 = vadd.f32 %v1060_v13, %v1059_v5 }
 0x16a   :  { %v864_v14 = vadd.f32 %v863_v21, %v862_v18  ;;  %v1063_v53 = vadd.f32 %v1062_v20, %v1061_v19 }
 0x16c   :  { %v865_v23 = vrot.slane %v864_v14, 4  ;;  %v1065_v24 = vadd.f32 %v1064_v54, %v1063_v53 }
 0x16e   :  { %v866_v34 = vadd.f32 %v865_v23, %v864_v14  ;;  %v1066_v29 = vrot.slane %v1065_v24, 4 }
 0x170   :  { %v867_v37 = vrot.slane %v866_v34, 2  ;;  %v1067_v45 = vadd.f32 %v1066_v29, %v1065_v24 }
 0x172   :  { %v868_v26 = vadd.f32 %v867_v37, %v866_v34  ;;  %v1068_v27 = vrot.slane %v1067_v45, 2 }
 0x174   :  { %v869_v28 = vrot.slane %v868_v26, 1  ;;  %v1069_v30 = vadd.f32 %v1068_v27, %v1067_v45 }
 0x176   :  { %v870_v31 = vadd.f32 %v869_v28, %v868_v26  ;;  %v1070_v44 = vrot.slane %v1069_v30, 1 }
 0x178   :  { %v871_v15 = vadd.f32 %v870_v31, %v737_v48  ;;  %v1071_v32 = vadd.f32 %v1070_v44, %v1069_v30 }
 0x17a   :  { %873 = vst.msk [vmem:[%s2085_s3] sm:$0x1] %vm734_vm2, %v871_v15  ;;  %v1072_v52 = vadd.f32 %v1071_v32, %v874_v47 }
 0x17c   :  { %1073 = vst.msk [vmem:[%s2086_s4] sm:$0x1] %vm734_vm2, %v1072_v52 }

// kernel: attention_conv_block_l3.49
= control target key start
LH: loop header
LB: loop body
LE: loop exit
PB: predicated region body
PF: predicated region fallthrough
CT: control target
= control target key end

     0   :  { %vm337_vm0 = vcmask 1041408   ;;  %vm240_vm1 = vcmask 31744   ;;  %vm699_vm2 = vcmask 57344   ;;  %vm630_vm3 = vcmask 64512   ;;  %s2006_s1 = inlined_call_operand.vmem [shape: bf16[4,8], index: 1, kind: input, shape index: {}]   ;;  %s2007_s0 = inlined_call_operand.vmem [shape: bf16[512,4], index: 0, kind: input, shape index: {}]   ;;  %s2008_s3 = inlined_call_operand.vmem [shape: f32[1,8], index: 3, kind: output, shape index: {1}]   ;;  %s2009_s4 = inlined_call_operand.vmem [shape: f32[1,8], index: 4, kind: output, shape index: {2}]   ;;  %s2010_s2 = inlined_call_operand.vmem [shape: f32[512,8], index: 2, kind: output, shape index: {0}]  }
   0x1   :  { %v79_v0 = vld [vmem:[%s2006_s1] sm:$0x3]  ;;  %v1220_v3 = vld [vmem:[%s2007_s0 + $0x8] sm:$0xff]   ;;  %v1221_v4 = vld [vmem:[%s2007_s0 + $0x10] sm:$0xff]   ;;  %v1251_v34 = vmov 0.0  }
   0x2   :  { %1216 = vmatprep.subr.msk.bf16.mxu0 %vm337_vm0, %v79_v0  ;;  %v339_v1 = vsel %vm337_vm0, %v79_v0, 0  ;;  %v1219_v2 = vld [vmem:[%s2007_s0] sm:$0xff]   ;;  %1217 = vmatprep.subr.msk.bf16.mxu1 %vm337_vm0, %v79_v0  ;;  %v1222_v5 = vld [vmem:[%s2007_s0 + $0x18] sm:$0xff]   ;;  %v1224_v7 = vld [vmem:[%s2007_s0 + $0x28] sm:$0xff]   ;;  %700 = vst.msk [vmem:[%s2008_s3] sm:$0x1] %vm699_vm2, %v1251_v34 }
   0x3   :  { %1149 = vmatpush3.bf16.msra.mxu0 %v339_v1  ;;  %1215 = vmatpush3.bf16.msra.mxu1 %v339_v1  ;;  %v1223_v6 = vld [vmem:[%s2007_s0 + $0x20] sm:$0xff]   ;;  %v1225_v8 = vld [vmem:[%s2007_s0 + $0x30] sm:$0xff]   ;;  %v1236_v10 = vld [vmem:[%s2007_s0 + $0x88] sm:$0xff]   ;;  %701 = vst.msk [vmem:[%s2009_s4] sm:$0x1] %vm699_vm2, %v1251_v34 }
   0x4   :  { %1150 = vmatprep.mubr.msk.bf16.mxu0 %vm240_vm1, %v1219_v2  ;;  %v1235_v9 = vld [vmem:[%s2007_s0 + $0x80] sm:$0xff]   ;;  %v1237_v11 = vld [vmem:[%s2007_s0 + $0x90] sm:$0xff]   ;;  %v1226_v12 = vld [vmem:[%s2007_s0 + $0x38] sm:$0xff]  }
   0x5   :  { %1182 = vmatprep.mubr.msk.bf16.mxu1 %vm240_vm1, %v1235_v9  ;;  %v1238_v13 = vld [vmem:[%s2007_s0 + $0x98] sm:$0xff]   ;;  %v1239_v14 = vld [vmem:[%s2007_s0 + $0xa0] sm:$0xff]   ;;  %v1240_v16 = vld [vmem:[%s2007_s0 + $0xa8] sm:$0xff]  }
   0x6   :  { %1151 = vmatmul.mubr.msk.bf16.vlgmr.msra.gmra.mrb[0].mxu0 %vm240_vm1, %v1220_v3  ;;  %1183 = vmatmul.mubr.msk.bf16.vlgmr.msra.gmra.mrb[0].mxu1 %vm240_vm1, %v1236_v10  ;;  %v1227_v15 = vld [vmem:[%s2007_s0 + $0x40] sm:$0xff]   ;;  %v1228_v17 = vld [vmem:[%s2007_s0 + $0x48] sm:$0xff]   ;;  %v1241_v18 = vld [vmem:[%s2007_s0 + $0xb0] sm:$0xff]  }
   0x7   :  { %1154 = vmatprep.mubr.msk.bf16.mxu0 %vm240_vm1, %v1221_v4  ;;  %1186 = vmatprep.mubr.msk.bf16.mxu1 %vm240_vm1, %v1237_v11  ;;  %v1229_v19 = vld [vmem:[%s2007_s0 + $0x50] sm:$0xff]   ;;  %v1242_v20 = vld [vmem:[%s2007_s0 + $0xb8] sm:$0xff]   ;;  %v1243_v22 = vld [vmem:[%s2007_s0 + $0xc0] sm:$0xff]  }
   0x8   :  { %v1230_v21 = vld [vmem:[%s2007_s0 + $0x58] sm:$0xff]   ;;  %v1231_v23 = vld [vmem:[%s2007_s0 + $0x60] sm:$0xff]   ;;  %v1244_v24 = vld [vmem:[%s2007_s0 + $0xc8] sm:$0xff]  }
   0x9   :  { %v1232_v25 = vld [vmem:[%s2007_s0 + $0x68] sm:$0xff]   ;;  %v1245_v26 = vld [vmem:[%s2007_s0 + $0xd0] sm:$0xff]   ;;  %v1246_v28 = vld [vmem:[%s2007_s0 + $0xd8] sm:$0xff]  }
   0xa   :  { %v1233_v27 = vld [vmem:[%s2007_s0 + $0x70] sm:$0xff]   ;;  %v1234_v29 = vld [vmem:[%s2007_s0 + $0x78] sm:$0xff]   ;;  %v1247_v30 = vld [vmem:[%s2007_s0 + $0xe0] sm:$0xff]  }
   0xb   :  { %v1248_v31 = vld [vmem:[%s2007_s0 + $0xe8] sm:$0xff]   ;;  %v1249_v32 = vld [vmem:[%s2007_s0 + $0xf0] sm:$0xff]   ;;  %v1250_v33 = vld [vmem:[%s2007_s0 + $0xf8] sm:$0xff]  }
   0xe   :  { %1155 = vmatmul.mubr.msk.bf16.gmra.mrb[4].mxu0 %vm240_vm1, %v1222_v5  ;;  %1187 = vmatmul.mubr.msk.bf16.gmra.mrb[4].mxu1 %vm240_vm1, %v1238_v13 }
   0xf   :  { %1158 = vmatprep.mubr.msk.bf16.mxu0 %vm240_vm1, %v1223_v6  ;;  %1190 = vmatprep.mubr.msk.bf16.mxu1 %vm240_vm1, %v1239_v14 }
  0x16   :  { %1159 = vmatmul.mubr.msk.bf16.gmra.mrb[8].mxu0 %vm240_vm1, %v1224_v7  ;;  %1191 = vmatmul.mubr.msk.bf16.gmra.mrb[8].mxu1 %vm240_vm1, %v1240_v16 }
  0x17   :  { %1162 = vmatprep.mubr.msk.bf16.mxu0 %vm240_vm1, %v1225_v8  ;;  %1194 = vmatprep.mubr.msk.bf16.mxu1 %vm240_vm1, %v1241_v18 }
  0x1e   :  { %1163 = vmatmul.mubr.msk.bf16.gmra.mrb[12].mxu0 %vm240_vm1, %v1226_v12  ;;  %1195 = vmatmul.mubr.msk.bf16.gmra.mrb[12].mxu1 %vm240_vm1, %v1242_v20 }
  0x1f   :  { %1166 = vmatprep.mubr.msk.bf16.mxu0 %vm240_vm1, %v1227_v15  ;;  %1198 = vmatprep.mubr.msk.bf16.mxu1 %vm240_vm1, %v1243_v22 }
  0x26   :  { %1167 = vmatmul.mubr.msk.bf16.gmra.mrb[16].mxu0 %vm240_vm1, %v1228_v17  ;;  %1199 = vmatmul.mubr.msk.bf16.gmra.mrb[16].mxu1 %vm240_vm1, %v1244_v24 }
  0x27   :  { %1170 = vmatprep.mubr.msk.bf16.mxu0 %vm240_vm1, %v1229_v19  ;;  %1202 = vmatprep.mubr.msk.bf16.mxu1 %vm240_vm1, %v1245_v26 }
  0x2e   :  { %1171 = vmatmul.mubr.msk.bf16.gmra.mrb[20].mxu0 %vm240_vm1, %v1230_v21  ;;  %1203 = vmatmul.mubr.msk.bf16.gmra.mrb[20].mxu1 %vm240_vm1, %v1246_v28 }
  0x2f   :  { %1174 = vmatprep.mubr.msk.bf16.mxu0 %vm240_vm1, %v1231_v23  ;;  %1206 = vmatprep.mubr.msk.bf16.mxu1 %vm240_vm1, %v1247_v30 }
  0x36   :  { %1175 = vmatmul.mubr.msk.bf16.gmra.mrb[24].mxu0 %vm240_vm1, %v1232_v25  ;;  %1207 = vmatmul.mubr.msk.bf16.gmra.mrb[24].mxu1 %vm240_vm1, %v1248_v31 }
  0x37   :  { %1178 = vmatprep.mubr.msk.bf16.mxu0 %vm240_vm1, %v1233_v27  ;;  %1210 = vmatprep.mubr.msk.bf16.mxu1 %vm240_vm1, %v1249_v32 }
  0x3e   :  { %1179 = vmatmul.mubr.msk.bf16.gmra.mrb[28].mxu0 %vm240_vm1, %v1234_v29  ;;  %1211 = vmatmul.mubr.msk.bf16.gmra.mrb[28].mxu1 %vm240_vm1, %v1250_v33 }
  0xd9   :  { %v1152_v35 = vpop.f32.mrb[0].mxu0  ;;  %v1461_v11 = vpop.f32.mrb[0].mxu1 }
  0xda   :  { %633 = vst.msk [vmem:[%s2010_s2 + $0x10] sm:$0xff] %vm630_vm3, %v1152_v35  ;;  %v375_v36 = vpop.f32.mrb[1].mxu0  ;;  %v842_v40 = vmul.f32 %v1152_v35, %v1152_v35  ;;  %v706_v45 = vsel %vm630_vm3, %v1152_v35, 0.0  ;;  %665 = vst.msk [vmem:[%s2010_s2 + $0x110] sm:$0xff] %vm630_vm3, %v1461_v11  ;;  %v1470_v15 = vpop.f32.mrb[1].mxu1 }
  0xdb   :  { %631 = vst.msk [vmem:[%s2010_s2] sm:$0xff] %vm630_vm3, %v375_v36  ;;  %v840_v37 = vmul.f32 %v375_v36, %v375_v36  ;;  %v1153_v38 = vpop.f32.mrb[2].mxu0  ;;  %v703_v41 = vsel %vm630_vm3, %v375_v36, 0.0  ;;  %663 = vst.msk [vmem:[%s2010_s2 + $0x100] sm:$0xff] %vm630_vm3, %v1470_v15  ;;  %v1481_v19 = vpop.f32.mrb[2].mxu1 }
  0xdc   :  { %634 = vst.msk [vmem:[%s2010_s2 + $0x18] sm:$0xff] %vm630_vm3, %v1153_v38  ;;  %v378_v39 = vpop.f32.mrb[3].mxu0  ;;  %v843_v47 = vmul.f32 %v1153_v38, %v1153_v38  ;;  %v907_v51 = vsel %vm630_vm3, %v842_v40, 0.0  ;;  %v708_v52 = vsel %vm630_vm3, %v1153_v38, 0.0  ;;  %666 = vst.msk [vmem:[%s2010_s2 + $0x118] sm:$0xff] %vm630_vm3, %v1481_v19  ;;  %v1494_v24 = vpop.f32.mrb[3].mxu1 }
  0xdd   :  { %632 = vst.msk [vmem:[%s2010_s2 + $0x8] sm:$0xff] %vm630_vm3, %v378_v39  ;;  %v704_v42 = vsel %vm630_vm3, %v378_v39, 0.0  ;;  %v841_v43 = vmul.f32 %v378_v39, %v378_v39  ;;  %v904_v46 = vsel %vm630_vm3, %v840_v37, 0.0  ;;  %664 = vst.msk [vmem:[%s2010_s2 + $0x108] sm:$0xff] %vm630_vm3, %v1494_v24 }
  0xde   :  { %v705_v44 = vadd.f32 %v704_v42, %v703_v41  ;;  %v909_v57 = vsel %vm630_vm3, %v843_v47, 0.0 }
  0xdf   :  { %v905_v48 = vsel %vm630_vm3, %v841_v43, 0.0 }
  0xe0   :  { %v707_v49 = vadd.f32 %v706_v45, %v705_v44  ;;  %v906_v50 = vadd.f32 %v905_v48, %v904_v46 }
  0xe1   :  { %v1156_v53 = vpop.f32.mrb[4].mxu0  ;;  %v1513_v39 = vpop.f32.mrb[4].mxu1 }
  0xe2   :  { %v908_v54 = vadd.f32 %v907_v51, %v906_v50  ;;  %637 = vst.msk [vmem:[%s2010_s2 + $0x30] sm:$0xff] %vm630_vm3, %v1156_v53  ;;  %v391_v55 = vpop.f32.mrb[5].mxu0  ;;  %v709_v56 = vadd.f32 %v708_v52, %v707_v49  ;;  %v846_v0 = vmul.f32 %v1156_v53, %v1156_v53  ;;  %v714_v6 = vsel %vm630_vm3, %v1156_v53, 0.0  ;;  %669 = vst.msk [vmem:[%s2010_s2 + $0x130] sm:$0xff] %vm630_vm3, %v1513_v39  ;;  %v1522_v43 = vpop.f32.mrb[5].mxu1 }
  0xe3   :  { %635 = vst.msk [vmem:[%s2010_s2 + $0x20] sm:$0xff] %vm630_vm3, %v391_v55  ;;  %v710_v58 = vsel %vm630_vm3, %v391_v55, 0.0  ;;  %v844_v59 = vmul.f32 %v391_v55, %v391_v55  ;;  %v1157_v60 = vpop.f32.mrb[6].mxu0  ;;  %667 = vst.msk [vmem:[%s2010_s2 + $0x120] sm:$0xff] %vm630_vm3, %v1522_v43  ;;  %v1533_v47 = vpop.f32.mrb[6].mxu1 }
  0xe4   :  { %v711_v61 = vadd.f32 %v710_v58, %v709_v56  ;;  %v910_v62 = vadd.f32 %v909_v57, %v908_v54  ;;  %638 = vst.msk [vmem:[%s2010_s2 + $0x38] sm:$0xff] %vm630_vm3, %v1157_v60  ;;  %v394_v63 = vpop.f32.mrb[7].mxu0  ;;  %v847_v7 = vmul.f32 %v1157_v60, %v1157_v60  ;;  %v915_v12 = vsel %vm630_vm3, %v846_v0, 0.0  ;;  %670 = vst.msk [vmem:[%s2010_s2 + $0x138] sm:$0xff] %vm630_vm3, %v1533_v47  ;;  %v1546_v52 = vpop.f32.mrb[7].mxu1 }
  0xe5   :  { %v911_v1 = vsel %vm630_vm3, %v844_v59, 0.0  ;;  %636 = vst.msk [vmem:[%s2010_s2 + $0x28] sm:$0xff] %vm630_vm3, %v394_v63  ;;  %v712_v2 = vsel %vm630_vm3, %v394_v63, 0.0  ;;  %v845_v3 = vmul.f32 %v394_v63, %v394_v63  ;;  %v716_v13 = vsel %vm630_vm3, %v1157_v60, 0.0  ;;  %668 = vst.msk [vmem:[%s2010_s2 + $0x128] sm:$0xff] %vm630_vm3, %v1546_v52 }
  0xe6   :  { %v912_v4 = vadd.f32 %v911_v1, %v910_v62  ;;  %v713_v5 = vadd.f32 %v712_v2, %v711_v61  ;;  %v917_v20 = vsel %vm630_vm3, %v847_v7, 0.0 }
  0xe7   :  { %v913_v8 = vsel %vm630_vm3, %v845_v3, 0.0 }
  0xe8   :  { %v715_v9 = vadd.f32 %v714_v6, %v713_v5  ;;  %v914_v10 = vadd.f32 %v913_v8, %v912_v4 }
  0xe9   :  { %v1160_v14 = vpop.f32.mrb[8].mxu0  ;;  %v1565_v3 = vpop.f32.mrb[8].mxu1 }
  0xea   :  { %v916_v16 = vadd.f32 %v915_v12, %v914_v10  ;;  %641 = vst.msk [vmem:[%s2010_s2 + $0x50] sm:$0xff] %vm630_vm3, %v1160_v14  ;;  %v407_v17 = vpop.f32.mrb[9].mxu0  ;;  %v717_v18 = vadd.f32 %v716_v13, %v715_v9  ;;  %v850_v28 = vmul.f32 %v1160_v14, %v1160_v14  ;;  %v722_v34 = vsel %vm630_vm3, %v1160_v14, 0.0  ;;  %673 = vst.msk [vmem:[%s2010_s2 + $0x150] sm:$0xff] %vm630_vm3, %v1565_v3  ;;  %v1574_v7 = vpop.f32.mrb[9].mxu1 }
  0xeb   :  { %639 = vst.msk [vmem:[%s2010_s2 + $0x40] sm:$0xff] %vm630_vm3, %v407_v17  ;;  %v718_v21 = vsel %vm630_vm3, %v407_v17, 0.0  ;;  %v848_v22 = vmul.f32 %v407_v17, %v407_v17  ;;  %v1161_v23 = vpop.f32.mrb[10].mxu0  ;;  %671 = vst.msk [vmem:[%s2010_s2 + $0x140] sm:$0xff] %vm630_vm3, %v1574_v7  ;;  %v1585_v12 = vpop.f32.mrb[10].mxu1 }
  0xec   :  { %v719_v25 = vadd.f32 %v718_v21, %v717_v18  ;;  %v918_v26 = vadd.f32 %v917_v20, %v916_v16  ;;  %642 = vst.msk [vmem:[%s2010_s2 + $0x58] sm:$0xff] %vm630_vm3, %v1161_v23  ;;  %v410_v27 = vpop.f32.mrb[11].mxu0  ;;  %v851_v35 = vmul.f32 %v1161_v23, %v1161_v23  ;;  %v923_v40 = vsel %vm630_vm3, %v850_v28, 0.0  ;;  %674 = vst.msk [vmem:[%s2010_s2 + $0x158] sm:$0xff] %vm630_vm3, %v1585_v12  ;;  %v1598_v18 = vpop.f32.mrb[11].mxu1 }
  0xed   :  { %v919_v29 = vsel %vm630_vm3, %v848_v22, 0.0  ;;  %640 = vst.msk [vmem:[%s2010_s2 + $0x48] sm:$0xff] %vm630_vm3, %v410_v27  ;;  %v720_v30 = vsel %vm630_vm3, %v410_v27, 0.0  ;;  %v849_v31 = vmul.f32 %v410_v27, %v410_v27  ;;  %v724_v41 = vsel %vm630_vm3, %v1161_v23, 0.0  ;;  %672 = vst.msk [vmem:[%s2010_s2 + $0x148] sm:$0xff] %vm630_vm3, %v1598_v18 }
  0xee   :  { %v920_v32 = vadd.f32 %v919_v29, %v918_v26  ;;  %v721_v33 = vadd.f32 %v720_v30, %v719_v25  ;;  %v925_v48 = vsel %vm630_vm3, %v851_v35, 0.0 }
  0xef   :  { %v921_v36 = vsel %vm630_vm3, %v849_v31, 0.0 }
  0xf0   :  { %v723_v37 = vadd.f32 %v722_v34, %v721_v33  ;;  %v922_v38 = vadd.f32 %v921_v36, %v920_v32 }
  0xf1   :  { %v1164_v42 = vpop.f32.mrb[12].mxu0  ;;  %v1617_v35 = vpop.f32.mrb[12].mxu1 }
  0xf2   :  { %v924_v44 = vadd.f32 %v923_v40, %v922_v38  ;;  %645 = vst.msk [vmem:[%s2010_s2 + $0x70] sm:$0xff] %vm630_vm3, %v1164_v42  ;;  %v423_v45 = vpop.f32.mrb[13].mxu0  ;;  %v725_v46 = vadd.f32 %v724_v41, %v723_v37  ;;  %v854_v56 = vmul.f32 %v1164_v42, %v1164_v42  ;;  %v730_v62 = vsel %vm630_vm3, %v1164_v42, 0.0  ;;  %677 = vst.msk [vmem:[%s2010_s2 + $0x170] sm:$0xff] %vm630_vm3, %v1617_v35  ;;  %v1626_v40 = vpop.f32.mrb[13].mxu1 }
  0xf3   :  { %643 = vst.msk [vmem:[%s2010_s2 + $0x60] sm:$0xff] %vm630_vm3, %v423_v45  ;;  %v726_v49 = vsel %vm630_vm3, %v423_v45, 0.0  ;;  %v852_v50 = vmul.f32 %v423_v45, %v423_v45  ;;  %v1165_v51 = vpop.f32.mrb[14].mxu0  ;;  %675 = vst.msk [vmem:[%s2010_s2 + $0x160] sm:$0xff] %vm630_vm3, %v1626_v40  ;;  %v1637_v45 = vpop.f32.mrb[14].mxu1 }
  0xf4   :  { %v727_v53 = vadd.f32 %v726_v49, %v725_v46  ;;  %v926_v54 = vadd.f32 %v925_v48, %v924_v44  ;;  %646 = vst.msk [vmem:[%s2010_s2 + $0x78] sm:$0xff] %vm630_vm3, %v1165_v51  ;;  %v426_v55 = vpop.f32.mrb[15].mxu0  ;;  %v855_v63 = vmul.f32 %v1165_v51, %v1165_v51  ;;  %v931_v4 = vsel %vm630_vm3, %v854_v56, 0.0  ;;  %678 = vst.msk [vmem:[%s2010_s2 + $0x178] sm:$0xff] %vm630_vm3, %v1637_v45 }
  0xf5   :  { %v927_v57 = vsel %vm630_vm3, %v852_v50, 0.0  ;;  %644 = vst.msk [vmem:[%s2010_s2 + $0x68] sm:$0xff] %vm630_vm3, %v426_v55  ;;  %v728_v58 = vsel %vm630_vm3, %v426_v55, 0.0  ;;  %v853_v59 = vmul.f32 %v426_v55, %v426_v55  ;;  %v732_v5 = vsel %vm630_vm3, %v1165_v51, 0.0  ;;  %v1650_v51 = vpop.f32.mrb[15].mxu1 }
  0xf6   :  { %v928_v60 = vadd.f32 %v927_v57, %v926_v54  ;;  %v729_v61 = vadd.f32 %v728_v58, %v727_v53  ;;  %v933_v13 = vsel %vm630_vm3, %v855_v63, 0.0  ;;  %676 = vst.msk [vmem:[%s2010_s2 + $0x168] sm:$0xff] %vm630_vm3, %v1650_v51 }
  0xf7   :  { %v929_v0 = vsel %vm630_vm3, %v853_v59, 0.0 }
  0xf8   :  { %v731_v1 = vadd.f32 %v730_v62, %v729_v61  ;;  %v930_v2 = vadd.f32 %v929_v0, %v928_v60 }
  0xf9   :  { %v1168_v6 = vpop.f32.mrb[16].mxu0 }
  0xfa   :  { %v932_v8 = vadd.f32 %v931_v4, %v930_v2  ;;  %649 = vst.msk [vmem:[%s2010_s2 + $0x90] sm:$0xff] %vm630_vm3, %v1168_v6  ;;  %v439_v9 = vpop.f32.mrb[17].mxu0  ;;  %v733_v10 = vadd.f32 %v732_v5, %v731_v1  ;;  %v858_v23 = vmul.f32 %v1168_v6, %v1168_v6  ;;  %v738_v30 = vsel %vm630_vm3, %v1168_v6, 0.0  ;;  %v1669_v4 = vpop.f32.mrb[16].mxu1 }
  0xfb   :  { %647 = vst.msk [vmem:[%s2010_s2 + $0x80] sm:$0xff] %vm630_vm3, %v439_v9  ;;  %v734_v14 = vsel %vm630_vm3, %v439_v9, 0.0  ;;  %v856_v16 = vmul.f32 %v439_v9, %v439_v9  ;;  %v1169_v17 = vpop.f32.mrb[18].mxu0  ;;  %681 = vst.msk [vmem:[%s2010_s2 + $0x190] sm:$0xff] %vm630_vm3, %v1669_v4  ;;  %v1678_v9 = vpop.f32.mrb[17].mxu1 }
  0xfc   :  { %v735_v20 = vadd.f32 %v734_v14, %v733_v10  ;;  %v934_v21 = vadd.f32 %v933_v13, %v932_v8  ;;  %650 = vst.msk [vmem:[%s2010_s2 + $0x98] sm:$0xff] %vm630_vm3, %v1169_v17  ;;  %v442_v22 = vpop.f32.mrb[19].mxu0  ;;  %v859_v31 = vmul.f32 %v1169_v17, %v1169_v17  ;;  %v939_v36 = vsel %vm630_vm3, %v858_v23, 0.0  ;;  %679 = vst.msk [vmem:[%s2010_s2 + $0x180] sm:$0xff] %vm630_vm3, %v1678_v9 }
  0xfd   :  { %v935_v25 = vsel %vm630_vm3, %v856_v16, 0.0  ;;  %648 = vst.msk [vmem:[%s2010_s2 + $0x88] sm:$0xff] %vm630_vm3, %v442_v22  ;;  %v736_v26 = vsel %vm630_vm3, %v442_v22, 0.0  ;;  %v857_v27 = vmul.f32 %v442_v22, %v442_v22  ;;  %v740_v37 = vsel %vm630_vm3, %v1169_v17, 0.0  ;;  %v1689_v16 = vpop.f32.mrb[18].mxu1 }
  0xfe   :  { %v936_v28 = vadd.f32 %v935_v25, %v934_v21  ;;  %v737_v29 = vadd.f32 %v736_v26, %v735_v20  ;;  %v941_v46 = vsel %vm630_vm3, %v859_v31, 0.0  ;;  %682 = vst.msk [vmem:[%s2010_s2 + $0x198] sm:$0xff] %vm630_vm3, %v1689_v16  ;;  %v1702_v23 = vpop.f32.mrb[19].mxu1 }
  0xff   :  { %v937_v32 = vsel %vm630_vm3, %v857_v27, 0.0  ;;  %680 = vst.msk [vmem:[%s2010_s2 + $0x188] sm:$0xff] %vm630_vm3, %v1702_v23 }
 0x100   :  { %v739_v33 = vadd.f32 %v738_v30, %v737_v29  ;;  %v938_v34 = vadd.f32 %v937_v32, %v936_v28 }
 0x101   :  { %v1172_v38 = vpop.f32.mrb[20].mxu0 }
 0x102   :  { %v940_v41 = vadd.f32 %v939_v36, %v938_v34  ;;  %653 = vst.msk [vmem:[%s2010_s2 + $0xb0] sm:$0xff] %vm630_vm3, %v1172_v38  ;;  %v455_v42 = vpop.f32.mrb[21].mxu0  ;;  %v741_v44 = vadd.f32 %v740_v37, %v739_v33  ;;  %v862_v56 = vmul.f32 %v1172_v38, %v1172_v38  ;;  %v746_v62 = vsel %vm630_vm3, %v1172_v38, 0.0 }
 0x103   :  { %651 = vst.msk [vmem:[%s2010_s2 + $0xa0] sm:$0xff] %vm630_vm3, %v455_v42  ;;  %v742_v48 = vsel %vm630_vm3, %v455_v42, 0.0  ;;  %v860_v49 = vmul.f32 %v455_v42, %v455_v42  ;;  %v1173_v50 = vpop.f32.mrb[22].mxu0  ;;  %v1721_v42 = vpop.f32.mrb[20].mxu1 }
 0x104   :  { %v743_v53 = vadd.f32 %v742_v48, %v741_v44  ;;  %v942_v54 = vadd.f32 %v941_v46, %v940_v41  ;;  %654 = vst.msk [vmem:[%s2010_s2 + $0xb8] sm:$0xff] %vm630_vm3, %v1173_v50  ;;  %v458_v55 = vpop.f32.mrb[23].mxu0  ;;  %v863_v63 = vmul.f32 %v1173_v50, %v1173_v50  ;;  %v947_v5 = vsel %vm630_vm3, %v862_v56, 0.0  ;;  %685 = vst.msk [vmem:[%s2010_s2 + $0x1b0] sm:$0xff] %vm630_vm3, %v1721_v42 }
 0x105   :  { %v943_v57 = vsel %vm630_vm3, %v860_v49, 0.0  ;;  %652 = vst.msk [vmem:[%s2010_s2 + $0xa8] sm:$0xff] %vm630_vm3, %v458_v55  ;;  %v744_v58 = vsel %vm630_vm3, %v458_v55, 0.0  ;;  %v861_v59 = vmul.f32 %v458_v55, %v458_v55  ;;  %v748_v6 = vsel %vm630_vm3, %v1173_v50, 0.0  ;;  %v1730_v49 = vpop.f32.mrb[21].mxu1 }
 0x106   :  { %v944_v60 = vadd.f32 %v943_v57, %v942_v54  ;;  %v745_v61 = vadd.f32 %v744_v58, %v743_v53  ;;  %v949_v17 = vsel %vm630_vm3, %v863_v63, 0.0  ;;  %683 = vst.msk [vmem:[%s2010_s2 + $0x1a0] sm:$0xff] %vm630_vm3, %v1730_v49  ;;  %v1741_v55 = vpop.f32.mrb[22].mxu1 }
 0x107   :  { %v945_v0 = vsel %vm630_vm3, %v861_v59, 0.0  ;;  %686 = vst.msk [vmem:[%s2010_s2 + $0x1b8] sm:$0xff] %vm630_vm3, %v1741_v55 }
 0x108   :  { %v747_v1 = vadd.f32 %v746_v62, %v745_v61  ;;  %v946_v2 = vadd.f32 %v945_v0, %v944_v60  ;;  %v1754_v60 = vpop.f32.mrb[23].mxu1 }
 0x109   :  { %v1176_v8 = vpop.f32.mrb[24].mxu0  ;;  %684 = vst.msk [vmem:[%s2010_s2 + $0x1a8] sm:$0xff] %vm630_vm3, %v1754_v60 }
 0x10a   :  { %v948_v10 = vadd.f32 %v947_v5, %v946_v2  ;;  %657 = vst.msk [vmem:[%s2010_s2 + $0xd0] sm:$0xff] %vm630_vm3, %v1176_v8  ;;  %v471_v13 = vpop.f32.mrb[25].mxu0  ;;  %v749_v14 = vadd.f32 %v748_v6, %v747_v1  ;;  %v866_v28 = vmul.f32 %v1176_v8, %v1176_v8  ;;  %v754_v34 = vsel %vm630_vm3, %v1176_v8, 0.0 }
 0x10b   :  { %655 = vst.msk [vmem:[%s2010_s2 + $0xc0] sm:$0xff] %vm630_vm3, %v471_v13  ;;  %v750_v20 = vsel %vm630_vm3, %v471_v13, 0.0  ;;  %v864_v21 = vmul.f32 %v471_v13, %v471_v13  ;;  %v1177_v22 = vpop.f32.mrb[26].mxu0 }
 0x10c   :  { %v751_v25 = vadd.f32 %v750_v20, %v749_v14  ;;  %v950_v26 = vadd.f32 %v949_v17, %v948_v10  ;;  %658 = vst.msk [vmem:[%s2010_s2 + $0xd8] sm:$0xff] %vm630_vm3, %v1177_v22  ;;  %v474_v27 = vpop.f32.mrb[27].mxu0  ;;  %v867_v36 = vmul.f32 %v1177_v22, %v1177_v22  ;;  %v955_v44 = vsel %vm630_vm3, %v866_v28, 0.0 }
 0x10d   :  { %v951_v29 = vsel %vm630_vm3, %v864_v21, 0.0  ;;  %656 = vst.msk [vmem:[%s2010_s2 + $0xc8] sm:$0xff] %vm630_vm3, %v474_v27  ;;  %v752_v30 = vsel %vm630_vm3, %v474_v27, 0.0  ;;  %v865_v31 = vmul.f32 %v474_v27, %v474_v27  ;;  %v756_v46 = vsel %vm630_vm3, %v1177_v22, 0.0  ;;  %v1775_v22 = vpop.f32.mrb[24].mxu1 }
 0x10e   :  { %v952_v32 = vadd.f32 %v951_v29, %v950_v26  ;;  %v753_v33 = vadd.f32 %v752_v30, %v751_v25  ;;  %v957_v56 = vsel %vm630_vm3, %v867_v36, 0.0  ;;  %v872_v17 = vmul.f32 %v1470_v15, %v1470_v15  ;;  %689 = vst.msk [vmem:[%s2010_s2 + $0x1d0] sm:$0xff] %vm630_vm3, %v1775_v22  ;;  %v1786_v28 = vpop.f32.mrb[25].mxu1 }
 0x10f   :  { %v953_v37 = vsel %vm630_vm3, %v865_v31, 0.0  ;;  %v766_v27 = vsel %vm630_vm3, %v1470_v15, 0.0  ;;  %687 = vst.msk [vmem:[%s2010_s2 + $0x1c0] sm:$0xff] %vm630_vm3, %v1786_v28  ;;  %v1793_v31 = vpop.f32.mrb[26].mxu1 }
 0x110   :  { %v755_v38 = vadd.f32 %v754_v34, %v753_v33  ;;  %v954_v41 = vadd.f32 %v953_v37, %v952_v32  ;;  %v967_v32 = vsel %vm630_vm3, %v872_v17, 0.0  ;;  %v873_v33 = vmul.f32 %v1494_v24, %v1494_v24  ;;  %690 = vst.msk [vmem:[%s2010_s2 + $0x1d8] sm:$0xff] %vm630_vm3, %v1793_v31  ;;  %v1804_v34 = vpop.f32.mrb[27].mxu1 }
 0x111   :  { %v1180_v48 = vpop.f32.mrb[28].mxu0  ;;  %688 = vst.msk [vmem:[%s2010_s2 + $0x1c8] sm:$0xff] %vm630_vm3, %v1804_v34  ;;  %v778_v17 = vsel %vm630_vm3, %v1513_v39, 0.0 }
 0x112   :  { %v956_v50 = vadd.f32 %v955_v44, %v954_v41  ;;  %661 = vst.msk [vmem:[%s2010_s2 + $0xf0] sm:$0xff] %vm630_vm3, %v1180_v48  ;;  %v487_v53 = vpop.f32.mrb[29].mxu0  ;;  %v757_v54 = vadd.f32 %v756_v46, %v755_v38  ;;  %v870_v0 = vmul.f32 %v1180_v48, %v1180_v48  ;;  %v762_v10 = vsel %vm630_vm3, %v1180_v48, 0.0 }
 0x113   :  { %659 = vst.msk [vmem:[%s2010_s2 + $0xe0] sm:$0xff] %vm630_vm3, %v487_v53  ;;  %v758_v57 = vsel %vm630_vm3, %v487_v53, 0.0  ;;  %v868_v58 = vmul.f32 %v487_v53, %v487_v53  ;;  %v1181_v59 = vpop.f32.mrb[30].mxu0  ;;  %v874_v38 = vmul.f32 %v1461_v11, %v1461_v11  ;;  %v768_v41 = vsel %vm630_vm3, %v1494_v24, 0.0 }
 0x114   :  { %v759_v61 = vadd.f32 %v758_v57, %v757_v54  ;;  %v958_v62 = vadd.f32 %v957_v56, %v956_v50  ;;  %662 = vst.msk [vmem:[%s2010_s2 + $0xf8] sm:$0xff] %vm630_vm3, %v1181_v59  ;;  %v490_v63 = vpop.f32.mrb[31].mxu0  ;;  %v871_v13 = vmul.f32 %v1181_v59, %v1181_v59  ;;  %v963_v25 = vsel %vm630_vm3, %v870_v0, 0.0 }
 0x115   :  { %v959_v1 = vsel %vm630_vm3, %v868_v58, 0.0  ;;  %660 = vst.msk [vmem:[%s2010_s2 + $0xe8] sm:$0xff] %vm630_vm3, %v490_v63  ;;  %v760_v2 = vsel %vm630_vm3, %v490_v63, 0.0  ;;  %v869_v5 = vmul.f32 %v490_v63, %v490_v63  ;;  %v764_v26 = vsel %vm630_vm3, %v1181_v59, 0.0  ;;  %v1822_v58 = vpop.f32.mrb[28].mxu1 }
 0x116   :  { %v960_v6 = vadd.f32 %v959_v1, %v958_v62  ;;  %v761_v8 = vadd.f32 %v760_v2, %v759_v61  ;;  %v965_v15 = vsel %vm630_vm3, %v871_v13, 0.0  ;;  %v770_v48 = vsel %vm630_vm3, %v1461_v11, 0.0  ;;  %693 = vst.msk [vmem:[%s2010_s2 + $0x1f0] sm:$0xff] %vm630_vm3, %v1822_v58  ;;  %v1834_v61 = vpop.f32.mrb[29].mxu1 }
 0x117   :  { %v961_v14 = vsel %vm630_vm3, %v869_v5, 0.0  ;;  %v875_v50 = vmul.f32 %v1481_v19, %v1481_v19  ;;  %v969_v53 = vsel %vm630_vm3, %v873_v33, 0.0  ;;  %v876_v54 = vmul.f32 %v1522_v43, %v1522_v43  ;;  %691 = vst.msk [vmem:[%s2010_s2 + $0x1e0] sm:$0xff] %vm630_vm3, %v1834_v61 }
 0x118   :  { %v763_v20 = vadd.f32 %v762_v10, %v761_v8  ;;  %v962_v21 = vadd.f32 %v961_v14, %v960_v6  ;;  %v971_v59 = vsel %vm630_vm3, %v874_v38, 0.0  ;;  %v772_v24 = vsel %vm630_vm3, %v1481_v19, 0.0  ;;  %v1841_v19 = vpop.f32.mrb[30].mxu1 }
 0x119   :  { %v774_v11 = vsel %vm630_vm3, %v1522_v43, 0.0  ;;  %v973_v43 = vsel %vm630_vm3, %v875_v50, 0.0  ;;  %v975_v0 = vsel %vm630_vm3, %v876_v54, 0.0  ;;  %v877_v1 = vmul.f32 %v1546_v52, %v1546_v52  ;;  %694 = vst.msk [vmem:[%s2010_s2 + $0x1f8] sm:$0xff] %vm630_vm3, %v1841_v19  ;;  %v1852_v2 = vpop.f32.mrb[31].mxu1 }
 0x11a   :  { %v964_v29 = vadd.f32 %v963_v25, %v962_v21  ;;  %v765_v30 = vadd.f32 %v764_v26, %v763_v20  ;;  %692 = vst.msk [vmem:[%s2010_s2 + $0x1e8] sm:$0xff] %vm630_vm3, %v1852_v2  ;;  %v878_v8 = vmul.f32 %v1513_v39, %v1513_v39  ;;  %v776_v10 = vsel %vm630_vm3, %v1546_v52, 0.0 }
 0x11b   :  { %v879_v20 = vmul.f32 %v1533_v47, %v1533_v47  ;;  %v977_v21 = vsel %vm630_vm3, %v877_v1, 0.0  ;;  %v880_v25 = vmul.f32 %v1574_v7, %v1574_v7  ;;  %v780_v52 = vsel %vm630_vm3, %v1533_v47, 0.0 }
 0x11c   :  { %v767_v36 = vadd.f32 %v766_v27, %v765_v30  ;;  %v966_v37 = vadd.f32 %v965_v15, %v964_v29  ;;  %v979_v29 = vsel %vm630_vm3, %v878_v8, 0.0  ;;  %v782_v30 = vsel %vm630_vm3, %v1574_v7, 0.0 }
 0x11d   :  { %v983_v33 = vsel %vm630_vm3, %v880_v25, 0.0  ;;  %v784_v47 = vsel %vm630_vm3, %v1598_v18, 0.0  ;;  %v786_v7 = vsel %vm630_vm3, %v1565_v3, 0.0  ;;  %v886_v1 = vmul.f32 %v1617_v35, %v1617_v35 }
 0x11e   :  { %v968_v44 = vadd.f32 %v967_v32, %v966_v37  ;;  %v769_v46 = vadd.f32 %v768_v41, %v767_v36  ;;  %v981_v32 = vsel %vm630_vm3, %v879_v20, 0.0  ;;  %v881_v36 = vmul.f32 %v1598_v18, %v1598_v18 }
 0x11f   :  { %v882_v41 = vmul.f32 %v1565_v3, %v1565_v3  ;;  %v788_v18 = vsel %vm630_vm3, %v1585_v12, 0.0  ;;  %v887_v8 = vmul.f32 %v1637_v45, %v1637_v45  ;;  %v995_v20 = vsel %vm630_vm3, %v886_v1, 0.0 }
 0x120   :  { %v771_v56 = vadd.f32 %v770_v48, %v769_v46  ;;  %v970_v57 = vadd.f32 %v969_v53, %v968_v44  ;;  %v883_v48 = vmul.f32 %v1585_v12, %v1585_v12  ;;  %v985_v50 = vsel %vm630_vm3, %v881_v36, 0.0 }
 0x121   :  { %v884_v53 = vmul.f32 %v1626_v40, %v1626_v40  ;;  %v792_v12 = vsel %vm630_vm3, %v1650_v51, 0.0 }
 0x122   :  { %v972_v62 = vadd.f32 %v971_v59, %v970_v57  ;;  %v773_v63 = vadd.f32 %v772_v24, %v771_v56  ;;  %v987_v57 = vsel %vm630_vm3, %v882_v41, 0.0  ;;  %v790_v59 = vsel %vm630_vm3, %v1626_v40, 0.0 }
 0x123   :  { %v794_v40 = vsel %vm630_vm3, %v1617_v35, 0.0 }
 0x124   :  { %v775_v5 = vadd.f32 %v774_v11, %v773_v63  ;;  %v974_v6 = vadd.f32 %v973_v43, %v972_v62  ;;  %v989_v11 = vsel %vm630_vm3, %v883_v48, 0.0  ;;  %v991_v62 = vsel %vm630_vm3, %v884_v53, 0.0 }
 0x125   :  { %v885_v63 = vmul.f32 %v1650_v51, %v1650_v51  ;;  %v796_v51 = vsel %vm630_vm3, %v1637_v45, 0.0  ;;  %v800_v45 = vsel %vm630_vm3, %v1702_v23, 0.0 }
 0x126   :  { %v976_v13 = vadd.f32 %v975_v0, %v974_v6  ;;  %v777_v14 = vadd.f32 %v776_v10, %v775_v5 }
 0x127   :  { %v993_v10 = vsel %vm630_vm3, %v885_v63, 0.0 }
 0x128   :  { %v779_v26 = vadd.f32 %v778_v17, %v777_v14  ;;  %v978_v27 = vadd.f32 %v977_v21, %v976_v13  ;;  %v888_v13 = vmul.f32 %v1678_v9, %v1678_v9  ;;  %v798_v21 = vsel %vm630_vm3, %v1678_v9, 0.0 }
 0x129   :  { %v802_v9 = vsel %vm630_vm3, %v1669_v4, 0.0 }
 0x12a   :  { %v980_v15 = vadd.f32 %v979_v29, %v978_v27  ;;  %v781_v39 = vadd.f32 %v780_v52, %v779_v26  ;;  %v997_v26 = vsel %vm630_vm3, %v887_v8, 0.0  ;;  %v999_v27 = vsel %vm630_vm3, %v888_v13, 0.0 }
 0x12b   :  { %v889_v29 = vmul.f32 %v1702_v23, %v1702_v23  ;;  %v804_v23 = vsel %vm630_vm3, %v1689_v16, 0.0  ;;  %v898_v8 = vmul.f32 %v1775_v22, %v1775_v22 }
 0x12c   :  { %v783_v37 = vadd.f32 %v782_v30, %v781_v39  ;;  %v982_v38 = vadd.f32 %v981_v32, %v980_v15  ;;  %v890_v15 = vmul.f32 %v1669_v4, %v1669_v4 }
 0x12d   :  { %v1001_v36 = vsel %vm630_vm3, %v889_v29, 0.0 }
 0x12e   :  { %v984_v44 = vadd.f32 %v983_v33, %v982_v38  ;;  %v785_v46 = vadd.f32 %v784_v47, %v783_v37  ;;  %v891_v33 = vmul.f32 %v1689_v16, %v1689_v16  ;;  %v892_v37 = vmul.f32 %v1730_v49, %v1730_v49 }
 0x12f   :  { %v1003_v47 = vsel %vm630_vm3, %v890_v15, 0.0  ;;  %v808_v16 = vsel %vm630_vm3, %v1754_v60, 0.0 }
 0x130   :  { %v787_v54 = vadd.f32 %v786_v7, %v785_v46  ;;  %v986_v56 = vadd.f32 %v985_v50, %v984_v44  ;;  %v806_v44 = vsel %vm630_vm3, %v1730_v49, 0.0  ;;  %v1005_v7 = vsel %vm630_vm3, %v891_v33, 0.0 }
 0x131   :  { %v1007_v48 = vsel %vm630_vm3, %v892_v37, 0.0  ;;  %v893_v50 = vmul.f32 %v1754_v60, %v1754_v60  ;;  %v810_v49 = vsel %vm630_vm3, %v1721_v42, 0.0  ;;  %v812_v60 = vsel %vm630_vm3, %v1741_v55, 0.0 }
 0x132   :  { %v988_v24 = vadd.f32 %v987_v57, %v986_v56  ;;  %v789_v3 = vadd.f32 %v788_v18, %v787_v54  ;;  %v894_v56 = vmul.f32 %v1721_v42, %v1721_v42 }
 0x134   :  { %v791_v43 = vadd.f32 %v790_v59, %v789_v3  ;;  %v990_v0 = vadd.f32 %v989_v11, %v988_v24  ;;  %v895_v59 = vmul.f32 %v1741_v55, %v1741_v55  ;;  %v1009_v24 = vsel %vm630_vm3, %v893_v50, 0.0 }
 0x135   :  { %v896_v3 = vmul.f32 %v1786_v28, %v1786_v28  ;;  %v1011_v63 = vsel %vm630_vm3, %v894_v56, 0.0  ;;  %v816_v55 = vsel %vm630_vm3, %v1804_v34, 0.0 }
 0x136   :  { %v992_v5 = vadd.f32 %v991_v62, %v990_v0  ;;  %v793_v6 = vadd.f32 %v792_v12, %v791_v43  ;;  %v814_v43 = vsel %vm630_vm3, %v1786_v28, 0.0  ;;  %v1013_v1 = vsel %vm630_vm3, %v895_v59, 0.0 }
 0x137   :  { %v1015_v12 = vsel %vm630_vm3, %v896_v3, 0.0  ;;  %v818_v28 = vsel %vm630_vm3, %v1775_v22, 0.0 }
 0x138   :  { %v795_v14 = vadd.f32 %v794_v40, %v793_v6  ;;  %v994_v17 = vadd.f32 %v993_v10, %v992_v5  ;;  %v897_v5 = vmul.f32 %v1804_v34, %v1804_v34  ;;  %v820_v34 = vsel %vm630_vm3, %v1793_v31, 0.0 }
 0x13a   :  { %v996_v25 = vadd.f32 %v995_v20, %v994_v17  ;;  %v797_v35 = vadd.f32 %v796_v51, %v795_v14  ;;  %v899_v14 = vmul.f32 %v1793_v31, %v1793_v31  ;;  %v1017_v17 = vsel %vm630_vm3, %v897_v5, 0.0 }
 0x13b   :  { %v900_v20 = vmul.f32 %v1834_v61, %v1834_v61  ;;  %v824_v31 = vsel %vm630_vm3, %v1852_v2, 0.0 }
 0x13c   :  { %v799_v52 = vadd.f32 %v798_v21, %v797_v35  ;;  %v998_v30 = vadd.f32 %v997_v26, %v996_v25  ;;  %v1019_v25 = vsel %vm630_vm3, %v898_v8, 0.0  ;;  %v822_v35 = vsel %vm630_vm3, %v1834_v61, 0.0 }
 0x13d   :  { %v1023_v29 = vsel %vm630_vm3, %v900_v20, 0.0  ;;  %v826_v61 = vsel %vm630_vm3, %v1822_v58, 0.0 }
 0x13e   :  { %v1000_v39 = vadd.f32 %v999_v27, %v998_v30  ;;  %v801_v32 = vadd.f32 %v800_v45, %v799_v52  ;;  %v1021_v27 = vsel %vm630_vm3, %v899_v14, 0.0  ;;  %v901_v52 = vmul.f32 %v1852_v2, %v1852_v2 }
 0x13f   :  { %v902_v45 = vmul.f32 %v1822_v58, %v1822_v58 }
 0x140   :  { %v803_v38 = vadd.f32 %v802_v9, %v801_v32  ;;  %v1002_v41 = vadd.f32 %v1001_v36, %v1000_v39  ;;  %v903_v9 = vmul.f32 %v1841_v19, %v1841_v19  ;;  %v1025_v33 = vsel %vm630_vm3, %v901_v52, 0.0 }
 0x142   :  { %v1004_v46 = vadd.f32 %v1003_v47, %v1002_v41  ;;  %v805_v4 = vadd.f32 %v804_v23, %v803_v38  ;;  %v1027_v38 = vsel %vm630_vm3, %v902_v45, 0.0  ;;  %v828_v41 = vsel %vm630_vm3, %v1841_v19, 0.0 }
 0x143   :  { %v1029_v2 = vsel %vm630_vm3, %v903_v9, 0.0 }
 0x144   :  { %v807_v53 = vadd.f32 %v806_v44, %v805_v4  ;;  %v1006_v54 = vadd.f32 %v1005_v7, %v1004_v46 }
 0x146   :  { %v1008_v57 = vadd.f32 %v1007_v48, %v1006_v54  ;;  %v809_v18 = vadd.f32 %v808_v16, %v807_v53  ;;  %v702_v16 = vld [vmem:[%s2008_s3] sm:$0x1] }
 0x148   :  { %v811_v11 = vadd.f32 %v810_v49, %v809_v18  ;;  %v1010_v62 = vadd.f32 %v1009_v24, %v1008_v57  ;;  %v839_v18 = vld [vmem:[%s2009_s4] sm:$0x1] }
 0x14a   :  { %v1012_v0 = vadd.f32 %v1011_v63, %v1010_v62  ;;  %v813_v42 = vadd.f32 %v812_v60, %v811_v11 }
 0x14c   :  { %v815_v6 = vadd.f32 %v814_v43, %v813_v42  ;;  %v1014_v40 = vadd.f32 %v1013_v1, %v1012_v0 }
 0x14e   :  { %v1016_v10 = vadd.f32 %v1015_v12, %v1014_v40  ;;  %v817_v13 = vadd.f32 %v816_v55, %v815_v6 }
 0x150   :  { %v819_v51 = vadd.f32 %v818_v28, %v817_v13  ;;  %v1018_v21 = vadd.f32 %v1017_v17, %v1016_v10 }
 0x152   :  { %v1020_v26 = vadd.f32 %v1019_v25, %v1018_v21  ;;  %v821_v22 = vadd.f32 %v820_v34, %v819_v51 }
 0x154   :  { %v823_v30 = vadd.f32 %v822_v35, %v821_v22  ;;  %v1022_v15 = vadd.f32 %v1021_v27, %v1020_v26 }
 0x156   :  { %v1024_v39 = vadd.f32 %v1023_v29, %v1022_v15  ;;  %v825_v32 = vadd.f32 %v824_v31, %v823_v30 }
 0x158   :  { %v827_v36 = vadd.f32 %v826_v61, %v825_v32  ;;  %v1026_v37 = vadd.f32 %v1025_v33, %v1024_v39 }
 0x15a   :  { %v829_v47 = vadd.f32 %v828_v41, %v827_v36  ;;  %v1028_v23 = vadd.f32 %v1027_v38, %v1026_v37 }
 0x15c   :  { %v830_v44 = vrot.slane %v829_v47, 4  ;;  %v1030_v46 = vadd.f32 %v1029_v2, %v1028_v23 }
 0x15e   :  { %v831_v4 = vadd.f32 %v830_v44, %v829_v47  ;;  %v1031_v58 = vrot.slane %v1030_v46, 4 }
 0x160   :  { %v832_v7 = vrot.slane %v831_v4, 2  ;;  %v1032_v48 = vadd.f32 %v1031_v58, %v1030_v46 }
 0x162   :  { %v833_v50 = vadd.f32 %v832_v7, %v831_v4  ;;  %v1033_v53 = vrot.slane %v1032_v48, 2 }
 0x164   :  { %v834_v54 = vrot.slane %v833_v50, 1  ;;  %v1034_v56 = vadd.f32 %v1033_v53, %v1032_v48 }
 0x166   :  { %v835_v57 = vadd.f32 %v834_v54, %v833_v50  ;;  %v1035_v19 = vrot.slane %v1034_v56, 1 }
 0x168   :  { %v836_v49 = vadd.f32 %v835_v57, %v702_v16  ;;  %v1036_v59 = vadd.f32 %v1035_v19, %v1034_v56 }
 0x16a   :  { %838 = vst.msk [vmem:[%s2008_s3] sm:$0x1] %vm699_vm2, %v836_v49  ;;  %v1037_v24 = vadd.f32 %v1036_v59, %v839_v18 }
 0x16c   :  { %1038 = vst.msk [vmem:[%s2009_s4] sm:$0x1] %vm699_vm2, %v1037_v24 }

// kernel: attention_conv_block_l3.50
= control target key start
LH: loop header
LB: loop body
LE: loop exit
PB: predicated region body
PF: predicated region fallthrough
CT: control target
= control target key end

     0   :  { %s178_s0 = inlined_call_operand.vmem [shape: f32[32,128], index: 0, kind: input, shape index: {}]   ;;  %s179_s1 = inlined_call_operand.vmem [shape: f32[32,128], index: 1, kind: input, shape index: {}]   ;;  %s180_s2 = inlined_call_operand.vmem [shape: f32[1,128], index: 2, kind: input, shape index: {}]   ;;  %s181_s3 = inlined_call_operand.vmem [shape: f32[1,128], index: 3, kind: input, shape index: {}]   ;;  %s182_s4 = inlined_call_operand.vmem [shape: f32[1,128], index: 4, kind: input, shape index: {}]   ;;  %s183_s5 = inlined_call_operand.vmem [shape: f32[1,128], index: 5, kind: input, shape index: {}]   ;;  %s184_s6 = inlined_call_operand.vmem [shape: f32[32,128], index: 6, kind: output, shape index: {}]  }
   0x1   :  { %v23_v0 = vld [vmem:[%s178_s0] sm:$0xff]  ;;  %v24_v7 = vld [vmem:[%s178_s0 + $0x8] sm:$0xff]  ;;  %v25_v9 = vld [vmem:[%s178_s0 + $0x10] sm:$0xff] }
   0x2   :  { %v91_v1 = vld [vmem:[%s180_s2] ss:$0 sm:$0xff]  ;;  %v50_v8 = vld [vmem:[%s179_s1 + $0x8] sm:$0xff]  ;;  %v51_v14 = vld [vmem:[%s179_s1 + $0x10] sm:$0xff] }
   0x3   :  { %v92_v2 = vld [vmem:[%s181_s3] ss:$0 sm:$0xff]  ;;  %v34_v3 = vmul.f32 %v91_v1, %v23_v0  ;;  %v35_v11 = vmul.f32 %v91_v1, %v24_v7  ;;  %v36_v13 = vmul.f32 %v91_v1, %v25_v9  ;;  %v26_v15 = vld [vmem:[%s178_s0 + $0x18] sm:$0xff] }
   0x4   :  { %v49_v4 = vld [vmem:[%s179_s1] sm:$0xff]  ;;  %v52_v16 = vld [vmem:[%s179_s1 + $0x18] sm:$0xff]  ;;  %v37_v19 = vmul.f32 %v91_v1, %v26_v15 }
   0x5   :  { %v93_v5 = vld [vmem:[%s182_s4] ss:$0 sm:$0xff]  ;;  %v45_v10 = vadd.f32 %v92_v2, %v34_v3  ;;  %v46_v22 = vadd.f32 %v92_v2, %v35_v11  ;;  %v47_v23 = vadd.f32 %v92_v2, %v36_v13 }
   0x6   :  { %v60_v6 = vmul.f32 %v93_v5, %v49_v4  ;;  %v61_v12 = vmul.f32 %v93_v5, %v50_v8  ;;  %v94_v17 = vld [vmem:[%s183_s5] ss:$0 sm:$0xff]  ;;  %v62_v18 = vmul.f32 %v93_v5, %v51_v14  ;;  %v63_v20 = vmul.f32 %v93_v5, %v52_v16 }
   0x7   :  { %v48_v24 = vadd.f32 %v92_v2, %v37_v19 }
   0x8   :  { %v64_v21 = vadd.f32 %v60_v6, %v45_v10  ;;  %v65_v26 = vadd.f32 %v61_v12, %v46_v22  ;;  %v66_v27 = vadd.f32 %v62_v18, %v47_v23 }
   0x9   :  { %v67_v28 = vadd.f32 %v63_v20, %v48_v24 }
   0xa   :  { %v75_v25 = vadd.f32 %v94_v17, %v64_v21  ;;  %v76_v30 = vadd.f32 %v94_v17, %v65_v26  ;;  %v77_v31 = vadd.f32 %v94_v17, %v66_v27 }
   0xb   :  { %v78_v32 = vadd.f32 %v94_v17, %v67_v28 }
   0xc   :  { %v79_v29 = vmax.f32 %v75_v25, 0.0  ;;  %v80_v33 = vmax.f32 %v76_v30, 0.0  ;;  %v81_v34 = vmax.f32 %v77_v31, 0.0 }
   0xd   :  { %v82_v35 = vmax.f32 %v78_v32, 0.0 }
   0xe   :  { %83 = vst [vmem:[%s184_s6] sm:$0xff] %v79_v29  ;;  %84 = vst [vmem:[%s184_s6 + $0x8] sm:$0xff] %v80_v33 }
   0xf   :  { %85 = vst [vmem:[%s184_s6 + $0x10] sm:$0xff] %v81_v34  ;;  %86 = vst [vmem:[%s184_s6 + $0x18] sm:$0xff] %v82_v35 }

// kernel: attention_conv_block_l3.55
= control target key start
LH: loop header
LB: loop body
LE: loop exit
PB: predicated region body
PF: predicated region fallthrough
CT: control target
= control target key end

     0   :  { %vm66_vm0 = vcmask 523264   ;;  %s183_s0 = inlined_call_operand.vmem [shape: f32[16,64], index: 0, kind: input, shape index: {}]   ;;  %s184_s1 = inlined_call_operand.vmem [shape: f32[16,64], index: 1, kind: input, shape index: {}]   ;;  %s185_s2 = inlined_call_operand.vmem [shape: f32[16,64], index: 2, kind: input, shape index: {}]   ;;  %s186_s3 = inlined_call_operand.vmem [shape: f32[16,64], index: 3, kind: input, shape index: {}]   ;;  %s187_s4 = inlined_call_operand.vmem [shape: f32[16,64], index: 4, kind: input, shape index: {}]   ;;  %s188_s5 = inlined_call_operand.vmem [shape: f32[16,64], index: 5, kind: input, shape index: {}]   ;;  %s189_s6 = inlined_call_operand.vmem [shape: f32[16,64], index: 6, kind: input, shape index: {}]   ;;  %s190_s7 = inlined_call_operand.vmem [shape: f32[16,64], index: 7, kind: input, shape index: {}]   ;;  %s191_s8 = inlined_call_operand.vmem [shape: f32[16,64], index: 8, kind: input, shape index: {}]   ;;  %s192_s9 = inlined_call_operand.vmem [shape: f32[16,64], index: 9, kind: output, shape index: {}]  }
   0x1   :  { %v32_v0 = vld [vmem:[%s183_s0] sm:$0xff]  ;;  %v33_v6 = vld [vmem:[%s183_s0 + $0x8] sm:$0xff] }
   0x2   :  { %v34_v1 = vld [vmem:[%s184_s1] sm:$0xff]  ;;  %v35_v7 = vld [vmem:[%s184_s1 + $0x8] sm:$0xff] }
   0x3   :  { %v38_v2 = vld [vmem:[%s185_s2] sm:$0xff]  ;;  %v36_v3 = vmax.f32 %v32_v0, %v34_v1  ;;  %v39_v8 = vld [vmem:[%s185_s2 + $0x8] sm:$0xff]  ;;  %v37_v10 = vmax.f32 %v33_v6, %v35_v7 }
   0x4   :  { %v42_v4 = vld [vmem:[%s186_s3] sm:$0xff]  ;;  %v43_v12 = vld [vmem:[%s186_s3 + $0x8] sm:$0xff] }
   0x5   :  { %v40_v5 = vmax.f32 %v36_v3, %v38_v2  ;;  %v46_v9 = vld [vmem:[%s187_s4] sm:$0xff]  ;;  %v41_v14 = vmax.f32 %v37_v10, %v39_v8  ;;  %v47_v16 = vld [vmem:[%s187_s4 + $0x8] sm:$0xff] }
   0x6   :  { %v50_v13 = vld [vmem:[%s188_s5] sm:$0xff]  ;;  %v51_v20 = vld [vmem:[%s188_s5 + $0x8] sm:$0xff] }
   0x7   :  { %v44_v11 = vmax.f32 %v40_v5, %v42_v4  ;;  %v54_v17 = vld [vmem:[%s189_s6] sm:$0xff]  ;;  %v45_v18 = vmax.f32 %v41_v14, %v43_v12  ;;  %v55_v24 = vld [vmem:[%s189_s6 + $0x8] sm:$0xff] }
   0x8   :  { %v58_v21 = vld [vmem:[%s190_s7] sm:$0xff]  ;;  %v59_v28 = vld [vmem:[%s190_s7 + $0x8] sm:$0xff] }
   0x9   :  { %v48_v15 = vmax.f32 %v44_v11, %v46_v9  ;;  %v49_v22 = vmax.f32 %v45_v18, %v47_v16  ;;  %v62_v25 = vld [vmem:[%s191_s8] sm:$0xff]  ;;  %v63_v31 = vld [vmem:[%s191_s8 + $0x8] sm:$0xff] }
   0xb   :  { %v52_v19 = vmax.f32 %v48_v15, %v50_v13  ;;  %v53_v26 = vmax.f32 %v49_v22, %v51_v20 }
   0xd   :  { %v56_v23 = vmax.f32 %v52_v19, %v54_v17  ;;  %v57_v29 = vmax.f32 %v53_v26, %v55_v24 }
   0xf   :  { %v60_v27 = vmax.f32 %v56_v23, %v58_v21  ;;  %v61_v32 = vmax.f32 %v57_v29, %v59_v28 }
  0x11   :  { %v64_v30 = vmax.f32 %v60_v27, %v62_v25  ;;  %v65_v33 = vmax.f32 %v61_v32, %v63_v31 }
  0x13   :  { %67 = vst.msk [vmem:[%s192_s9] sm:$0xff] %vm66_vm0, %v64_v30  ;;  %68 = vst.msk [vmem:[%s192_s9 + $0x8] sm:$0xff] %vm66_vm0, %v65_v33 }

// kernel: tile.267
= control target key start
LH: loop header
LB: loop body
LE: loop exit
PB: predicated region body
PF: predicated region fallthrough
CT: control target
= control target key end

     0   :  { %s22_s0 = inlined_call_operand.vmem [shape: f32[8], index: 0, kind: input, shape index: {}]   ;;  %s23_s1 = inlined_call_operand.vmem [shape: f32[8,8], index: 1, kind: output, shape index: {}]  }
   0x1   :  { %v4_v0 = vld [vmem:[%s22_s0] ss:$0 sm:$0xff] }
   0x2   :  { %5 = vst [vmem:[%s23_s1] sm:$0xff] %v4_v0 }

// kernel: tile.268
= control target key start
LH: loop header
LB: loop body
LE: loop exit
PB: predicated region body
PF: predicated region fallthrough
CT: control target
= control target key end

     0   :  { %s67_s10 = smov 56   ;;  %s68_s11 = smov 40   ;;  %vm3_vm0 = vcmask 64512   ;;  %vm9_vm1 = vcmask 523712   ;;  %vm15_vm2 = vcmask 458112   ;;  %vm21_vm3 = vcmask 392512   ;;  %s111_s0 = inlined_call_operand.vmem [shape: f32[8,8], index: 0, kind: input, shape index: {}]   ;;  %s112_s1 = inlined_call_operand.vmem [shape: f32[1,64], index: 1, kind: output, shape index: {}]  }
   0x1   :  { %v53_v0 = vld [vmem:[%s111_s0 + $0x7] sm:$0x1]   ;;  %v55_v1 = vld [vmem:[%s111_s0 + $0x5] sm:$0x1]   ;;  %v54_v2 = vld [vmem:[%s111_s0 + $0x6] sm:$0x1]  }
   0x2   :  { %7 = vrot.lane.b32.xlu0 %v53_v0, %s67_s10  ;;  %19 = vrot.lane.b32.xlu1 %v55_v1, %s68_s11  ;;  %v56_v3 = vld [vmem:[%s111_s0 + $0x4] sm:$0x1]   ;;  %v2_v4 = vld [vmem:[%s111_s0] sm:$0x1]   ;;  %s69_s18 = smov 48   ;;  %s70_s19 = smov 32  }
   0x3   :  { %4 = vst.msk [vmem:[#allocation0] sm:$0x1] %vm3_vm0, %v2_v4   ;;  %v57_v5 = vld [vmem:[%s111_s0 + $0x3] sm:$0x1]   ;;  %v58_v6 = vld [vmem:[%s111_s0 + $0x2] sm:$0x1]  }
   0x4   :  { %s71_s24 = smov 24   ;;  %s72_s25 = smov 16   ;;  %v59_v7 = vld [vmem:[%s111_s0 + $0x1] sm:$0x1]   ;;  %vm27_vm4 = vcmask 326912   ;;  %vm33_vm5 = vcmask 261312  }
   0x5   :  { %s73_s0 = smov 8   ;;  %vm39_vm6 = vcmask 195712   ;;  %vm45_vm7 = vcmask 130112  }
   0x6   :  { %13 = vrot.lane.b32.xlu0 %v54_v2, %s69_s18  ;;  %25 = vrot.lane.b32.xlu1 %v56_v3, %s70_s19 }
   0xa   :  { %31 = vrot.lane.b32.xlu0 %v57_v5, %s71_s24  ;;  %37 = vrot.lane.b32.xlu1 %v58_v6, %s72_s25 }
   0xe   :  { %43 = vrot.lane.b32.xlu0 %v59_v7, %s73_s0 }
  0x74   :  { %v8_v8 = vpop.permute.xlu0 %7   ;;  %v20_v9 = vpop.permute.xlu1 %19  }
  0x75   :  { %10 = vst.msk [vmem:[#allocation0] sm:$0x1] %vm9_vm1, %v8_v8  }
  0x78   :  { %v14_v10 = vpop.permute.xlu0 %13   ;;  %v26_v11 = vpop.permute.xlu1 %25  }
  0x79   :  { %16 = vst.msk [vmem:[#allocation0] sm:$0x1] %vm15_vm2, %v14_v10  }
  0x7a   :  { %22 = vst.msk [vmem:[#allocation0] sm:$0x1] %vm21_vm3, %v20_v9  }
  0x7b   :  { %28 = vst.msk [vmem:[#allocation0] sm:$0x1] %vm27_vm4, %v26_v11  }
  0x7c   :  { %v32_v12 = vpop.permute.xlu0 %31   ;;  %v38_v13 = vpop.permute.xlu1 %37  }
  0x7d   :  { %34 = vst.msk [vmem:[#allocation0] sm:$0x1] %vm33_vm5, %v32_v12  }
  0x7e   :  { %40 = vst.msk [vmem:[#allocation0] sm:$0x1] %vm39_vm6, %v38_v13  }
  0x80   :  { %v44_v14 = vpop.permute.xlu0 %43  }
  0x81   :  { %46 = vst.msk [vmem:[#allocation0] sm:$0x1] %vm45_vm7, %v44_v14  }
  0x88   :  { %v50_v15 = vld [vmem:[#allocation0] sm:$0x1] }
  0x89   :  { %52 = vst [vmem:[%s112_s1] sm:$0x1] %v50_v15 }

// kernel: tile.163
= control target key start
LH: loop header
LB: loop body
LE: loop exit
PB: predicated region body
PF: predicated region fallthrough
CT: control target
= control target key end

     0   :  { %s20_s0 = inlined_call_operand.<no memory space> [shape: f32[], index: 0, kind: input, shape index: {}]   ;;  %s21_s1 = inlined_call_operand.vmem [shape: f32[1,64], index: 1, kind: output, shape index: {}]  }
   0x1   :  { %v2_v0 = vstv %s20_s0 }
   0x2   :  { %3 = vst [vmem:[%s21_s1] sm:$0x1] %v2_v0 }

// kernel: attention_conv_block_l3.57
= control target key start
LH: loop header
LB: loop body
LE: loop exit
PB: predicated region body
PF: predicated region fallthrough
CT: control target
= control target key end

     0   :  { %vm36_vm0 = vcmask 523264   ;;  %s83_s0 = inlined_call_operand.vmem [shape: f32[16,64], index: 0, kind: input, shape index: {}]   ;;  %s84_s1 = inlined_call_operand.vmem [shape: f32[1,64], index: 1, kind: input, shape index: {}]   ;;  %s85_s2 = inlined_call_operand.vmem [shape: f32[1,64], index: 2, kind: input, shape index: {}]   ;;  %s86_s3 = inlined_call_operand.vmem [shape: f32[16,64], index: 3, kind: output, shape index: {}]  }
   0x1   :  { %v14_v0 = vld [vmem:[%s83_s0] sm:$0xff]  ;;  %v15_v4 = vld [vmem:[%s83_s0 + $0x8] sm:$0xff] }
   0x2   :  { %v43_v1 = vld [vmem:[%s84_s1] ss:$0 sm:$0xff] }
   0x3   :  { %v44_v2 = vld [vmem:[%s85_s2] ss:$0 sm:$0xff]  ;;  %v23_v3 = vmul.f32 %v43_v1, %v14_v0  ;;  %v24_v5 = vmul.f32 %v43_v1, %v15_v4 }
   0x5   :  { %v32_v6 = vadd.f32 %v44_v2, %v23_v3  ;;  %v33_v7 = vadd.f32 %v44_v2, %v24_v5 }
   0x7   :  { %v34_v8 = vmax.f32 %v32_v6, 0.0  ;;  %v35_v9 = vmax.f32 %v33_v7, 0.0 }
   0x9   :  { %37 = vst.msk [vmem:[%s86_s3] sm:$0xff] %vm36_vm0, %v34_v8  ;;  %38 = vst.msk [vmem:[%s86_s3 + $0x8] sm:$0xff] %vm36_vm0, %v35_v9 }

// kernel: attention_conv_block_l3.56
= control target key start
LH: loop header
LB: loop body
LE: loop exit
PB: predicated region body
PF: predicated region fallthrough
CT: control target
= control target key end

     0   :  { %vm107_vm0 = vcmask 588800   ;;  %vm132_vm1 = vcmask 1043456   ;;  %vm254_vm2 = vcmask 57344   ;;  %v452_v14 = vmov 0.0   ;;  %s661_s1 = inlined_call_operand.vmem [shape: bf16[72,8], index: 1, kind: input, shape index: {}]   ;;  %s662_s0 = inlined_call_operand.vmem [shape: bf16[128,72], index: 0, kind: input, shape index: {}]   ;;  %s663_s3 = inlined_call_operand.vmem [shape: f32[1,8], index: 3, kind: output, shape index: {1}]   ;;  %s664_s4 = inlined_call_operand.vmem [shape: f32[1,8], index: 4, kind: output, shape index: {2}]   ;;  %s665_s2 = inlined_call_operand.vmem [shape: f32[128,8], index: 2, kind: output, shape index: {0}]  }
   0x1   :  { %v439_v0 = vld [vmem:[%s661_s1] sm:$0xff]   ;;  %v440_v1 = vld [vmem:[%s661_s1 + $0x8] sm:$0xff]   ;;  %v441_v2 = vld [vmem:[%s661_s1 + $0x10] sm:$0xff]   ;;  %255 = vst.msk [vmem:[%s663_s3] sm:$0x1] %vm254_vm2, %v452_v14  ;;  %vm233_vm3 = vcmask 64512  }
   0x2   :  { %400 = vmatprep.subr.bf16.mxu0 %v439_v0  ;;  %426 = vmatprep.subr.bf16.mxu1 %v439_v0  ;;  %v444_v3 = vld [vmem:[%s662_s0] sm:$0xff]   ;;  %v442_v4 = vld [vmem:[%s661_s1 + $0x18] sm:$0xff]   ;;  %v445_v8 = vld [vmem:[%s662_s0 + $0x8] sm:$0xff]   ;;  %256 = vst.msk [vmem:[%s664_s4] sm:$0x1] %vm254_vm2, %v452_v14 }
   0x3   :  { %401 = vmatpush3.bf16.msra.mxu0 %v439_v0  ;;  %431 = vmatpush3.bf16.msra.mxu1 %v439_v0  ;;  %v448_v5 = vld [vmem:[%s662_s0 + $0x20] sm:$0xff]   ;;  %v449_v9 = vld [vmem:[%s662_s0 + $0x28] sm:$0xff]   ;;  %v446_v10 = vld [vmem:[%s662_s0 + $0x10] sm:$0xff]  }
   0x4   :  { %402 = vmatprep.subr.bf16.mxu0 %v440_v1  ;;  %427 = vmatprep.subr.bf16.mxu1 %v440_v1  ;;  %v443_v6 = vld [vmem:[%s661_s1 + $0x20] ss:$0 sps:$4 sm:$0xff]   ;;  %v450_v11 = vld [vmem:[%s662_s0 + $0x30] sm:$0xff]   ;;  %v447_v12 = vld [vmem:[%s662_s0 + $0x18] sm:$0xff]  }
   0x5   :  { %410 = vmatprep.mubr.msk.bf16.mxu0 %vm107_vm0, %v444_v3  ;;  %418 = vmatprep.mubr.msk.bf16.mxu1 %vm107_vm0, %v448_v5  ;;  %v134_v7 = vsel %vm132_vm1, %v443_v6, 0  ;;  %v451_v13 = vld [vmem:[%s662_s0 + $0x38] sm:$0xff]  }
   0x7   :  { %403 = vmatpush3.bf16.msra.mxu0 %v440_v1  ;;  %432 = vmatpush3.bf16.msra.mxu1 %v440_v1 }
   0x8   :  { %404 = vmatprep.subr.bf16.mxu0 %v441_v2  ;;  %428 = vmatprep.subr.bf16.mxu1 %v441_v2 }
   0xb   :  { %405 = vmatpush3.bf16.msra.mxu0 %v441_v2  ;;  %433 = vmatpush3.bf16.msra.mxu1 %v441_v2 }
   0xc   :  { %406 = vmatprep.subr.bf16.mxu0 %v442_v4  ;;  %429 = vmatprep.subr.bf16.mxu1 %v442_v4 }
   0xf   :  { %407 = vmatpush3.bf16.msra.mxu0 %v442_v4  ;;  %434 = vmatpush3.bf16.msra.mxu1 %v442_v4 }
  0x10   :  { %436 = vmatprep.subr.msk.bf16.mxu0 %vm132_vm1, %v443_v6  ;;  %437 = vmatprep.subr.msk.bf16.mxu1 %vm132_vm1, %v443_v6 }
  0x13   :  { %409 = vmatpush3.bf16.msra.mxu0 %v134_v7  ;;  %435 = vmatpush3.bf16.msra.mxu1 %v134_v7 }
  0x16   :  { %411 = vmatmul.mubr.msk.bf16.vlgmr.msra.gmra.mrb[0].mxu0 %vm107_vm0, %v445_v8  ;;  %419 = vmatmul.mubr.msk.bf16.vlgmr.msra.gmra.mrb[0].mxu1 %vm107_vm0, %v449_v9 }
  0x17   :  { %414 = vmatprep.mubr.msk.bf16.mxu0 %vm107_vm0, %v446_v10  ;;  %422 = vmatprep.mubr.msk.bf16.mxu1 %vm107_vm0, %v450_v11 }
  0x1e   :  { %415 = vmatmul.mubr.msk.bf16.gmra.mrb[4].mxu0 %vm107_vm0, %v447_v12  ;;  %423 = vmatmul.mubr.msk.bf16.gmra.mrb[4].mxu1 %vm107_vm0, %v451_v13 }
  0xe9   :  { %v412_v15 = vpop.f32.mrb[0].mxu0  ;;  %v533_v16 = vpop.f32.mrb[0].mxu1 }
  0xea   :  { %236 = vst.msk [vmem:[%s665_s2 + $0x10] sm:$0xff] %vm233_vm3, %v412_v15  ;;  %v170_v17 = vpop.f32.mrb[1].mxu0  ;;  %244 = vst.msk [vmem:[%s665_s2 + $0x50] sm:$0xff] %vm233_vm3, %v533_v16  ;;  %v202_v18 = vpop.f32.mrb[1].mxu1  ;;  %v301_v24 = vmul.f32 %v412_v15, %v412_v15  ;;  %v261_v29 = vsel %vm233_vm3, %v412_v15, 0.0  ;;  %v309_v10 = vmul.f32 %v533_v16, %v533_v16  ;;  %v277_v14 = vsel %vm233_vm3, %v533_v16, 0.0 }
  0xeb   :  { %234 = vst.msk [vmem:[%s665_s2] sm:$0xff] %vm233_vm3, %v170_v17  ;;  %v299_v19 = vmul.f32 %v170_v17, %v170_v17  ;;  %v413_v20 = vpop.f32.mrb[2].mxu0  ;;  %242 = vst.msk [vmem:[%s665_s2 + $0x40] sm:$0xff] %vm233_vm3, %v202_v18  ;;  %v552_v21 = vpop.f32.mrb[2].mxu1  ;;  %v258_v25 = vsel %vm233_vm3, %v170_v17, 0.0  ;;  %v307_v61 = vmul.f32 %v202_v18, %v202_v18  ;;  %v273_v2 = vsel %vm233_vm3, %v202_v18, 0.0 }
  0xec   :  { %237 = vst.msk [vmem:[%s665_s2 + $0x18] sm:$0xff] %vm233_vm3, %v413_v20  ;;  %v173_v22 = vpop.f32.mrb[3].mxu0  ;;  %245 = vst.msk [vmem:[%s665_s2 + $0x58] sm:$0xff] %vm233_vm3, %v552_v21  ;;  %v205_v23 = vpop.f32.mrb[3].mxu1  ;;  %v302_v31 = vmul.f32 %v413_v20, %v413_v20  ;;  %v318_v35 = vsel %vm233_vm3, %v301_v24, 0.0  ;;  %v263_v36 = vsel %vm233_vm3, %v413_v20, 0.0  ;;  %v310_v15 = vmul.f32 %v552_v21, %v552_v21 }
  0xed   :  { %235 = vst.msk [vmem:[%s665_s2 + $0x8] sm:$0xff] %vm233_vm3, %v173_v22  ;;  %v259_v26 = vsel %vm233_vm3, %v173_v22, 0.0  ;;  %v300_v27 = vmul.f32 %v173_v22, %v173_v22  ;;  %243 = vst.msk [vmem:[%s665_s2 + $0x48] sm:$0xff] %vm233_vm3, %v205_v23  ;;  %v315_v30 = vsel %vm233_vm3, %v299_v19, 0.0  ;;  %v330_v6 = vsel %vm233_vm3, %v307_v61, 0.0 }
  0xee   :  { %v260_v28 = vadd.f32 %v259_v26, %v258_v25  ;;  %v320_v43 = vsel %vm233_vm3, %v302_v31, 0.0  ;;  %v308_v7 = vmul.f32 %v205_v23, %v205_v23  ;;  %v275_v11 = vsel %vm233_vm3, %v205_v23, 0.0 }
  0xef   :  { %v316_v32 = vsel %vm233_vm3, %v300_v27, 0.0  ;;  %v334_v22 = vsel %vm233_vm3, %v309_v10, 0.0  ;;  %v279_v24 = vsel %vm233_vm3, %v552_v21, 0.0  ;;  %v336_v27 = vsel %vm233_vm3, %v310_v15, 0.0 }
  0xf0   :  { %v262_v33 = vadd.f32 %v261_v29, %v260_v28  ;;  %v317_v34 = vadd.f32 %v316_v32, %v315_v30  ;;  %v332_v17 = vsel %vm233_vm3, %v308_v7, 0.0 }
  0xf1   :  { %v416_v37 = vpop.f32.mrb[4].mxu0  ;;  %v578_v38 = vpop.f32.mrb[4].mxu1 }
  0xf2   :  { %v319_v39 = vadd.f32 %v318_v35, %v317_v34  ;;  %240 = vst.msk [vmem:[%s665_s2 + $0x30] sm:$0xff] %vm233_vm3, %v416_v37  ;;  %v186_v40 = vpop.f32.mrb[5].mxu0  ;;  %v264_v41 = vadd.f32 %v263_v36, %v262_v33  ;;  %248 = vst.msk [vmem:[%s665_s2 + $0x70] sm:$0xff] %vm233_vm3, %v578_v38  ;;  %v218_v42 = vpop.f32.mrb[5].mxu1  ;;  %v305_v52 = vmul.f32 %v416_v37, %v416_v37  ;;  %v269_v58 = vsel %vm233_vm3, %v416_v37, 0.0 }
  0xf3   :  { %238 = vst.msk [vmem:[%s665_s2 + $0x20] sm:$0xff] %vm233_vm3, %v186_v40  ;;  %v265_v44 = vsel %vm233_vm3, %v186_v40, 0.0  ;;  %v303_v45 = vmul.f32 %v186_v40, %v186_v40  ;;  %v417_v46 = vpop.f32.mrb[6].mxu0  ;;  %246 = vst.msk [vmem:[%s665_s2 + $0x60] sm:$0xff] %vm233_vm3, %v218_v42  ;;  %v425_v47 = vpop.f32.mrb[6].mxu1  ;;  %v311_v18 = vmul.f32 %v218_v42, %v218_v42  ;;  %v281_v23 = vsel %vm233_vm3, %v218_v42, 0.0 }
  0xf4   :  { %v266_v48 = vadd.f32 %v265_v44, %v264_v41  ;;  %v321_v49 = vadd.f32 %v320_v43, %v319_v39  ;;  %241 = vst.msk [vmem:[%s665_s2 + $0x38] sm:$0xff] %vm233_vm3, %v417_v46  ;;  %v189_v50 = vpop.f32.mrb[7].mxu0  ;;  %249 = vst.msk [vmem:[%s665_s2 + $0x78] sm:$0xff] %vm233_vm3, %v425_v47  ;;  %v221_v51 = vpop.f32.mrb[7].mxu1  ;;  %v306_v59 = vmul.f32 %v417_v46, %v417_v46  ;;  %v326_v0 = vsel %vm233_vm3, %v305_v52, 0.0 }
  0xf5   :  { %v322_v53 = vsel %vm233_vm3, %v303_v45, 0.0  ;;  %239 = vst.msk [vmem:[%s665_s2 + $0x28] sm:$0xff] %vm233_vm3, %v189_v50  ;;  %v267_v54 = vsel %vm233_vm3, %v189_v50, 0.0  ;;  %v304_v55 = vmul.f32 %v189_v50, %v189_v50  ;;  %247 = vst.msk [vmem:[%s665_s2 + $0x68] sm:$0xff] %vm233_vm3, %v221_v51  ;;  %v271_v1 = vsel %vm233_vm3, %v417_v46, 0.0 }
  0xf6   :  { %v323_v56 = vadd.f32 %v322_v53, %v321_v49  ;;  %v268_v57 = vadd.f32 %v267_v54, %v266_v48  ;;  %v328_v5 = vsel %vm233_vm3, %v306_v59, 0.0  ;;  %v338_v16 = vsel %vm233_vm3, %v311_v18, 0.0 }
  0xf7   :  { %v324_v60 = vsel %vm233_vm3, %v304_v55, 0.0  ;;  %v312_v28 = vmul.f32 %v221_v51, %v221_v51  ;;  %v313_v31 = vmul.f32 %v578_v38, %v578_v38  ;;  %v283_v32 = vsel %vm233_vm3, %v221_v51, 0.0  ;;  %v257_v55 = vld [vmem:[%s663_s3] sm:$0x1] }
  0xf8   :  { %v270_v62 = vadd.f32 %v269_v58, %v268_v57  ;;  %v325_v63 = vadd.f32 %v324_v60, %v323_v56  ;;  %v285_v21 = vsel %vm233_vm3, %v578_v38, 0.0  ;;  %v314_v35 = vmul.f32 %v425_v47, %v425_v47  ;;  %v298_v57 = vld [vmem:[%s664_s4] sm:$0x1] }
  0xf9   :  { %v340_v36 = vsel %vm233_vm3, %v312_v28, 0.0  ;;  %v342_v40 = vsel %vm233_vm3, %v313_v31, 0.0  ;;  %v287_v41 = vsel %vm233_vm3, %v425_v47, 0.0 }
  0xfa   :  { %v327_v3 = vadd.f32 %v326_v0, %v325_v63  ;;  %v272_v4 = vadd.f32 %v271_v1, %v270_v62  ;;  %v344_v44 = vsel %vm233_vm3, %v314_v35, 0.0 }
  0xfc   :  { %v274_v8 = vadd.f32 %v273_v2, %v272_v4  ;;  %v329_v9 = vadd.f32 %v328_v5, %v327_v3 }
  0xfe   :  { %v331_v12 = vadd.f32 %v330_v6, %v329_v9  ;;  %v276_v13 = vadd.f32 %v275_v11, %v274_v8 }
 0x100   :  { %v278_v19 = vadd.f32 %v277_v14, %v276_v13  ;;  %v333_v20 = vadd.f32 %v332_v17, %v331_v12 }
 0x102   :  { %v335_v25 = vadd.f32 %v334_v22, %v333_v20  ;;  %v280_v26 = vadd.f32 %v279_v24, %v278_v19 }
 0x104   :  { %v282_v29 = vadd.f32 %v281_v23, %v280_v26  ;;  %v337_v30 = vadd.f32 %v336_v27, %v335_v25 }
 0x106   :  { %v339_v33 = vadd.f32 %v338_v16, %v337_v30  ;;  %v284_v34 = vadd.f32 %v283_v32, %v282_v29 }
 0x108   :  { %v286_v37 = vadd.f32 %v285_v21, %v284_v34  ;;  %v341_v39 = vadd.f32 %v340_v36, %v339_v33 }
 0x10a   :  { %v288_v42 = vadd.f32 %v287_v41, %v286_v37  ;;  %v343_v43 = vadd.f32 %v342_v40, %v341_v39 }
 0x10c   :  { %v289_v45 = vrot.slane %v288_v42, 4  ;;  %v345_v46 = vadd.f32 %v344_v44, %v343_v43 }
 0x10e   :  { %v290_v48 = vadd.f32 %v289_v45, %v288_v42  ;;  %v346_v49 = vrot.slane %v345_v46, 4 }
 0x110   :  { %v291_v50 = vrot.slane %v290_v48, 2  ;;  %v347_v51 = vadd.f32 %v346_v49, %v345_v46 }
 0x112   :  { %v292_v38 = vadd.f32 %v291_v50, %v290_v48  ;;  %v348_v52 = vrot.slane %v347_v51, 2 }
 0x114   :  { %v293_v53 = vrot.slane %v292_v38, 1  ;;  %v349_v54 = vadd.f32 %v348_v52, %v347_v51 }
 0x116   :  { %v294_v56 = vadd.f32 %v293_v53, %v292_v38  ;;  %v350_v47 = vrot.slane %v349_v54, 1 }
 0x118   :  { %v295_v58 = vadd.f32 %v294_v56, %v257_v55  ;;  %v351_v59 = vadd.f32 %v350_v47, %v349_v54 }
 0x11a   :  { %297 = vst.msk [vmem:[%s663_s3] sm:$0x1] %vm254_vm2, %v295_v58  ;;  %v352_v60 = vadd.f32 %v351_v59, %v298_v57 }
 0x11c   :  { %353 = vst.msk [vmem:[%s664_s4] sm:$0x1] %vm254_vm2, %v352_v60 }

// kernel: attention_conv_block_l3.59
= control target key start
LH: loop header
LB: loop body
LE: loop exit
PB: predicated region body
PF: predicated region fallthrough
CT: control target
= control target key end

     0   :  { %vm67_vm0 = vcmask 523264   ;;  %s143_s0 = inlined_call_operand.vmem [shape: f32[16,64], index: 0, kind: input, shape index: {}]   ;;  %s144_s1 = inlined_call_operand.vmem [shape: f32[16,64], index: 1, kind: input, shape index: {}]   ;;  %s145_s2 = inlined_call_operand.vmem [shape: f32[1,64], index: 2, kind: input, shape index: {}]   ;;  %s146_s3 = inlined_call_operand.vmem [shape: f32[1,64], index: 3, kind: input, shape index: {}]   ;;  %s147_s4 = inlined_call_operand.vmem [shape: f32[1,64], index: 4, kind: input, shape index: {}]   ;;  %s148_s5 = inlined_call_operand.vmem [shape: f32[1,64], index: 5, kind: input, shape index: {}]   ;;  %s149_s6 = inlined_call_operand.vmem [shape: f32[16,64], index: 6, kind: output, shape index: {}]  }
   0x1   :  { %v23_v0 = vld [vmem:[%s143_s0] sm:$0xff]  ;;  %v24_v7 = vld [vmem:[%s143_s0 + $0x8] sm:$0xff] }
   0x2   :  { %v74_v1 = vld [vmem:[%s145_s2] ss:$0 sm:$0xff]  ;;  %v44_v8 = vld [vmem:[%s144_s1 + $0x8] sm:$0xff] }
   0x3   :  { %v75_v2 = vld [vmem:[%s146_s3] ss:$0 sm:$0xff]  ;;  %v32_v3 = vmul.f32 %v74_v1, %v23_v0  ;;  %v33_v10 = vmul.f32 %v74_v1, %v24_v7 }
   0x4   :  { %v43_v4 = vld [vmem:[%s144_s1] sm:$0xff] }
   0x5   :  { %v76_v5 = vld [vmem:[%s147_s4] ss:$0 sm:$0xff]  ;;  %v41_v9 = vadd.f32 %v75_v2, %v32_v3  ;;  %v42_v14 = vadd.f32 %v75_v2, %v33_v10 }
   0x6   :  { %v52_v6 = vmul.f32 %v76_v5, %v43_v4  ;;  %v53_v11 = vmul.f32 %v76_v5, %v44_v8  ;;  %v77_v12 = vld [vmem:[%s148_s5] ss:$0 sm:$0xff] }
   0x8   :  { %v54_v13 = vadd.f32 %v52_v6, %v41_v9  ;;  %v55_v16 = vadd.f32 %v53_v11, %v42_v14 }
   0xa   :  { %v63_v15 = vadd.f32 %v77_v12, %v54_v13  ;;  %v64_v18 = vadd.f32 %v77_v12, %v55_v16 }
   0xc   :  { %v65_v17 = vmax.f32 %v63_v15, 0.0  ;;  %v66_v19 = vmax.f32 %v64_v18, 0.0 }
   0xe   :  { %68 = vst.msk [vmem:[%s149_s6] sm:$0xff] %vm67_vm0, %v65_v17  ;;  %69 = vst.msk [vmem:[%s149_s6 + $0x8] sm:$0xff] %vm67_vm0, %v66_v19 }

// kernel: attention_conv_block_l3.60
= control target key start
LH: loop header
LB: loop body
LE: loop exit
PB: predicated region body
PF: predicated region fallthrough
CT: control target
= control target key end

     0   :  { %vm49_vm0 = vcmask 261120   ;;  %s135_s0 = inlined_call_operand.vmem [shape: f32[8,32], index: 0, kind: input, shape index: {}]   ;;  %s136_s1 = inlined_call_operand.vmem [shape: f32[8,32], index: 1, kind: input, shape index: {}]   ;;  %s137_s2 = inlined_call_operand.vmem [shape: f32[8,32], index: 2, kind: input, shape index: {}]   ;;  %s138_s3 = inlined_call_operand.vmem [shape: f32[8,32], index: 3, kind: input, shape index: {}]   ;;  %s139_s4 = inlined_call_operand.vmem [shape: f32[8,32], index: 4, kind: input, shape index: {}]   ;;  %s140_s5 = inlined_call_operand.vmem [shape: f32[8,32], index: 5, kind: input, shape index: {}]   ;;  %s141_s6 = inlined_call_operand.vmem [shape: f32[8,32], index: 6, kind: input, shape index: {}]   ;;  %s142_s7 = inlined_call_operand.vmem [shape: f32[8,32], index: 7, kind: input, shape index: {}]   ;;  %s143_s8 = inlined_call_operand.vmem [shape: f32[8,32], index: 8, kind: input, shape index: {}]   ;;  %s144_s9 = inlined_call_operand.vmem [shape: f32[8,32], index: 9, kind: output, shape index: {}]  }
   0x1   :  { %v32_v0 = vld [vmem:[%s135_s0] sm:$0xff] }
   0x2   :  { %v33_v1 = vld [vmem:[%s136_s1] sm:$0xff] }
   0x3   :  { %v35_v2 = vld [vmem:[%s137_s2] sm:$0xff]  ;;  %v34_v3 = vmax.f32 %v32_v0, %v33_v1 }
   0x4   :  { %v37_v4 = vld [vmem:[%s138_s3] sm:$0xff] }
   0x5   :  { %v36_v5 = vmax.f32 %v34_v3, %v35_v2  ;;  %v39_v6 = vld [vmem:[%s139_s4] sm:$0xff] }
   0x6   :  { %v41_v8 = vld [vmem:[%s140_s5] sm:$0xff] }
   0x7   :  { %v38_v7 = vmax.f32 %v36_v5, %v37_v4  ;;  %v43_v10 = vld [vmem:[%s141_s6] sm:$0xff] }
   0x8   :  { %v45_v12 = vld [vmem:[%s142_s7] sm:$0xff] }
   0x9   :  { %v40_v9 = vmax.f32 %v38_v7, %v39_v6  ;;  %v47_v14 = vld [vmem:[%s143_s8] sm:$0xff] }
   0xb   :  { %v42_v11 = vmax.f32 %v40_v9, %v41_v8 }
   0xd   :  { %v44_v13 = vmax.f32 %v42_v11, %v43_v10 }
   0xf   :  { %v46_v15 = vmax.f32 %v44_v13, %v45_v12 }
  0x11   :  { %v48_v16 = vmax.f32 %v46_v15, %v47_v14 }
  0x13   :  { %50 = vst.msk [vmem:[%s144_s9] sm:$0xff] %vm49_vm0, %v48_v16 }

// kernel: tile.287
= control target key start
LH: loop header
LB: loop body
LE: loop exit
PB: predicated region body
PF: predicated region fallthrough
CT: control target
= control target key end

     0   :  { %s22_s0 = inlined_call_operand.vmem [shape: f32[8], index: 0, kind: input, shape index: {}]   ;;  %s23_s1 = inlined_call_operand.vmem [shape: f32[4,8], index: 1, kind: output, shape index: {}]  }
   0x1   :  { %v4_v0 = vld [vmem:[%s22_s0] ss:$0 sm:$0xff] }
   0x2   :  { %5 = vst [vmem:[%s23_s1] sm:$0xf] %v4_v0 }

// kernel: tile.288
= control target key start
LH: loop header
LB: loop body
LE: loop exit
PB: predicated region body
PF: predicated region fallthrough
CT: control target
= control target key end

     0   :  { %vm7_vm0 = vcmask 64512   ;;  %s37_s8 = smov 8   ;;  %s38_s9 = smov 16   ;;  %vm13_vm1 = vcmask 261312   ;;  %vm19_vm2 = vcmask 195712   ;;  %vm25_vm3 = vcmask 130112   ;;  %s55_s0 = inlined_call_operand.vmem [shape: f32[4,8], index: 0, kind: input, shape index: {}]   ;;  %s56_s1 = inlined_call_operand.vmem [shape: f32[1,32], index: 1, kind: output, shape index: {}]  }
   0x1   :  { %v4_v0 = vld [vmem:[%s55_s0] sm:$0xf]  ;;  %s36_s0 = smov 24  }
   0x2   :  { %5 = vst [vmem:[#allocation1] sm:$0xf] %v4_v0 }
   0x9   :  { %v10_v1 = vld [vmem:[#allocation1 + $0x3] sm:$0x1]   ;;  %v22_v2 = vld [vmem:[#allocation1 + $0x1] sm:$0x1]   ;;  %v6_v3 = vld [vmem:[#allocation1] sm:$0x1]  }
   0xa   :  { %11 = vrot.lane.b32.xlu0 %v10_v1, %s36_s0  ;;  %23 = vrot.lane.b32.xlu1 %v22_v2, %s37_s8  ;;  %v16_v4 = vld [vmem:[#allocation1 + $0x2] sm:$0x1]   ;;  %8 = vst.msk [vmem:[#allocation0] sm:$0x1] %vm7_vm0, %v6_v3  }
   0xe   :  { %17 = vrot.lane.b32.xlu0 %v16_v4, %s38_s9 }
  0x7c   :  { %v12_v5 = vpop.permute.xlu0 %11   ;;  %v24_v6 = vpop.permute.xlu1 %23  }
  0x7d   :  { %14 = vst.msk [vmem:[#allocation0] sm:$0x1] %vm13_vm1, %v12_v5  }
  0x80   :  { %v18_v7 = vpop.permute.xlu0 %17  }
  0x81   :  { %20 = vst.msk [vmem:[#allocation0] sm:$0x1] %vm19_vm2, %v18_v7  }
  0x82   :  { %26 = vst.msk [vmem:[#allocation0] sm:$0x1] %vm25_vm3, %v24_v6  }
  0x89   :  { %v30_v8 = vld [vmem:[#allocation0] sm:$0x1] }
  0x8a   :  { %32 = vst [vmem:[%s56_s1] sm:$0x1] %v30_v8 }

// kernel: attention_conv_block_l3.62
= control target key start
LH: loop header
LB: loop body
LE: loop exit
PB: predicated region body
PF: predicated region fallthrough
CT: control target
= control target key end

     0   :  { %vm32_vm0 = vcmask 261120   ;;  %s72_s0 = inlined_call_operand.vmem [shape: f32[8,32], index: 0, kind: input, shape index: {}]   ;;  %s73_s1 = inlined_call_operand.vmem [shape: f32[1,32], index: 1, kind: input, shape index: {}]   ;;  %s74_s2 = inlined_call_operand.vmem [shape: f32[1,32], index: 2, kind: input, shape index: {}]   ;;  %s75_s3 = inlined_call_operand.vmem [shape: f32[8,32], index: 3, kind: output, shape index: {}]  }
   0x1   :  { %v14_v0 = vld [vmem:[%s72_s0] sm:$0xff] }
   0x2   :  { %v38_v1 = vld [vmem:[%s73_s1] ss:$0 sm:$0xff] }
   0x3   :  { %v39_v2 = vld [vmem:[%s74_s2] ss:$0 sm:$0xff]  ;;  %v22_v3 = vmul.f32 %v38_v1, %v14_v0 }
   0x5   :  { %v30_v4 = vadd.f32 %v39_v2, %v22_v3 }
   0x7   :  { %v31_v5 = vmax.f32 %v30_v4, 0.0 }
   0x9   :  { %33 = vst.msk [vmem:[%s75_s3] sm:$0xff] %vm32_vm0, %v31_v5 }

// kernel: attention_conv_block_l3.61
= control target key start
LH: loop header
LB: loop body
LE: loop exit
PB: predicated region body
PF: predicated region fallthrough
CT: control target
= control target key end

     0   :  { %vm65_vm0 = vcmask 588800   ;;  %vm72_vm1 = vcmask 1043456   ;;  %vm134_vm2 = vcmask 57344   ;;  %v225_v8 = vmov 0.0   ;;  %s318_s1 = inlined_call_operand.vmem [shape: bf16[72,8], index: 1, kind: input, shape index: {}]   ;;  %s319_s0 = inlined_call_operand.vmem [shape: bf16[32,72], index: 0, kind: input, shape index: {}]   ;;  %s320_s3 = inlined_call_operand.vmem [shape: f32[1,8], index: 3, kind: output, shape index: {1}]   ;;  %s321_s4 = inlined_call_operand.vmem [shape: f32[1,8], index: 4, kind: output, shape index: {2}]   ;;  %s322_s2 = inlined_call_operand.vmem [shape: f32[32,8], index: 2, kind: output, shape index: {0}]  }
   0x1   :  { %v218_v0 = vld [vmem:[%s318_s1] sm:$0xff]   ;;  %v219_v1 = vld [vmem:[%s318_s1 + $0x8] sm:$0xff]   ;;  %v220_v2 = vld [vmem:[%s318_s1 + $0x10] sm:$0xff]   ;;  %135 = vst.msk [vmem:[%s320_s3] sm:$0x1] %vm134_vm2, %v225_v8  ;;  %vm125_vm3 = vcmask 64512  }
   0x2   :  { %202 = vmatprep.subr.bf16.mxu0 %v218_v0  ;;  %v223_v3 = vld [vmem:[%s319_s0] sm:$0xff]   ;;  %v221_v4 = vld [vmem:[%s318_s1 + $0x18] sm:$0xff]   ;;  %v224_v7 = vld [vmem:[%s319_s0 + $0x8] sm:$0xff]   ;;  %136 = vst.msk [vmem:[%s321_s4] sm:$0x1] %vm134_vm2, %v225_v8 }
   0x3   :  { %203 = vmatpush3.bf16.msra.mxu0 %v218_v0  ;;  %212 = vmatprep.mubr.msk.bf16.mxu0 %vm65_vm0, %v223_v3  ;;  %v222_v5 = vld [vmem:[%s318_s1 + $0x20] ss:$0 sps:$4 sm:$0xff]  }
   0x4   :  { %204 = vmatprep.subr.bf16.mxu0 %v219_v1  ;;  %v74_v6 = vsel %vm72_vm1, %v222_v5, 0 }
   0x7   :  { %205 = vmatpush3.bf16.msra.mxu0 %v219_v1 }
   0x8   :  { %206 = vmatprep.subr.bf16.mxu0 %v220_v2  ;;  %v137_v40 = vld [vmem:[%s320_s3] sm:$0x1] }
   0x9   :  { %v154_v43 = vld [vmem:[%s321_s4] sm:$0x1] }
   0xb   :  { %207 = vmatpush3.bf16.msra.mxu0 %v220_v2 }
   0xc   :  { %208 = vmatprep.subr.bf16.mxu0 %v221_v4 }
   0xf   :  { %209 = vmatpush3.bf16.msra.mxu0 %v221_v4 }
  0x10   :  { %216 = vmatprep.subr.msk.bf16.mxu0 %vm72_vm1, %v222_v5 }
  0x13   :  { %211 = vmatpush3.bf16.msra.mxu0 %v74_v6 }
  0x16   :  { %213 = vmatmul.mubr.msk.bf16.vlgmr.msra.gmra.mrb[0].mxu0 %vm65_vm0, %v224_v7 }
  0xe9   :  { %v214_v9 = vpop.f32.mrb[0].mxu0 }
  0xea   :  { %128 = vst.msk [vmem:[%s322_s2 + $0x10] sm:$0xff] %vm125_vm3, %v214_v9  ;;  %v110_v10 = vpop.f32.mrb[1].mxu0  ;;  %v157_v14 = vmul.f32 %v214_v9, %v214_v9  ;;  %v141_v19 = vsel %vm125_vm3, %v214_v9, 0.0 }
  0xeb   :  { %126 = vst.msk [vmem:[%s322_s2] sm:$0xff] %vm125_vm3, %v110_v10  ;;  %v155_v11 = vmul.f32 %v110_v10, %v110_v10  ;;  %v215_v12 = vpop.f32.mrb[2].mxu0  ;;  %v138_v15 = vsel %vm125_vm3, %v110_v10, 0.0 }
  0xec   :  { %129 = vst.msk [vmem:[%s322_s2 + $0x18] sm:$0xff] %vm125_vm3, %v215_v12  ;;  %v113_v13 = vpop.f32.mrb[3].mxu0  ;;  %v158_v21 = vmul.f32 %v215_v12, %v215_v12  ;;  %v162_v25 = vsel %vm125_vm3, %v157_v14, 0.0  ;;  %v143_v26 = vsel %vm125_vm3, %v215_v12, 0.0 }
  0xed   :  { %127 = vst.msk [vmem:[%s322_s2 + $0x8] sm:$0xff] %vm125_vm3, %v113_v13  ;;  %v139_v16 = vsel %vm125_vm3, %v113_v13, 0.0  ;;  %v156_v17 = vmul.f32 %v113_v13, %v113_v13  ;;  %v159_v20 = vsel %vm125_vm3, %v155_v11, 0.0 }
  0xee   :  { %v140_v18 = vadd.f32 %v139_v16, %v138_v15  ;;  %v164_v29 = vsel %vm125_vm3, %v158_v21, 0.0 }
  0xef   :  { %v160_v22 = vsel %vm125_vm3, %v156_v17, 0.0 }
  0xf0   :  { %v142_v23 = vadd.f32 %v141_v19, %v140_v18  ;;  %v161_v24 = vadd.f32 %v160_v22, %v159_v20 }
  0xf2   :  { %v144_v27 = vadd.f32 %v143_v26, %v142_v23  ;;  %v163_v28 = vadd.f32 %v162_v25, %v161_v24 }
  0xf4   :  { %v145_v30 = vrot.slane %v144_v27, 4  ;;  %v165_v31 = vadd.f32 %v164_v29, %v163_v28 }
  0xf6   :  { %v146_v32 = vadd.f32 %v145_v30, %v144_v27  ;;  %v166_v33 = vrot.slane %v165_v31, 4 }
  0xf8   :  { %v147_v34 = vrot.slane %v146_v32, 2  ;;  %v167_v35 = vadd.f32 %v166_v33, %v165_v31 }
  0xfa   :  { %v148_v36 = vadd.f32 %v147_v34, %v146_v32  ;;  %v168_v37 = vrot.slane %v167_v35, 2 }
  0xfc   :  { %v149_v38 = vrot.slane %v148_v36, 1  ;;  %v169_v39 = vadd.f32 %v168_v37, %v167_v35 }
  0xfe   :  { %v150_v41 = vadd.f32 %v149_v38, %v148_v36  ;;  %v170_v42 = vrot.slane %v169_v39, 1 }
 0x100   :  { %v151_v44 = vadd.f32 %v150_v41, %v137_v40  ;;  %v171_v45 = vadd.f32 %v170_v42, %v169_v39 }
 0x102   :  { %153 = vst.msk [vmem:[%s320_s3] sm:$0x1] %vm134_vm2, %v151_v44  ;;  %v172_v46 = vadd.f32 %v171_v45, %v154_v43 }
 0x104   :  { %173 = vst.msk [vmem:[%s321_s4] sm:$0x1] %vm134_vm2, %v172_v46 }

// kernel: attention_conv_block_l3.64
= control target key start
LH: loop header
LB: loop body
LE: loop exit
PB: predicated region body
PF: predicated region fallthrough
CT: control target
= control target key end

     0   :  { %vm59_vm0 = vcmask 261120   ;;  %s125_s0 = inlined_call_operand.vmem [shape: f32[8,32], index: 0, kind: input, shape index: {}]   ;;  %s126_s1 = inlined_call_operand.vmem [shape: f32[8,32], index: 1, kind: input, shape index: {}]   ;;  %s127_s2 = inlined_call_operand.vmem [shape: f32[1,32], index: 2, kind: input, shape index: {}]   ;;  %s128_s3 = inlined_call_operand.vmem [shape: f32[1,32], index: 3, kind: input, shape index: {}]   ;;  %s129_s4 = inlined_call_operand.vmem [shape: f32[1,32], index: 4, kind: input, shape index: {}]   ;;  %s130_s5 = inlined_call_operand.vmem [shape: f32[1,32], index: 5, kind: input, shape index: {}]   ;;  %s131_s6 = inlined_call_operand.vmem [shape: f32[8,32], index: 6, kind: output, shape index: {}]  }
   0x1   :  { %v23_v0 = vld [vmem:[%s125_s0] sm:$0xff] }
   0x2   :  { %v65_v1 = vld [vmem:[%s127_s2] ss:$0 sm:$0xff] }
   0x3   :  { %v66_v2 = vld [vmem:[%s128_s3] ss:$0 sm:$0xff]  ;;  %v31_v3 = vmul.f32 %v65_v1, %v23_v0 }
   0x4   :  { %v40_v4 = vld [vmem:[%s126_s1] sm:$0xff] }
   0x5   :  { %v67_v5 = vld [vmem:[%s129_s4] ss:$0 sm:$0xff]  ;;  %v39_v7 = vadd.f32 %v66_v2, %v31_v3 }
   0x6   :  { %v48_v6 = vmul.f32 %v67_v5, %v40_v4  ;;  %v68_v8 = vld [vmem:[%s130_s5] ss:$0 sm:$0xff] }
   0x8   :  { %v49_v9 = vadd.f32 %v48_v6, %v39_v7 }
   0xa   :  { %v57_v10 = vadd.f32 %v68_v8, %v49_v9 }
   0xc   :  { %v58_v11 = vmax.f32 %v57_v10, 0.0 }
   0xe   :  { %60 = vst.msk [vmem:[%s131_s6] sm:$0xff] %vm59_vm0, %v58_v11 }

// kernel: attention_conv_block_l3.70
= control target key start
LH: loop header
LB: loop body
LE: loop exit
PB: predicated region body
PF: predicated region fallthrough
CT: control target
= control target key end

     0   :  { %vm26_vm0 = vcmask 1043456   ;;  %vm19_vm1 = vcmask 31744   ;;  %vm105_vm2 = vcmask 130048   ;;  %s164_s1 = inlined_call_operand.vmem [shape: f32[4,16], index: 1, kind: input, shape index: {}]   ;;  %s165_s0 = inlined_call_operand.vmem [shape: f32[16,4], index: 0, kind: input, shape index: {}]   ;;  %s166_s2 = inlined_call_operand.vmem [shape: f32[16,16], index: 2, kind: input, shape index: {}]   ;;  %s167_s3 = inlined_call_operand.vmem [shape: f32[16,16], index: 3, kind: output, shape index: {}]  }
   0x1   :  { %v16_v0 = vld [vmem:[%s164_s1] sm:$0xf]  ;;  %v15_v2 = vld [vmem:[%s165_s0 + $0x8] sm:$0xff] }
   0x2   :  { %v14_v1 = vld [vmem:[%s165_s0] sm:$0xff]  ;;  %118 = vmatprep.subr.msk.mxu0 %vm26_vm0, %v16_v0  ;;  %v18_v3 = vld [vmem:[%s166_s2 + $0x8] sm:$0xff] }
   0x3   :  { %120 = vmatprep.mubr.msk.f32.mxu0 %vm19_vm1, %v14_v1  ;;  %119 = vmatpush3.msk.msra.mxu0 %vm26_vm0, %v16_v0  ;;  %v17_v4 = vld [vmem:[%s166_s2] sm:$0xff] }
   0x4   :  { %121 = vmatmul.mubr.msk.f32.vlgmr.msra.gmra.mrb[0].mxu0 %vm19_vm1, %v15_v2 }
  0xd7   :  { %v122_v5 = vpop.f32.mrb[0].mxu0 }
  0xd8   :  { %v102_v6 = vadd.f32 %v122_v5, %v18_v3  ;;  %v96_v7 = vpop.f32.mrb[1].mxu0 }
  0xd9   :  { %v97_v8 = vadd.f32 %v96_v7, %v17_v4 }
  0xda   :  { %107 = vst.msk [vmem:[%s167_s3 + $0x8] sm:$0xff] %vm105_vm2, %v102_v6 }
  0xdb   :  { %106 = vst.msk [vmem:[%s167_s3] sm:$0xff] %vm105_vm2, %v97_v8 }

// kernel: attention_conv_block_l3.69
= control target key start
LH: loop header
LB: loop body
LE: loop exit
PB: predicated region body
PF: predicated region fallthrough
CT: control target
= control target key end

     0   :  { %vm49_vm0 = vcmask 125952   ;;  %s135_s0 = inlined_call_operand.vmem [shape: f32[4,16], index: 0, kind: input, shape index: {}]   ;;  %s136_s1 = inlined_call_operand.vmem [shape: f32[4,16], index: 1, kind: input, shape index: {}]   ;;  %s137_s2 = inlined_call_operand.vmem [shape: f32[4,16], index: 2, kind: input, shape index: {}]   ;;  %s138_s3 = inlined_call_operand.vmem [shape: f32[4,16], index: 3, kind: input, shape index: {}]   ;;  %s139_s4 = inlined_call_operand.vmem [shape: f32[4,16], index: 4, kind: input, shape index: {}]   ;;  %s140_s5 = inlined_call_operand.vmem [shape: f32[4,16], index: 5, kind: input, shape index: {}]   ;;  %s141_s6 = inlined_call_operand.vmem [shape: f32[4,16], index: 6, kind: input, shape index: {}]   ;;  %s142_s7 = inlined_call_operand.vmem [shape: f32[4,16], index: 7, kind: input, shape index: {}]   ;;  %s143_s8 = inlined_call_operand.vmem [shape: f32[4,16], index: 8, kind: input, shape index: {}]   ;;  %s144_s9 = inlined_call_operand.vmem [shape: f32[4,16], index: 9, kind: output, shape index: {}]  }
   0x1   :  { %v32_v0 = vld [vmem:[%s135_s0] sm:$0xf] }
   0x2   :  { %v33_v1 = vld [vmem:[%s136_s1] sm:$0xf] }
   0x3   :  { %v35_v2 = vld [vmem:[%s137_s2] sm:$0xf]  ;;  %v34_v3 = vmax.f32 %v32_v0, %v33_v1 }
   0x4   :  { %v37_v4 = vld [vmem:[%s138_s3] sm:$0xf] }
   0x5   :  { %v36_v5 = vmax.f32 %v34_v3, %v35_v2  ;;  %v39_v6 = vld [vmem:[%s139_s4] sm:$0xf] }
   0x6   :  { %v41_v8 = vld [vmem:[%s140_s5] sm:$0xf] }
   0x7   :  { %v38_v7 = vmax.f32 %v36_v5, %v37_v4  ;;  %v43_v10 = vld [vmem:[%s141_s6] sm:$0xf] }
   0x8   :  { %v45_v12 = vld [vmem:[%s142_s7] sm:$0xf] }
   0x9   :  { %v40_v9 = vmax.f32 %v38_v7, %v39_v6  ;;  %v47_v14 = vld [vmem:[%s143_s8] sm:$0xf] }
   0xb   :  { %v42_v11 = vmax.f32 %v40_v9, %v41_v8 }
   0xd   :  { %v44_v13 = vmax.f32 %v42_v11, %v43_v10 }
   0xf   :  { %v46_v15 = vmax.f32 %v44_v13, %v45_v12 }
  0x11   :  { %v48_v16 = vmax.f32 %v46_v15, %v47_v14 }
  0x13   :  { %50 = vst.msk [vmem:[%s144_s9] sm:$0xf] %vm49_vm0, %v48_v16 }

// kernel: squeeze.70
= control target key start
LH: loop header
LB: loop body
LE: loop exit
PB: predicated region body
PF: predicated region fallthrough
CT: control target
= control target key end

     0   :  { %vm7_vm0 = vcmask 64512   ;;  %s39_s0 = inlined_call_operand.vmem [shape: f32[16], index: 0, kind: input, shape index: {}]   ;;  %s40_s1 = inlined_call_operand.vmem [shape: f32[2,8], index: 1, kind: output, shape index: {}]  }
   0x1   :  { %v4_v0 = vld [vmem:[%s39_s0] sm:$0x1]  ;;  %s22_s0 = smov 120  }
   0x2   :  { %5 = vst [vmem:[#allocation1] sm:$0x1] %v4_v0 }
   0x9   :  { %v9_v1 = vld [vmem:[#allocation1] sm:$0x1]  }
   0xa   :  { %v6_v2 = vld [vmem:[#allocation1] sm:$0x1]   ;;  %10 = vrot.lane.b32.xlu0 %v9_v1, %s22_s0 }
   0xb   :  { %8 = vst.msk [vmem:[#allocation0] sm:$0x1] %vm7_vm0, %v6_v2  }
  0x7c   :  { %v11_v3 = vpop.permute.xlu0 %10  }
  0x7d   :  { %14 = vst.msk [vmem:[#allocation0 + $0x1] sm:$0x1] %vm7_vm0, %v11_v3  }
  0x84   :  { %v18_v4 = vld [vmem:[#allocation0] sm:$0x3] }
  0x85   :  { %20 = vst [vmem:[%s40_s1] sm:$0x3] %v18_v4 }

// kernel: attention_conv_block_l3.71
= control target key start
LH: loop header
LB: loop body
LE: loop exit
PB: predicated region body
PF: predicated region fallthrough
CT: control target
= control target key end

     0   :  { %vm83_vm0 = vcmask 130048   ;;  %vm506_vm1 = vcmask 122880   ;;  %s1300_s1 = inlined_call_operand.vmem [shape: f32[16,16], index: 1, kind: input, shape index: {}]   ;;  %s1301_s0 = inlined_call_operand.vmem [shape: f32[256,16], index: 0, kind: input, shape index: {}]   ;;  %s1302_s2 = inlined_call_operand.vmem [shape: f32[256,16], index: 2, kind: input, shape index: {}]   ;;  %s1303_s3 = inlined_call_operand.vmem [shape: f32[256,16], index: 3, kind: output, shape index: {0}]   ;;  %s1304_s4 = inlined_call_operand.vmem [shape: f32[1,16], index: 4, kind: output, shape index: {1}]   ;;  %s1305_s5 = inlined_call_operand.vmem [shape: f32[1,16], index: 5, kind: output, shape index: {2}]  }
   0x1   :  { %v49_v0 = vld [vmem:[%s1300_s1] sm:$0xff]  ;;  %v50_v1 = vld [vmem:[%s1300_s1 + $0x8] sm:$0xff]  ;;  %v19_v5 = vld [vmem:[%s1301_s0 + $0x10] sm:$0xff] }
   0x2   :  { %v17_v2 = vld [vmem:[%s1301_s0] sm:$0xff]  ;;  %v740_v3 = vpack.c.bf16 %v50_v1, %v49_v0  ;;  %v18_v4 = vld [vmem:[%s1301_s0 + $0x8] sm:$0xff]  ;;  %v35_v8 = vld [vmem:[%s1301_s0 + $0x90] sm:$0xff] }
   0x3   :  { %692 = vmatprep.mubr.msk.f32.mxu0 %vm83_vm0, %v17_v2  ;;  %v33_v6 = vld [vmem:[%s1301_s0 + $0x80] sm:$0xff]  ;;  %v34_v7 = vld [vmem:[%s1301_s0 + $0x88] sm:$0xff]  ;;  %v20_v9 = vld [vmem:[%s1301_s0 + $0x18] sm:$0xff] }
   0x4   :  { %741 = vmatprep.subr.bf16.mxu0 %v740_v3  ;;  %744 = vmatprep.subr.bf16.mxu1 %v740_v3  ;;  %v21_v10 = vld [vmem:[%s1301_s0 + $0x20] sm:$0xff]  ;;  %v36_v11 = vld [vmem:[%s1301_s0 + $0x98] sm:$0xff]  ;;  %v22_v13 = vld [vmem:[%s1301_s0 + $0x28] sm:$0xff] }
   0x5   :  { %743 = vmatpush3.bf16.msra.mxu0 %v740_v3  ;;  %745 = vmatpush3.bf16.msra.mxu1 %v740_v3  ;;  %v37_v12 = vld [vmem:[%s1301_s0 + $0xa0] sm:$0xff]  ;;  %v23_v14 = vld [vmem:[%s1301_s0 + $0x30] sm:$0xff]  ;;  %v38_v15 = vld [vmem:[%s1301_s0 + $0xa8] sm:$0xff] }
   0x6   :  { %716 = vmatprep.mubr.msk.f32.mxu1 %vm83_vm0, %v33_v6  ;;  %v39_v16 = vld [vmem:[%s1301_s0 + $0xb0] sm:$0xff]  ;;  %v24_v17 = vld [vmem:[%s1301_s0 + $0x38] sm:$0xff]  ;;  %v25_v18 = vld [vmem:[%s1301_s0 + $0x40] sm:$0xff] }
   0x7   :  { %v40_v19 = vld [vmem:[%s1301_s0 + $0xb8] sm:$0xff]  ;;  %v41_v20 = vld [vmem:[%s1301_s0 + $0xc0] sm:$0xff]  ;;  %v26_v21 = vld [vmem:[%s1301_s0 + $0x48] sm:$0xff] }
   0x8   :  { %693 = vmatmul.mubr.msk.f32.vlgmr.msra.gmra.mrb[0].mxu0 %vm83_vm0, %v18_v4  ;;  %717 = vmatmul.mubr.msk.f32.vlgmr.msra.gmra.mrb[0].mxu1 %vm83_vm0, %v34_v7  ;;  %v27_v22 = vld [vmem:[%s1301_s0 + $0x50] sm:$0xff]  ;;  %v42_v23 = vld [vmem:[%s1301_s0 + $0xc8] sm:$0xff]  ;;  %v28_v25 = vld [vmem:[%s1301_s0 + $0x58] sm:$0xff] }
   0x9   :  { %695 = vmatprep.mubr.msk.f32.mxu0 %vm83_vm0, %v19_v5  ;;  %719 = vmatprep.mubr.msk.f32.mxu1 %vm83_vm0, %v35_v8  ;;  %v43_v24 = vld [vmem:[%s1301_s0 + $0xd0] sm:$0xff]  ;;  %v29_v26 = vld [vmem:[%s1301_s0 + $0x60] sm:$0xff]  ;;  %v44_v27 = vld [vmem:[%s1301_s0 + $0xd8] sm:$0xff] }
   0xa   :  { %v45_v28 = vld [vmem:[%s1301_s0 + $0xe0] sm:$0xff]  ;;  %v30_v29 = vld [vmem:[%s1301_s0 + $0x68] sm:$0xff]  ;;  %v31_v30 = vld [vmem:[%s1301_s0 + $0x70] sm:$0xff] }
   0xb   :  { %v46_v31 = vld [vmem:[%s1301_s0 + $0xe8] sm:$0xff]  ;;  %v47_v32 = vld [vmem:[%s1301_s0 + $0xf0] sm:$0xff]  ;;  %v32_v33 = vld [vmem:[%s1301_s0 + $0x78] sm:$0xff] }
   0xc   :  { %696 = vmatmul.mubr.msk.f32.gmra.mrb[2].mxu0 %vm83_vm0, %v20_v9  ;;  %720 = vmatmul.mubr.msk.f32.gmra.mrb[2].mxu1 %vm83_vm0, %v36_v11  ;;  %v48_v34 = vld [vmem:[%s1301_s0 + $0xf8] sm:$0xff]  ;;  %v52_v35 = vld [vmem:[%s1302_s2 + $0x8] sm:$0xff]  ;;  %v51_v36 = vld [vmem:[%s1302_s2] sm:$0xff] }
   0xd   :  { %698 = vmatprep.mubr.msk.f32.mxu0 %vm83_vm0, %v21_v10  ;;  %722 = vmatprep.mubr.msk.f32.mxu1 %vm83_vm0, %v37_v12  ;;  %v68_v37 = vld [vmem:[%s1302_s2 + $0x88] sm:$0xff]  ;;  %v67_v39 = vld [vmem:[%s1302_s2 + $0x80] sm:$0xff]  ;;  %v54_v44 = vld [vmem:[%s1302_s2 + $0x18] sm:$0xff] }
   0xe   :  { %v53_v49 = vld [vmem:[%s1302_s2 + $0x10] sm:$0xff]  ;;  %v70_v54 = vld [vmem:[%s1302_s2 + $0x98] sm:$0xff]  ;;  %v56_v63 = vld [vmem:[%s1302_s2 + $0x28] sm:$0xff] }
   0xf   :  { %v69_v60 = vld [vmem:[%s1302_s2 + $0x90] sm:$0xff]  ;;  %v55_v2 = vld [vmem:[%s1302_s2 + $0x20] sm:$0xff] }
  0x10   :  { %699 = vmatmul.mubr.msk.f32.gmra.mrb[4].mxu0 %vm83_vm0, %v22_v13  ;;  %723 = vmatmul.mubr.msk.f32.gmra.mrb[4].mxu1 %vm83_vm0, %v38_v15 }
  0x11   :  { %701 = vmatprep.mubr.msk.f32.mxu0 %vm83_vm0, %v23_v14  ;;  %725 = vmatprep.mubr.msk.f32.mxu1 %vm83_vm0, %v39_v16  ;;  %v58_v16 = vld [vmem:[%s1302_s2 + $0x38] sm:$0xff] }
  0x14   :  { %702 = vmatmul.mubr.msk.f32.gmra.mrb[6].mxu0 %vm83_vm0, %v24_v17  ;;  %726 = vmatmul.mubr.msk.f32.gmra.mrb[6].mxu1 %vm83_vm0, %v40_v19 }
  0x15   :  { %704 = vmatprep.mubr.msk.f32.mxu0 %vm83_vm0, %v25_v18  ;;  %728 = vmatprep.mubr.msk.f32.mxu1 %vm83_vm0, %v41_v20  ;;  %v57_v20 = vld [vmem:[%s1302_s2 + $0x30] sm:$0xff] }
  0x18   :  { %705 = vmatmul.mubr.msk.f32.gmra.mrb[8].mxu0 %vm83_vm0, %v26_v21  ;;  %729 = vmatmul.mubr.msk.f32.gmra.mrb[8].mxu1 %vm83_vm0, %v42_v23  ;;  %v72_v21 = vld [vmem:[%s1302_s2 + $0xa8] sm:$0xff] }
  0x19   :  { %707 = vmatprep.mubr.msk.f32.mxu0 %vm83_vm0, %v27_v22  ;;  %731 = vmatprep.mubr.msk.f32.mxu1 %vm83_vm0, %v43_v24 }
  0x1c   :  { %708 = vmatmul.mubr.msk.f32.gmra.mrb[10].mxu0 %vm83_vm0, %v28_v25  ;;  %732 = vmatmul.mubr.msk.f32.gmra.mrb[10].mxu1 %vm83_vm0, %v44_v27 }
  0x1d   :  { %710 = vmatprep.mubr.msk.f32.mxu0 %vm83_vm0, %v29_v26  ;;  %734 = vmatprep.mubr.msk.f32.mxu1 %vm83_vm0, %v45_v28 }
  0x20   :  { %711 = vmatmul.mubr.msk.f32.gmra.mrb[12].mxu0 %vm83_vm0, %v30_v29  ;;  %735 = vmatmul.mubr.msk.f32.gmra.mrb[12].mxu1 %vm83_vm0, %v46_v31 }
  0x21   :  { %713 = vmatprep.mubr.msk.f32.mxu0 %vm83_vm0, %v31_v30  ;;  %737 = vmatprep.mubr.msk.f32.mxu1 %vm83_vm0, %v47_v32 }
  0x24   :  { %714 = vmatmul.mubr.msk.f32.gmra.mrb[14].mxu0 %vm83_vm0, %v32_v33  ;;  %738 = vmatmul.mubr.msk.f32.gmra.mrb[14].mxu1 %vm83_vm0, %v48_v34 }
  0xdb   :  { %v694_v38 = vpop.f32.mrb[0].mxu0  ;;  %v718_v42 = vpop.f32.mrb[0].mxu1 }
  0xdc   :  { %v252_v40 = vadd.f32 %v694_v38, %v52_v35  ;;  %v246_v41 = vpop.f32.mrb[1].mxu0  ;;  %v925_v45 = vadd.f32 %v718_v42, %v68_v37  ;;  %v326_v46 = vpop.f32.mrb[1].mxu1  ;;  %v60_v35 = vld [vmem:[%s1302_s2 + $0x48] sm:$0xff] }
  0xdd   :  { %v247_v43 = vadd.f32 %v246_v41, %v51_v36  ;;  %v935_v50 = vadd.f32 %v326_v46, %v67_v39  ;;  %v71_v41 = vld [vmem:[%s1302_s2 + $0xa0] sm:$0xff] }
  0xde   :  { %406 = vst.msk [vmem:[%s1303_s3 + $0x8] sm:$0xff] %vm83_vm0, %v252_v40  ;;  %v438_v47 = vsel %vm83_vm0, %v252_v40, 0.0  ;;  %v509_v48 = vmul.f32 %v252_v40, %v252_v40  ;;  %422 = vst.msk [vmem:[%s1303_s3 + $0x88] sm:$0xff] %vm83_vm0, %v925_v45  ;;  %v59_v40 = vld [vmem:[%s1302_s2 + $0x40] sm:$0xff] }
  0xdf   :  { %405 = vst.msk [vmem:[%s1303_s3] sm:$0xff] %vm83_vm0, %v247_v43  ;;  %v437_v51 = vsel %vm83_vm0, %v247_v43, 0.0  ;;  %v508_v52 = vmul.f32 %v247_v43, %v247_v43  ;;  %v697_v53 = vpop.f32.mrb[2].mxu0  ;;  %421 = vst.msk [vmem:[%s1303_s3 + $0x80] sm:$0xff] %vm83_vm0, %v935_v50  ;;  %v721_v59 = vpop.f32.mrb[2].mxu1 }
  0xe0   :  { %v541_v55 = vsel %vm83_vm0, %v509_v48, 0.0  ;;  %v439_v56 = vadd.f32 %v438_v47, %v437_v51  ;;  %v262_v57 = vadd.f32 %v697_v53, %v54_v44  ;;  %v256_v58 = vpop.f32.mrb[3].mxu0  ;;  %v336_v0 = vpop.f32.mrb[3].mxu1  ;;  %v970_v3 = vadd.f32 %v721_v59, %v70_v54 }
  0xe1   :  { %v540_v61 = vsel %vm83_vm0, %v508_v52, 0.0  ;;  %v257_v62 = vadd.f32 %v256_v58, %v53_v49  ;;  %v977_v8 = vadd.f32 %v336_v0, %v69_v60 }
  0xe2   :  { %v542_v1 = vadd.f32 %v541_v55, %v540_v61  ;;  %408 = vst.msk [vmem:[%s1303_s3 + $0x18] sm:$0xff] %vm83_vm0, %v262_v57  ;;  %v511_v4 = vmul.f32 %v262_v57, %v262_v57  ;;  %424 = vst.msk [vmem:[%s1303_s3 + $0x98] sm:$0xff] %vm83_vm0, %v970_v3  ;;  %v442_v13 = vsel %vm83_vm0, %v262_v57, 0.0  ;;  %v62_v57 = vld [vmem:[%s1302_s2 + $0x58] sm:$0xff] }
  0xe3   :  { %407 = vst.msk [vmem:[%s1303_s3 + $0x10] sm:$0xff] %vm83_vm0, %v257_v62  ;;  %v440_v5 = vsel %vm83_vm0, %v257_v62, 0.0  ;;  %v510_v6 = vmul.f32 %v257_v62, %v257_v62  ;;  %v700_v7 = vpop.f32.mrb[4].mxu0  ;;  %v724_v12 = vpop.f32.mrb[4].mxu1  ;;  %423 = vst.msk [vmem:[%s1303_s3 + $0x90] sm:$0xff] %vm83_vm0, %v977_v8  ;;  %v61_v62 = vld [vmem:[%s1302_s2 + $0x50] sm:$0xff] }
  0xe4   :  { %v441_v9 = vadd.f32 %v440_v5, %v439_v56  ;;  %v272_v10 = vadd.f32 %v700_v7, %v56_v63  ;;  %v266_v11 = vpop.f32.mrb[5].mxu0  ;;  %v346_v17 = vpop.f32.mrb[5].mxu1  ;;  %v545_v22 = vsel %vm83_vm0, %v511_v4, 0.0  ;;  %v1015_v36 = vadd.f32 %v724_v12, %v72_v21  ;;  %v74_v63 = vld [vmem:[%s1302_s2 + $0xb8] sm:$0xff]  ;;  %v73_v21 = vld [vmem:[%s1302_s2 + $0xb0] sm:$0xff] }
  0xe5   :  { %v543_v14 = vsel %vm83_vm0, %v510_v6, 0.0  ;;  %v267_v15 = vadd.f32 %v266_v11, %v55_v2  ;;  %v1047_v58 = vadd.f32 %v346_v17, %v71_v41 }
  0xe6   :  { %v544_v18 = vadd.f32 %v543_v14, %v542_v1  ;;  %410 = vst.msk [vmem:[%s1303_s3 + $0x28] sm:$0xff] %vm83_vm0, %v272_v10  ;;  %v443_v19 = vadd.f32 %v442_v13, %v441_v9  ;;  %v513_v23 = vmul.f32 %v272_v10, %v272_v10  ;;  %v446_v32 = vsel %vm83_vm0, %v272_v10, 0.0  ;;  %426 = vst.msk [vmem:[%s1303_s3 + $0xa8] sm:$0xff] %vm83_vm0, %v1015_v36 }
  0xe7   :  { %409 = vst.msk [vmem:[%s1303_s3 + $0x20] sm:$0xff] %vm83_vm0, %v267_v15  ;;  %v444_v24 = vsel %vm83_vm0, %v267_v15, 0.0  ;;  %v512_v25 = vmul.f32 %v267_v15, %v267_v15  ;;  %v703_v26 = vpop.f32.mrb[6].mxu0  ;;  %v727_v31 = vpop.f32.mrb[6].mxu1  ;;  %425 = vst.msk [vmem:[%s1303_s3 + $0xa0] sm:$0xff] %vm83_vm0, %v1047_v58  ;;  %v64_v15 = vld [vmem:[%s1302_s2 + $0x68] sm:$0xff] }
  0xe8   :  { %v445_v27 = vadd.f32 %v444_v24, %v443_v19  ;;  %v546_v28 = vadd.f32 %v545_v22, %v544_v18  ;;  %v282_v29 = vadd.f32 %v703_v26, %v58_v16  ;;  %v276_v30 = vpop.f32.mrb[7].mxu0  ;;  %v1017_v37 = vpop.f32.mrb[7].mxu1  ;;  %v549_v42 = vsel %vm83_vm0, %v513_v23, 0.0 }
  0xe9   :  { %v547_v33 = vsel %vm83_vm0, %v512_v25, 0.0  ;;  %v277_v34 = vadd.f32 %v276_v30, %v57_v20  ;;  %v1079_v16 = vadd.f32 %v727_v31, %v74_v63  ;;  %v63_v20 = vld [vmem:[%s1302_s2 + $0x60] sm:$0xff] }
  0xea   :  { %v548_v38 = vadd.f32 %v547_v33, %v546_v28  ;;  %412 = vst.msk [vmem:[%s1303_s3 + $0x38] sm:$0xff] %vm83_vm0, %v282_v29  ;;  %v447_v39 = vadd.f32 %v446_v32, %v445_v27  ;;  %v515_v43 = vmul.f32 %v282_v29, %v282_v29  ;;  %v450_v54 = vsel %vm83_vm0, %v282_v29, 0.0 }
  0xeb   :  { %411 = vst.msk [vmem:[%s1303_s3 + $0x30] sm:$0xff] %vm83_vm0, %v277_v34  ;;  %v448_v44 = vsel %vm83_vm0, %v277_v34, 0.0  ;;  %v514_v46 = vmul.f32 %v277_v34, %v277_v34  ;;  %v706_v47 = vpop.f32.mrb[8].mxu0  ;;  %v1040_v53 = vpop.f32.mrb[8].mxu1  ;;  %428 = vst.msk [vmem:[%s1303_s3 + $0xb8] sm:$0xff] %vm83_vm0, %v1079_v16 }
  0xec   :  { %v449_v48 = vadd.f32 %v448_v44, %v447_v39  ;;  %v550_v49 = vadd.f32 %v549_v42, %v548_v38  ;;  %v292_v51 = vadd.f32 %v706_v47, %v60_v35  ;;  %v286_v52 = vpop.f32.mrb[9].mxu0  ;;  %v1049_v59 = vpop.f32.mrb[9].mxu1  ;;  %v553_v0 = vsel %vm83_vm0, %v515_v43, 0.0  ;;  %v66_v35 = vld [vmem:[%s1302_s2 + $0x78] sm:$0xff]  ;;  %v65_v42 = vld [vmem:[%s1302_s2 + $0x70] sm:$0xff]  ;;  %v76_v43 = vld [vmem:[%s1302_s2 + $0xc8] sm:$0xff] }
  0xed   :  { %v551_v55 = vsel %vm83_vm0, %v514_v46, 0.0  ;;  %v287_v56 = vadd.f32 %v286_v52, %v59_v40  ;;  %v1112_v38 = vadd.f32 %v1017_v37, %v73_v21  ;;  %v80_v21 = vld [vmem:[%s1302_s2 + $0xe8] sm:$0xff] }
  0xee   :  { %v552_v60 = vadd.f32 %v551_v55, %v550_v49  ;;  %414 = vst.msk [vmem:[%s1303_s3 + $0x48] sm:$0xff] %vm83_vm0, %v292_v51  ;;  %v451_v61 = vadd.f32 %v450_v54, %v449_v48  ;;  %v517_v1 = vmul.f32 %v292_v51, %v292_v51  ;;  %v454_v12 = vsel %vm83_vm0, %v292_v51, 0.0 }
  0xef   :  { %413 = vst.msk [vmem:[%s1303_s3 + $0x40] sm:$0xff] %vm83_vm0, %v287_v56  ;;  %v452_v2 = vsel %vm83_vm0, %v287_v56, 0.0  ;;  %v516_v4 = vmul.f32 %v287_v56, %v287_v56  ;;  %v709_v5 = vpop.f32.mrb[10].mxu0  ;;  %v1072_v11 = vpop.f32.mrb[10].mxu1  ;;  %427 = vst.msk [vmem:[%s1303_s3 + $0xb0] sm:$0xff] %vm83_vm0, %v1112_v38 }
  0xf0   :  { %v453_v6 = vadd.f32 %v452_v2, %v451_v61  ;;  %v554_v7 = vadd.f32 %v553_v0, %v552_v60  ;;  %v302_v9 = vadd.f32 %v709_v5, %v62_v57  ;;  %v296_v10 = vpop.f32.mrb[11].mxu0  ;;  %v1081_v17 = vpop.f32.mrb[11].mxu1  ;;  %v557_v22 = vsel %vm83_vm0, %v517_v1, 0.0 }
  0xf1   :  { %v555_v13 = vsel %vm83_vm0, %v516_v4, 0.0  ;;  %v297_v14 = vadd.f32 %v296_v10, %v61_v62  ;;  %v1138_v61 = vadd.f32 %v1040_v53, %v76_v43  ;;  %v75_v62 = vld [vmem:[%s1302_s2 + $0xc0] sm:$0xff]  ;;  %v524_v2 = vmul.f32 %v935_v50, %v935_v50  ;;  %v78_v53 = vld [vmem:[%s1302_s2 + $0xd8] sm:$0xff]  ;;  %v77_v4 = vld [vmem:[%s1302_s2 + $0xd0] sm:$0xff] }
  0xf2   :  { %v556_v18 = vadd.f32 %v555_v13, %v554_v7  ;;  %416 = vst.msk [vmem:[%s1303_s3 + $0x58] sm:$0xff] %vm83_vm0, %v302_v9  ;;  %v455_v19 = vadd.f32 %v454_v12, %v453_v6  ;;  %v519_v23 = vmul.f32 %v302_v9, %v302_v9  ;;  %v458_v32 = vsel %vm83_vm0, %v302_v9, 0.0 }
  0xf3   :  { %415 = vst.msk [vmem:[%s1303_s3 + $0x50] sm:$0xff] %vm83_vm0, %v297_v14  ;;  %v456_v24 = vsel %vm83_vm0, %v297_v14, 0.0  ;;  %v518_v25 = vmul.f32 %v297_v14, %v297_v14  ;;  %v712_v26 = vpop.f32.mrb[12].mxu0  ;;  %v1104_v31 = vpop.f32.mrb[12].mxu1  ;;  %430 = vst.msk [vmem:[%s1303_s3 + $0xc8] sm:$0xff] %vm83_vm0, %v1138_v61  ;;  %v468_v13 = vsel %vm83_vm0, %v935_v50, 0.0  ;;  %v367_v14 = vadd.f32 %v1049_v59, %v75_v62 }
  0xf4   :  { %v457_v27 = vadd.f32 %v456_v24, %v455_v19  ;;  %v558_v28 = vadd.f32 %v557_v22, %v556_v18  ;;  %v312_v29 = vadd.f32 %v712_v26, %v64_v15  ;;  %v306_v30 = vpop.f32.mrb[13].mxu0  ;;  %v386_v39 = vpop.f32.mrb[13].mxu1  ;;  %v561_v44 = vsel %vm83_vm0, %v519_v23, 0.0  ;;  %v79_v50 = vld [vmem:[%s1302_s2 + $0xe0] sm:$0xff]  ;;  %v82_v59 = vld [vmem:[%s1302_s2 + $0xf8] sm:$0xff] }
  0xf5   :  { %v559_v33 = vsel %vm83_vm0, %v518_v25, 0.0  ;;  %v307_v34 = vadd.f32 %v306_v30, %v63_v20  ;;  %v1172_v19 = vadd.f32 %v1072_v11, %v78_v53  ;;  %v1175_v20 = vadd.f32 %v1081_v17, %v77_v4  ;;  %429 = vst.msk [vmem:[%s1303_s3 + $0xc0] sm:$0xff] %vm83_vm0, %v367_v14 }
  0xf6   :  { %v560_v40 = vadd.f32 %v559_v33, %v558_v28  ;;  %418 = vst.msk [vmem:[%s1303_s3 + $0x68] sm:$0xff] %vm83_vm0, %v312_v29  ;;  %v459_v41 = vadd.f32 %v458_v32, %v457_v27  ;;  %v521_v37 = vmul.f32 %v312_v29, %v312_v29  ;;  %v462_v56 = vsel %vm83_vm0, %v312_v29, 0.0 }
  0xf7   :  { %417 = vst.msk [vmem:[%s1303_s3 + $0x60] sm:$0xff] %vm83_vm0, %v307_v34  ;;  %v460_v46 = vsel %vm83_vm0, %v307_v34, 0.0  ;;  %v520_v47 = vmul.f32 %v307_v34, %v307_v34  ;;  %v715_v48 = vpop.f32.mrb[14].mxu0  ;;  %v739_v55 = vpop.f32.mrb[14].mxu1  ;;  %v525_v17 = vmul.f32 %v925_v45, %v925_v45  ;;  %v571_v24 = vsel %vm83_vm0, %v524_v2, 0.0  ;;  %432 = vst.msk [vmem:[%s1303_s3 + $0xd8] sm:$0xff] %vm83_vm0, %v1172_v19 }
  0xf8   :  { %v461_v49 = vadd.f32 %v460_v46, %v459_v41  ;;  %v562_v51 = vadd.f32 %v561_v44, %v560_v40  ;;  %v322_v52 = vadd.f32 %v715_v48, %v66_v35  ;;  %v316_v54 = vpop.f32.mrb[15].mxu0  ;;  %v396_v63 = vpop.f32.mrb[15].mxu1  ;;  %v565_v5 = vsel %vm83_vm0, %v521_v37, 0.0  ;;  %431 = vst.msk [vmem:[%s1303_s3 + $0xd0] sm:$0xff] %vm83_vm0, %v1175_v20  ;;  %v81_v34 = vld [vmem:[%s1302_s2 + $0xf0] sm:$0xff] }
  0xf9   :  { %v563_v57 = vsel %vm83_vm0, %v520_v47, 0.0  ;;  %v317_v60 = vadd.f32 %v316_v54, %v65_v42  ;;  %v526_v25 = vmul.f32 %v977_v8, %v977_v8  ;;  %v1207_v28 = vadd.f32 %v1104_v31, %v80_v21 }
  0xfa   :  { %v564_v0 = vadd.f32 %v563_v57, %v562_v51  ;;  %420 = vst.msk [vmem:[%s1303_s3 + $0x78] sm:$0xff] %vm83_vm0, %v322_v52  ;;  %v463_v1 = vadd.f32 %v462_v56, %v461_v49  ;;  %v523_v6 = vmul.f32 %v322_v52, %v322_v52  ;;  %v466_v15 = vsel %vm83_vm0, %v322_v52, 0.0 }
  0xfb   :  { %419 = vst.msk [vmem:[%s1303_s3 + $0x70] sm:$0xff] %vm83_vm0, %v317_v60  ;;  %v464_v7 = vsel %vm83_vm0, %v317_v60, 0.0  ;;  %v522_v9 = vmul.f32 %v317_v60, %v317_v60  ;;  %v470_v29 = vsel %vm83_vm0, %v925_v45, 0.0  ;;  %v472_v30 = vsel %vm83_vm0, %v977_v8, 0.0  ;;  %434 = vst.msk [vmem:[%s1303_s3 + $0xe8] sm:$0xff] %vm83_vm0, %v1207_v28 }
  0xfc   :  { %v465_v10 = vadd.f32 %v464_v7, %v463_v1  ;;  %v566_v12 = vadd.f32 %v565_v5, %v564_v0  ;;  %v569_v11 = vsel %vm83_vm0, %v523_v6, 0.0  ;;  %v387_v32 = vadd.f32 %v386_v39, %v79_v50 }
  0xfd   :  { %v567_v18 = vsel %vm83_vm0, %v522_v9, 0.0  ;;  %v1213_v33 = vadd.f32 %v739_v55, %v82_v59  ;;  %v573_v45 = vsel %vm83_vm0, %v525_v17, 0.0  ;;  %v527_v8 = vmul.f32 %v970_v3, %v970_v3 }
  0xfe   :  { %v568_v22 = vadd.f32 %v567_v18, %v566_v12  ;;  %v467_v23 = vadd.f32 %v466_v15, %v465_v10  ;;  %v575_v31 = vsel %vm83_vm0, %v526_v25, 0.0  ;;  %v528_v39 = vmul.f32 %v1047_v58, %v1047_v58  ;;  %433 = vst.msk [vmem:[%s1303_s3 + $0xe0] sm:$0xff] %vm83_vm0, %v387_v32 }
  0xff   :  { %436 = vst.msk [vmem:[%s1303_s3 + $0xf8] sm:$0xff] %vm83_vm0, %v1213_v33  ;;  %v397_v43 = vadd.f32 %v396_v63, %v81_v34  ;;  %v474_v44 = vsel %vm83_vm0, %v970_v3, 0.0  ;;  %v476_v37 = vsel %vm83_vm0, %v1047_v58, 0.0  ;;  %v577_v48 = vsel %vm83_vm0, %v527_v8, 0.0 }
 0x100   :  { %v469_v26 = vadd.f32 %v468_v13, %v467_v23  ;;  %v570_v27 = vadd.f32 %v569_v11, %v568_v22  ;;  %v529_v49 = vmul.f32 %v1015_v36, %v1015_v36  ;;  %v579_v51 = vsel %vm83_vm0, %v528_v39, 0.0 }
 0x101   :  { %435 = vst.msk [vmem:[%s1303_s3 + $0xf0] sm:$0xff] %vm83_vm0, %v397_v43  ;;  %v530_v3 = vmul.f32 %v1112_v38, %v1112_v38  ;;  %v478_v58 = vsel %vm83_vm0, %v1015_v36, 0.0  ;;  %v480_v55 = vsel %vm83_vm0, %v1112_v38, 0.0  ;;  %v531_v62 = vmul.f32 %v1079_v16, %v1079_v16 }
 0x102   :  { %v572_v35 = vadd.f32 %v571_v24, %v570_v27  ;;  %v471_v40 = vadd.f32 %v470_v29, %v469_v26  ;;  %v581_v60 = vsel %vm83_vm0, %v529_v49, 0.0  ;;  %v532_v0 = vmul.f32 %v367_v14, %v367_v14 }
 0x103   :  { %v583_v63 = vsel %vm83_vm0, %v530_v3, 0.0  ;;  %v482_v53 = vsel %vm83_vm0, %v1079_v16, 0.0  ;;  %v484_v36 = vsel %vm83_vm0, %v367_v14, 0.0  ;;  %v585_v38 = vsel %vm83_vm0, %v531_v62, 0.0 }
 0x104   :  { %v473_v41 = vadd.f32 %v472_v30, %v471_v40  ;;  %v574_v42 = vadd.f32 %v573_v45, %v572_v35  ;;  %v533_v6 = vmul.f32 %v1138_v61, %v1138_v61  ;;  %v587_v7 = vsel %vm83_vm0, %v532_v0, 0.0 }
 0x105   :  { %v534_v9 = vmul.f32 %v1175_v20, %v1175_v20  ;;  %v486_v13 = vsel %vm83_vm0, %v1138_v61, 0.0  ;;  %v488_v16 = vsel %vm83_vm0, %v1175_v20, 0.0  ;;  %v535_v21 = vmul.f32 %v1172_v19, %v1172_v19 }
 0x106   :  { %v576_v46 = vadd.f32 %v575_v31, %v574_v42  ;;  %v475_v47 = vadd.f32 %v474_v44, %v473_v41  ;;  %v589_v18 = vsel %vm83_vm0, %v533_v6, 0.0  ;;  %v536_v23 = vmul.f32 %v387_v32, %v387_v32 }
 0x107   :  { %v591_v22 = vsel %vm83_vm0, %v534_v9, 0.0  ;;  %v490_v11 = vsel %vm83_vm0, %v1172_v19, 0.0  ;;  %v492_v61 = vsel %vm83_vm0, %v387_v32, 0.0  ;;  %v593_v20 = vsel %vm83_vm0, %v535_v21, 0.0 }
 0x108   :  { %v477_v52 = vadd.f32 %v476_v37, %v475_v47  ;;  %v578_v54 = vadd.f32 %v577_v48, %v576_v46  ;;  %v537_v25 = vmul.f32 %v1207_v28, %v1207_v28  ;;  %v595_v26 = vsel %vm83_vm0, %v536_v23, 0.0 }
 0x109   :  { %v538_v27 = vmul.f32 %v397_v43, %v397_v43  ;;  %v494_v34 = vsel %vm83_vm0, %v1207_v28, 0.0  ;;  %v496_v35 = vsel %vm83_vm0, %v397_v43, 0.0  ;;  %v539_v45 = vmul.f32 %v1213_v33, %v1213_v33 }
 0x10a   :  { %v580_v56 = vadd.f32 %v579_v51, %v578_v54  ;;  %v479_v57 = vadd.f32 %v478_v58, %v477_v52  ;;  %v597_v32 = vsel %vm83_vm0, %v537_v25, 0.0  ;;  %v498_v41 = vsel %vm83_vm0, %v1213_v33, 0.0 }
 0x10b   :  { %v599_v8 = vsel %vm83_vm0, %v538_v27, 0.0  ;;  %v601_v28 = vsel %vm83_vm0, %v539_v45, 0.0 }
 0x10c   :  { %v481_v1 = vadd.f32 %v480_v55, %v479_v57  ;;  %v582_v2 = vadd.f32 %v581_v60, %v580_v56 }
 0x10e   :  { %v584_v4 = vadd.f32 %v583_v63, %v582_v2  ;;  %v483_v5 = vadd.f32 %v482_v53, %v481_v1 }
 0x110   :  { %v485_v10 = vadd.f32 %v484_v36, %v483_v5  ;;  %v586_v12 = vadd.f32 %v585_v38, %v584_v4 }
 0x112   :  { %v588_v14 = vadd.f32 %v587_v7, %v586_v12  ;;  %v487_v15 = vadd.f32 %v486_v13, %v485_v10 }
 0x114   :  { %v489_v50 = vadd.f32 %v488_v16, %v487_v15  ;;  %v590_v59 = vadd.f32 %v589_v18, %v588_v14 }
 0x116   :  { %v592_v17 = vadd.f32 %v591_v22, %v590_v59  ;;  %v491_v24 = vadd.f32 %v490_v11, %v489_v50 }
 0x118   :  { %v493_v29 = vadd.f32 %v492_v61, %v491_v24  ;;  %v594_v30 = vadd.f32 %v593_v20, %v592_v17 }
 0x11a   :  { %v596_v19 = vadd.f32 %v595_v26, %v594_v30  ;;  %v495_v40 = vadd.f32 %v494_v34, %v493_v29 }
 0x11c   :  { %v497_v31 = vadd.f32 %v496_v35, %v495_v40  ;;  %v598_v39 = vadd.f32 %v597_v32, %v596_v19 }
 0x11e   :  { %v499_v42 = vadd.f32 %v498_v41, %v497_v31  ;;  %v600_v44 = vadd.f32 %v599_v8, %v598_v39 }
 0x120   :  { %v500_v37 = vrot.slane %v499_v42, 4  ;;  %v602_v43 = vadd.f32 %v601_v28, %v600_v44 }
 0x122   :  { %v501_v46 = vadd.f32 %v500_v37, %v499_v42  ;;  %v603_v47 = vrot.slane %v602_v43, 4 }
 0x124   :  { %v502_v48 = vrot.slane %v501_v46, 2  ;;  %v604_v49 = vadd.f32 %v603_v47, %v602_v43 }
 0x126   :  { %v503_v51 = vadd.f32 %v502_v48, %v501_v46  ;;  %v605_v3 = vrot.slane %v604_v49, 2 }
 0x128   :  { %v504_v52 = vrot.slane %v503_v51, 1  ;;  %v606_v54 = vadd.f32 %v605_v3, %v604_v49 }
 0x12a   :  { %v505_v58 = vadd.f32 %v504_v52, %v503_v51  ;;  %v607_v55 = vrot.slane %v606_v54, 1 }
 0x12c   :  { %507 = vst.msk [vmem:[%s1304_s4] sm:$0x1] %vm506_vm1, %v505_v58  ;;  %v608_v33 = vadd.f32 %v607_v55, %v606_v54 }
 0x12e   :  { %609 = vst.msk [vmem:[%s1305_s5] sm:$0x1] %vm506_vm1, %v608_v33 }

// kernel: attention_conv_block_l3.72
= control target key start
LH: loop header
LB: loop body
LE: loop exit
PB: predicated region body
PF: predicated region fallthrough
CT: control target
= control target key end

     0   :  { %vm421_vm0 = vcmask 1043456   ;;  %vm324_vm1 = vcmask 64512   ;;  %vm782_vm2 = vcmask 57344   ;;  %s2334_s3 = inlined_call_operand.vmem [shape: bf16[8,8], index: 3, kind: input, shape index: {}]   ;;  %s2335_s0 = inlined_call_operand.vmem [shape: f32[512,8], index: 0, kind: input, shape index: {}]   ;;  %s2336_s1 = inlined_call_operand.vmem [shape: f32[1,8], index: 1, kind: input, shape index: {}]   ;;  %s2337_s2 = inlined_call_operand.vmem [shape: f32[1,8], index: 2, kind: input, shape index: {}]   ;;  %s2338_s5 = inlined_call_operand.vmem [shape: f32[1,8], index: 5, kind: output, shape index: {1}]   ;;  %s2339_s6 = inlined_call_operand.vmem [shape: f32[1,8], index: 6, kind: output, shape index: {2}]   ;;  %s2340_s4 = inlined_call_operand.vmem [shape: f32[512,8], index: 4, kind: output, shape index: {0}]  }
   0x1   :  { %v323_v0 = vld [vmem:[%s2334_s3] sm:$0xf]  ;;  %v22_v2 = vld [vmem:[%s2335_s0 + $0x8] sm:$0xff]  ;;  %v23_v6 = vld [vmem:[%s2335_s0 + $0x10] sm:$0xff] }
   0x2   :  { %v21_v1 = vld [vmem:[%s2335_s0] sm:$0xff]  ;;  %1269 = vmatprep.subr.msk.bf16.mxu0 %vm421_vm0, %v323_v0  ;;  %v423_v3 = vsel %vm421_vm0, %v323_v0, 0  ;;  %1270 = vmatprep.subr.msk.bf16.mxu1 %vm421_vm0, %v323_v0  ;;  %v24_v9 = vld [vmem:[%s2335_s0 + $0x18] sm:$0xff]  ;;  %v26_v12 = vld [vmem:[%s2335_s0 + $0x28] sm:$0xff] }
   0x3   :  { %v1320_v4 = vld [vmem:[%s2336_s1] ss:$0 sm:$0xff]  ;;  %1202 = vmatpush3.bf16.msra.mxu0 %v423_v3  ;;  %1268 = vmatpush3.bf16.msra.mxu1 %v423_v3  ;;  %v27_v16 = vld [vmem:[%s2335_s0 + $0x30] sm:$0xff]  ;;  %v28_v17 = vld [vmem:[%s2335_s0 + $0x38] sm:$0xff] }
   0x4   :  { %v1325_v5 = vld [vmem:[%s2337_s2] ss:$0 sm:$0xff]  ;;  %v92_v7 = vmul.f32 %v1320_v4, %v21_v1  ;;  %v93_v8 = vmul.f32 %v1320_v4, %v22_v2  ;;  %v94_v10 = vmul.f32 %v1320_v4, %v23_v6  ;;  %v95_v13 = vmul.f32 %v1320_v4, %v24_v9  ;;  %v30_v27 = vld [vmem:[%s2335_s0 + $0x48] sm:$0xff]  ;;  %v31_v32 = vld [vmem:[%s2335_s0 + $0x50] sm:$0xff] }
   0x5   :  { %v25_v11 = vld [vmem:[%s2335_s0 + $0x20] sm:$0xff]  ;;  %v97_v15 = vmul.f32 %v1320_v4, %v26_v12  ;;  %v98_v21 = vmul.f32 %v1320_v4, %v27_v16  ;;  %v99_v25 = vmul.f32 %v1320_v4, %v28_v17  ;;  %v32_v37 = vld [vmem:[%s2335_s0 + $0x58] sm:$0xff]  ;;  %v101_v41 = vmul.f32 %v1320_v4, %v30_v27  ;;  %v34_v42 = vld [vmem:[%s2335_s0 + $0x68] sm:$0xff] }
   0x6   :  { %v96_v14 = vmul.f32 %v1320_v4, %v25_v11  ;;  %v163_v18 = vadd.f32 %v1325_v5, %v92_v7  ;;  %v164_v19 = vadd.f32 %v1325_v5, %v93_v8  ;;  %v165_v20 = vadd.f32 %v1325_v5, %v94_v10  ;;  %v29_v26 = vld [vmem:[%s2335_s0 + $0x40] sm:$0xff]  ;;  %v35_v46 = vld [vmem:[%s2335_s0 + $0x70] sm:$0xff]  ;;  %v36_v55 = vld [vmem:[%s2335_s0 + $0x78] sm:$0xff] }
   0x7   :  { %v166_v22 = vadd.f32 %v1325_v5, %v95_v13  ;;  %v168_v24 = vadd.f32 %v1325_v5, %v97_v15  ;;  %v169_v31 = vadd.f32 %v1325_v5, %v98_v21  ;;  %v170_v36 = vadd.f32 %v1325_v5, %v99_v25  ;;  %v33_v38 = vld [vmem:[%s2335_s0 + $0x60] sm:$0xff]  ;;  %v38_v60 = vld [vmem:[%s2335_s0 + $0x88] sm:$0xff]  ;;  %v39_v0 = vld [vmem:[%s2335_s0 + $0x90] sm:$0xff] }
   0x8   :  { %v167_v23 = vadd.f32 %v1325_v5, %v96_v14  ;;  %v227_v28 = vmax.f32 %v163_v18, 0.0  ;;  %v228_v29 = vmax.f32 %v164_v19, 0.0  ;;  %v229_v30 = vmax.f32 %v165_v20, 0.0  ;;  %v37_v56 = vld [vmem:[%s2335_s0 + $0x80] sm:$0xff]  ;;  %v40_v1 = vld [vmem:[%s2335_s0 + $0x98] sm:$0xff]  ;;  %v42_v10 = vld [vmem:[%s2335_s0 + $0xa8] sm:$0xff] }
   0x9   :  { %v230_v33 = vmax.f32 %v166_v22, 0.0  ;;  %v232_v35 = vmax.f32 %v168_v24, 0.0  ;;  %v100_v40 = vmul.f32 %v1320_v4, %v29_v26  ;;  %v102_v45 = vmul.f32 %v1320_v4, %v31_v32  ;;  %v41_v6 = vld [vmem:[%s2335_s0 + $0xa0] sm:$0xff]  ;;  %v43_v15 = vld [vmem:[%s2335_s0 + $0xb0] sm:$0xff]  ;;  %v44_v20 = vld [vmem:[%s2335_s0 + $0xb8] sm:$0xff] }
   0xa   :  { %v231_v34 = vmax.f32 %v167_v23, 0.0  ;;  %v291_v39 = vpack.c.bf16 %v228_v29, %v227_v28  ;;  %v172_v48 = vadd.f32 %v1325_v5, %v101_v41  ;;  %v103_v49 = vmul.f32 %v1320_v4, %v32_v37  ;;  %v45_v25 = vld [vmem:[%s2335_s0 + $0xc0] sm:$0xff]  ;;  %v46_v29 = vld [vmem:[%s2335_s0 + $0xc8] sm:$0xff] }
   0xb   :  { %v292_v43 = vpack.c.bf16 %v230_v33, %v229_v30  ;;  %v171_v47 = vadd.f32 %v1325_v5, %v100_v40  ;;  %v104_v50 = vmul.f32 %v1320_v4, %v33_v38  ;;  %v233_v51 = vmax.f32 %v169_v31, 0.0  ;;  %v47_v33 = vld [vmem:[%s2335_s0 + $0xd0] sm:$0xff] }
   0xc   :  { %v293_v44 = vpack.c.bf16 %v232_v35, %v231_v34  ;;  %1203 = vmatprep.mubr.msk.bf16.mxu0 %vm324_vm1, %v291_v39  ;;  %v234_v52 = vmax.f32 %v170_v36, 0.0  ;;  %v173_v53 = vadd.f32 %v1325_v5, %v102_v45  ;;  %v105_v54 = vmul.f32 %v1320_v4, %v34_v42  ;;  %v48_v42 = vld [vmem:[%s2335_s0 + $0xd8] sm:$0xff] }
   0xd   :  { %1204 = vmatmul.mubr.msk.bf16.vlgmr.msra.gmra.mrb[0].mxu0 %vm324_vm1, %v292_v43  ;;  %v235_v57 = vmax.f32 %v171_v47, 0.0  ;;  %v236_v58 = vmax.f32 %v172_v48, 0.0  ;;  %v106_v59 = vmul.f32 %v1320_v4, %v35_v46  ;;  %v174_v61 = vadd.f32 %v1325_v5, %v103_v49  ;;  %v49_v47 = vld [vmem:[%s2335_s0 + $0xe0] sm:$0xff] }
   0xe   :  { %1207 = vmatprep.mubr.msk.bf16.mxu0 %vm324_vm1, %v293_v44  ;;  %v175_v62 = vadd.f32 %v1325_v5, %v104_v50  ;;  %v176_v63 = vadd.f32 %v1325_v5, %v105_v54  ;;  %v107_v2 = vmul.f32 %v1320_v4, %v36_v55  ;;  %v108_v3 = vmul.f32 %v1320_v4, %v37_v56  ;;  %v53_v54 = vld [vmem:[%s2335_s0 + $0x100] sm:$0xff]  ;;  %v50_v56 = vld [vmem:[%s2335_s0 + $0xe8] sm:$0xff] }
   0xf   :  { %v294_v7 = vpack.c.bf16 %v234_v52, %v233_v51  ;;  %v237_v8 = vmax.f32 %v173_v53, 0.0  ;;  %v109_v9 = vmul.f32 %v1320_v4, %v38_v60  ;;  %v295_v11 = vpack.c.bf16 %v236_v58, %v235_v57  ;;  %v54_v58 = vld [vmem:[%s2335_s0 + $0x108] sm:$0xff] }
  0x10   :  { %v177_v12 = vadd.f32 %v1325_v5, %v106_v59  ;;  %v110_v13 = vmul.f32 %v1320_v4, %v39_v0  ;;  %v111_v14 = vmul.f32 %v1320_v4, %v40_v1  ;;  %v238_v16 = vmax.f32 %v174_v61, 0.0  ;;  %v56_v0 = vld [vmem:[%s2335_s0 + $0x118] sm:$0xff] }
  0x11   :  { %v239_v17 = vmax.f32 %v175_v62, 0.0  ;;  %v240_v18 = vmax.f32 %v176_v63, 0.0  ;;  %v112_v19 = vmul.f32 %v1320_v4, %v41_v6  ;;  %v178_v21 = vadd.f32 %v1325_v5, %v107_v2  ;;  %v55_v63 = vld [vmem:[%s2335_s0 + $0x110] sm:$0xff] }
  0x12   :  { %v179_v22 = vadd.f32 %v1325_v5, %v108_v3  ;;  %v180_v23 = vadd.f32 %v1325_v5, %v109_v9  ;;  %v113_v24 = vmul.f32 %v1320_v4, %v42_v10  ;;  %v181_v26 = vadd.f32 %v1325_v5, %v110_v13  ;;  %v51_v6 = vld [vmem:[%s2335_s0 + $0xf0] sm:$0xff]  ;;  %v58_v13 = vld [vmem:[%s2335_s0 + $0x128] sm:$0xff] }
  0x13   :  { %v182_v27 = vadd.f32 %v1325_v5, %v111_v14  ;;  %v114_v28 = vmul.f32 %v1320_v4, %v43_v15  ;;  %v183_v30 = vadd.f32 %v1325_v5, %v112_v19  ;;  %v115_v32 = vmul.f32 %v1320_v4, %v44_v20 }
  0x14   :  { %v184_v31 = vadd.f32 %v1325_v5, %v113_v24  ;;  %v296_v34 = vpack.c.bf16 %v238_v16, %v237_v8  ;;  %v297_v35 = vpack.c.bf16 %v240_v18, %v239_v17  ;;  %v241_v36 = vmax.f32 %v177_v12, 0.0  ;;  %v57_v8 = vld [vmem:[%s2335_s0 + $0x120] sm:$0xff]  ;;  %v59_v18 = vld [vmem:[%s2335_s0 + $0x130] sm:$0xff] }
  0x15   :  { %1208 = vmatmul.mubr.msk.bf16.gmra.mrb[4].mxu0 %vm324_vm1, %v294_v7  ;;  %v116_v37 = vmul.f32 %v1320_v4, %v45_v25  ;;  %v242_v38 = vmax.f32 %v178_v21, 0.0  ;;  %v243_v39 = vmax.f32 %v179_v22, 0.0  ;;  %v244_v40 = vmax.f32 %v180_v23, 0.0  ;;  %v60_v23 = vld [vmem:[%s2335_s0 + $0x138] sm:$0xff] }
  0x16   :  { %1211 = vmatprep.mubr.msk.bf16.mxu0 %vm324_vm1, %v295_v11  ;;  %v117_v41 = vmul.f32 %v1320_v4, %v46_v29  ;;  %v245_v43 = vmax.f32 %v181_v26, 0.0  ;;  %v246_v44 = vmax.f32 %v182_v27, 0.0  ;;  %v1459_v45 = vadd.f32 %v1325_v5, %v114_v28  ;;  %v61_v28 = vld [vmem:[%s2335_s0 + $0x140] sm:$0xff] }
  0x17   :  { %v118_v46 = vmul.f32 %v1320_v4, %v47_v33  ;;  %v247_v48 = vmax.f32 %v183_v30, 0.0  ;;  %v248_v49 = vmax.f32 %v184_v31, 0.0  ;;  %v1466_v50 = vadd.f32 %v1325_v5, %v115_v32  ;;  %v62_v33 = vld [vmem:[%s2335_s0 + $0x148] sm:$0xff] }
  0x18   :  { %v1469_v51 = vadd.f32 %v1325_v5, %v116_v37  ;;  %v1472_v52 = vadd.f32 %v1325_v5, %v117_v41  ;;  %v119_v53 = vmul.f32 %v1320_v4, %v48_v42  ;;  %v298_v55 = vpack.c.bf16 %v242_v38, %v241_v36  ;;  %v63_v38 = vld [vmem:[%s2335_s0 + $0x150] sm:$0xff] }
  0x19   :  { %v120_v57 = vmul.f32 %v1320_v4, %v49_v47  ;;  %v299_v59 = vpack.c.bf16 %v244_v40, %v243_v39  ;;  %v1486_v60 = vpack.c.bf16 %v246_v44, %v245_v43  ;;  %v249_v61 = vmax.f32 %v1459_v45, 0.0  ;;  %v64_v39 = vld [vmem:[%s2335_s0 + $0x158] sm:$0xff]  ;;  %v65_v44 = vld [vmem:[%s2335_s0 + $0x160] sm:$0xff] }
  0x1a   :  { %v1490_v62 = vadd.f32 %v1325_v5, %v118_v46  ;;  %v1499_v1 = vpack.c.bf16 %v248_v49, %v247_v48  ;;  %v250_v2 = vmax.f32 %v1466_v50, 0.0  ;;  %v251_v3 = vmax.f32 %v1469_v51, 0.0  ;;  %v76_v45 = vld [vmem:[%s2335_s0 + $0x1b8] sm:$0xff] }
  0x1b   :  { %v124_v7 = vmul.f32 %v1320_v4, %v53_v54  ;;  %v252_v9 = vmax.f32 %v1472_v52, 0.0  ;;  %v1512_v10 = vadd.f32 %v1325_v5, %v119_v53  ;;  %v121_v11 = vmul.f32 %v1320_v4, %v50_v56  ;;  %v66_v53 = vld [vmem:[%s2335_s0 + $0x168] sm:$0xff] }
  0x1c   :  { %v125_v12 = vmul.f32 %v1320_v4, %v54_v58  ;;  %v1520_v14 = vadd.f32 %v1325_v5, %v120_v57  ;;  %v126_v16 = vmul.f32 %v1320_v4, %v55_v63  ;;  %v127_v17 = vmul.f32 %v1320_v4, %v56_v0  ;;  %v67_v58 = vld [vmem:[%s2335_s0 + $0x170] sm:$0xff] }
  0x1d   :  { %1212 = vmatmul.mubr.msk.bf16.gmra.mrb[8].mxu0 %vm324_vm1, %v296_v34  ;;  %v195_v15 = vadd.f32 %v1325_v5, %v124_v7  ;;  %v253_v19 = vmax.f32 %v1490_v62, 0.0  ;;  %v122_v20 = vmul.f32 %v1320_v4, %v51_v6  ;;  %v128_v22 = vmul.f32 %v1320_v4, %v57_v8  ;;  %v68_v8 = vld [vmem:[%s2335_s0 + $0x178] sm:$0xff]  ;;  %v73_v62 = vld [vmem:[%s2335_s0 + $0x1a0] sm:$0xff] }
  0x1e   :  { %1215 = vmatprep.mubr.msk.bf16.mxu0 %vm324_vm1, %v297_v35  ;;  %v196_v21 = vadd.f32 %v1325_v5, %v125_v12  ;;  %v197_v25 = vadd.f32 %v1325_v5, %v126_v16  ;;  %v198_v26 = vadd.f32 %v1325_v5, %v127_v17  ;;  %v129_v27 = vmul.f32 %v1320_v4, %v58_v13  ;;  %v69_v16 = vld [vmem:[%s2335_s0 + $0x180] sm:$0xff] }
  0x1f   :  { %v259_v24 = vmax.f32 %v195_v15, 0.0  ;;  %v1542_v29 = vadd.f32 %v1325_v5, %v121_v11  ;;  %v199_v31 = vadd.f32 %v1325_v5, %v128_v22  ;;  %v130_v32 = vmul.f32 %v1320_v4, %v59_v18 }
  0x20   :  { %v260_v30 = vmax.f32 %v196_v21, 0.0  ;;  %v261_v34 = vmax.f32 %v197_v25, 0.0  ;;  %v262_v35 = vmax.f32 %v198_v26, 0.0  ;;  %v200_v36 = vadd.f32 %v1325_v5, %v129_v27  ;;  %v70_v27 = vld [vmem:[%s2335_s0 + $0x188] sm:$0xff] }
  0x21   :  { %v131_v37 = vmul.f32 %v1320_v4, %v60_v23  ;;  %v263_v41 = vmax.f32 %v199_v31, 0.0  ;;  %v201_v42 = vadd.f32 %v1325_v5, %v130_v32  ;;  %v132_v43 = vmul.f32 %v1320_v4, %v61_v28 }
  0x22   :  { %v307_v40 = vpack.c.bf16 %v260_v30, %v259_v24  ;;  %v308_v46 = vpack.c.bf16 %v262_v35, %v261_v34  ;;  %v264_v47 = vmax.f32 %v200_v36, 0.0  ;;  %v133_v49 = vmul.f32 %v1320_v4, %v62_v33  ;;  %v71_v36 = vld [vmem:[%s2335_s0 + $0x190] sm:$0xff] }
  0x23   :  { %v202_v48 = vadd.f32 %v1325_v5, %v131_v37  ;;  %v265_v54 = vmax.f32 %v201_v42, 0.0  ;;  %v134_v56 = vmul.f32 %v1320_v4, %v63_v38  ;;  %v135_v57 = vmul.f32 %v1320_v4, %v64_v39 }
  0x24   :  { %1235 = vmatprep.mubr.msk.bf16.mxu1 %vm324_vm1, %v307_v40  ;;  %v309_v63 = vpack.c.bf16 %v264_v47, %v263_v41  ;;  %v204_v6 = vadd.f32 %v1325_v5, %v133_v49  ;;  %v136_v7 = vmul.f32 %v1320_v4, %v65_v44  ;;  %v137_v15 = vmul.f32 %v1320_v4, %v66_v53  ;;  %v72_v40 = vld [vmem:[%s2335_s0 + $0x198] sm:$0xff]  ;;  %v74_v41 = vld [vmem:[%s2335_s0 + $0x1a8] sm:$0xff]  ;;  %v79_v49 = vld [vmem:[%s2335_s0 + $0x1d0] sm:$0xff] }
  0x25   :  { %1216 = vmatmul.mubr.msk.bf16.gmra.mrb[12].mxu0 %vm324_vm1, %v298_v55  ;;  %v203_v55 = vadd.f32 %v1325_v5, %v132_v43  ;;  %1236 = vmatmul.mubr.msk.bf16.vlgmr.msra.gmra.mrb[0].mxu1 %vm324_vm1, %v308_v46  ;;  %v266_v0 = vmax.f32 %v202_v48, 0.0  ;;  %v205_v12 = vadd.f32 %v1325_v5, %v134_v56  ;;  %v206_v13 = vadd.f32 %v1325_v5, %v135_v57  ;;  %v78_v43 = vld [vmem:[%s2335_s0 + $0x1c8] sm:$0xff]  ;;  %v80_v53 = vld [vmem:[%s2335_s0 + $0x1d8] sm:$0xff] }
  0x26   :  { %1219 = vmatprep.mubr.msk.bf16.mxu0 %vm324_vm1, %v299_v59  ;;  %v52_v59 = vld [vmem:[%s2335_s0 + $0xf8] sm:$0xff]  ;;  %v254_v17 = vmax.f32 %v1512_v10, 0.0  ;;  %1239 = vmatprep.mubr.msk.bf16.mxu1 %vm324_vm1, %v309_v63  ;;  %v268_v18 = vmax.f32 %v204_v6, 0.0  ;;  %v207_v21 = vadd.f32 %v1325_v5, %v136_v7  ;;  %v138_v22 = vmul.f32 %v1320_v4, %v67_v58  ;;  %v81_v58 = vld [vmem:[%s2335_s0 + $0x1e0] sm:$0xff]  ;;  %v82_v7 = vld [vmem:[%s2335_s0 + $0x1e8] sm:$0xff] }
  0x27   :  { %v267_v11 = vmax.f32 %v203_v55, 0.0  ;;  %v255_v23 = vmax.f32 %v1520_v14, 0.0  ;;  %v123_v24 = vmul.f32 %v1320_v4, %v52_v59  ;;  %v208_v25 = vadd.f32 %v1325_v5, %v137_v15  ;;  %v83_v15 = vld [vmem:[%s2335_s0 + $0x1f0] sm:$0xff] }
  0x28   :  { %v139_v26 = vmul.f32 %v1320_v4, %v68_v8  ;;  %v256_v10 = vmax.f32 %v1542_v29, 0.0  ;;  %v1604_v28 = vadd.f32 %v1325_v5, %v122_v20  ;;  %v310_v30 = vpack.c.bf16 %v266_v0, %v265_v54 }
  0x29   :  { %v140_v31 = vmul.f32 %v1320_v4, %v69_v16  ;;  %v311_v14 = vpack.c.bf16 %v268_v18, %v267_v11  ;;  %v269_v32 = vmax.f32 %v205_v12, 0.0  ;;  %v270_v33 = vmax.f32 %v206_v13, 0.0 }
  0x2a   :  { %v1610_v34 = vadd.f32 %v1325_v5, %v138_v22  ;;  %v271_v35 = vmax.f32 %v207_v21, 0.0  ;;  %v272_v29 = vmax.f32 %v208_v25, 0.0  ;;  %v141_v20 = vmul.f32 %v1320_v4, %v70_v27  ;;  %v84_v22 = vld [vmem:[%s2335_s0 + $0x1f8] sm:$0xff] }
  0x2b   :  { %v302_v37 = vpack.c.bf16 %v250_v2, %v249_v61  ;;  %v1631_v38 = vpack.c.bf16 %v254_v17, %v253_v19  ;;  %v1634_v39 = vadd.f32 %v1325_v5, %v139_v26  ;;  %v1642_v50 = vpack.c.bf16 %v256_v10, %v255_v23  ;;  %v77_v2 = vld [vmem:[%s2335_s0 + $0x1c0] sm:$0xff] }
  0x2c   :  { %v1645_v51 = vadd.f32 %v1325_v5, %v123_v24  ;;  %v257_v52 = vmax.f32 %v1604_v28, 0.0  ;;  %v1650_v61 = vadd.f32 %v1325_v5, %v140_v31  ;;  %v142_v19 = vmul.f32 %v1320_v4, %v71_v36 }
  0x2d   :  { %1220 = vmatmul.mubr.msk.bf16.gmra.mrb[16].mxu0 %vm324_vm1, %v1486_v60  ;;  %v75_v60 = vld [vmem:[%s2335_s0 + $0x1b0] sm:$0xff]  ;;  %1240 = vmatmul.mubr.msk.bf16.gmra.mrb[4].mxu1 %vm324_vm1, %v310_v30  ;;  %v313_v44 = vpack.c.bf16 %v272_v29, %v271_v35  ;;  %v212_v46 = vadd.f32 %v1325_v5, %v141_v20  ;;  %v143_v47 = vmul.f32 %v1320_v4, %v72_v40  ;;  %v274_v54 = vmax.f32 %v1634_v39, 0.0 }
  0x2e   :  { %1223 = vmatprep.mubr.msk.bf16.mxu0 %vm324_vm1, %v1499_v1  ;;  %v303_v1 = vpack.c.bf16 %v252_v9, %v251_v3  ;;  %1243 = vmatprep.mubr.msk.bf16.mxu1 %vm324_vm1, %v311_v14  ;;  %v312_v3 = vpack.c.bf16 %v270_v33, %v269_v32  ;;  %v273_v9 = vmax.f32 %v1610_v34, 0.0  ;;  %v146_v42 = vmul.f32 %v1320_v4, %v75_v60 }
  0x2f   :  { %v147_v48 = vmul.f32 %v1320_v4, %v76_v45  ;;  %v144_v55 = vmul.f32 %v1320_v4, %v73_v62  ;;  %v148_v57 = vmul.f32 %v1320_v4, %v77_v2  ;;  %v275_v59 = vmax.f32 %v1650_v61, 0.0 }
  0x30   :  { %v217_v56 = vadd.f32 %v1325_v5, %v146_v42  ;;  %v145_v63 = vmul.f32 %v1320_v4, %v74_v41  ;;  %v149_v6 = vmul.f32 %v1320_v4, %v78_v43  ;;  %v150_v12 = vmul.f32 %v1320_v4, %v79_v49 }
  0x31   :  { %v218_v0 = vadd.f32 %v1325_v5, %v147_v48  ;;  %v219_v11 = vadd.f32 %v1325_v5, %v148_v57  ;;  %v151_v13 = vmul.f32 %v1320_v4, %v80_v53  ;;  %v276_v16 = vmax.f32 %v212_v46, 0.0 }
  0x32   :  { %v281_v8 = vmax.f32 %v217_v56, 0.0  ;;  %v220_v18 = vadd.f32 %v1325_v5, %v149_v6  ;;  %v152_v21 = vmul.f32 %v1320_v4, %v81_v58  ;;  %v221_v24 = vadd.f32 %v1325_v5, %v150_v12 }
  0x33   :  { %v282_v17 = vmax.f32 %v218_v0, 0.0  ;;  %v283_v23 = vmax.f32 %v219_v11, 0.0  ;;  %v222_v25 = vadd.f32 %v1325_v5, %v151_v13  ;;  %v153_v26 = vmul.f32 %v1320_v4, %v82_v7 }
  0x34   :  { %v284_v10 = vmax.f32 %v220_v18, 0.0  ;;  %v223_v30 = vadd.f32 %v1325_v5, %v152_v21  ;;  %v154_v31 = vmul.f32 %v1320_v4, %v83_v15  ;;  %v285_v14 = vmax.f32 %v221_v24, 0.0 }
  0x35   :  { %1224 = vmatmul.mubr.msk.bf16.gmra.mrb[20].mxu0 %vm324_vm1, %v302_v37  ;;  %1244 = vmatmul.mubr.msk.bf16.gmra.mrb[8].mxu1 %vm324_vm1, %v312_v3  ;;  %v318_v27 = vpack.c.bf16 %v282_v17, %v281_v8  ;;  %v286_v32 = vmax.f32 %v222_v25, 0.0  ;;  %v224_v33 = vadd.f32 %v1325_v5, %v153_v26  ;;  %v155_v34 = vmul.f32 %v1320_v4, %v84_v22 }
  0x36   :  { %1227 = vmatprep.mubr.msk.bf16.mxu0 %vm324_vm1, %v303_v1  ;;  %1247 = vmatprep.mubr.msk.bf16.mxu1 %vm324_vm1, %v313_v44  ;;  %v258_v35 = vmax.f32 %v1645_v51, 0.0  ;;  %v319_v29 = vpack.c.bf16 %v284_v10, %v283_v23  ;;  %v287_v20 = vmax.f32 %v223_v30, 0.0  ;;  %v225_v36 = vadd.f32 %v1325_v5, %v154_v31 }
  0x37   :  { %v213_v60 = vadd.f32 %v1325_v5, %v142_v19  ;;  %v320_v37 = vpack.c.bf16 %v286_v32, %v285_v14  ;;  %v288_v1 = vmax.f32 %v224_v33, 0.0  ;;  %v226_v39 = vadd.f32 %v1325_v5, %v155_v34 }
  0x38   :  { %v314_v40 = vpack.c.bf16 %v274_v54, %v273_v9  ;;  %v214_v45 = vadd.f32 %v1325_v5, %v143_v47  ;;  %v215_v61 = vadd.f32 %v1325_v5, %v144_v55  ;;  %v289_v62 = vmax.f32 %v225_v36, 0.0 }
  0x39   :  { %v315_v4 = vpack.c.bf16 %v276_v16, %v275_v59  ;;  %v216_v51 = vadd.f32 %v1325_v5, %v145_v63  ;;  %v321_v2 = vpack.c.bf16 %v288_v1, %v287_v20  ;;  %v290_v3 = vmax.f32 %v226_v39, 0.0 }
  0x3a   :  { %v277_v9 = vmax.f32 %v213_v60, 0.0  ;;  %v278_v41 = vmax.f32 %v214_v45, 0.0  ;;  %v306_v42 = vpack.c.bf16 %v258_v35, %v257_v52  ;;  %v279_v43 = vmax.f32 %v215_v61, 0.0 }
  0x3b   :  { %v322_v19 = vpack.c.bf16 %v290_v3, %v289_v62  ;;  %v1272_v28 = vmov 0.0  }
  0x3c   :  { %v316_v44 = vpack.c.bf16 %v278_v41, %v277_v9  ;;  %783 = vst.msk [vmem:[%s2338_s5] sm:$0x1] %vm782_vm2, %v1272_v28  ;;  %784 = vst.msk [vmem:[%s2339_s6] sm:$0x1] %vm782_vm2, %v1272_v28 }
  0x3d   :  { %1228 = vmatmul.mubr.msk.bf16.gmra.mrb[24].mxu0 %vm324_vm1, %v1631_v38  ;;  %1248 = vmatmul.mubr.msk.bf16.gmra.mrb[12].mxu1 %vm324_vm1, %v314_v40  ;;  %v280_v38 = vmax.f32 %v216_v51, 0.0 }
  0x3e   :  { %1231 = vmatprep.mubr.msk.bf16.mxu0 %vm324_vm1, %v1642_v50  ;;  %1251 = vmatprep.mubr.msk.bf16.mxu1 %vm324_vm1, %v315_v4 }
  0x3f   :  { %v317_v5 = vpack.c.bf16 %v280_v38, %v279_v43 }
  0x45   :  { %1232 = vmatmul.mubr.msk.bf16.gmra.mrb[28].mxu0 %vm324_vm1, %v306_v42  ;;  %1252 = vmatmul.mubr.msk.bf16.gmra.mrb[16].mxu1 %vm324_vm1, %v316_v44 }
  0x46   :  { %1255 = vmatprep.mubr.msk.bf16.mxu1 %vm324_vm1, %v317_v5 }
  0x4d   :  { %1256 = vmatmul.mubr.msk.bf16.gmra.mrb[20].mxu1 %vm324_vm1, %v318_v27 }
  0x4e   :  { %1259 = vmatprep.mubr.msk.bf16.mxu1 %vm324_vm1, %v319_v29 }
  0x55   :  { %1260 = vmatmul.mubr.msk.bf16.gmra.mrb[24].mxu1 %vm324_vm1, %v320_v37 }
  0x56   :  { %1263 = vmatprep.mubr.msk.bf16.mxu1 %vm324_vm1, %v321_v2 }
  0x5d   :  { %1264 = vmatmul.mubr.msk.bf16.gmra.mrb[28].mxu1 %vm324_vm1, %v322_v19 }
  0xe0   :  { %v1205_v50 = vpop.f32.mrb[0].mxu0 }
  0xe1   :  { %716 = vst.msk [vmem:[%s2340_s4 + $0x10] sm:$0xff] %vm324_vm1, %v1205_v50  ;;  %v459_v52 = vpop.f32.mrb[1].mxu0  ;;  %v925_v49 = vmul.f32 %v1205_v50, %v1205_v50  ;;  %v789_v57 = vsel %vm324_vm1, %v1205_v50, 0.0 }
  0xe2   :  { %714 = vst.msk [vmem:[%s2340_s4] sm:$0xff] %vm324_vm1, %v459_v52  ;;  %v923_v46 = vmul.f32 %v459_v52, %v459_v52  ;;  %v1206_v47 = vpop.f32.mrb[2].mxu0  ;;  %v786_v53 = vsel %vm324_vm1, %v459_v52, 0.0 }
  0xe3   :  { %717 = vst.msk [vmem:[%s2340_s4 + $0x18] sm:$0xff] %vm324_vm1, %v1206_v47  ;;  %v462_v48 = vpop.f32.mrb[3].mxu0  ;;  %v926_v59 = vmul.f32 %v1206_v47, %v1206_v47  ;;  %v990_v7 = vsel %vm324_vm1, %v925_v49, 0.0  ;;  %v791_v8 = vsel %vm324_vm1, %v1206_v47, 0.0 }
  0xe4   :  { %715 = vst.msk [vmem:[%s2340_s4 + $0x8] sm:$0xff] %vm324_vm1, %v462_v48  ;;  %v787_v54 = vsel %vm324_vm1, %v462_v48, 0.0  ;;  %v924_v55 = vmul.f32 %v462_v48, %v462_v48  ;;  %v987_v58 = vsel %vm324_vm1, %v923_v46, 0.0 }
  0xe5   :  { %v788_v56 = vadd.f32 %v787_v54, %v786_v53  ;;  %v992_v16 = vsel %vm324_vm1, %v926_v59, 0.0 }
  0xe6   :  { %v988_v63 = vsel %vm324_vm1, %v924_v55, 0.0 }
  0xe7   :  { %v790_v0 = vadd.f32 %v789_v57, %v788_v56  ;;  %v989_v6 = vadd.f32 %v988_v63, %v987_v58 }
  0xe8   :  { %v1209_v11 = vpop.f32.mrb[4].mxu0 }
  0xe9   :  { %v991_v12 = vadd.f32 %v990_v7, %v989_v6  ;;  %720 = vst.msk [vmem:[%s2340_s4 + $0x30] sm:$0xff] %vm324_vm1, %v1209_v11  ;;  %v475_v13 = vpop.f32.mrb[5].mxu0  ;;  %v792_v15 = vadd.f32 %v791_v8, %v790_v0  ;;  %v929_v25 = vmul.f32 %v1209_v11, %v1209_v11  ;;  %v797_v14 = vsel %vm324_vm1, %v1209_v11, 0.0 }
  0xea   :  { %718 = vst.msk [vmem:[%s2340_s4 + $0x20] sm:$0xff] %vm324_vm1, %v475_v13  ;;  %v793_v17 = vsel %vm324_vm1, %v475_v13, 0.0  ;;  %v927_v18 = vmul.f32 %v475_v13, %v475_v13  ;;  %v1210_v21 = vpop.f32.mrb[6].mxu0 }
  0xeb   :  { %v794_v22 = vadd.f32 %v793_v17, %v792_v15  ;;  %v993_v23 = vadd.f32 %v992_v16, %v991_v12  ;;  %721 = vst.msk [vmem:[%s2340_s4 + $0x38] sm:$0xff] %vm324_vm1, %v1210_v21  ;;  %v478_v24 = vpop.f32.mrb[7].mxu0  ;;  %v930_v32 = vmul.f32 %v1210_v21, %v1210_v21  ;;  %v998_v29 = vsel %vm324_vm1, %v929_v25, 0.0 }
  0xec   :  { %v994_v26 = vsel %vm324_vm1, %v927_v18, 0.0  ;;  %719 = vst.msk [vmem:[%s2340_s4 + $0x28] sm:$0xff] %vm324_vm1, %v478_v24  ;;  %v795_v27 = vsel %vm324_vm1, %v478_v24, 0.0  ;;  %v928_v10 = vmul.f32 %v478_v24, %v478_v24  ;;  %v799_v20 = vsel %vm324_vm1, %v1210_v21, 0.0 }
  0xed   :  { %v995_v30 = vadd.f32 %v994_v26, %v993_v23  ;;  %v796_v31 = vadd.f32 %v795_v27, %v794_v22  ;;  %v1000_v39 = vsel %vm324_vm1, %v930_v32, 0.0 }
  0xee   :  { %v996_v33 = vsel %vm324_vm1, %v928_v10, 0.0 }
  0xef   :  { %v798_v34 = vadd.f32 %v797_v14, %v796_v31  ;;  %v997_v35 = vadd.f32 %v996_v33, %v995_v30 }
  0xf0   :  { %v1213_v36 = vpop.f32.mrb[8].mxu0 }
  0xf1   :  { %v999_v60 = vadd.f32 %v998_v29, %v997_v35  ;;  %724 = vst.msk [vmem:[%s2340_s4 + $0x50] sm:$0xff] %vm324_vm1, %v1213_v36  ;;  %v491_v37 = vpop.f32.mrb[9].mxu0  ;;  %v800_v1 = vadd.f32 %v799_v20, %v798_v34  ;;  %v933_v2 = vmul.f32 %v1213_v36, %v1213_v36  ;;  %v805_v43 = vsel %vm324_vm1, %v1213_v36, 0.0 }
  0xf2   :  { %722 = vst.msk [vmem:[%s2340_s4 + $0x40] sm:$0xff] %vm324_vm1, %v491_v37  ;;  %v801_v40 = vsel %vm324_vm1, %v491_v37, 0.0  ;;  %v931_v45 = vmul.f32 %v491_v37, %v491_v37  ;;  %v1214_v61 = vpop.f32.mrb[10].mxu0 }
  0xf3   :  { %v802_v62 = vadd.f32 %v801_v40, %v800_v1  ;;  %v1001_v4 = vadd.f32 %v1000_v39, %v999_v60  ;;  %725 = vst.msk [vmem:[%s2340_s4 + $0x58] sm:$0xff] %vm324_vm1, %v1214_v61  ;;  %v494_v51 = vpop.f32.mrb[11].mxu0  ;;  %v934_v38 = vmul.f32 %v1214_v61, %v1214_v61  ;;  %v1006_v50 = vsel %vm324_vm1, %v933_v2, 0.0 }
  0xf4   :  { %v1002_v3 = vsel %vm324_vm1, %v931_v45, 0.0  ;;  %723 = vst.msk [vmem:[%s2340_s4 + $0x48] sm:$0xff] %vm324_vm1, %v494_v51  ;;  %v803_v19 = vsel %vm324_vm1, %v494_v51, 0.0  ;;  %v932_v9 = vmul.f32 %v494_v51, %v494_v51  ;;  %v807_v52 = vsel %vm324_vm1, %v1214_v61, 0.0 }
  0xf5   :  { %v1003_v41 = vadd.f32 %v1002_v3, %v1001_v4  ;;  %v804_v42 = vadd.f32 %v803_v19, %v802_v62  ;;  %v1008_v53 = vsel %vm324_vm1, %v934_v38, 0.0 }
  0xf6   :  { %v1004_v44 = vsel %vm324_vm1, %v932_v9, 0.0 }
  0xf7   :  { %v806_v5 = vadd.f32 %v805_v43, %v804_v42  ;;  %v1005_v28 = vadd.f32 %v1004_v44, %v1003_v41 }
  0xf8   :  { %v1217_v46 = vpop.f32.mrb[12].mxu0  ;;  %v1829_v63 = vpop.f32.mrb[0].mxu1 }
  0xf9   :  { %v1007_v47 = vadd.f32 %v1006_v50, %v1005_v28  ;;  %728 = vst.msk [vmem:[%s2340_s4 + $0x70] sm:$0xff] %vm324_vm1, %v1217_v46  ;;  %v507_v48 = vpop.f32.mrb[13].mxu0  ;;  %v808_v49 = vadd.f32 %v807_v52, %v806_v5  ;;  %v937_v0 = vmul.f32 %v1217_v46, %v1217_v46  ;;  %748 = vst.msk [vmem:[%s2340_s4 + $0x110] sm:$0xff] %vm324_vm1, %v1829_v63  ;;  %v1842_v11 = vpop.f32.mrb[1].mxu1  ;;  %v813_v16 = vsel %vm324_vm1, %v1217_v46, 0.0 }
  0xfa   :  { %726 = vst.msk [vmem:[%s2340_s4 + $0x60] sm:$0xff] %vm324_vm1, %v507_v48  ;;  %v809_v54 = vsel %vm324_vm1, %v507_v48, 0.0  ;;  %v935_v55 = vmul.f32 %v507_v48, %v507_v48  ;;  %v1218_v56 = vpop.f32.mrb[14].mxu0  ;;  %746 = vst.msk [vmem:[%s2340_s4 + $0x100] sm:$0xff] %vm324_vm1, %v1842_v11  ;;  %v1849_v15 = vpop.f32.mrb[2].mxu1 }
  0xfb   :  { %v810_v57 = vadd.f32 %v809_v54, %v808_v49  ;;  %v1009_v58 = vadd.f32 %v1008_v53, %v1007_v47  ;;  %729 = vst.msk [vmem:[%s2340_s4 + $0x78] sm:$0xff] %vm324_vm1, %v1218_v56  ;;  %v510_v59 = vpop.f32.mrb[15].mxu0  ;;  %v938_v17 = vmul.f32 %v1218_v56, %v1218_v56  ;;  %749 = vst.msk [vmem:[%s2340_s4 + $0x118] sm:$0xff] %vm324_vm1, %v1849_v15  ;;  %v1858_v21 = vpop.f32.mrb[3].mxu1  ;;  %v1014_v24 = vsel %vm324_vm1, %v937_v0, 0.0 }
  0xfc   :  { %v1010_v6 = vsel %vm324_vm1, %v935_v55, 0.0  ;;  %727 = vst.msk [vmem:[%s2340_s4 + $0x68] sm:$0xff] %vm324_vm1, %v510_v59  ;;  %v811_v7 = vsel %vm324_vm1, %v510_v59, 0.0  ;;  %v936_v8 = vmul.f32 %v510_v59, %v510_v59  ;;  %747 = vst.msk [vmem:[%s2340_s4 + $0x108] sm:$0xff] %vm324_vm1, %v1858_v21  ;;  %v815_v25 = vsel %vm324_vm1, %v1218_v56, 0.0 }
  0xfd   :  { %v1011_v12 = vadd.f32 %v1010_v6, %v1009_v58  ;;  %v812_v13 = vadd.f32 %v811_v7, %v810_v57  ;;  %v1016_v31 = vsel %vm324_vm1, %v938_v17, 0.0 }
  0xfe   :  { %v1012_v18 = vsel %vm324_vm1, %v936_v8, 0.0 }
  0xff   :  { %v814_v22 = vadd.f32 %v813_v16, %v812_v13  ;;  %v1013_v23 = vadd.f32 %v1012_v18, %v1011_v12 }
 0x100   :  { %v1221_v26 = vpop.f32.mrb[16].mxu0  ;;  %v1881_v20 = vpop.f32.mrb[4].mxu1 }
 0x101   :  { %v1015_v27 = vadd.f32 %v1014_v24, %v1013_v23  ;;  %732 = vst.msk [vmem:[%s2340_s4 + $0x90] sm:$0xff] %vm324_vm1, %v1221_v26  ;;  %v523_v10 = vpop.f32.mrb[17].mxu0  ;;  %v816_v30 = vadd.f32 %v815_v25, %v814_v22  ;;  %v941_v36 = vmul.f32 %v1221_v26, %v1221_v26  ;;  %752 = vst.msk [vmem:[%s2340_s4 + $0x130] sm:$0xff] %vm324_vm1, %v1881_v20  ;;  %v1894_v39 = vpop.f32.mrb[5].mxu1  ;;  %v821_v62 = vsel %vm324_vm1, %v1221_v26, 0.0 }
 0x102   :  { %730 = vst.msk [vmem:[%s2340_s4 + $0x80] sm:$0xff] %vm324_vm1, %v523_v10  ;;  %v817_v14 = vsel %vm324_vm1, %v523_v10, 0.0  ;;  %v939_v32 = vmul.f32 %v523_v10, %v523_v10  ;;  %v1222_v33 = vpop.f32.mrb[18].mxu0  ;;  %750 = vst.msk [vmem:[%s2340_s4 + $0x120] sm:$0xff] %vm324_vm1, %v1894_v39  ;;  %v1901_v61 = vpop.f32.mrb[6].mxu1 }
 0x103   :  { %v818_v34 = vadd.f32 %v817_v14, %v816_v30  ;;  %v1017_v35 = vadd.f32 %v1016_v31, %v1015_v27  ;;  %733 = vst.msk [vmem:[%s2340_s4 + $0x98] sm:$0xff] %vm324_vm1, %v1222_v33  ;;  %v526_v29 = vpop.f32.mrb[19].mxu0  ;;  %v942_v4 = vmul.f32 %v1222_v33, %v1222_v33  ;;  %753 = vst.msk [vmem:[%s2340_s4 + $0x138] sm:$0xff] %vm324_vm1, %v1901_v61  ;;  %v1910_v2 = vpop.f32.mrb[7].mxu1  ;;  %v1022_v9 = vsel %vm324_vm1, %v941_v36, 0.0 }
 0x104   :  { %v1018_v60 = vsel %vm324_vm1, %v939_v32, 0.0  ;;  %731 = vst.msk [vmem:[%s2340_s4 + $0x88] sm:$0xff] %vm324_vm1, %v526_v29  ;;  %v819_v37 = vsel %vm324_vm1, %v526_v29, 0.0  ;;  %v940_v1 = vmul.f32 %v526_v29, %v526_v29  ;;  %751 = vst.msk [vmem:[%s2340_s4 + $0x128] sm:$0xff] %vm324_vm1, %v1910_v2  ;;  %v823_v41 = vsel %vm324_vm1, %v1222_v33, 0.0 }
 0x105   :  { %v1019_v40 = vadd.f32 %v1018_v60, %v1017_v35  ;;  %v820_v45 = vadd.f32 %v819_v37, %v818_v34  ;;  %v1024_v5 = vsel %vm324_vm1, %v942_v4, 0.0 }
 0x106   :  { %v1020_v51 = vsel %vm324_vm1, %v940_v1, 0.0 }
 0x107   :  { %v822_v3 = vadd.f32 %v821_v62, %v820_v45  ;;  %v1021_v19 = vadd.f32 %v1020_v51, %v1019_v40 }
 0x108   :  { %v1225_v42 = vpop.f32.mrb[20].mxu0  ;;  %v1933_v49 = vpop.f32.mrb[8].mxu1 }
 0x109   :  { %v1023_v43 = vadd.f32 %v1022_v9, %v1021_v19  ;;  %736 = vst.msk [vmem:[%s2340_s4 + $0xb0] sm:$0xff] %vm324_vm1, %v1225_v42  ;;  %v539_v38 = vpop.f32.mrb[21].mxu0  ;;  %v824_v44 = vadd.f32 %v823_v41, %v822_v3  ;;  %v945_v53 = vmul.f32 %v1225_v42, %v1225_v42  ;;  %756 = vst.msk [vmem:[%s2340_s4 + $0x150] sm:$0xff] %vm324_vm1, %v1933_v49  ;;  %v1946_v57 = vpop.f32.mrb[9].mxu1  ;;  %v829_v6 = vsel %vm324_vm1, %v1225_v42, 0.0 }
 0x10a   :  { %734 = vst.msk [vmem:[%s2340_s4 + $0xa0] sm:$0xff] %vm324_vm1, %v539_v38  ;;  %v825_v28 = vsel %vm324_vm1, %v539_v38, 0.0  ;;  %v943_v50 = vmul.f32 %v539_v38, %v539_v38  ;;  %v1226_v52 = vpop.f32.mrb[22].mxu0  ;;  %754 = vst.msk [vmem:[%s2340_s4 + $0x140] sm:$0xff] %vm324_vm1, %v1946_v57  ;;  %v1953_v0 = vpop.f32.mrb[10].mxu1 }
 0x10b   :  { %v826_v46 = vadd.f32 %v825_v28, %v824_v44  ;;  %v1025_v47 = vadd.f32 %v1024_v5, %v1023_v43  ;;  %737 = vst.msk [vmem:[%s2340_s4 + $0xb8] sm:$0xff] %vm324_vm1, %v1226_v52  ;;  %v542_v48 = vpop.f32.mrb[23].mxu0  ;;  %v946_v7 = vmul.f32 %v1226_v52, %v1226_v52  ;;  %757 = vst.msk [vmem:[%s2340_s4 + $0x158] sm:$0xff] %vm324_vm1, %v1953_v0  ;;  %v1962_v12 = vpop.f32.mrb[11].mxu1  ;;  %v1030_v17 = vsel %vm324_vm1, %v945_v53, 0.0 }
 0x10c   :  { %v1026_v54 = vsel %vm324_vm1, %v943_v50, 0.0  ;;  %735 = vst.msk [vmem:[%s2340_s4 + $0xa8] sm:$0xff] %vm324_vm1, %v542_v48  ;;  %v827_v55 = vsel %vm324_vm1, %v542_v48, 0.0  ;;  %v944_v56 = vmul.f32 %v542_v48, %v542_v48  ;;  %755 = vst.msk [vmem:[%s2340_s4 + $0x148] sm:$0xff] %vm324_vm1, %v1962_v12  ;;  %v831_v18 = vsel %vm324_vm1, %v1226_v52, 0.0 }
 0x10d   :  { %v1027_v58 = vadd.f32 %v1026_v54, %v1025_v47  ;;  %v828_v59 = vadd.f32 %v827_v55, %v826_v46  ;;  %v1032_v26 = vsel %vm324_vm1, %v946_v7, 0.0 }
 0x10e   :  { %v1028_v8 = vsel %vm324_vm1, %v944_v56, 0.0 }
 0x10f   :  { %v830_v13 = vadd.f32 %v829_v6, %v828_v59  ;;  %v1029_v16 = vadd.f32 %v1028_v8, %v1027_v58 }
 0x110   :  { %v1229_v22 = vpop.f32.mrb[24].mxu0  ;;  %v1985_v33 = vpop.f32.mrb[12].mxu1 }
 0x111   :  { %v1031_v23 = vadd.f32 %v1030_v17, %v1029_v16  ;;  %740 = vst.msk [vmem:[%s2340_s4 + $0xd0] sm:$0xff] %vm324_vm1, %v1229_v22  ;;  %v555_v24 = vpop.f32.mrb[25].mxu0  ;;  %v832_v25 = vadd.f32 %v831_v18, %v830_v13  ;;  %v949_v34 = vmul.f32 %v1229_v22, %v1229_v22  ;;  %760 = vst.msk [vmem:[%s2340_s4 + $0x170] sm:$0xff] %vm324_vm1, %v1985_v33  ;;  %v1998_v60 = vpop.f32.mrb[13].mxu1  ;;  %v837_v45 = vsel %vm324_vm1, %v1229_v22, 0.0 }
 0x112   :  { %738 = vst.msk [vmem:[%s2340_s4 + $0xc0] sm:$0xff] %vm324_vm1, %v555_v24  ;;  %v833_v27 = vsel %vm324_vm1, %v555_v24, 0.0  ;;  %v947_v10 = vmul.f32 %v555_v24, %v555_v24  ;;  %v1230_v30 = vpop.f32.mrb[26].mxu0  ;;  %758 = vst.msk [vmem:[%s2340_s4 + $0x160] sm:$0xff] %vm324_vm1, %v1998_v60  ;;  %v2005_v40 = vpop.f32.mrb[14].mxu1  ;;  %v955_v18 = vmul.f32 %v1842_v11, %v1842_v11 }
 0x113   :  { %v834_v31 = vadd.f32 %v833_v27, %v832_v25  ;;  %v1033_v14 = vadd.f32 %v1032_v26, %v1031_v23  ;;  %741 = vst.msk [vmem:[%s2340_s4 + $0xd8] sm:$0xff] %vm324_vm1, %v1230_v30  ;;  %v558_v32 = vpop.f32.mrb[27].mxu0  ;;  %v950_v62 = vmul.f32 %v1230_v30, %v1230_v30  ;;  %761 = vst.msk [vmem:[%s2340_s4 + $0x178] sm:$0xff] %vm324_vm1, %v2005_v40  ;;  %v2014_v51 = vpop.f32.mrb[15].mxu1  ;;  %v1038_v9 = vsel %vm324_vm1, %v949_v34, 0.0 }
 0x114   :  { %v1034_v35 = vsel %vm324_vm1, %v947_v10, 0.0  ;;  %739 = vst.msk [vmem:[%s2340_s4 + $0xc8] sm:$0xff] %vm324_vm1, %v558_v32  ;;  %v835_v29 = vsel %vm324_vm1, %v558_v32, 0.0  ;;  %v948_v36 = vmul.f32 %v558_v32, %v558_v32  ;;  %759 = vst.msk [vmem:[%s2340_s4 + $0x168] sm:$0xff] %vm324_vm1, %v2014_v51  ;;  %v839_v41 = vsel %vm324_vm1, %v1230_v30, 0.0 }
 0x115   :  { %v1035_v37 = vadd.f32 %v1034_v35, %v1033_v14  ;;  %v836_v1 = vadd.f32 %v835_v29, %v834_v31  ;;  %v1040_v5 = vsel %vm324_vm1, %v950_v62, 0.0  ;;  %v849_v27 = vsel %vm324_vm1, %v1842_v11, 0.0 }
 0x116   :  { %v1036_v4 = vsel %vm324_vm1, %v948_v36, 0.0  ;;  %v1050_v14 = vsel %vm324_vm1, %v955_v18, 0.0  ;;  %v956_v32 = vmul.f32 %v1858_v21, %v1858_v21  ;;  %v957_v36 = vmul.f32 %v1829_v63, %v1829_v63 }
 0x117   :  { %v838_v3 = vadd.f32 %v837_v45, %v836_v1  ;;  %v1037_v19 = vadd.f32 %v1036_v4, %v1035_v37  ;;  %v851_v37 = vsel %vm324_vm1, %v1858_v21, 0.0  ;;  %v853_v21 = vsel %vm324_vm1, %v1829_v63, 0.0 }
 0x118   :  { %v1233_v42 = vpop.f32.mrb[28].mxu0  ;;  %v2037_v53 = vpop.f32.mrb[16].mxu1  ;;  %v958_v4 = vmul.f32 %v1849_v15, %v1849_v15  ;;  %v1054_v63 = vsel %vm324_vm1, %v957_v36, 0.0 }
 0x119   :  { %v1039_v43 = vadd.f32 %v1038_v9, %v1037_v19  ;;  %744 = vst.msk [vmem:[%s2340_s4 + $0xf0] sm:$0xff] %vm324_vm1, %v1233_v42  ;;  %v571_v38 = vpop.f32.mrb[29].mxu0  ;;  %v840_v44 = vadd.f32 %v839_v41, %v838_v3  ;;  %v953_v54 = vmul.f32 %v1233_v42, %v1233_v42  ;;  %764 = vst.msk [vmem:[%s2340_s4 + $0x190] sm:$0xff] %vm324_vm1, %v2037_v53  ;;  %v2050_v59 = vpop.f32.mrb[17].mxu1  ;;  %v845_v13 = vsel %vm324_vm1, %v1233_v42, 0.0 }
 0x11a   :  { %742 = vst.msk [vmem:[%s2340_s4 + $0xe0] sm:$0xff] %vm324_vm1, %v571_v38  ;;  %v841_v28 = vsel %vm324_vm1, %v571_v38, 0.0  ;;  %v951_v50 = vmul.f32 %v571_v38, %v571_v38  ;;  %v1234_v52 = vpop.f32.mrb[30].mxu0  ;;  %762 = vst.msk [vmem:[%s2340_s4 + $0x180] sm:$0xff] %vm324_vm1, %v2050_v59  ;;  %v2057_v8 = vpop.f32.mrb[18].mxu1  ;;  %v1052_v3 = vsel %vm324_vm1, %v956_v32, 0.0  ;;  %v959_v19 = vmul.f32 %v1894_v39, %v1894_v39 }
 0x11b   :  { %v842_v46 = vadd.f32 %v841_v28, %v840_v44  ;;  %v1041_v47 = vadd.f32 %v1040_v5, %v1039_v43  ;;  %745 = vst.msk [vmem:[%s2340_s4 + $0xf8] sm:$0xff] %vm324_vm1, %v1234_v52  ;;  %v574_v48 = vpop.f32.mrb[31].mxu0  ;;  %v954_v16 = vmul.f32 %v1234_v52, %v1234_v52  ;;  %765 = vst.msk [vmem:[%s2340_s4 + $0x198] sm:$0xff] %vm324_vm1, %v2057_v8  ;;  %v2068_v22 = vpop.f32.mrb[19].mxu1  ;;  %v1046_v25 = vsel %vm324_vm1, %v953_v54, 0.0 }
 0x11c   :  { %v1042_v55 = vsel %vm324_vm1, %v951_v50, 0.0  ;;  %743 = vst.msk [vmem:[%s2340_s4 + $0xe8] sm:$0xff] %vm324_vm1, %v574_v48  ;;  %v843_v56 = vsel %vm324_vm1, %v574_v48, 0.0  ;;  %v952_v58 = vmul.f32 %v574_v48, %v574_v48  ;;  %763 = vst.msk [vmem:[%s2340_s4 + $0x188] sm:$0xff] %vm324_vm1, %v2068_v22  ;;  %v847_v26 = vsel %vm324_vm1, %v1234_v52, 0.0 }
 0x11d   :  { %v1043_v6 = vadd.f32 %v1042_v55, %v1041_v47  ;;  %v844_v7 = vadd.f32 %v843_v56, %v842_v46  ;;  %v1048_v31 = vsel %vm324_vm1, %v954_v16, 0.0  ;;  %v855_v43 = vsel %vm324_vm1, %v1849_v15, 0.0 }
 0x11e   :  { %v1044_v17 = vsel %vm324_vm1, %v952_v58, 0.0  ;;  %v857_v38 = vsel %vm324_vm1, %v1894_v39, 0.0  ;;  %v1056_v28 = vsel %vm324_vm1, %v958_v4, 0.0  ;;  %v1058_v50 = vsel %vm324_vm1, %v959_v19, 0.0 }
 0x11f   :  { %v846_v23 = vadd.f32 %v845_v13, %v844_v7  ;;  %v1045_v24 = vadd.f32 %v1044_v17, %v1043_v6  ;;  %v960_v52 = vmul.f32 %v1910_v2, %v1910_v2  ;;  %v961_v54 = vmul.f32 %v1881_v20, %v1881_v20 }
 0x120   :  { %v2083_v29 = vpop.f32.mrb[20].mxu1  ;;  %v859_v15 = vsel %vm324_vm1, %v1910_v2, 0.0  ;;  %v861_v2 = vsel %vm324_vm1, %v1881_v20, 0.0  ;;  %v962_v6 = vmul.f32 %v1901_v61, %v1901_v61  ;;  %v963_v13 = vmul.f32 %v1946_v57, %v1946_v57 }
 0x121   :  { %v1047_v10 = vadd.f32 %v1046_v25, %v1045_v24  ;;  %v848_v30 = vadd.f32 %v847_v26, %v846_v23  ;;  %768 = vst.msk [vmem:[%s2340_s4 + $0x1b0] sm:$0xff] %vm324_vm1, %v2083_v29  ;;  %v2094_v11 = vpop.f32.mrb[21].mxu1  ;;  %v1060_v7 = vsel %vm324_vm1, %v960_v52, 0.0  ;;  %v1062_v20 = vsel %vm324_vm1, %v961_v54, 0.0 }
 0x122   :  { %766 = vst.msk [vmem:[%s2340_s4 + $0x1a0] sm:$0xff] %vm324_vm1, %v2094_v11  ;;  %v2101_v62 = vpop.f32.mrb[22].mxu1  ;;  %v863_v23 = vsel %vm324_vm1, %v1901_v61, 0.0  ;;  %v865_v24 = vsel %vm324_vm1, %v1946_v57, 0.0  ;;  %v867_v61 = vsel %vm324_vm1, %v1962_v12, 0.0  ;;  %v969_v52 = vmul.f32 %v1985_v33, %v1985_v33 }
 0x123   :  { %v850_v34 = vadd.f32 %v849_v27, %v848_v30  ;;  %v1049_v35 = vadd.f32 %v1048_v31, %v1047_v10  ;;  %769 = vst.msk [vmem:[%s2340_s4 + $0x1b8] sm:$0xff] %vm324_vm1, %v2101_v62  ;;  %v2115_v9 = vpop.f32.mrb[23].mxu1  ;;  %v1064_v27 = vsel %vm324_vm1, %v962_v6, 0.0  ;;  %v1066_v10 = vsel %vm324_vm1, %v963_v13, 0.0 }
 0x124   :  { %767 = vst.msk [vmem:[%s2340_s4 + $0x1a8] sm:$0xff] %vm324_vm1, %v2115_v9  ;;  %v964_v30 = vmul.f32 %v1962_v12, %v1962_v12  ;;  %v869_v12 = vsel %vm324_vm1, %v1933_v49, 0.0  ;;  %v970_v54 = vmul.f32 %v2005_v40, %v2005_v40  ;;  %v1078_v6 = vsel %vm324_vm1, %v969_v52, 0.0 }
 0x125   :  { %v1051_v1 = vadd.f32 %v1050_v14, %v1049_v35  ;;  %v852_v45 = vadd.f32 %v851_v37, %v850_v34  ;;  %v965_v34 = vmul.f32 %v1933_v49, %v1933_v49 }
 0x127   :  { %v854_v41 = vadd.f32 %v853_v21, %v852_v45  ;;  %v1053_v42 = vadd.f32 %v1052_v3, %v1051_v1  ;;  %v966_v1 = vmul.f32 %v1953_v0, %v1953_v0  ;;  %v1068_v45 = vsel %vm324_vm1, %v964_v30, 0.0 }
 0x128   :  { %v2131_v48 = vpop.f32.mrb[24].mxu1  ;;  %v967_v21 = vmul.f32 %v1998_v60, %v1998_v60  ;;  %v1070_v49 = vsel %vm324_vm1, %v965_v34, 0.0 }
 0x129   :  { %v1055_v44 = vadd.f32 %v1054_v63, %v1053_v42  ;;  %v856_v5 = vadd.f32 %v855_v43, %v854_v41  ;;  %772 = vst.msk [vmem:[%s2340_s4 + $0x1d0] sm:$0xff] %vm324_vm1, %v2131_v48  ;;  %v2142_v39 = vpop.f32.mrb[25].mxu1  ;;  %v871_v41 = vsel %vm324_vm1, %v1953_v0, 0.0  ;;  %v873_v42 = vsel %vm324_vm1, %v1998_v60, 0.0 }
 0x12a   :  { %770 = vst.msk [vmem:[%s2340_s4 + $0x1c0] sm:$0xff] %vm324_vm1, %v2142_v39  ;;  %v2149_v58 = vpop.f32.mrb[26].mxu1  ;;  %v875_v0 = vsel %vm324_vm1, %v2014_v51, 0.0  ;;  %v877_v60 = vsel %vm324_vm1, %v1985_v33, 0.0 }
 0x12b   :  { %v858_v46 = vadd.f32 %v857_v38, %v856_v5  ;;  %v1057_v47 = vadd.f32 %v1056_v28, %v1055_v44  ;;  %773 = vst.msk [vmem:[%s2340_s4 + $0x1d8] sm:$0xff] %vm324_vm1, %v2149_v58  ;;  %v2163_v16 = vpop.f32.mrb[27].mxu1  ;;  %v1072_v38 = vsel %vm324_vm1, %v966_v1, 0.0  ;;  %v1074_v44 = vsel %vm324_vm1, %v967_v21, 0.0 }
 0x12c   :  { %771 = vst.msk [vmem:[%s2340_s4 + $0x1c8] sm:$0xff] %vm324_vm1, %v2163_v16  ;;  %v968_v5 = vmul.f32 %v2014_v51, %v2014_v51  ;;  %v879_v51 = vsel %vm324_vm1, %v2005_v40, 0.0  ;;  %v883_v40 = vsel %vm324_vm1, %v2068_v22, 0.0 }
 0x12d   :  { %v1059_v55 = vadd.f32 %v1058_v50, %v1057_v47  ;;  %v860_v56 = vadd.f32 %v859_v15, %v858_v46 }
 0x12e   :  { %v1076_v15 = vsel %vm324_vm1, %v968_v5, 0.0 }
 0x12f   :  { %v862_v17 = vadd.f32 %v861_v2, %v860_v56  ;;  %v1061_v18 = vadd.f32 %v1060_v7, %v1059_v55  ;;  %v971_v55 = vmul.f32 %v2050_v59, %v2050_v59  ;;  %v881_v7 = vsel %vm324_vm1, %v2050_v59, 0.0 }
 0x130   :  { %v2179_v32 = vpop.f32.mrb[28].mxu1  ;;  %v885_v59 = vsel %vm324_vm1, %v2037_v53, 0.0 }
 0x131   :  { %v1063_v25 = vadd.f32 %v1062_v20, %v1061_v18  ;;  %v864_v26 = vadd.f32 %v863_v23, %v862_v17  ;;  %776 = vst.msk [vmem:[%s2340_s4 + $0x1f0] sm:$0xff] %vm324_vm1, %v2179_v32  ;;  %v2190_v57 = vpop.f32.mrb[29].mxu1  ;;  %v1080_v17 = vsel %vm324_vm1, %v970_v54, 0.0  ;;  %v1082_v18 = vsel %vm324_vm1, %v971_v55, 0.0 }
 0x132   :  { %774 = vst.msk [vmem:[%s2340_s4 + $0x1e0] sm:$0xff] %vm324_vm1, %v2190_v57  ;;  %v2197_v37 = vpop.f32.mrb[30].mxu1  ;;  %v972_v20 = vmul.f32 %v2068_v22, %v2068_v22  ;;  %v887_v22 = vsel %vm324_vm1, %v2057_v8, 0.0  ;;  %v981_v54 = vmul.f32 %v2131_v48, %v2131_v48 }
 0x133   :  { %v866_v31 = vadd.f32 %v865_v24, %v864_v26  ;;  %v1065_v14 = vadd.f32 %v1064_v27, %v1063_v25  ;;  %777 = vst.msk [vmem:[%s2340_s4 + $0x1f8] sm:$0xff] %vm324_vm1, %v2197_v37  ;;  %v2211_v4 = vpop.f32.mrb[31].mxu1  ;;  %v973_v25 = vmul.f32 %v2037_v53, %v2037_v53 }
 0x134   :  { %775 = vst.msk [vmem:[%s2340_s4 + $0x1e8] sm:$0xff] %vm324_vm1, %v2211_v4  ;;  %v1084_v30 = vsel %vm324_vm1, %v972_v20, 0.0 }
 0x135   :  { %v1067_v35 = vadd.f32 %v1066_v10, %v1065_v14  ;;  %v868_v36 = vadd.f32 %v867_v61, %v866_v31  ;;  %v974_v10 = vmul.f32 %v2057_v8, %v2057_v8  ;;  %v975_v31 = vmul.f32 %v2094_v11, %v2094_v11 }
 0x136   :  { %v1086_v61 = vsel %vm324_vm1, %v973_v25, 0.0  ;;  %v891_v8 = vsel %vm324_vm1, %v2115_v9, 0.0 }
 0x137   :  { %v870_v3 = vadd.f32 %v869_v12, %v868_v36  ;;  %v1069_v19 = vadd.f32 %v1068_v45, %v1067_v35  ;;  %v889_v35 = vsel %vm324_vm1, %v2094_v11, 0.0  ;;  %v1088_v12 = vsel %vm324_vm1, %v974_v10, 0.0 }
 0x138   :  { %v1090_v1 = vsel %vm324_vm1, %v975_v31, 0.0  ;;  %v976_v45 = vmul.f32 %v2115_v9, %v2115_v9  ;;  %v893_v11 = vsel %vm324_vm1, %v2083_v29, 0.0  ;;  %v895_v9 = vsel %vm324_vm1, %v2101_v62, 0.0 }
 0x139   :  { %v1071_v63 = vadd.f32 %v1070_v49, %v1069_v19  ;;  %v872_v43 = vadd.f32 %v871_v41, %v870_v3  ;;  %v977_v19 = vmul.f32 %v2083_v29, %v2083_v29 }
 0x13b   :  { %v874_v28 = vadd.f32 %v873_v42, %v872_v43  ;;  %v1073_v50 = vadd.f32 %v1072_v38, %v1071_v63  ;;  %v978_v42 = vmul.f32 %v2101_v62, %v2101_v62  ;;  %v1092_v63 = vsel %vm324_vm1, %v976_v45, 0.0 }
 0x13c   :  { %v979_v43 = vmul.f32 %v2142_v39, %v2142_v39  ;;  %v1094_v5 = vsel %vm324_vm1, %v977_v19, 0.0  ;;  %v899_v62 = vsel %vm324_vm1, %v2163_v16, 0.0 }
 0x13d   :  { %v1075_v46 = vadd.f32 %v1074_v44, %v1073_v50  ;;  %v876_v47 = vadd.f32 %v875_v0, %v874_v28  ;;  %v897_v28 = vsel %vm324_vm1, %v2142_v39, 0.0  ;;  %v1096_v52 = vsel %vm324_vm1, %v978_v42, 0.0 }
 0x13e   :  { %v1098_v0 = vsel %vm324_vm1, %v979_v43, 0.0  ;;  %v901_v39 = vsel %vm324_vm1, %v2131_v48, 0.0 }
 0x13f   :  { %v878_v56 = vadd.f32 %v877_v60, %v876_v47  ;;  %v1077_v2 = vadd.f32 %v1076_v15, %v1075_v46  ;;  %v980_v46 = vmul.f32 %v2163_v16, %v2163_v16  ;;  %v903_v16 = vsel %vm324_vm1, %v2149_v58, 0.0 }
 0x141   :  { %v1079_v13 = vadd.f32 %v1078_v6, %v1077_v2  ;;  %v880_v33 = vadd.f32 %v879_v51, %v878_v56  ;;  %v982_v56 = vmul.f32 %v2149_v58, %v2149_v58  ;;  %v1100_v2 = vsel %vm324_vm1, %v980_v46, 0.0 }
 0x142   :  { %v983_v6 = vmul.f32 %v2190_v57, %v2190_v57  ;;  %v907_v58 = vsel %vm324_vm1, %v2211_v4, 0.0 }
 0x143   :  { %v882_v23 = vadd.f32 %v881_v7, %v880_v33  ;;  %v1081_v24 = vadd.f32 %v1080_v17, %v1079_v13  ;;  %v1102_v13 = vsel %vm324_vm1, %v981_v54, 0.0  ;;  %v905_v33 = vsel %vm324_vm1, %v2190_v57, 0.0 }
 0x144   :  { %v1106_v20 = vsel %vm324_vm1, %v983_v6, 0.0  ;;  %v909_v57 = vsel %vm324_vm1, %v2179_v32, 0.0 }
 0x145   :  { %v1083_v26 = vadd.f32 %v1082_v18, %v1081_v24  ;;  %v884_v27 = vadd.f32 %v883_v40, %v882_v23  ;;  %v1104_v18 = vsel %vm324_vm1, %v982_v56, 0.0  ;;  %v984_v23 = vmul.f32 %v2211_v4, %v2211_v4 }
 0x146   :  { %v985_v40 = vmul.f32 %v2179_v32, %v2179_v32 }
 0x147   :  { %v886_v14 = vadd.f32 %v885_v59, %v884_v27  ;;  %v1085_v34 = vadd.f32 %v1084_v30, %v1083_v26  ;;  %v986_v59 = vmul.f32 %v2197_v37, %v2197_v37  ;;  %v1108_v10 = vsel %vm324_vm1, %v984_v23, 0.0 }
 0x149   :  { %v1087_v36 = vadd.f32 %v1086_v61, %v1085_v34  ;;  %v888_v53 = vadd.f32 %v887_v22, %v886_v14  ;;  %v1110_v14 = vsel %vm324_vm1, %v985_v40, 0.0  ;;  %v911_v34 = vsel %vm324_vm1, %v2197_v37, 0.0 }
 0x14a   :  { %v1112_v4 = vsel %vm324_vm1, %v986_v59, 0.0 }
 0x14b   :  { %v890_v21 = vadd.f32 %v889_v35, %v888_v53  ;;  %v1089_v3 = vadd.f32 %v1088_v12, %v1087_v36 }
 0x14d   :  { %v1091_v49 = vadd.f32 %v1090_v1, %v1089_v3  ;;  %v892_v41 = vadd.f32 %v891_v8, %v890_v21  ;;  %v785_v8 = vld [vmem:[%s2338_s5] sm:$0x1] }
 0x14f   :  { %v894_v38 = vadd.f32 %v893_v11, %v892_v41  ;;  %v1093_v44 = vadd.f32 %v1092_v63, %v1091_v49  ;;  %v922_v41 = vld [vmem:[%s2339_s6] sm:$0x1] }
 0x151   :  { %v1095_v50 = vadd.f32 %v1094_v5, %v1093_v44  ;;  %v896_v29 = vadd.f32 %v895_v9, %v894_v38 }
 0x153   :  { %v898_v47 = vadd.f32 %v897_v28, %v896_v29  ;;  %v1097_v60 = vadd.f32 %v1096_v52, %v1095_v50 }
 0x155   :  { %v1099_v15 = vadd.f32 %v1098_v0, %v1097_v60  ;;  %v900_v55 = vadd.f32 %v899_v62, %v898_v47 }
 0x157   :  { %v902_v51 = vadd.f32 %v901_v39, %v900_v55  ;;  %v1101_v7 = vadd.f32 %v1100_v2, %v1099_v15 }
 0x159   :  { %v1103_v17 = vadd.f32 %v1102_v13, %v1101_v7  ;;  %v904_v48 = vadd.f32 %v903_v16, %v902_v51 }
 0x15b   :  { %v906_v24 = vadd.f32 %v905_v33, %v904_v48  ;;  %v1105_v25 = vadd.f32 %v1104_v18, %v1103_v17 }
 0x15d   :  { %v1107_v26 = vadd.f32 %v1106_v20, %v1105_v25  ;;  %v908_v27 = vadd.f32 %v907_v58, %v906_v24 }
 0x15f   :  { %v910_v30 = vadd.f32 %v909_v57, %v908_v27  ;;  %v1109_v31 = vadd.f32 %v1108_v10, %v1107_v26 }
 0x161   :  { %v912_v61 = vadd.f32 %v911_v34, %v910_v30  ;;  %v1111_v22 = vadd.f32 %v1110_v14, %v1109_v31 }
 0x163   :  { %v913_v35 = vrot.slane %v912_v61, 4  ;;  %v1113_v36 = vadd.f32 %v1112_v4, %v1111_v22 }
 0x165   :  { %v914_v53 = vadd.f32 %v913_v35, %v912_v61  ;;  %v1114_v32 = vrot.slane %v1113_v36, 4 }
 0x167   :  { %v915_v12 = vrot.slane %v914_v53, 2  ;;  %v1115_v1 = vadd.f32 %v1114_v32, %v1113_v36 }
 0x169   :  { %v916_v45 = vadd.f32 %v915_v12, %v914_v53  ;;  %v1116_v21 = vrot.slane %v1115_v1, 2 }
 0x16b   :  { %v917_v3 = vrot.slane %v916_v45, 1  ;;  %v1117_v19 = vadd.f32 %v1116_v21, %v1115_v1 }
 0x16d   :  { %v918_v49 = vadd.f32 %v917_v3, %v916_v45  ;;  %v1118_v37 = vrot.slane %v1117_v19, 1 }
 0x16f   :  { %v919_v11 = vadd.f32 %v918_v49, %v785_v8  ;;  %v1119_v42 = vadd.f32 %v1118_v37, %v1117_v19 }
 0x171   :  { %921 = vst.msk [vmem:[%s2338_s5] sm:$0x1] %vm782_vm2, %v919_v11  ;;  %v1120_v63 = vadd.f32 %v1119_v42, %v922_v41 }
 0x173   :  { %1121 = vst.msk [vmem:[%s2339_s6] sm:$0x1] %vm782_vm2, %v1120_v63 }

// kernel: attention_conv_block_l3.73
= control target key start
LH: loop header
LB: loop body
LE: loop exit
PB: predicated region body
PF: predicated region fallthrough
CT: control target
= control target key end

     0   :  { %vm421_vm0 = vcmask 1043456   ;;  %vm324_vm1 = vcmask 64512   ;;  %s2796_s3 = inlined_call_operand.vmem [shape: bf16[8,8], index: 3, kind: input, shape index: {}]   ;;  %s2797_s0 = inlined_call_operand.vmem [shape: f32[512,8], index: 0, kind: input, shape index: {}]   ;;  %s2798_s1 = inlined_call_operand.vmem [shape: f32[1,8], index: 1, kind: input, shape index: {}]   ;;  %s2799_s2 = inlined_call_operand.vmem [shape: f32[1,8], index: 2, kind: input, shape index: {}]   ;;  %s2800_s4 = inlined_call_operand.vmem [shape: f32[512,8], index: 4, kind: input, shape index: {}]   ;;  %s2801_s5 = inlined_call_operand.vmem [shape: f32[512,8], index: 5, kind: output, shape index: {}]  }
   0x1   :  { %v323_v0 = vld [vmem:[%s2796_s3] sm:$0xf]  ;;  %v22_v2 = vld [vmem:[%s2797_s0 + $0x8] sm:$0xff]  ;;  %v23_v11 = vld [vmem:[%s2797_s0 + $0x10] sm:$0xff] }
   0x2   :  { %v21_v1 = vld [vmem:[%s2797_s0] sm:$0xff]  ;;  %1557 = vmatprep.subr.msk.bf16.mxu0 %vm421_vm0, %v323_v0  ;;  %1558 = vmatprep.subr.msk.bf16.mxu1 %vm421_vm0, %v323_v0  ;;  %v423_v3 = vsel %vm421_vm0, %v323_v0, 0  ;;  %v54_v9 = vld [vmem:[%s2797_s0 + $0x108] sm:$0xff]  ;;  %v24_v12 = vld [vmem:[%s2797_s0 + $0x18] sm:$0xff] }
   0x3   :  { %v1857_v4 = vld [vmem:[%s2798_s1] ss:$0 sm:$0xff]  ;;  %1490 = vmatpush3.bf16.msra.mxu0 %v423_v3  ;;  %1556 = vmatpush3.bf16.msra.mxu1 %v423_v3  ;;  %v55_v16 = vld [vmem:[%s2797_s0 + $0x110] sm:$0xff]  ;;  %v56_v17 = vld [vmem:[%s2797_s0 + $0x118] sm:$0xff] }
   0x4   :  { %v1862_v5 = vld [vmem:[%s2799_s2] ss:$0 sm:$0xff]  ;;  %v92_v7 = vmul.f32 %v1857_v4, %v21_v1  ;;  %v93_v8 = vmul.f32 %v1857_v4, %v22_v2  ;;  %v125_v13 = vmul.f32 %v1857_v4, %v54_v9  ;;  %v94_v14 = vmul.f32 %v1857_v4, %v23_v11  ;;  %v26_v27 = vld [vmem:[%s2797_s0 + $0x28] sm:$0xff]  ;;  %v27_v38 = vld [vmem:[%s2797_s0 + $0x30] sm:$0xff] }
   0x5   :  { %v53_v6 = vld [vmem:[%s2797_s0 + $0x100] sm:$0xff]  ;;  %v95_v15 = vmul.f32 %v1857_v4, %v24_v12  ;;  %v126_v21 = vmul.f32 %v1857_v4, %v55_v16  ;;  %v127_v25 = vmul.f32 %v1857_v4, %v56_v17  ;;  %v58_v37 = vld [vmem:[%s2797_s0 + $0x128] sm:$0xff]  ;;  %v97_v42 = vmul.f32 %v1857_v4, %v26_v27  ;;  %v28_v43 = vld [vmem:[%s2797_s0 + $0x38] sm:$0xff] }
   0x6   :  { %v124_v10 = vmul.f32 %v1857_v4, %v53_v6  ;;  %v163_v18 = vadd.f32 %v1862_v5, %v92_v7  ;;  %v164_v19 = vadd.f32 %v1862_v5, %v93_v8  ;;  %v196_v22 = vadd.f32 %v1862_v5, %v125_v13  ;;  %v25_v26 = vld [vmem:[%s2797_s0 + $0x20] sm:$0xff]  ;;  %v59_v52 = vld [vmem:[%s2797_s0 + $0x130] sm:$0xff]  ;;  %v60_v53 = vld [vmem:[%s2797_s0 + $0x138] sm:$0xff] }
   0x7   :  { %v165_v23 = vadd.f32 %v1862_v5, %v94_v14  ;;  %v166_v24 = vadd.f32 %v1862_v5, %v95_v15  ;;  %v197_v31 = vadd.f32 %v1862_v5, %v126_v21  ;;  %v57_v32 = vld [vmem:[%s2797_s0 + $0x120] sm:$0xff]  ;;  %v198_v36 = vadd.f32 %v1862_v5, %v127_v25  ;;  %v30_v62 = vld [vmem:[%s2797_s0 + $0x48] sm:$0xff]  ;;  %v31_v15 = vld [vmem:[%s2797_s0 + $0x50] sm:$0xff] }
   0x8   :  { %v195_v20 = vadd.f32 %v1862_v5, %v124_v10  ;;  %v227_v28 = vmax.f32 %v163_v18, 0.0  ;;  %v228_v29 = vmax.f32 %v164_v19, 0.0  ;;  %v260_v33 = vmax.f32 %v196_v22, 0.0  ;;  %v29_v57 = vld [vmem:[%s2797_s0 + $0x40] sm:$0xff]  ;;  %v62_v6 = vld [vmem:[%s2797_s0 + $0x148] sm:$0xff]  ;;  %v63_v21 = vld [vmem:[%s2797_s0 + $0x150] sm:$0xff] }
   0x9   :  { %v229_v34 = vmax.f32 %v165_v23, 0.0  ;;  %v230_v35 = vmax.f32 %v166_v24, 0.0  ;;  %v261_v40 = vmax.f32 %v197_v31, 0.0  ;;  %v96_v41 = vmul.f32 %v1857_v4, %v25_v26  ;;  %v61_v3 = vld [vmem:[%s2797_s0 + $0x140] sm:$0xff]  ;;  %v64_v26 = vld [vmem:[%s2797_s0 + $0x158] sm:$0xff] }
   0xa   :  { %v259_v30 = vmax.f32 %v195_v20, 0.0  ;;  %v291_v39 = vpack.c.bf16 %v228_v29, %v227_v28  ;;  %v262_v46 = vmax.f32 %v198_v36, 0.0  ;;  %v128_v47 = vmul.f32 %v1857_v4, %v57_v32  ;;  %v32_v20 = vld [vmem:[%s2797_s0 + $0x58] sm:$0xff]  ;;  %v33_v31 = vld [vmem:[%s2797_s0 + $0x60] sm:$0xff]  ;;  %v34_v36 = vld [vmem:[%s2797_s0 + $0x68] sm:$0xff] }
   0xb   :  { %v292_v45 = vpack.c.bf16 %v230_v35, %v229_v34  ;;  %v167_v48 = vadd.f32 %v1862_v5, %v96_v41  ;;  %v168_v49 = vadd.f32 %v1862_v5, %v97_v42  ;;  %v129_v50 = vmul.f32 %v1857_v4, %v58_v37  ;;  %v65_v41 = vld [vmem:[%s2797_s0 + $0x160] sm:$0xff] }
   0xc   :  { %v307_v44 = vpack.c.bf16 %v260_v33, %v259_v30  ;;  %1491 = vmatprep.mubr.msk.bf16.mxu0 %vm324_vm1, %v291_v39  ;;  %v98_v51 = vmul.f32 %v1857_v4, %v27_v38  ;;  %v308_v54 = vpack.c.bf16 %v262_v46, %v261_v40  ;;  %v199_v55 = vadd.f32 %v1862_v5, %v128_v47  ;;  %v66_v46 = vld [vmem:[%s2797_s0 + $0x168] sm:$0xff]  ;;  %v35_v47 = vld [vmem:[%s2797_s0 + $0x70] sm:$0xff] }
   0xd   :  { %1492 = vmatmul.mubr.msk.bf16.vlgmr.msra.gmra.mrb[0].mxu0 %vm324_vm1, %v292_v45  ;;  %v99_v56 = vmul.f32 %v1857_v4, %v28_v43  ;;  %v231_v58 = vmax.f32 %v167_v48, 0.0  ;;  %v232_v59 = vmax.f32 %v168_v49, 0.0  ;;  %v200_v60 = vadd.f32 %v1862_v5, %v129_v50 }
   0xe   :  { %1523 = vmatprep.mubr.msk.bf16.mxu1 %vm324_vm1, %v307_v44  ;;  %v169_v61 = vadd.f32 %v1862_v5, %v98_v51  ;;  %v263_v63 = vmax.f32 %v199_v55, 0.0  ;;  %v130_v1 = vmul.f32 %v1857_v4, %v59_v52  ;;  %v131_v2 = vmul.f32 %v1857_v4, %v60_v53  ;;  %v36_v52 = vld [vmem:[%s2797_s0 + $0x78] sm:$0xff] }
   0xf   :  { %1524 = vmatmul.mubr.msk.bf16.vlgmr.msra.gmra.mrb[0].mxu1 %vm324_vm1, %v308_v54  ;;  %v170_v0 = vadd.f32 %v1862_v5, %v99_v56  ;;  %v293_v7 = vpack.c.bf16 %v232_v59, %v231_v58  ;;  %v264_v8 = vmax.f32 %v200_v60, 0.0  ;;  %v100_v10 = vmul.f32 %v1857_v4, %v29_v57 }
  0x10   :  { %v233_v9 = vmax.f32 %v169_v61, 0.0  ;;  %v201_v12 = vadd.f32 %v1862_v5, %v130_v1  ;;  %v202_v13 = vadd.f32 %v1862_v5, %v131_v2  ;;  %v101_v14 = vmul.f32 %v1857_v4, %v30_v62  ;;  %v67_v61 = vld [vmem:[%s2797_s0 + $0x170] sm:$0xff]  ;;  %v68_v62 = vld [vmem:[%s2797_s0 + $0x178] sm:$0xff] }
  0x11   :  { %v234_v11 = vmax.f32 %v170_v0, 0.0  ;;  %1495 = vmatprep.mubr.msk.bf16.mxu0 %vm324_vm1, %v293_v7  ;;  %v309_v16 = vpack.c.bf16 %v264_v8, %v263_v63  ;;  %v171_v17 = vadd.f32 %v1862_v5, %v100_v10  ;;  %v132_v18 = vmul.f32 %v1857_v4, %v61_v3  ;;  %v37_v3 = vld [vmem:[%s2797_s0 + $0x80] sm:$0xff]  ;;  %v38_v10 = vld [vmem:[%s2797_s0 + $0x88] sm:$0xff] }
  0x12   :  { %v133_v19 = vmul.f32 %v1857_v4, %v62_v6  ;;  %v265_v23 = vmax.f32 %v201_v12, 0.0  ;;  %v266_v24 = vmax.f32 %v202_v13, 0.0  ;;  %v172_v25 = vadd.f32 %v1862_v5, %v101_v14 }
  0x13   :  { %v294_v22 = vpack.c.bf16 %v234_v11, %v233_v9  ;;  %1527 = vmatprep.mubr.msk.bf16.mxu1 %vm324_vm1, %v309_v16  ;;  %v235_v27 = vmax.f32 %v171_v17, 0.0  ;;  %v203_v28 = vadd.f32 %v1862_v5, %v132_v18  ;;  %v102_v30 = vmul.f32 %v1857_v4, %v31_v15  ;;  %v69_v15 = vld [vmem:[%s2797_s0 + $0x180] sm:$0xff]  ;;  %v70_v16 = vld [vmem:[%s2797_s0 + $0x188] sm:$0xff] }
  0x14   :  { %v204_v29 = vadd.f32 %v1862_v5, %v133_v19  ;;  %v310_v32 = vpack.c.bf16 %v266_v24, %v265_v23  ;;  %v236_v33 = vmax.f32 %v172_v25, 0.0  ;;  %v103_v34 = vmul.f32 %v1857_v4, %v32_v20  ;;  %v39_v25 = vld [vmem:[%s2797_s0 + $0x90] sm:$0xff] }
  0x15   :  { %1496 = vmatmul.mubr.msk.bf16.gmra.mrb[4].mxu0 %vm324_vm1, %v294_v22  ;;  %v134_v35 = vmul.f32 %v1857_v4, %v63_v21  ;;  %v267_v37 = vmax.f32 %v203_v28, 0.0  ;;  %v173_v39 = vadd.f32 %v1862_v5, %v102_v30  ;;  %v135_v40 = vmul.f32 %v1857_v4, %v64_v26  ;;  %v40_v30 = vld [vmem:[%s2797_s0 + $0x98] sm:$0xff] }
  0x16   :  { %v268_v38 = vmax.f32 %v204_v29, 0.0  ;;  %v295_v42 = vpack.c.bf16 %v236_v33, %v235_v27  ;;  %v174_v43 = vadd.f32 %v1862_v5, %v103_v34  ;;  %v104_v45 = vmul.f32 %v1857_v4, %v33_v31  ;;  %v71_v31 = vld [vmem:[%s2797_s0 + $0x190] sm:$0xff] }
  0x17   :  { %1528 = vmatmul.mubr.msk.bf16.gmra.mrb[4].mxu1 %vm324_vm1, %v310_v32  ;;  %v205_v44 = vadd.f32 %v1862_v5, %v134_v35  ;;  %v237_v49 = vmax.f32 %v173_v39, 0.0  ;;  %v206_v50 = vadd.f32 %v1862_v5, %v135_v40  ;;  %v105_v51 = vmul.f32 %v1857_v4, %v34_v36  ;;  %v72_v36 = vld [vmem:[%s2797_s0 + $0x198] sm:$0xff] }
  0x18   :  { %v311_v48 = vpack.c.bf16 %v268_v38, %v267_v37  ;;  %1499 = vmatprep.mubr.msk.bf16.mxu0 %vm324_vm1, %v295_v42  ;;  %v238_v53 = vmax.f32 %v174_v43, 0.0  ;;  %v175_v55 = vadd.f32 %v1862_v5, %v104_v45  ;;  %v136_v56 = vmul.f32 %v1857_v4, %v65_v41  ;;  %v41_v41 = vld [vmem:[%s2797_s0 + $0xa0] sm:$0xff] }
  0x19   :  { %v269_v54 = vmax.f32 %v205_v44, 0.0  ;;  %v270_v57 = vmax.f32 %v206_v50, 0.0  ;;  %v176_v58 = vadd.f32 %v1862_v5, %v105_v51  ;;  %v137_v59 = vmul.f32 %v1857_v4, %v66_v46  ;;  %v42_v46 = vld [vmem:[%s2797_s0 + $0xa8] sm:$0xff]  ;;  %v73_v51 = vld [vmem:[%s2797_s0 + $0x1a0] sm:$0xff] }
  0x1a   :  { %1531 = vmatprep.mubr.msk.bf16.mxu1 %vm324_vm1, %v311_v48  ;;  %v106_v60 = vmul.f32 %v1857_v4, %v35_v47  ;;  %v296_v63 = vpack.c.bf16 %v238_v53, %v237_v49  ;;  %v239_v0 = vmax.f32 %v175_v55, 0.0  ;;  %v207_v1 = vadd.f32 %v1862_v5, %v136_v56  ;;  %v74_v56 = vld [vmem:[%s2797_s0 + $0x1a8] sm:$0xff] }
  0x1b   :  { %v107_v2 = vmul.f32 %v1857_v4, %v36_v52  ;;  %v312_v6 = vpack.c.bf16 %v270_v57, %v269_v54  ;;  %v240_v7 = vmax.f32 %v176_v58, 0.0  ;;  %v208_v8 = vadd.f32 %v1862_v5, %v137_v59  ;;  %v43_v57 = vld [vmem:[%s2797_s0 + $0xb0] sm:$0xff] }
  0x1c   :  { %v177_v9 = vadd.f32 %v1862_v5, %v106_v60  ;;  %v271_v11 = vmax.f32 %v207_v1, 0.0  ;;  %v138_v13 = vmul.f32 %v1857_v4, %v67_v61  ;;  %v139_v14 = vmul.f32 %v1857_v4, %v68_v62  ;;  %v44_v62 = vld [vmem:[%s2797_s0 + $0xb8] sm:$0xff] }
  0x1d   :  { %1500 = vmatmul.mubr.msk.bf16.gmra.mrb[8].mxu0 %vm324_vm1, %v296_v63  ;;  %v178_v12 = vadd.f32 %v1862_v5, %v107_v2  ;;  %v297_v17 = vpack.c.bf16 %v240_v7, %v239_v0  ;;  %v272_v18 = vmax.f32 %v208_v8, 0.0  ;;  %v108_v20 = vmul.f32 %v1857_v4, %v37_v3 }
  0x1e   :  { %v241_v19 = vmax.f32 %v177_v9, 0.0  ;;  %v209_v22 = vadd.f32 %v1862_v5, %v138_v13  ;;  %v210_v23 = vadd.f32 %v1862_v5, %v139_v14  ;;  %v109_v24 = vmul.f32 %v1857_v4, %v38_v10  ;;  %v75_v9 = vld [vmem:[%s2797_s0 + $0x1b0] sm:$0xff]  ;;  %v76_v10 = vld [vmem:[%s2797_s0 + $0x1b8] sm:$0xff] }
  0x1f   :  { %1532 = vmatmul.mubr.msk.bf16.gmra.mrb[8].mxu1 %vm324_vm1, %v312_v6  ;;  %v242_v21 = vmax.f32 %v178_v12, 0.0  ;;  %1503 = vmatprep.mubr.msk.bf16.mxu0 %vm324_vm1, %v297_v17  ;;  %v313_v26 = vpack.c.bf16 %v272_v18, %v271_v11  ;;  %v179_v27 = vadd.f32 %v1862_v5, %v108_v20  ;;  %v140_v28 = vmul.f32 %v1857_v4, %v69_v15  ;;  %v45_v15 = vld [vmem:[%s2797_s0 + $0xc0] sm:$0xff]  ;;  %v46_v20 = vld [vmem:[%s2797_s0 + $0xc8] sm:$0xff] }
  0x20   :  { %v141_v29 = vmul.f32 %v1857_v4, %v70_v16  ;;  %v273_v33 = vmax.f32 %v209_v22, 0.0  ;;  %v274_v34 = vmax.f32 %v210_v23, 0.0  ;;  %v180_v35 = vadd.f32 %v1862_v5, %v109_v24 }
  0x21   :  { %v298_v32 = vpack.c.bf16 %v242_v21, %v241_v19  ;;  %1535 = vmatprep.mubr.msk.bf16.mxu1 %vm324_vm1, %v313_v26  ;;  %v243_v37 = vmax.f32 %v179_v27, 0.0  ;;  %v211_v38 = vadd.f32 %v1862_v5, %v140_v28  ;;  %v110_v40 = vmul.f32 %v1857_v4, %v39_v25  ;;  %v77_v25 = vld [vmem:[%s2797_s0 + $0x1c0] sm:$0xff]  ;;  %v78_v26 = vld [vmem:[%s2797_s0 + $0x1c8] sm:$0xff] }
  0x22   :  { %v212_v39 = vadd.f32 %v1862_v5, %v141_v29  ;;  %v314_v42 = vpack.c.bf16 %v274_v34, %v273_v33  ;;  %v244_v43 = vmax.f32 %v180_v35, 0.0  ;;  %v111_v44 = vmul.f32 %v1857_v4, %v40_v30  ;;  %v47_v35 = vld [vmem:[%s2797_s0 + $0xd0] sm:$0xff] }
  0x23   :  { %v142_v45 = vmul.f32 %v1857_v4, %v71_v31  ;;  %v275_v47 = vmax.f32 %v211_v38, 0.0  ;;  %v181_v49 = vadd.f32 %v1862_v5, %v110_v40  ;;  %v143_v50 = vmul.f32 %v1857_v4, %v72_v36  ;;  %v48_v40 = vld [vmem:[%s2797_s0 + $0xd8] sm:$0xff] }
  0x24   :  { %v276_v48 = vmax.f32 %v212_v39, 0.0  ;;  %v299_v52 = vpack.c.bf16 %v244_v43, %v243_v37  ;;  %v182_v53 = vadd.f32 %v1862_v5, %v111_v44  ;;  %v112_v55 = vmul.f32 %v1857_v4, %v41_v41  ;;  %v79_v41 = vld [vmem:[%s2797_s0 + $0x1d0] sm:$0xff] }
  0x25   :  { %1504 = vmatmul.mubr.msk.bf16.gmra.mrb[12].mxu0 %vm324_vm1, %v298_v32  ;;  %v213_v54 = vadd.f32 %v1862_v5, %v142_v45  ;;  %v245_v59 = vmax.f32 %v181_v49, 0.0  ;;  %v214_v60 = vadd.f32 %v1862_v5, %v143_v50  ;;  %v113_v61 = vmul.f32 %v1857_v4, %v42_v46  ;;  %v80_v46 = vld [vmem:[%s2797_s0 + $0x1d8] sm:$0xff] }
  0x26   :  { %v315_v58 = vpack.c.bf16 %v276_v48, %v275_v47  ;;  %1507 = vmatprep.mubr.msk.bf16.mxu0 %vm324_vm1, %v299_v52  ;;  %v246_v63 = vmax.f32 %v182_v53, 0.0  ;;  %v183_v1 = vadd.f32 %v1862_v5, %v112_v55  ;;  %v144_v2 = vmul.f32 %v1857_v4, %v73_v51  ;;  %v49_v51 = vld [vmem:[%s2797_s0 + $0xe0] sm:$0xff] }
  0x27   :  { %1536 = vmatmul.mubr.msk.bf16.gmra.mrb[12].mxu1 %vm324_vm1, %v314_v42  ;;  %v277_v0 = vmax.f32 %v213_v54, 0.0  ;;  %v278_v3 = vmax.f32 %v214_v60, 0.0  ;;  %v184_v6 = vadd.f32 %v1862_v5, %v113_v61  ;;  %v145_v7 = vmul.f32 %v1857_v4, %v74_v56  ;;  %v50_v56 = vld [vmem:[%s2797_s0 + $0xe8] sm:$0xff]  ;;  %v81_v61 = vld [vmem:[%s2797_s0 + $0x1e0] sm:$0xff] }
  0x28   :  { %1539 = vmatprep.mubr.msk.bf16.mxu1 %vm324_vm1, %v315_v58  ;;  %v114_v8 = vmul.f32 %v1857_v4, %v43_v57  ;;  %v300_v11 = vpack.c.bf16 %v246_v63, %v245_v59  ;;  %v247_v12 = vmax.f32 %v183_v1, 0.0  ;;  %v215_v13 = vadd.f32 %v1862_v5, %v144_v2  ;;  %v82_v2 = vld [vmem:[%s2797_s0 + $0x1e8] sm:$0xff] }
  0x29   :  { %v115_v14 = vmul.f32 %v1857_v4, %v44_v62  ;;  %v316_v16 = vpack.c.bf16 %v278_v3, %v277_v0  ;;  %v248_v17 = vmax.f32 %v184_v6, 0.0  ;;  %v216_v18 = vadd.f32 %v1862_v5, %v145_v7  ;;  %v51_v3 = vld [vmem:[%s2797_s0 + $0xf0] sm:$0xff] }
  0x2a   :  { %v185_v19 = vadd.f32 %v1862_v5, %v114_v8  ;;  %v279_v21 = vmax.f32 %v215_v13, 0.0  ;;  %v146_v23 = vmul.f32 %v1857_v4, %v75_v9  ;;  %v147_v24 = vmul.f32 %v1857_v4, %v76_v10  ;;  %v52_v10 = vld [vmem:[%s2797_s0 + $0xf8] sm:$0xff] }
  0x2b   :  { %v186_v22 = vadd.f32 %v1862_v5, %v115_v14  ;;  %v301_v27 = vpack.c.bf16 %v248_v17, %v247_v12  ;;  %v280_v28 = vmax.f32 %v216_v18, 0.0  ;;  %v116_v30 = vmul.f32 %v1857_v4, %v45_v15  ;;  %v83_v18 = vld [vmem:[%s2797_s0 + $0x1f0] sm:$0xff] }
  0x2c   :  { %v249_v29 = vmax.f32 %v185_v19, 0.0  ;;  %v217_v32 = vadd.f32 %v1862_v5, %v146_v23  ;;  %v218_v33 = vadd.f32 %v1862_v5, %v147_v24  ;;  %v117_v34 = vmul.f32 %v1857_v4, %v46_v20  ;;  %v84_v19 = vld [vmem:[%s2797_s0 + $0x1f8] sm:$0xff] }
  0x2d   :  { %1508 = vmatmul.mubr.msk.bf16.gmra.mrb[16].mxu0 %vm324_vm1, %v300_v11  ;;  %v250_v31 = vmax.f32 %v186_v22, 0.0  ;;  %v317_v36 = vpack.c.bf16 %v280_v28, %v279_v21  ;;  %v187_v37 = vadd.f32 %v1862_v5, %v116_v30  ;;  %v148_v38 = vmul.f32 %v1857_v4, %v77_v25 }
  0x2e   :  { %1511 = vmatprep.mubr.msk.bf16.mxu0 %vm324_vm1, %v301_v27  ;;  %v149_v39 = vmul.f32 %v1857_v4, %v78_v26  ;;  %v281_v43 = vmax.f32 %v217_v32, 0.0  ;;  %v282_v44 = vmax.f32 %v218_v33, 0.0  ;;  %v188_v45 = vadd.f32 %v1862_v5, %v117_v34 }
  0x2f   :  { %1540 = vmatmul.mubr.msk.bf16.gmra.mrb[16].mxu1 %vm324_vm1, %v316_v16  ;;  %v302_v42 = vpack.c.bf16 %v250_v31, %v249_v29  ;;  %v251_v47 = vmax.f32 %v187_v37, 0.0  ;;  %v219_v48 = vadd.f32 %v1862_v5, %v148_v38  ;;  %v118_v50 = vmul.f32 %v1857_v4, %v47_v35 }
  0x30   :  { %1543 = vmatprep.mubr.msk.bf16.mxu1 %vm324_vm1, %v317_v36  ;;  %v220_v49 = vadd.f32 %v1862_v5, %v149_v39  ;;  %v318_v52 = vpack.c.bf16 %v282_v44, %v281_v43  ;;  %v252_v53 = vmax.f32 %v188_v45, 0.0  ;;  %v119_v54 = vmul.f32 %v1857_v4, %v48_v40 }
  0x31   :  { %v150_v55 = vmul.f32 %v1857_v4, %v79_v41  ;;  %v283_v57 = vmax.f32 %v219_v48, 0.0  ;;  %v189_v59 = vadd.f32 %v1862_v5, %v118_v50  ;;  %v151_v60 = vmul.f32 %v1857_v4, %v80_v46 }
  0x32   :  { %v284_v58 = vmax.f32 %v220_v49, 0.0  ;;  %v303_v62 = vpack.c.bf16 %v252_v53, %v251_v47  ;;  %v190_v63 = vadd.f32 %v1862_v5, %v119_v54  ;;  %v120_v1 = vmul.f32 %v1857_v4, %v49_v51 }
  0x33   :  { %v221_v0 = vadd.f32 %v1862_v5, %v150_v55  ;;  %v253_v7 = vmax.f32 %v189_v59, 0.0  ;;  %v222_v8 = vadd.f32 %v1862_v5, %v151_v60  ;;  %v121_v9 = vmul.f32 %v1857_v4, %v50_v56 }
  0x34   :  { %v319_v6 = vpack.c.bf16 %v284_v58, %v283_v57  ;;  %v254_v11 = vmax.f32 %v190_v63, 0.0  ;;  %v191_v12 = vadd.f32 %v1862_v5, %v120_v1  ;;  %v152_v13 = vmul.f32 %v1857_v4, %v81_v61 }
  0x35   :  { %1512 = vmatmul.mubr.msk.bf16.gmra.mrb[20].mxu0 %vm324_vm1, %v302_v42  ;;  %v285_v14 = vmax.f32 %v221_v0, 0.0  ;;  %v192_v15 = vadd.f32 %v1862_v5, %v121_v9  ;;  %v153_v16 = vmul.f32 %v1857_v4, %v82_v2  ;;  %v122_v17 = vmul.f32 %v1857_v4, %v51_v3 }
  0x36   :  { %1515 = vmatprep.mubr.msk.bf16.mxu0 %vm324_vm1, %v303_v62  ;;  %v286_v20 = vmax.f32 %v222_v8, 0.0  ;;  %v255_v21 = vmax.f32 %v191_v12, 0.0  ;;  %v223_v22 = vadd.f32 %v1862_v5, %v152_v13  ;;  %v123_v23 = vmul.f32 %v1857_v4, %v52_v10 }
  0x37   :  { %1544 = vmatmul.mubr.msk.bf16.gmra.mrb[20].mxu1 %vm324_vm1, %v318_v52  ;;  %v304_v24 = vpack.c.bf16 %v254_v11, %v253_v7  ;;  %v256_v25 = vmax.f32 %v192_v15, 0.0  ;;  %v224_v26 = vadd.f32 %v1862_v5, %v153_v16  ;;  %v193_v27 = vadd.f32 %v1862_v5, %v122_v17 }
  0x38   :  { %1547 = vmatprep.mubr.msk.bf16.mxu1 %vm324_vm1, %v319_v6  ;;  %v287_v28 = vmax.f32 %v223_v22, 0.0  ;;  %v194_v29 = vadd.f32 %v1862_v5, %v123_v23  ;;  %v154_v30 = vmul.f32 %v1857_v4, %v83_v18  ;;  %v155_v31 = vmul.f32 %v1857_v4, %v84_v19 }
  0x39   :  { %v305_v32 = vpack.c.bf16 %v256_v25, %v255_v21  ;;  %v288_v33 = vmax.f32 %v224_v26, 0.0  ;;  %v320_v34 = vpack.c.bf16 %v286_v20, %v285_v14  ;;  %v257_v38 = vmax.f32 %v193_v27, 0.0 }
  0x3a   :  { %v225_v35 = vadd.f32 %v1862_v5, %v154_v30  ;;  %v226_v36 = vadd.f32 %v1862_v5, %v155_v31  ;;  %v258_v39 = vmax.f32 %v194_v29, 0.0 }
  0x3b   :  { %v321_v37 = vpack.c.bf16 %v288_v33, %v287_v28 }
  0x3c   :  { %v289_v40 = vmax.f32 %v225_v35, 0.0  ;;  %v290_v41 = vmax.f32 %v226_v36, 0.0  ;;  %v306_v4 = vpack.c.bf16 %v258_v39, %v257_v38 }
  0x3d   :  { %1516 = vmatmul.mubr.msk.bf16.gmra.mrb[24].mxu0 %vm324_vm1, %v304_v24 }
  0x3e   :  { %1519 = vmatprep.mubr.msk.bf16.mxu0 %vm324_vm1, %v305_v32  ;;  %v322_v42 = vpack.c.bf16 %v290_v41, %v289_v40 }
  0x3f   :  { %1548 = vmatmul.mubr.msk.bf16.gmra.mrb[24].mxu1 %vm324_vm1, %v320_v34 }
  0x40   :  { %1551 = vmatprep.mubr.msk.bf16.mxu1 %vm324_vm1, %v321_v37 }
  0x45   :  { %1520 = vmatmul.mubr.msk.bf16.gmra.mrb[28].mxu0 %vm324_vm1, %v306_v4 }
  0x47   :  { %1552 = vmatmul.mubr.msk.bf16.gmra.mrb[28].mxu1 %vm324_vm1, %v322_v42 }
  0xe0   :  { %v1493_v5 = vpop.f32.mrb[0].mxu0 }
  0xe1   :  { %v1394_v43 = vmul.f32 -1.442695, %v1493_v5  ;;  %v459_v44 = vpop.f32.mrb[1].mxu0 }
  0xe2   :  { %v1525_v45 = vpop.f32.mrb[0].mxu1  ;;  %v1392_v46 = vmul.f32 -1.442695, %v459_v44  ;;  %v1494_v47 = vpop.f32.mrb[2].mxu0  ;;  %v1164_v44 = vld [vmem:[%s2800_s4 + $0x10] sm:$0xff] }
  0xe3   :  { %1559 = vpow2.f32 %v1394_v43  ;;  %v1426_v48 = vmul.f32 -1.442695, %v1525_v45  ;;  %v587_v49 = vpop.f32.mrb[1].mxu1  ;;  %v1395_v50 = vmul.f32 -1.442695, %v1494_v47  ;;  %v462_v51 = vpop.f32.mrb[3].mxu0 }
  0xe4   :  { %1561 = vpow2.f32 %v1392_v46  ;;  %v1424_v52 = vmul.f32 -1.442695, %v587_v49  ;;  %v1526_v53 = vpop.f32.mrb[2].mxu1  ;;  %v1393_v55 = vmul.f32 -1.442695, %v462_v51  ;;  %v1162_v51 = vld [vmem:[%s2800_s4] sm:$0xff] }
  0xe5   :  { %1563 = vpow2.f32 %v1426_v48  ;;  %v1427_v54 = vmul.f32 -1.442695, %v1526_v53  ;;  %v590_v56 = vpop.f32.mrb[3].mxu1 }
  0xe6   :  { %1565 = vpow2.f32 %v1424_v52  ;;  %v1425_v57 = vmul.f32 -1.442695, %v590_v56 }
  0xe7   :  { %1567 = vpow2.f32 %v1395_v50 }
  0xe8   :  { %1569 = vpow2.f32 %v1427_v54  ;;  %v1497_v58 = vpop.f32.mrb[4].mxu0 }
  0xe9   :  { %1571 = vpow2.f32 %v1393_v55  ;;  %v1398_v59 = vmul.f32 -1.442695, %v1497_v58  ;;  %v475_v60 = vpop.f32.mrb[5].mxu0  ;;  %v1196_v55 = vld [vmem:[%s2800_s4 + $0x110] sm:$0xff] }
  0xea   :  { %1573 = vpow2.f32 %v1425_v57  ;;  %v1529_v61 = vpop.f32.mrb[4].mxu1  ;;  %v1396_v62 = vmul.f32 -1.442695, %v475_v60  ;;  %v1498_v63 = vpop.f32.mrb[6].mxu0 }
  0xeb   :  { %1575 = vpow2.f32 %v1398_v59  ;;  %v1430_v0 = vmul.f32 -1.442695, %v1529_v61  ;;  %v603_v1 = vpop.f32.mrb[5].mxu1  ;;  %v1399_v2 = vmul.f32 -1.442695, %v1498_v63  ;;  %v478_v3 = vpop.f32.mrb[7].mxu0 }
  0xec   :  { %1577 = vpow2.f32 %v1396_v62  ;;  %v1428_v6 = vmul.f32 -1.442695, %v603_v1  ;;  %v1530_v7 = vpop.f32.mrb[6].mxu1  ;;  %v1397_v46 = vmul.f32 -1.442695, %v478_v3  ;;  %v1194_v63 = vld [vmem:[%s2800_s4 + $0x100] sm:$0xff] }
  0xed   :  { %v1560_v8 = vpop.eup %1559  ;;  %1579 = vpow2.f32 %v1430_v0  ;;  %v606_v9 = vpop.f32.mrb[7].mxu1  ;;  %v1431_v42 = vmul.f32 -1.442695, %v1530_v7  ;;  %v1165_v7 = vld [vmem:[%s2800_s4 + $0x18] sm:$0xff] }
  0xee   :  { %v1562_v10 = vpop.eup %1561  ;;  %v908_v11 = vadd.f32 1.0, %v1560_v8  ;;  %1581 = vpow2.f32 %v1428_v6  ;;  %v1429_v52 = vmul.f32 -1.442695, %v606_v9 }
  0xef   :  { %v1564_v12 = vpop.eup %1563  ;;  %v906_v13 = vadd.f32 1.0, %v1562_v10  ;;  %1583 = vpow2.f32 %v1399_v2 }
  0xf0   :  { %v1566_v14 = vpop.eup %1565  ;;  %1585 = vrcp.f32 %v908_v11  ;;  %v940_v15 = vadd.f32 1.0, %v1564_v12  ;;  %v1501_v16 = vpop.f32.mrb[8].mxu0  ;;  %v1197_v12 = vld [vmem:[%s2800_s4 + $0x118] sm:$0xff] }
  0xf1   :  { %v1568_v17 = vpop.eup %1567  ;;  %1587 = vrcp.f32 %v906_v13  ;;  %v938_v18 = vadd.f32 1.0, %v1566_v14  ;;  %v2210_v19 = vpop.f32.mrb[9].mxu0  ;;  %v1402_v57 = vmul.f32 -1.442695, %v1501_v16 }
  0xf2   :  { %v1570_v20 = vpop.eup %1569  ;;  %1589 = vrcp.f32 %v940_v15  ;;  %v909_v21 = vadd.f32 1.0, %v1568_v17  ;;  %v1533_v22 = vpop.f32.mrb[8].mxu1  ;;  %v1400_v8 = vmul.f32 -1.442695, %v2210_v19  ;;  %v1163_v17 = vld [vmem:[%s2800_s4 + $0x8] sm:$0xff] }
  0xf3   :  { %v2212_v23 = vpop.f32.mrb[10].mxu0  ;;  %v1572_v24 = vpop.eup %1571  ;;  %1591 = vrcp.f32 %v938_v18  ;;  %v941_v25 = vadd.f32 1.0, %v1570_v20  ;;  %v1434_v0 = vmul.f32 -1.442695, %v1533_v22 }
  0xf4   :  { %v2214_v26 = vpop.f32.mrb[9].mxu1  ;;  %v1574_v27 = vpop.eup %1573  ;;  %1593 = vrcp.f32 %v909_v21  ;;  %v907_v28 = vadd.f32 1.0, %v1572_v24  ;;  %v1403_v18 = vmul.f32 -1.442695, %v2212_v23  ;;  %v1195_v24 = vld [vmem:[%s2800_s4 + $0x108] sm:$0xff] }
  0xf5   :  { %v2216_v29 = vpop.f32.mrb[10].mxu1  ;;  %v2218_v30 = vpop.f32.mrb[11].mxu0  ;;  %1595 = vrcp.f32 %v941_v25  ;;  %v939_v32 = vadd.f32 1.0, %v1574_v27  ;;  %v1432_v13 = vmul.f32 -1.442695, %v2214_v26 }
  0xf6   :  { %v1576_v31 = vpop.eup %1575  ;;  %v2220_v33 = vpop.f32.mrb[11].mxu1  ;;  %1597 = vrcp.f32 %v907_v28  ;;  %v1435_v25 = vmul.f32 -1.442695, %v2216_v29 }
  0xf7   :  { %v1578_v34 = vpop.eup %1577  ;;  %v912_v35 = vadd.f32 1.0, %v1576_v31  ;;  %1599 = vrcp.f32 %v939_v32  ;;  %v1168_v31 = vld [vmem:[%s2800_s4 + $0x30] sm:$0xff]  ;;  %v1401_v32 = vmul.f32 -1.442695, %v2218_v30 }
  0xf8   :  { %v1580_v36 = vpop.eup %1579  ;;  %v910_v37 = vadd.f32 1.0, %v1578_v34  ;;  %v2222_v40 = vpop.f32.mrb[12].mxu0 }
  0xf9   :  { %v1582_v38 = vpop.eup %1581  ;;  %1601 = vrcp.f32 %v912_v35  ;;  %v944_v39 = vadd.f32 1.0, %v1580_v36  ;;  %v2224_v5 = vpop.f32.mrb[13].mxu0 }
  0xfa   :  { %v1584_v41 = vpop.eup %1583  ;;  %1603 = vrcp.f32 %v910_v37  ;;  %v942_v4 = vadd.f32 1.0, %v1582_v38  ;;  %v2229_v47 = vpop.f32.mrb[12].mxu1  ;;  %v1166_v38 = vld [vmem:[%s2800_s4 + $0x20] sm:$0xff] }
  0xfb   :  { %v1586_v43 = vpop.eup %1585  ;;  %1605 = vrcp.f32 %v944_v39  ;;  %v913_v45 = vadd.f32 1.0, %v1584_v41  ;;  %v2231_v48 = vpop.f32.mrb[14].mxu0  ;;  %v1433_v39 = vmul.f32 -1.442695, %v2220_v33 }
  0xfc   :  { %v1588_v49 = vpop.eup %1587  ;;  %v1100_v50 = vadd.f32 1.0, %v1586_v43  ;;  %1607 = vrcp.f32 %v942_v4  ;;  %v2236_v53 = vpop.f32.mrb[13].mxu1  ;;  %v1200_v43 = vld [vmem:[%s2800_s4 + $0x130] sm:$0xff] }
  0xfd   :  { %v1590_v54 = vpop.eup %1589  ;;  %v1098_v56 = vadd.f32 1.0, %v1588_v49  ;;  %1609 = vrcp.f32 %v913_v45  ;;  %v2241_v58 = vpop.f32.mrb[14].mxu1  ;;  %v1406_v45 = vmul.f32 -1.442695, %v2222_v40 }
  0xfe   :  { %v2243_v59 = vpop.f32.mrb[15].mxu0  ;;  %v1592_v60 = vpop.eup %1591  ;;  %v1228_v61 = vmul.f32 %v1164_v44, %v1100_v50  ;;  %v1132_v62 = vadd.f32 1.0, %v1590_v54  ;;  %1611 = vpow2.f32 %v1431_v42 }
  0xff   :  { %v2248_v1 = vpop.f32.mrb[15].mxu1  ;;  %v1594_v2 = vpop.eup %1593  ;;  %v1226_v3 = vmul.f32 %v1162_v51, %v1098_v56  ;;  %v1130_v6 = vadd.f32 1.0, %v1592_v60  ;;  %1613 = vpow2.f32 %v1397_v46  ;;  %v1198_v51 = vld [vmem:[%s2800_s4 + $0x120] sm:$0xff] }
 0x100   :  { %v1596_v9 = vpop.eup %1595  ;;  %1292 = vst.msk [vmem:[%s2801_s5 + $0x10] sm:$0xff] %vm324_vm1, %v1228_v61  ;;  %v1260_v10 = vmul.f32 %v1196_v55, %v1132_v62  ;;  %v1101_v11 = vadd.f32 1.0, %v1594_v2  ;;  %1615 = vpow2.f32 %v1429_v52  ;;  %v2270_v19 = vpop.f32.mrb[16].mxu0  ;;  %v1438_v52 = vmul.f32 -1.442695, %v2229_v47 }
 0x101   :  { %v1598_v14 = vpop.eup %1597  ;;  %1290 = vst.msk [vmem:[%s2801_s5] sm:$0xff] %vm324_vm1, %v1226_v3  ;;  %v1258_v15 = vmul.f32 %v1194_v63, %v1130_v6  ;;  %v1133_v16 = vadd.f32 1.0, %v1596_v9  ;;  %1617 = vpow2.f32 %v1402_v57  ;;  %v2280_v26 = vpop.f32.mrb[17].mxu0  ;;  %v1169_v57 = vld [vmem:[%s2800_s4 + $0x38] sm:$0xff] }
 0x102   :  { %v1600_v20 = vpop.eup %1599  ;;  %1324 = vst.msk [vmem:[%s2801_s5 + $0x110] sm:$0xff] %vm324_vm1, %v1260_v10  ;;  %v1229_v21 = vmul.f32 %v1165_v7, %v1101_v11  ;;  %v1099_v22 = vadd.f32 1.0, %v1598_v14  ;;  %1619 = vpow2.f32 %v1434_v0  ;;  %v2290_v34 = vpop.f32.mrb[16].mxu1 }
 0x103   :  { %v1602_v23 = vpop.eup %1601  ;;  %1322 = vst.msk [vmem:[%s2801_s5 + $0x100] sm:$0xff] %vm324_vm1, %v1258_v15  ;;  %v1261_v27 = vmul.f32 %v1197_v12, %v1133_v16  ;;  %v1131_v28 = vadd.f32 1.0, %v1600_v20  ;;  %1621 = vpow2.f32 %v1400_v8  ;;  %v2292_v29 = vpop.f32.mrb[18].mxu0 }
 0x104   :  { %v1604_v35 = vpop.eup %1603  ;;  %1293 = vst.msk [vmem:[%s2801_s5 + $0x18] sm:$0xff] %vm324_vm1, %v1229_v21  ;;  %v1227_v36 = vmul.f32 %v1163_v17, %v1099_v22  ;;  %v1104_v37 = vadd.f32 1.0, %v1602_v23  ;;  %1623 = vpow2.f32 %v1432_v13  ;;  %v2302_v30 = vpop.f32.mrb[17].mxu1 }
 0x105   :  { %v2304_v41 = vpop.f32.mrb[19].mxu0  ;;  %v1606_v4 = vpop.eup %1605  ;;  %1325 = vst.msk [vmem:[%s2801_s5 + $0x118] sm:$0xff] %vm324_vm1, %v1261_v27  ;;  %v1259_v42 = vmul.f32 %v1195_v24, %v1131_v28  ;;  %v1102_v44 = vadd.f32 1.0, %v1604_v35  ;;  %1625 = vpow2.f32 %v1403_v18 }
 0x106   :  { %v2314_v33 = vpop.f32.mrb[18].mxu1  ;;  %v1608_v46 = vpop.eup %1607  ;;  %1291 = vst.msk [vmem:[%s2801_s5 + $0x8] sm:$0xff] %vm324_vm1, %v1227_v36  ;;  %v1232_v49 = vmul.f32 %v1168_v31, %v1104_v37  ;;  %v1136_v50 = vadd.f32 1.0, %v1606_v4  ;;  %1627 = vpow2.f32 %v1435_v25 }
 0x107   :  { %v2324_v54 = vpop.f32.mrb[19].mxu1  ;;  %v1610_v40 = vpop.eup %1609  ;;  %1323 = vst.msk [vmem:[%s2801_s5 + $0x108] sm:$0xff] %vm324_vm1, %v1259_v42  ;;  %v1230_v55 = vmul.f32 %v1166_v38, %v1102_v44  ;;  %v1134_v56 = vadd.f32 1.0, %v1608_v46  ;;  %1629 = vpow2.f32 %v1401_v32  ;;  %v1404_v46 = vmul.f32 -1.442695, %v2224_v5  ;;  %v1167_v5 = vld [vmem:[%s2800_s4 + $0x28] sm:$0xff] }
 0x108   :  { %v1612_v60 = vpop.eup %1611  ;;  %1296 = vst.msk [vmem:[%s2801_s5 + $0x30] sm:$0xff] %vm324_vm1, %v1232_v49  ;;  %v1264_v47 = vmul.f32 %v1200_v43, %v1136_v50  ;;  %v1105_v61 = vadd.f32 1.0, %v1610_v40  ;;  %1631 = vpow2.f32 %v1433_v39  ;;  %v2341_v2 = vpop.f32.mrb[20].mxu0  ;;  %v1436_v40 = vmul.f32 -1.442695, %v2236_v53  ;;  %v1199_v53 = vld [vmem:[%s2800_s4 + $0x128] sm:$0xff] }
 0x109   :  { %v1614_v62 = vpop.eup %1613  ;;  %1294 = vst.msk [vmem:[%s2801_s5 + $0x20] sm:$0xff] %vm324_vm1, %v1230_v55  ;;  %v1262_v63 = vmul.f32 %v1198_v51, %v1134_v56  ;;  %v945_v0 = vadd.f32 1.0, %v1612_v60  ;;  %1633 = vpow2.f32 %v1406_v45  ;;  %v2347_v8 = vpop.f32.mrb[21].mxu0  ;;  %v1201_v51 = vld [vmem:[%s2800_s4 + $0x138] sm:$0xff] }
 0x10a   :  { %v1616_v3 = vpop.eup %1615  ;;  %1328 = vst.msk [vmem:[%s2801_s5 + $0x130] sm:$0xff] %vm324_vm1, %v1264_v47  ;;  %v1233_v6 = vmul.f32 %v1169_v57, %v1105_v61  ;;  %v911_v7 = vadd.f32 1.0, %v1614_v62  ;;  %1635 = vpow2.f32 %v1438_v52  ;;  %v2353_v11 = vpop.f32.mrb[20].mxu1  ;;  %v1407_v47 = vmul.f32 -1.442695, %v2231_v48 }
 0x10b   :  { %v1618_v9 = vpop.eup %1617  ;;  %1326 = vst.msk [vmem:[%s2801_s5 + $0x120] sm:$0xff] %vm324_vm1, %v1262_v63  ;;  %1637 = vrcp.f32 %v945_v0  ;;  %v943_v10 = vadd.f32 1.0, %v1616_v3  ;;  %v2355_v12 = vpop.f32.mrb[22].mxu0  ;;  %v1439_v0 = vmul.f32 -1.442695, %v2241_v58 }
 0x10c   :  { %v1620_v13 = vpop.eup %1619  ;;  %1297 = vst.msk [vmem:[%s2801_s5 + $0x38] sm:$0xff] %vm324_vm1, %v1233_v6  ;;  %1639 = vrcp.f32 %v911_v7  ;;  %v916_v14 = vadd.f32 1.0, %v1618_v9  ;;  %v2361_v15 = vpop.f32.mrb[21].mxu1  ;;  %v1172_v9 = vld [vmem:[%s2800_s4 + $0x50] sm:$0xff]  ;;  %v1405_v48 = vmul.f32 -1.442695, %v2243_v59 }
 0x10d   :  { %v1622_v16 = vpop.eup %1621  ;;  %1641 = vrcp.f32 %v943_v10  ;;  %v948_v17 = vadd.f32 1.0, %v1620_v13  ;;  %v2363_v18 = vpop.f32.mrb[22].mxu1  ;;  %v1437_v58 = vmul.f32 -1.442695, %v2248_v1 }
 0x10e   :  { %v2365_v20 = vpop.f32.mrb[23].mxu0  ;;  %v1624_v21 = vpop.eup %1623  ;;  %1643 = vrcp.f32 %v916_v14  ;;  %v914_v22 = vadd.f32 1.0, %v1622_v16  ;;  %v1204_v16 = vld [vmem:[%s2800_s4 + $0x150] sm:$0xff] }
 0x10f   :  { %v2367_v24 = vpop.f32.mrb[23].mxu1  ;;  %v1626_v25 = vpop.eup %1625  ;;  %1645 = vrcp.f32 %v948_v17  ;;  %v946_v23 = vadd.f32 1.0, %v1624_v21 }
 0x110   :  { %v1628_v27 = vpop.eup %1627  ;;  %1647 = vrcp.f32 %v914_v22  ;;  %v917_v28 = vadd.f32 1.0, %v1626_v25  ;;  %v2369_v35 = vpop.f32.mrb[24].mxu0  ;;  %v1170_v25 = vld [vmem:[%s2800_s4 + $0x40] sm:$0xff] }
 0x111   :  { %v1630_v31 = vpop.eup %1629  ;;  %1649 = vrcp.f32 %v946_v23  ;;  %v949_v32 = vadd.f32 1.0, %v1628_v27  ;;  %v2371_v38 = vpop.f32.mrb[25].mxu0  ;;  %v1410_v23 = vmul.f32 -1.442695, %v2270_v19 }
 0x112   :  { %v1632_v36 = vpop.eup %1631  ;;  %1651 = vrcp.f32 %v917_v28  ;;  %v915_v37 = vadd.f32 1.0, %v1630_v31  ;;  %v2373_v42 = vpop.f32.mrb[24].mxu1 }
 0x113   :  { %v1634_v39 = vpop.eup %1633  ;;  %1653 = vrcp.f32 %v949_v32  ;;  %v947_v4 = vadd.f32 1.0, %v1632_v36  ;;  %v2375_v43 = vpop.f32.mrb[26].mxu0  ;;  %v1202_v32 = vld [vmem:[%s2800_s4 + $0x140] sm:$0xff]  ;;  %v1442_v36 = vmul.f32 -1.442695, %v2290_v34 }
 0x114   :  { %v1636_v44 = vpop.eup %1635  ;;  %1655 = vrcp.f32 %v915_v37  ;;  %v920_v45 = vadd.f32 1.0, %v1634_v39  ;;  %v2378_v49 = vpop.f32.mrb[25].mxu1 }
 0x115   :  { %v1638_v50 = vpop.eup %1637  ;;  %1657 = vrcp.f32 %v947_v4  ;;  %v952_v52 = vadd.f32 1.0, %v1636_v44  ;;  %v2384_v55 = vpop.f32.mrb[26].mxu1 }
 0x116   :  { %v2386_v56 = vpop.f32.mrb[27].mxu0  ;;  %v1640_v57 = vpop.eup %1639  ;;  %v1137_v60 = vadd.f32 1.0, %v1638_v50  ;;  %1659 = vrcp.f32 %v920_v45  ;;  %v1173_v45 = vld [vmem:[%s2800_s4 + $0x58] sm:$0xff] }
 0x117   :  { %v2392_v61 = vpop.f32.mrb[27].mxu1  ;;  %v1642_v62 = vpop.eup %1641  ;;  %v1103_v63 = vadd.f32 1.0, %v1640_v57  ;;  %1661 = vrcp.f32 %v952_v52  ;;  %v1205_v57 = vld [vmem:[%s2800_s4 + $0x158] sm:$0xff] }
 0x118   :  { %v1644_v3 = vpop.eup %1643  ;;  %v1265_v6 = vmul.f32 %v1201_v51, %v1137_v60  ;;  %v1135_v7 = vadd.f32 1.0, %v1642_v62  ;;  %1663 = vpow2.f32 %v1404_v46  ;;  %v2406_v17 = vpop.f32.mrb[28].mxu0  ;;  %v1408_v46 = vmul.f32 -1.442695, %v2280_v26 }
 0x119   :  { %v1646_v10 = vpop.eup %1645  ;;  %v1231_v13 = vmul.f32 %v1167_v5, %v1103_v63  ;;  %v1108_v14 = vadd.f32 1.0, %v1644_v3  ;;  %1665 = vpow2.f32 %v1436_v40  ;;  %v2416_v27 = vpop.f32.mrb[29].mxu0  ;;  %v1440_v60 = vmul.f32 -1.442695, %v2302_v30  ;;  %v1171_v63 = vld [vmem:[%s2800_s4 + $0x48] sm:$0xff] }
 0x11a   :  { %v1648_v21 = vpop.eup %1647  ;;  %1329 = vst.msk [vmem:[%s2801_s5 + $0x138] sm:$0xff] %vm324_vm1, %v1265_v6  ;;  %v1263_v22 = vmul.f32 %v1199_v53, %v1135_v7  ;;  %v1140_v59 = vadd.f32 1.0, %v1646_v10  ;;  %1667 = vpow2.f32 %v1407_v47  ;;  %v2426_v37 = vpop.f32.mrb[28].mxu1  ;;  %v1411_v53 = vmul.f32 -1.442695, %v2292_v29  ;;  %v1203_v7 = vld [vmem:[%s2800_s4 + $0x148] sm:$0xff] }
 0x11b   :  { %v1650_v1 = vpop.eup %1649  ;;  %1295 = vst.msk [vmem:[%s2801_s5 + $0x28] sm:$0xff] %vm324_vm1, %v1231_v13  ;;  %v1236_v28 = vmul.f32 %v1172_v9, %v1108_v14  ;;  %v1106_v31 = vadd.f32 1.0, %v1648_v21  ;;  %1669 = vpow2.f32 %v1439_v0  ;;  %v2428_v19 = vpop.f32.mrb[30].mxu0  ;;  %v1443_v9 = vmul.f32 -1.442695, %v2314_v33  ;;  %v1176_v13 = vld [vmem:[%s2800_s4 + $0x70] sm:$0xff] }
 0x11c   :  { %v1652_v39 = vpop.eup %1651  ;;  %1327 = vst.msk [vmem:[%s2801_s5 + $0x128] sm:$0xff] %vm324_vm1, %v1263_v22  ;;  %v1268_v4 = vmul.f32 %v1204_v16, %v1140_v59  ;;  %v1138_v44 = vadd.f32 1.0, %v1650_v1  ;;  %1671 = vpow2.f32 %v1405_v48  ;;  %v2438_v34 = vpop.f32.mrb[29].mxu1  ;;  %v1409_v14 = vmul.f32 -1.442695, %v2304_v41  ;;  %v1208_v21 = vld [vmem:[%s2800_s4 + $0x170] sm:$0xff] }
 0x11d   :  { %v2440_v50 = vpop.f32.mrb[31].mxu0  ;;  %v1654_v51 = vpop.eup %1653  ;;  %1300 = vst.msk [vmem:[%s2801_s5 + $0x50] sm:$0xff] %vm324_vm1, %v1236_v28  ;;  %v1234_v52 = vmul.f32 %v1170_v25, %v1106_v31  ;;  %v1109_v40 = vadd.f32 1.0, %v1652_v39  ;;  %1673 = vpow2.f32 %v1437_v58 }
 0x11e   :  { %v2450_v26 = vpop.f32.mrb[30].mxu1  ;;  %v1656_v5 = vpop.eup %1655  ;;  %1332 = vst.msk [vmem:[%s2801_s5 + $0x150] sm:$0xff] %vm324_vm1, %v1268_v4  ;;  %v1266_v47 = vmul.f32 %v1202_v32, %v1138_v44  ;;  %v1141_v62 = vadd.f32 1.0, %v1654_v51  ;;  %1675 = vpow2.f32 %v1410_v23 }
 0x11f   :  { %v2460_v0 = vpop.f32.mrb[31].mxu1  ;;  %v1658_v30 = vpop.eup %1657  ;;  %1298 = vst.msk [vmem:[%s2801_s5 + $0x40] sm:$0xff] %vm324_vm1, %v1234_v52  ;;  %v1237_v3 = vmul.f32 %v1173_v45, %v1109_v40  ;;  %v1107_v6 = vadd.f32 1.0, %v1656_v5  ;;  %1677 = vpow2.f32 %v1442_v36 }
 0x120   :  { %v1660_v48 = vpop.eup %1659  ;;  %1330 = vst.msk [vmem:[%s2801_s5 + $0x140] sm:$0xff] %vm324_vm1, %v1266_v47  ;;  %v1269_v29 = vmul.f32 %v1205_v57, %v1141_v62  ;;  %v1139_v10 = vadd.f32 1.0, %v1658_v30  ;;  %1679 = vpow2.f32 %v1408_v46 }
 0x121   :  { %v1662_v16 = vpop.eup %1661  ;;  %1301 = vst.msk [vmem:[%s2801_s5 + $0x58] sm:$0xff] %vm324_vm1, %v1237_v3  ;;  %v1235_v33 = vmul.f32 %v1171_v63, %v1107_v6  ;;  %v1112_v58 = vadd.f32 1.0, %v1660_v48  ;;  %1681 = vpow2.f32 %v1440_v60 }
 0x122   :  { %v1664_v22 = vpop.eup %1663  ;;  %1333 = vst.msk [vmem:[%s2801_s5 + $0x158] sm:$0xff] %vm324_vm1, %v1269_v29  ;;  %v1267_v41 = vmul.f32 %v1203_v7, %v1139_v10  ;;  %v1144_v59 = vadd.f32 1.0, %v1662_v16  ;;  %1683 = vpow2.f32 %v1411_v53  ;;  %v1174_v29 = vld [vmem:[%s2800_s4 + $0x60] sm:$0xff] }
 0x123   :  { %v1666_v25 = vpop.eup %1665  ;;  %1299 = vst.msk [vmem:[%s2801_s5 + $0x48] sm:$0xff] %vm324_vm1, %v1235_v33  ;;  %v1240_v23 = vmul.f32 %v1176_v13, %v1112_v58  ;;  %v918_v1 = vadd.f32 1.0, %v1664_v22  ;;  %1685 = vpow2.f32 %v1443_v9  ;;  %v1441_v9 = vmul.f32 -1.442695, %v2324_v54  ;;  %v1206_v33 = vld [vmem:[%s2800_s4 + $0x160] sm:$0xff]  ;;  %v1177_v22 = vld [vmem:[%s2800_s4 + $0x78] sm:$0xff] }
 0x124   :  { %v1668_v28 = vpop.eup %1667  ;;  %1331 = vst.msk [vmem:[%s2801_s5 + $0x148] sm:$0xff] %vm324_vm1, %v1267_v41  ;;  %v1272_v31 = vmul.f32 %v1208_v21, %v1144_v59  ;;  %v950_v32 = vadd.f32 1.0, %v1666_v25  ;;  %1687 = vpow2.f32 %v1409_v14  ;;  %v1414_v13 = vmul.f32 -1.442695, %v2341_v2 }
 0x125   :  { %v1670_v36 = vpop.eup %1669  ;;  %1304 = vst.msk [vmem:[%s2801_s5 + $0x70] sm:$0xff] %vm324_vm1, %v1240_v23  ;;  %1689 = vrcp.f32 %v918_v1  ;;  %v921_v39 = vadd.f32 1.0, %v1668_v28  ;;  %v1446_v58 = vmul.f32 -1.442695, %v2353_v11  ;;  %v1412_v41 = vmul.f32 -1.442695, %v2347_v8 }
 0x126   :  { %v1672_v4 = vpop.eup %1671  ;;  %1336 = vst.msk [vmem:[%s2801_s5 + $0x170] sm:$0xff] %vm324_vm1, %v1272_v31  ;;  %1691 = vrcp.f32 %v950_v32  ;;  %v953_v44 = vadd.f32 1.0, %v1670_v36  ;;  %v1209_v23 = vld [vmem:[%s2800_s4 + $0x178] sm:$0xff]  ;;  %v1444_v1 = vmul.f32 -1.442695, %v2361_v15  ;;  %v1175_v32 = vld [vmem:[%s2800_s4 + $0x68] sm:$0xff] }
 0x127   :  { %v1674_v45 = vpop.eup %1673  ;;  %1693 = vrcp.f32 %v921_v39  ;;  %v919_v46 = vadd.f32 1.0, %v1672_v4  ;;  %v1415_v8 = vmul.f32 -1.442695, %v2355_v12  ;;  %v1207_v15 = vld [vmem:[%s2800_s4 + $0x168] sm:$0xff] }
 0x128   :  { %v1676_v51 = vpop.eup %1675  ;;  %1695 = vrcp.f32 %v953_v44  ;;  %v951_v52 = vadd.f32 1.0, %v1674_v45  ;;  %v1447_v44 = vmul.f32 -1.442695, %v2363_v18 }
 0x129   :  { %v1678_v40 = vpop.eup %1677  ;;  %1697 = vrcp.f32 %v919_v46  ;;  %v924_v57 = vadd.f32 1.0, %v1676_v51  ;;  %v1180_v51 = vld [vmem:[%s2800_s4 + $0x90] sm:$0xff] }
 0x12a   :  { %v1680_v60 = vpop.eup %1679  ;;  %1699 = vrcp.f32 %v951_v52  ;;  %v956_v5 = vadd.f32 1.0, %v1678_v40  ;;  %v1413_v52 = vmul.f32 -1.442695, %v2365_v20 }
 0x12b   :  { %v1682_v47 = vpop.eup %1681  ;;  %1701 = vrcp.f32 %v924_v57  ;;  %v922_v62 = vadd.f32 1.0, %v1680_v60  ;;  %v1212_v60 = vld [vmem:[%s2800_s4 + $0x190] sm:$0xff] }
 0x12c   :  { %v1684_v63 = vpop.eup %1683  ;;  %1703 = vrcp.f32 %v956_v5  ;;  %v954_v53 = vadd.f32 1.0, %v1682_v47  ;;  %v1445_v5 = vmul.f32 -1.442695, %v2367_v24 }
 0x12d   :  { %v1686_v30 = vpop.eup %1685  ;;  %1705 = vrcp.f32 %v922_v62  ;;  %v925_v3 = vadd.f32 1.0, %v1684_v63  ;;  %v1178_v63 = vld [vmem:[%s2800_s4 + $0x80] sm:$0xff] }
 0x12e   :  { %v1688_v6 = vpop.eup %1687  ;;  %1707 = vrcp.f32 %v954_v53  ;;  %v957_v7 = vadd.f32 1.0, %v1686_v30  ;;  %v1418_v53 = vmul.f32 -1.442695, %v2369_v35 }
 0x12f   :  { %v1690_v48 = vpop.eup %1689  ;;  %1709 = vrcp.f32 %v925_v3  ;;  %v923_v10 = vadd.f32 1.0, %v1688_v6  ;;  %v1210_v6 = vld [vmem:[%s2800_s4 + $0x180] sm:$0xff] }
 0x130   :  { %v1692_v14 = vpop.eup %1691  ;;  %v1110_v16 = vadd.f32 1.0, %v1690_v48  ;;  %1711 = vrcp.f32 %v957_v7  ;;  %v1450_v7 = vmul.f32 -1.442695, %v2373_v42 }
 0x131   :  { %v1694_v21 = vpop.eup %1693  ;;  %v1142_v54 = vadd.f32 1.0, %v1692_v14  ;;  %1713 = vrcp.f32 %v923_v10  ;;  %v1416_v10 = vmul.f32 -1.442695, %v2371_v38 }
 0x132   :  { %v1696_v59 = vpop.eup %1695  ;;  %v1238_v2 = vmul.f32 %v1174_v29, %v1110_v16  ;;  %v1113_v25 = vadd.f32 1.0, %v1694_v21  ;;  %1715 = vpow2.f32 %v1441_v9  ;;  %v1181_v29 = vld [vmem:[%s2800_s4 + $0x98] sm:$0xff] }
 0x133   :  { %v1698_v11 = vpop.eup %1697  ;;  %v1270_v28 = vmul.f32 %v1206_v33, %v1142_v54  ;;  %v1145_v31 = vadd.f32 1.0, %v1696_v59  ;;  %1717 = vpow2.f32 %v1414_v13  ;;  %v1213_v16 = vld [vmem:[%s2800_s4 + $0x198] sm:$0xff]  ;;  %v1448_v33 = vmul.f32 -1.442695, %v2378_v49  ;;  %v1179_v54 = vld [vmem:[%s2800_s4 + $0x88] sm:$0xff] }
 0x134   :  { %v1700_v36 = vpop.eup %1699  ;;  %1302 = vst.msk [vmem:[%s2801_s5 + $0x60] sm:$0xff] %vm324_vm1, %v1238_v2  ;;  %v1241_v39 = vmul.f32 %v1177_v22, %v1113_v25  ;;  %v1111_v4 = vadd.f32 1.0, %v1698_v11  ;;  %1719 = vpow2.f32 %v1446_v58 }
 0x135   :  { %v1702_v45 = vpop.eup %1701  ;;  %1334 = vst.msk [vmem:[%s2801_s5 + $0x160] sm:$0xff] %vm324_vm1, %v1270_v28  ;;  %v1273_v12 = vmul.f32 %v1209_v23, %v1145_v31  ;;  %v1143_v46 = vadd.f32 1.0, %v1700_v36  ;;  %1721 = vpow2.f32 %v1412_v41 }
 0x136   :  { %v1704_v40 = vpop.eup %1703  ;;  %1305 = vst.msk [vmem:[%s2801_s5 + $0x78] sm:$0xff] %vm324_vm1, %v1241_v39  ;;  %v1239_v18 = vmul.f32 %v1175_v32, %v1111_v4  ;;  %v1116_v57 = vadd.f32 1.0, %v1702_v45  ;;  %1723 = vpow2.f32 %v1444_v1 }
 0x137   :  { %v1706_v47 = vpop.eup %1705  ;;  %1337 = vst.msk [vmem:[%s2801_s5 + $0x178] sm:$0xff] %vm324_vm1, %v1273_v12  ;;  %v1271_v20 = vmul.f32 %v1207_v15, %v1143_v46  ;;  %v1148_v62 = vadd.f32 1.0, %v1704_v40  ;;  %1725 = vpow2.f32 %v1415_v8 }
 0x138   :  { %v1708_v30 = vpop.eup %1707  ;;  %1303 = vst.msk [vmem:[%s2801_s5 + $0x68] sm:$0xff] %vm324_vm1, %v1239_v18  ;;  %v1244_v24 = vmul.f32 %v1180_v51, %v1116_v57  ;;  %v1114_v3 = vadd.f32 1.0, %v1706_v47  ;;  %1727 = vpow2.f32 %v1447_v44 }
 0x139   :  { %v1710_v9 = vpop.eup %1709  ;;  %1335 = vst.msk [vmem:[%s2801_s5 + $0x168] sm:$0xff] %vm324_vm1, %v1271_v20  ;;  %v1276_v35 = vmul.f32 %v1212_v60, %v1148_v62  ;;  %v1146_v48 = vadd.f32 1.0, %v1708_v30  ;;  %1729 = vpow2.f32 %v1413_v52  ;;  %v1419_v20 = vmul.f32 -1.442695, %v2375_v43 }
 0x13a   :  { %v1712_v13 = vpop.eup %1711  ;;  %1308 = vst.msk [vmem:[%s2801_s5 + $0x90] sm:$0xff] %vm324_vm1, %v1244_v24  ;;  %v1242_v42 = vmul.f32 %v1178_v63, %v1114_v3  ;;  %v1117_v14 = vadd.f32 1.0, %v1710_v9  ;;  %1731 = vpow2.f32 %v1445_v5  ;;  %v1211_v63 = vld [vmem:[%s2800_s4 + $0x188] sm:$0xff]  ;;  %v1451_v30 = vmul.f32 -1.442695, %v2384_v55 }
 0x13b   :  { %v1714_v58 = vpop.eup %1713  ;;  %1340 = vst.msk [vmem:[%s2801_s5 + $0x190] sm:$0xff] %vm324_vm1, %v1276_v35  ;;  %v1274_v38 = vmul.f32 %v1210_v6, %v1146_v48  ;;  %v1149_v21 = vadd.f32 1.0, %v1712_v13  ;;  %1733 = vpow2.f32 %v1418_v53  ;;  %v1184_v6 = vld [vmem:[%s2800_s4 + $0xb0] sm:$0xff]  ;;  %v1449_v48 = vmul.f32 -1.442695, %v2392_v61  ;;  %v1182_v13 = vld [vmem:[%s2800_s4 + $0xa0] sm:$0xff] }
 0x13c   :  { %v1716_v22 = vpop.eup %1715  ;;  %1306 = vst.msk [vmem:[%s2801_s5 + $0x80] sm:$0xff] %vm324_vm1, %v1242_v42  ;;  %v1245_v49 = vmul.f32 %v1181_v29, %v1117_v14  ;;  %v1115_v41 = vadd.f32 1.0, %v1714_v58  ;;  %1735 = vpow2.f32 %v1450_v7  ;;  %v1417_v7 = vmul.f32 -1.442695, %v2386_v56  ;;  %v1216_v35 = vld [vmem:[%s2800_s4 + $0x1b0] sm:$0xff] }
 0x13d   :  { %v1718_v59 = vpop.eup %1717  ;;  %1338 = vst.msk [vmem:[%s2801_s5 + $0x180] sm:$0xff] %vm324_vm1, %v1274_v38  ;;  %v1277_v2 = vmul.f32 %v1213_v16, %v1149_v21  ;;  %v955_v25 = vadd.f32 1.0, %v1716_v22  ;;  %1737 = vpow2.f32 %v1416_v10  ;;  %v1422_v42 = vmul.f32 -1.442695, %v2406_v17  ;;  %v1185_v17 = vld [vmem:[%s2800_s4 + $0xb8] sm:$0xff] }
 0x13e   :  { %v1720_v23 = vpop.eup %1719  ;;  %1309 = vst.msk [vmem:[%s2801_s5 + $0x98] sm:$0xff] %vm324_vm1, %v1245_v49  ;;  %v1243_v1 = vmul.f32 %v1179_v54, %v1115_v41  ;;  %v928_v11 = vadd.f32 1.0, %v1718_v59  ;;  %1739 = vpow2.f32 %v1448_v33  ;;  %v1214_v33 = vld [vmem:[%s2800_s4 + $0x1a0] sm:$0xff]  ;;  %v1454_v61 = vmul.f32 -1.442695, %v2426_v37  ;;  %v1217_v41 = vld [vmem:[%s2800_s4 + $0x1b8] sm:$0xff] }
 0x13f   :  { %v1722_v28 = vpop.eup %1721  ;;  %1341 = vst.msk [vmem:[%s2801_s5 + $0x198] sm:$0xff] %vm324_vm1, %v1277_v2  ;;  %1741 = vrcp.f32 %v955_v25  ;;  %v960_v31 = vadd.f32 1.0, %v1720_v23  ;;  %v1420_v54 = vmul.f32 -1.442695, %v2416_v27  ;;  %v1452_v59 = vmul.f32 -1.442695, %v2438_v34 }
 0x140   :  { %v1724_v32 = vpop.eup %1723  ;;  %1307 = vst.msk [vmem:[%s2801_s5 + $0x88] sm:$0xff] %vm324_vm1, %v1243_v1  ;;  %1743 = vrcp.f32 %v928_v11  ;;  %v926_v8 = vadd.f32 1.0, %v1722_v28  ;;  %v1183_v23 = vld [vmem:[%s2800_s4 + $0xa8] sm:$0xff]  ;;  %v1423_v1 = vmul.f32 -1.442695, %v2428_v19 }
 0x141   :  { %v1726_v36 = vpop.eup %1725  ;;  %1745 = vrcp.f32 %v960_v31  ;;  %v958_v39 = vadd.f32 1.0, %v1724_v32  ;;  %v1215_v31 = vld [vmem:[%s2800_s4 + $0x1a8] sm:$0xff]  ;;  %v1455_v32 = vmul.f32 -1.442695, %v2450_v26 }
 0x142   :  { %v1728_v4 = vpop.eup %1727  ;;  %1747 = vrcp.f32 %v926_v8  ;;  %v929_v15 = vadd.f32 1.0, %v1726_v36 }
 0x143   :  { %v1730_v44 = vpop.eup %1729  ;;  %1749 = vrcp.f32 %v958_v39  ;;  %v961_v45 = vadd.f32 1.0, %v1728_v4  ;;  %v1188_v39 = vld [vmem:[%s2800_s4 + $0xd0] sm:$0xff]  ;;  %v1421_v4 = vmul.f32 -1.442695, %v2440_v50 }
 0x144   :  { %v1732_v12 = vpop.eup %1731  ;;  %1751 = vrcp.f32 %v929_v15  ;;  %v927_v46 = vadd.f32 1.0, %v1730_v44 }
 0x145   :  { %v1734_v51 = vpop.eup %1733  ;;  %1753 = vrcp.f32 %v961_v45  ;;  %v959_v52 = vadd.f32 1.0, %v1732_v12  ;;  %v1220_v45 = vld [vmem:[%s2800_s4 + $0x1d0] sm:$0xff]  ;;  %v1453_v12 = vmul.f32 -1.442695, %v2460_v0 }
 0x146   :  { %v1736_v40 = vpop.eup %1735  ;;  %1755 = vrcp.f32 %v927_v46  ;;  %v932_v18 = vadd.f32 1.0, %v1734_v51 }
 0x147   :  { %v1738_v57 = vpop.eup %1737  ;;  %1757 = vrcp.f32 %v959_v52  ;;  %v964_v60 = vadd.f32 1.0, %v1736_v40  ;;  %v1186_v52 = vld [vmem:[%s2800_s4 + $0xc0] sm:$0xff] }
 0x148   :  { %v1740_v5 = vpop.eup %1739  ;;  %1759 = vrcp.f32 %v932_v18  ;;  %v930_v47 = vadd.f32 1.0, %v1738_v57  ;;  %v1218_v57 = vld [vmem:[%s2800_s4 + $0x1c0] sm:$0xff] }
 0x149   :  { %v1742_v62 = vpop.eup %1741  ;;  %1761 = vrcp.f32 %v964_v60  ;;  %v962_v53 = vadd.f32 1.0, %v1740_v5 }
 0x14a   :  { %v1744_v24 = vpop.eup %1743  ;;  %v1147_v3 = vadd.f32 1.0, %v1742_v62  ;;  %1763 = vrcp.f32 %v930_v47 }
 0x14b   :  { %v1746_v9 = vpop.eup %1745  ;;  %v1120_v43 = vadd.f32 1.0, %v1744_v24  ;;  %1765 = vrcp.f32 %v962_v53 }
 0x14c   :  { %v1748_v29 = vpop.eup %1747  ;;  %v1275_v55 = vmul.f32 %v1211_v63, %v1147_v3  ;;  %v1152_v10 = vadd.f32 1.0, %v1746_v9  ;;  %1767 = vpow2.f32 %v1419_v20 }
 0x14d   :  { %v1750_v56 = vpop.eup %1749  ;;  %v1248_v14 = vmul.f32 %v1184_v6, %v1120_v43  ;;  %v1118_v16 = vadd.f32 1.0, %v1748_v29  ;;  %1769 = vpow2.f32 %v1451_v30 }
 0x14e   :  { %v1752_v58 = vpop.eup %1751  ;;  %1339 = vst.msk [vmem:[%s2801_s5 + $0x188] sm:$0xff] %vm324_vm1, %v1275_v55  ;;  %v1280_v38 = vmul.f32 %v1216_v35, %v1152_v10  ;;  %v1150_v21 = vadd.f32 1.0, %v1750_v56  ;;  %1771 = vpow2.f32 %v1417_v7 }
 0x14f   :  { %v1754_v22 = vpop.eup %1753  ;;  %1312 = vst.msk [vmem:[%s2801_s5 + $0xb0] sm:$0xff] %vm324_vm1, %v1248_v14  ;;  %v1246_v37 = vmul.f32 %v1182_v13, %v1118_v16  ;;  %v1121_v49 = vadd.f32 1.0, %v1752_v58  ;;  %1773 = vpow2.f32 %v1449_v48 }
 0x150   :  { %v1756_v2 = vpop.eup %1755  ;;  %1344 = vst.msk [vmem:[%s2801_s5 + $0x1b0] sm:$0xff] %vm324_vm1, %v1280_v38  ;;  %v1278_v27 = vmul.f32 %v1214_v33, %v1150_v21  ;;  %v1153_v25 = vadd.f32 1.0, %v1754_v22  ;;  %1775 = vpow2.f32 %v1422_v42 }
 0x151   :  { %v1758_v11 = vpop.eup %1757  ;;  %1310 = vst.msk [vmem:[%s2801_s5 + $0xa0] sm:$0xff] %vm324_vm1, %v1246_v37  ;;  %v1249_v34 = vmul.f32 %v1185_v17, %v1121_v49  ;;  %v1119_v28 = vadd.f32 1.0, %v1756_v2  ;;  %1777 = vpow2.f32 %v1454_v61  ;;  %v1189_v17 = vld [vmem:[%s2800_s4 + $0xd8] sm:$0xff] }
 0x152   :  { %v1760_v8 = vpop.eup %1759  ;;  %1342 = vst.msk [vmem:[%s2801_s5 + $0x1a0] sm:$0xff] %vm324_vm1, %v1278_v27  ;;  %v1281_v19 = vmul.f32 %v1217_v41, %v1153_v25  ;;  %v1151_v36 = vadd.f32 1.0, %v1758_v11  ;;  %1779 = vpow2.f32 %v1420_v54  ;;  %v1221_v37 = vld [vmem:[%s2800_s4 + $0x1d8] sm:$0xff] }
 0x153   :  { %v1762_v15 = vpop.eup %1761  ;;  %1313 = vst.msk [vmem:[%s2801_s5 + $0xb8] sm:$0xff] %vm324_vm1, %v1249_v34  ;;  %v1247_v26 = vmul.f32 %v1183_v23, %v1119_v28  ;;  %v1124_v44 = vadd.f32 1.0, %v1760_v8  ;;  %1781 = vpow2.f32 %v1452_v59  ;;  %v1187_v59 = vld [vmem:[%s2800_s4 + $0xc8] sm:$0xff]  ;;  %v1192_v28 = vld [vmem:[%s2800_s4 + $0xf0] sm:$0xff] }
 0x154   :  { %v1764_v46 = vpop.eup %1763  ;;  %1345 = vst.msk [vmem:[%s2801_s5 + $0x1b8] sm:$0xff] %vm324_vm1, %v1281_v19  ;;  %v1279_v50 = vmul.f32 %v1215_v31, %v1151_v36  ;;  %v1156_v51 = vadd.f32 1.0, %v1762_v15  ;;  %1783 = vpow2.f32 %v1423_v1  ;;  %v1219_v23 = vld [vmem:[%s2800_s4 + $0x1c8] sm:$0xff]  ;;  %v1224_v19 = vld [vmem:[%s2800_s4 + $0x1f0] sm:$0xff]  ;;  %v1190_v15 = vld [vmem:[%s2800_s4 + $0xe0] sm:$0xff] }
 0x155   :  { %v1766_v40 = vpop.eup %1765  ;;  %1311 = vst.msk [vmem:[%s2801_s5 + $0xa8] sm:$0xff] %vm324_vm1, %v1247_v26  ;;  %v1252_v0 = vmul.f32 %v1188_v39, %v1124_v44  ;;  %v1122_v18 = vadd.f32 1.0, %v1764_v46  ;;  %1785 = vpow2.f32 %v1455_v32 }
 0x156   :  { %v1768_v60 = vpop.eup %1767  ;;  %1343 = vst.msk [vmem:[%s2801_s5 + $0x1a8] sm:$0xff] %vm324_vm1, %v1279_v50  ;;  %v1284_v5 = vmul.f32 %v1220_v45, %v1156_v51  ;;  %v1154_v47 = vadd.f32 1.0, %v1766_v40  ;;  %1787 = vpow2.f32 %v1421_v4 }
 0x157   :  { %v1770_v20 = vpop.eup %1769  ;;  %1316 = vst.msk [vmem:[%s2801_s5 + $0xd0] sm:$0xff] %vm324_vm1, %v1252_v0  ;;  %v1250_v62 = vmul.f32 %v1186_v52, %v1122_v18  ;;  %v933_v63 = vadd.f32 1.0, %v1768_v60  ;;  %1789 = vpow2.f32 %v1453_v12  ;;  %v1222_v12 = vld [vmem:[%s2800_s4 + $0x1e0] sm:$0xff]  ;;  %v1193_v52 = vld [vmem:[%s2800_s4 + $0xf8] sm:$0xff] }
 0x158   :  { %v1772_v53 = vpop.eup %1771  ;;  %1348 = vst.msk [vmem:[%s2801_s5 + $0x1d0] sm:$0xff] %vm324_vm1, %v1284_v5  ;;  %v1282_v30 = vmul.f32 %v1218_v57, %v1154_v47  ;;  %v965_v24 = vadd.f32 1.0, %v1770_v20  ;;  %v1225_v57 = vld [vmem:[%s2800_s4 + $0x1f8] sm:$0xff]  ;;  %v1191_v20 = vld [vmem:[%s2800_s4 + $0xe8] sm:$0xff] }
 0x159   :  { %v1774_v3 = vpop.eup %1773  ;;  %1314 = vst.msk [vmem:[%s2801_s5 + $0xc0] sm:$0xff] %vm324_vm1, %v1250_v62  ;;  %1791 = vrcp.f32 %v933_v63  ;;  %v931_v6 = vadd.f32 1.0, %v1772_v53 }
 0x15a   :  { %v1776_v7 = vpop.eup %1775  ;;  %1346 = vst.msk [vmem:[%s2801_s5 + $0x1c0] sm:$0xff] %vm324_vm1, %v1282_v30  ;;  %1793 = vrcp.f32 %v965_v24  ;;  %v963_v9 = vadd.f32 1.0, %v1774_v3  ;;  %v1223_v30 = vld [vmem:[%s2800_s4 + $0x1e8] sm:$0xff] }
 0x15b   :  { %v1778_v43 = vpop.eup %1777  ;;  %1795 = vrcp.f32 %v931_v6  ;;  %v936_v35 = vadd.f32 1.0, %v1776_v7 }
 0x15c   :  { %v1780_v48 = vpop.eup %1779  ;;  %1797 = vrcp.f32 %v963_v9  ;;  %v968_v29 = vadd.f32 1.0, %v1778_v43 }
 0x15d   :  { %v1782_v55 = vpop.eup %1781  ;;  %1799 = vrcp.f32 %v936_v35  ;;  %v934_v10 = vadd.f32 1.0, %v1780_v48 }
 0x15e   :  { %v1784_v13 = vpop.eup %1783  ;;  %1801 = vrcp.f32 %v968_v29  ;;  %v966_v42 = vadd.f32 1.0, %v1782_v55 }
 0x15f   :  { %v1786_v56 = vpop.eup %1785  ;;  %1803 = vrcp.f32 %v934_v10  ;;  %v937_v14 = vadd.f32 1.0, %v1784_v13 }
 0x160   :  { %v1788_v16 = vpop.eup %1787  ;;  %1805 = vrcp.f32 %v966_v42  ;;  %v969_v33 = vadd.f32 1.0, %v1786_v56 }
 0x161   :  { %v1790_v61 = vpop.eup %1789  ;;  %1807 = vrcp.f32 %v937_v14  ;;  %v935_v58 = vadd.f32 1.0, %v1788_v16 }
 0x162   :  { %1809 = vrcp.f32 %v969_v33  ;;  %v967_v38 = vadd.f32 1.0, %v1790_v61 }
 0x163   :  { %v1792_v21 = vpop.eup %1791  ;;  %1811 = vrcp.f32 %v935_v58 }
 0x164   :  { %v1794_v54 = vpop.eup %1793  ;;  %v1125_v22 = vadd.f32 1.0, %v1792_v21  ;;  %1813 = vrcp.f32 %v967_v38 }
 0x165   :  { %v1796_v49 = vpop.eup %1795  ;;  %v1157_v41 = vadd.f32 1.0, %v1794_v54 }
 0x166   :  { %v1798_v2 = vpop.eup %1797  ;;  %v1253_v27 = vmul.f32 %v1189_v17, %v1125_v22  ;;  %v1123_v25 = vadd.f32 1.0, %v1796_v49 }
 0x167   :  { %v1800_v1 = vpop.eup %1799  ;;  %v1285_v11 = vmul.f32 %v1221_v37, %v1157_v41  ;;  %v1155_v34 = vadd.f32 1.0, %v1798_v2 }
 0x168   :  { %v1802_v31 = vpop.eup %1801  ;;  %1317 = vst.msk [vmem:[%s2801_s5 + $0xd8] sm:$0xff] %vm324_vm1, %v1253_v27  ;;  %v1251_v32 = vmul.f32 %v1187_v59, %v1123_v25  ;;  %v1128_v8 = vadd.f32 1.0, %v1800_v1 }
 0x169   :  { %v1804_v36 = vpop.eup %1803  ;;  %1349 = vst.msk [vmem:[%s2801_s5 + $0x1d8] sm:$0xff] %vm324_vm1, %v1285_v11  ;;  %v1283_v39 = vmul.f32 %v1219_v23, %v1155_v34  ;;  %v1160_v4 = vadd.f32 1.0, %v1802_v31 }
 0x16a   :  { %v1806_v26 = vpop.eup %1805  ;;  %1315 = vst.msk [vmem:[%s2801_s5 + $0xc8] sm:$0xff] %vm324_vm1, %v1251_v32  ;;  %v1256_v44 = vmul.f32 %v1192_v28, %v1128_v8  ;;  %v1126_v45 = vadd.f32 1.0, %v1804_v36 }
 0x16b   :  { %v1808_v46 = vpop.eup %1807  ;;  %1347 = vst.msk [vmem:[%s2801_s5 + $0x1c8] sm:$0xff] %vm324_vm1, %v1283_v39  ;;  %v1288_v50 = vmul.f32 %v1224_v19, %v1160_v4  ;;  %v1158_v51 = vadd.f32 1.0, %v1806_v26 }
 0x16c   :  { %v1810_v40 = vpop.eup %1809  ;;  %1320 = vst.msk [vmem:[%s2801_s5 + $0xf0] sm:$0xff] %vm324_vm1, %v1256_v44  ;;  %v1254_v0 = vmul.f32 %v1190_v15, %v1126_v45  ;;  %v1129_v18 = vadd.f32 1.0, %v1808_v46 }
 0x16d   :  { %v1812_v60 = vpop.eup %1811  ;;  %1352 = vst.msk [vmem:[%s2801_s5 + $0x1f0] sm:$0xff] %vm324_vm1, %v1288_v50  ;;  %v1286_v5 = vmul.f32 %v1222_v12, %v1158_v51  ;;  %v1161_v47 = vadd.f32 1.0, %v1810_v40 }
 0x16e   :  { %v1814_v62 = vpop.eup %1813  ;;  %1318 = vst.msk [vmem:[%s2801_s5 + $0xe0] sm:$0xff] %vm324_vm1, %v1254_v0  ;;  %v1257_v63 = vmul.f32 %v1193_v52, %v1129_v18  ;;  %v1127_v53 = vadd.f32 1.0, %v1812_v60 }
 0x16f   :  { %1350 = vst.msk [vmem:[%s2801_s5 + $0x1e0] sm:$0xff] %vm324_vm1, %v1286_v5  ;;  %v1289_v24 = vmul.f32 %v1225_v57, %v1161_v47  ;;  %v1159_v3 = vadd.f32 1.0, %v1814_v62 }
 0x170   :  { %1321 = vst.msk [vmem:[%s2801_s5 + $0xf8] sm:$0xff] %vm324_vm1, %v1257_v63  ;;  %v1255_v6 = vmul.f32 %v1191_v20, %v1127_v53 }
 0x171   :  { %1353 = vst.msk [vmem:[%s2801_s5 + $0x1f8] sm:$0xff] %vm324_vm1, %v1289_v24  ;;  %v1287_v7 = vmul.f32 %v1223_v30, %v1159_v3 }
 0x172   :  { %1319 = vst.msk [vmem:[%s2801_s5 + $0xe8] sm:$0xff] %vm324_vm1, %v1255_v6 }
 0x173   :  { %1351 = vst.msk [vmem:[%s2801_s5 + $0x1e8] sm:$0xff] %vm324_vm1, %v1287_v7 }

</bundles_post_ra>
